<compile_context>
chip_gen: v6e
topology: v6e:2x2x1
jax: 0.10.0
libtpu: 0.0.40
codegen_flags: <defaults>
</compile_context>

<pallas_src>
import functools

import jax
import jax.numpy as jnp
from jax import lax
from jax.experimental import pallas as pl
from jax.experimental.pallas import tpu as pltpu

# ---- Hyperparameters from train.py ----
INPUT_CH = 67            # conv_in
INPUT_CH_PAD = 128       # zero-padded K dim for the first matmul
FEATURE_CH = 512         # conv_ch
MLP_CH = 1024            # mlp_ch
EDGE_NUM = 2
L = EDGE_NUM + 1         # spatial length of the Conv1d input
OUT_CH = EDGE_NUM + 1    # actor logits / actions (3)
OUT_PAD = 128            # lane-dense output width (OUT_CH real lanes + pad)
BLOCK_NUM = 3            # number of pointwise conv layers
NEG_BIG = -1e30          # pad-lane bias -> exp underflows to exactly 0


def _round_up(x, m):
    return (x + m - 1) // m * m


@functools.lru_cache(maxsize=None)
def _vmem_limit_bytes():
    """Per-chip scoped-VMEM budget: 96 MiB on 128 MiB chips, 48 MiB on v7x."""
    try:
        cap = int(pltpu.get_tpu_info().vmem_capacity_bytes)
    except Exception:  # conservative fallback (matches v7x per-TC VMEM)
        cap = 64 * 1024 * 1024
    return max(32 * 1024 * 1024, min((cap * 3) // 4, 96 * 1024 * 1024))


# ---------------------------------------------------------------------------
# Pallas kernel: fused forward (conv stage -> flatten -> MLP -> softmax)
# x_ref holds the L positions of this batch tile stacked along rows:
#   row (l * TB + b) = observation of local batch row b at position l.
# ---------------------------------------------------------------------------
def actor_fwd_kernel(x_ref,
                     w1_ref, b1_ref, w2_ref, b2_ref, w3_ref, b3_ref,
                     wm1_ref, bm1_ref, wm2_ref, bm2_ref, wm3_ref, bm3_ref,
                     out_ref):
    rows = x_ref.shape[0]          # L * TB (static)
    tb = rows // L

    def dense(h_bf16, w_ref, b_ref):
        y = jnp.dot(h_bf16, w_ref[...],
                    preferred_element_type=jnp.float32) + b_ref[...]
        return jnp.maximum(y, 0.0).astype(jnp.bfloat16)

    # --- conv stage: kernel_size=1 Conv1d == shared dense on stacked positions ---
    h = x_ref[...]                               # (L*TB, 128) bf16
    h = dense(h, w1_ref, b1_ref)                 # Conv1d(67 -> 512) + ReLU
    h = dense(h, w2_ref, b2_ref)                 # Conv1d(512 -> 512) + ReLU
    h = dense(h, w3_ref, b3_ref)                 # Conv1d(512 -> 512) + ReLU

    # --- Linear(1536 -> 1024): torch flatten handled as per-position slabs ---
    # Slices stay aligned views (tb is a multiple of 16 -> bf16 sublane tiles).
    acc = jnp.zeros((tb, MLP_CH), jnp.float32)
    for l in range(L):                           # static loop, L == 3
        acc += jnp.dot(h[l * tb:(l + 1) * tb, :], wm1_ref[l],
                       preferred_element_type=jnp.float32)
    z = jnp.maximum(acc + bm1_ref[...], 0.0).astype(jnp.bfloat16)

    z = dense(z, wm2_ref, bm2_ref)               # Linear(1024 -> 1024) + ReLU

    # --- Linear(1024 -> OUT_PAD): lane-dense final layer (pad lanes biased to
    # -1e30 so their softmax probability is exactly 0) ---
    logits = jnp.dot(z, wm3_ref[...],
                     preferred_element_type=jnp.float32) + bm3_ref[...]

    # --- Actor.forward: softmax over last dim (exact normalization) ---
    m = jnp.max(logits, axis=-1, keepdims=True)
    e = jnp.exp(logits - m)                      # pad lanes underflow to 0
    out_ref[...] = e / jnp.sum(e, axis=-1, keepdims=True)


# ---------------------------------------------------------------------------
# One-time parameter preparation (layout transforms + bf16; NOT per call)
# ---------------------------------------------------------------------------
def prepare_params(params):
    (w1, b1, w2, b2, w3, b3, wm1, bm1, wm2, bm2, wm3, bm3) = params

    # Conv1d weights (out, in, 1) -> (in, out); pad first layer's K to 128.
    w1_t = jnp.transpose(w1[:, :, 0])                                  # (67, 512)
    w1_k = (jnp.zeros((INPUT_CH_PAD, FEATURE_CH), jnp.float32)
               .at[:INPUT_CH].set(w1_t).astype(jnp.bfloat16))
    w2_k = jnp.transpose(w2[:, :, 0]).astype(jnp.bfloat16)
    w3_k = jnp.transpose(w3[:, :, 0]).astype(jnp.bfloat16)

    # torch flatten of (B, F, L) is channel-major (c*L + l); build per-position
    # slabs wm1_k[l, c, m] = wm1[m, c*L + l]  -> shape (L, F, M).
    wm1_k = (wm1.reshape(MLP_CH, FEATURE_CH, L)
                .transpose(2, 1, 0)).astype(jnp.bfloat16)
    wm2_k = jnp.transpose(wm2).astype(jnp.bfloat16)                    # (M, M)

    # Lane-dense final layer: pad OUT_CH -> OUT_PAD.  Pad weight columns are
    # zero; pad bias lanes are -1e30 so softmax assigns them exactly 0 mass.
    wm3_k = (jnp.zeros((MLP_CH, OUT_PAD), jnp.float32)
                .at[:, :OUT_CH].set(jnp.transpose(wm3))
                .astype(jnp.bfloat16))                                 # (M, 128)
    bm3_k = (jnp.full((1, OUT_PAD), NEG_BIG, jnp.float32)
                .at[0, :OUT_CH].set(bm3.astype(jnp.float32)))          # (1, 128)

    row = lambda b: b.reshape(1, -1).astype(jnp.float32)
    return (w1_k, row(b1), w2_k, row(b2), w3_k, row(b3),
            wm1_k, row(bm1), wm2_k, row(bm2), wm3_k, bm3_k)


# ---------------------------------------------------------------------------
# Wrapper: obs layout glue + pallas_call with a batch grid
# ---------------------------------------------------------------------------
@functools.partial(jax.jit, static_argnames=("batch_tile",))
def actor_forward(obs_ncl, kparams, *, batch_tile=512):
    """obs_ncl: (B, INPUT_CH, L) float32 observation (PyTorch NCL layout)."""
    (w1_k, b1_k, w2_k, b2_k, w3_k, b3_k,
     wm1_k, bm1_k, wm2_k, bm2_k, wm3_k, bm3_k) = kparams
    B = obs_ncl.shape[0]

    # Batch tile: multiple of 16 (bf16 sublane tiles) and at most ceil(B/2)
    # so the grid has >= 2 steps whenever B allows (both v7x TCs get work).
    tb = min(batch_tile, _round_up(pl.cdiv(B, 2), 16))
    tb = max(16, tb - tb % 16)
    grid = pl.cdiv(B, tb)
    b_pad = grid * tb

    # (B, C, L) -> (grid*L*TB, C_PAD): grid-block-major, then position, then row.
    x = jnp.transpose(obs_ncl.astype(jnp.float32), (2, 0, 1))          # (L, B, C)
    x = jnp.pad(x, ((0, 0), (0, b_pad - B), (0, INPUT_CH_PAD - INPUT_CH)))
    x = (x.reshape(L, grid, tb, INPUT_CH_PAD)
          .transpose(1, 0, 2, 3)
          .reshape(grid * L * tb, INPUT_CH_PAD)
          .astype(jnp.bfloat16))

    def res(shape):  # VMEM-resident weight/bias: constant block index
        return pl.BlockSpec(shape, lambda i, _s=shape: (0,) * len(_s))

    in_specs = [
        pl.BlockSpec((L * tb, INPUT_CH_PAD), lambda i: (i, 0)),        # obs tile
        res((INPUT_CH_PAD, FEATURE_CH)), res((1, FEATURE_CH)),
        res((FEATURE_CH, FEATURE_CH)), res((1, FEATURE_CH)),
        res((FEATURE_CH, FEATURE_CH)), res((1, FEATURE_CH)),
        res((L, FEATURE_CH, MLP_CH)), res((1, MLP_CH)),
        res((MLP_CH, MLP_CH)), res((1, MLP_CH)),
        res((MLP_CH, OUT_PAD)), res((1, OUT_PAD)),
    ]

    probs = pl.pallas_call(
        actor_fwd_kernel,
        out_shape=jax.ShapeDtypeStruct((b_pad, OUT_PAD), jnp.float32),
        grid=(grid,),
        in_specs=in_specs,
        out_specs=pl.BlockSpec((tb, OUT_PAD), lambda i: (i, 0)),
        compiler_params=pltpu.CompilerParams(
            dimension_semantics=("parallel",),
            vmem_limit_bytes=_vmem_limit_bytes()),
    )(x, w1_k, b1_k, w2_k, b2_k, w3_k, b3_k,
      wm1_k, bm1_k, wm2_k, bm2_k, wm3_k, bm3_k)

    return probs[:B, :OUT_CH]


# ---------------------------------------------------------------------------
# Deterministic parameter init (PyTorch-default-style uniform bounds)
# ---------------------------------------------------------------------------
def init_params(key):
    def uni(k, shape, fan_in):
        bound = 1.0 / float(fan_in) ** 0.5
        return jax.random.uniform(k, shape, jnp.float32, -bound, bound)

    ks = jax.random.split(key, 12)
    w1 = uni(ks[0], (FEATURE_CH, INPUT_CH, 1), INPUT_CH)
    b1 = uni(ks[1], (FEATURE_CH,), INPUT_CH)
    w2 = uni(ks[2], (FEATURE_CH, FEATURE_CH, 1), FEATURE_CH)
    b2 = uni(ks[3], (FEATURE_CH,), FEATURE_CH)
    w3 = uni(ks[4], (FEATURE_CH, FEATURE_CH, 1), FEATURE_CH)
    b3 = uni(ks[5], (FEATURE_CH,), FEATURE_CH)
    wm1 = uni(ks[6], (MLP_CH, L * FEATURE_CH), L * FEATURE_CH)
    bm1 = uni(ks[7], (MLP_CH,), L * FEATURE_CH)
    wm2 = uni(ks[8], (MLP_CH, MLP_CH), MLP_CH)
    bm2 = uni(ks[9], (MLP_CH,), MLP_CH)
    wm3 = uni(ks[10], (OUT_CH, MLP_CH), MLP_CH)
    bm3 = uni(ks[11], (OUT_CH,), MLP_CH)
    return (w1, b1, w2, b2, w3, b3, wm1, bm1, wm2, bm2, wm3, bm3)


# ---------------------------------------------------------------------------
# Pure-JAX f32 reference (mirrors the PyTorch graph, NCL conventions)
# ---------------------------------------------------------------------------
def actor_reference(obs_ncl, params):
    (w1, b1, w2, b2, w3, b3, wm1, bm1, wm2, bm2, wm3, bm3) = params
    prec = lax.Precision.HIGHEST

    def conv1x1_relu(h, w, b):
        y = jnp.einsum('bcl,oc->bol', h, w[:, :, 0], precision=prec)
        return jnp.maximum(y + b[None, :, None], 0.0)

    h = obs_ncl.astype(jnp.float32)
    h = conv1x1_relu(h, w1, b1)
    h = conv1x1_relu(h, w2, b2)
    h = conv1x1_relu(h, w3, b3)
    flat = h.reshape(h.shape[0], -1)               # torch x.view(B, -1)
    z = jnp.maximum(jnp.dot(flat, wm1.T, precision=prec) + bm1, 0.0)
    z = jnp.maximum(jnp.dot(z, wm2.T, precision=prec) + bm2, 0.0)
    logits = jnp.dot(z, wm3.T, precision=prec) + bm3
    return jax.nn.softmax(logits, axis=-1)


if __name__ == "__main__":
    key = jax.random.PRNGKey(0)
    pkey, xkey = jax.random.split(key)

    params = init_params(pkey)
    kparams = prepare_params(params)   # one-time layout + bf16 conversion

    B = 2
    obs = jax.random.normal(xkey, (B, INPUT_CH, L), dtype=jnp.float32)

    probs = jax.block_until_ready(actor_forward(obs, kparams))
    ref = jax.block_until_ready(actor_reference(obs, params))

    assert probs.shape == (B, OUT_CH)
    # Exact softmax normalization (pad lanes contribute exactly 0 mass).
    assert jnp.allclose(jnp.sum(probs, axis=-1), 1.0, atol=1e-4)
    # bf16 MXU matmuls vs f32 HIGHEST reference -> looser tolerance (deliberate).
    assert jnp.allclose(probs, ref, atol=2e-2, rtol=2e-2), (probs, ref)

    print("KERNEL_OK")
</pallas_src>

<mosaic_0001>
module attributes {stable_mosaic.version = 11 : i64} {
  func.func @actor_fwd_kernel(%arg0: i32, %arg1: memref<48x128xbf16, #tpu.memory_space<vmem>>, %arg2: memref<128x512xbf16, #tpu.memory_space<vmem>>, %arg3: memref<1x512xf32, #tpu.memory_space<vmem>>, %arg4: memref<512x512xbf16, #tpu.memory_space<vmem>>, %arg5: memref<1x512xf32, #tpu.memory_space<vmem>>, %arg6: memref<512x512xbf16, #tpu.memory_space<vmem>>, %arg7: memref<1x512xf32, #tpu.memory_space<vmem>>, %arg8: memref<3x512x1024xbf16, #tpu.memory_space<vmem>>, %arg9: memref<1x1024xf32, #tpu.memory_space<vmem>>, %arg10: memref<1024x1024xbf16, #tpu.memory_space<vmem>>, %arg11: memref<1x1024xf32, #tpu.memory_space<vmem>>, %arg12: memref<1024x128xbf16, #tpu.memory_space<vmem>>, %arg13: memref<1x128xf32, #tpu.memory_space<vmem>>, %arg14: memref<16x128xf32, #tpu.memory_space<vmem>>) attributes {dimension_semantics = [#tpu.dimension_semantics<parallel>], iteration_bounds = array<i64: 1>, scalar_prefetch = 0 : i64, scratch_operands = 0 : i64, tpu.core_type = #tpu.core_type<tc>, window_params = [{transform_indices = @transform_0, window_bounds = array<i64: 48, 128>}, {pipeline_mode = #tpu.pipeline_mode<synchronous>, transform_indices = @transform_1, window_bounds = array<i64: 128, 512>}, {pipeline_mode = #tpu.pipeline_mode<synchronous>, transform_indices = @transform_2, window_bounds = array<i64: 1, 512>}, {pipeline_mode = #tpu.pipeline_mode<synchronous>, transform_indices = @transform_3, window_bounds = array<i64: 512, 512>}, {pipeline_mode = #tpu.pipeline_mode<synchronous>, transform_indices = @transform_4, window_bounds = array<i64: 1, 512>}, {pipeline_mode = #tpu.pipeline_mode<synchronous>, transform_indices = @transform_5, window_bounds = array<i64: 512, 512>}, {pipeline_mode = #tpu.pipeline_mode<synchronous>, transform_indices = @transform_6, window_bounds = array<i64: 1, 512>}, {pipeline_mode = #tpu.pipeline_mode<synchronous>, transform_indices = @transform_7, window_bounds = array<i64: 3, 512, 1024>}, {pipeline_mode = #tpu.pipeline_mode<synchronous>, transform_indices = @transform_8, window_bounds = array<i64: 1, 1024>}, {pipeline_mode = #tpu.pipeline_mode<synchronous>, transform_indices = @transform_9, window_bounds = array<i64: 1024, 1024>}, {pipeline_mode = #tpu.pipeline_mode<synchronous>, transform_indices = @transform_10, window_bounds = array<i64: 1, 1024>}, {pipeline_mode = #tpu.pipeline_mode<synchronous>, transform_indices = @transform_11, window_bounds = array<i64: 1024, 128>}, {pipeline_mode = #tpu.pipeline_mode<synchronous>, transform_indices = @transform_12, window_bounds = array<i64: 1, 128>}, {transform_indices = @transform_13, window_bounds = array<i64: 16, 128>}]} {
    %c0 = arith.constant 0 : index
    %c0_0 = arith.constant 0 : index
    %0 = vector.load %arg1[%c0, %c0_0] : memref<48x128xbf16, #tpu.memory_space<vmem>>, vector<48x128xbf16>
    %c0_1 = arith.constant 0 : index
    %c0_2 = arith.constant 0 : index
    %1 = vector.load %arg2[%c0_1, %c0_2] : memref<128x512xbf16, #tpu.memory_space<vmem>>, vector<128x512xbf16>
    %cst = arith.constant dense<0.000000e+00> : vector<48x512xf32>
    %2 = tpu.matmul %0, %1, %cst {dimension_numbers = #tpu.dot_dimension_numbers<[1], [0], [0], [1], [0, 0, 1, 1], [], []>} : vector<48x128xbf16>, vector<128x512xbf16>, vector<48x512xf32> -> vector<48x512xf32>
    %c0_3 = arith.constant 0 : index
    %c0_4 = arith.constant 0 : index
    %3 = vector.load %arg3[%c0_3, %c0_4] : memref<1x512xf32, #tpu.memory_space<vmem>>, vector<1x512xf32>
    %4 = vector.broadcast %3 : vector<1x512xf32> to vector<48x512xf32>
    %5 = arith.addf %2, %4 : vector<48x512xf32>
    %cst_5 = arith.constant 0.000000e+00 : f32
    %6 = vector.broadcast %cst_5 : f32 to vector<48x512xf32>
    %7 = arith.maximumf %5, %6 : vector<48x512xf32>
    %8 = arith.truncf %7 : vector<48x512xf32> to vector<48x512xbf16>
    %c0_6 = arith.constant 0 : index
    %c0_7 = arith.constant 0 : index
    %9 = vector.load %arg4[%c0_6, %c0_7] : memref<512x512xbf16, #tpu.memory_space<vmem>>, vector<512x512xbf16>
    %cst_8 = arith.constant dense<0.000000e+00> : vector<48x512xf32>
    %10 = tpu.matmul %8, %9, %cst_8 {dimension_numbers = #tpu.dot_dimension_numbers<[1], [0], [0], [1], [0, 0, 1, 1], [], []>} : vector<48x512xbf16>, vector<512x512xbf16>, vector<48x512xf32> -> vector<48x512xf32>
    %c0_9 = arith.constant 0 : index
    %c0_10 = arith.constant 0 : index
    %11 = vector.load %arg5[%c0_9, %c0_10] : memref<1x512xf32, #tpu.memory_space<vmem>>, vector<1x512xf32>
    %12 = vector.broadcast %11 : vector<1x512xf32> to vector<48x512xf32>
    %13 = arith.addf %10, %12 : vector<48x512xf32>
    %cst_11 = arith.constant 0.000000e+00 : f32
    %14 = vector.broadcast %cst_11 : f32 to vector<48x512xf32>
    %15 = arith.maximumf %13, %14 : vector<48x512xf32>
    %16 = arith.truncf %15 : vector<48x512xf32> to vector<48x512xbf16>
    %c0_12 = arith.constant 0 : index
    %c0_13 = arith.constant 0 : index
    %17 = vector.load %arg6[%c0_12, %c0_13] : memref<512x512xbf16, #tpu.memory_space<vmem>>, vector<512x512xbf16>
    %cst_14 = arith.constant dense<0.000000e+00> : vector<48x512xf32>
    %18 = tpu.matmul %16, %17, %cst_14 {dimension_numbers = #tpu.dot_dimension_numbers<[1], [0], [0], [1], [0, 0, 1, 1], [], []>} : vector<48x512xbf16>, vector<512x512xbf16>, vector<48x512xf32> -> vector<48x512xf32>
    %c0_15 = arith.constant 0 : index
    %c0_16 = arith.constant 0 : index
    %19 = vector.load %arg7[%c0_15, %c0_16] : memref<1x512xf32, #tpu.memory_space<vmem>>, vector<1x512xf32>
    %20 = vector.broadcast %19 : vector<1x512xf32> to vector<48x512xf32>
    %21 = arith.addf %18, %20 : vector<48x512xf32>
    %cst_17 = arith.constant 0.000000e+00 : f32
    %22 = vector.broadcast %cst_17 : f32 to vector<48x512xf32>
    %23 = arith.maximumf %21, %22 : vector<48x512xf32>
    %24 = arith.truncf %23 : vector<48x512xf32> to vector<48x512xbf16>
    %cst_18 = arith.constant 0.000000e+00 : f32
    %25 = vector.broadcast %cst_18 : f32 to vector<16x1024xf32>
    %26 = vector.extract_strided_slice %24 {offsets = [0, 0], sizes = [16, 512], strides = [1, 1]} : vector<48x512xbf16> to vector<16x512xbf16>
    %c0_19 = arith.constant 0 : index
    %c0_20 = arith.constant 0 : index
    %c0_21 = arith.constant 0 : index
    %27 = vector.load %arg8[%c0_19, %c0_20, %c0_21] : memref<3x512x1024xbf16, #tpu.memory_space<vmem>>, vector<1x512x1024xbf16>
    %28 = vector.shape_cast %27 : vector<1x512x1024xbf16> to vector<512x1024xbf16>
    %cst_22 = arith.constant dense<0.000000e+00> : vector<16x1024xf32>
    %29 = tpu.matmul %26, %28, %cst_22 {dimension_numbers = #tpu.dot_dimension_numbers<[1], [0], [0], [1], [0, 0, 1, 1], [], []>} : vector<16x512xbf16>, vector<512x1024xbf16>, vector<16x1024xf32> -> vector<16x1024xf32>
    %30 = arith.addf %25, %29 : vector<16x1024xf32>
    %31 = vector.extract_strided_slice %24 {offsets = [16, 0], sizes = [16, 512], strides = [1, 1]} : vector<48x512xbf16> to vector<16x512xbf16>
    %c1 = arith.constant 1 : index
    %c0_23 = arith.constant 0 : index
    %c0_24 = arith.constant 0 : index
    %32 = vector.load %arg8[%c1, %c0_23, %c0_24] : memref<3x512x1024xbf16, #tpu.memory_space<vmem>>, vector<1x512x1024xbf16>
    %33 = vector.shape_cast %32 : vector<1x512x1024xbf16> to vector<512x1024xbf16>
    %cst_25 = arith.constant dense<0.000000e+00> : vector<16x1024xf32>
    %34 = tpu.matmul %31, %33, %cst_25 {dimension_numbers = #tpu.dot_dimension_numbers<[1], [0], [0], [1], [0, 0, 1, 1], [], []>} : vector<16x512xbf16>, vector<512x1024xbf16>, vector<16x1024xf32> -> vector<16x1024xf32>
    %35 = arith.addf %30, %34 : vector<16x1024xf32>
    %36 = vector.extract_strided_slice %24 {offsets = [32, 0], sizes = [16, 512], strides = [1, 1]} : vector<48x512xbf16> to vector<16x512xbf16>
    %c2 = arith.constant 2 : index
    %c0_26 = arith.constant 0 : index
    %c0_27 = arith.constant 0 : index
    %37 = vector.load %arg8[%c2, %c0_26, %c0_27] : memref<3x512x1024xbf16, #tpu.memory_space<vmem>>, vector<1x512x1024xbf16>
    %38 = vector.shape_cast %37 : vector<1x512x1024xbf16> to vector<512x1024xbf16>
    %cst_28 = arith.constant dense<0.000000e+00> : vector<16x1024xf32>
    %39 = tpu.matmul %36, %38, %cst_28 {dimension_numbers = #tpu.dot_dimension_numbers<[1], [0], [0], [1], [0, 0, 1, 1], [], []>} : vector<16x512xbf16>, vector<512x1024xbf16>, vector<16x1024xf32> -> vector<16x1024xf32>
    %40 = arith.addf %35, %39 : vector<16x1024xf32>
    %c0_29 = arith.constant 0 : index
    %c0_30 = arith.constant 0 : index
    %41 = vector.load %arg9[%c0_29, %c0_30] : memref<1x1024xf32, #tpu.memory_space<vmem>>, vector<1x1024xf32>
    %42 = vector.broadcast %41 : vector<1x1024xf32> to vector<16x1024xf32>
    %43 = arith.addf %40, %42 : vector<16x1024xf32>
    %cst_31 = arith.constant 0.000000e+00 : f32
    %44 = vector.broadcast %cst_31 : f32 to vector<16x1024xf32>
    %45 = arith.maximumf %43, %44 : vector<16x1024xf32>
    %46 = arith.truncf %45 : vector<16x1024xf32> to vector<16x1024xbf16>
    %c0_32 = arith.constant 0 : index
    %c0_33 = arith.constant 0 : index
    %47 = vector.load %arg10[%c0_32, %c0_33] : memref<1024x1024xbf16, #tpu.memory_space<vmem>>, vector<1024x1024xbf16>
    %cst_34 = arith.constant dense<0.000000e+00> : vector<16x1024xf32>
    %48 = tpu.matmul %46, %47, %cst_34 {dimension_numbers = #tpu.dot_dimension_numbers<[1], [0], [0], [1], [0, 0, 1, 1], [], []>} : vector<16x1024xbf16>, vector<1024x1024xbf16>, vector<16x1024xf32> -> vector<16x1024xf32>
    %c0_35 = arith.constant 0 : index
    %c0_36 = arith.constant 0 : index
    %49 = vector.load %arg11[%c0_35, %c0_36] : memref<1x1024xf32, #tpu.memory_space<vmem>>, vector<1x1024xf32>
    %50 = vector.broadcast %49 : vector<1x1024xf32> to vector<16x1024xf32>
    %51 = arith.addf %48, %50 : vector<16x1024xf32>
    %cst_37 = arith.constant 0.000000e+00 : f32
    %52 = vector.broadcast %cst_37 : f32 to vector<16x1024xf32>
    %53 = arith.maximumf %51, %52 : vector<16x1024xf32>
    %54 = arith.truncf %53 : vector<16x1024xf32> to vector<16x1024xbf16>
    %c0_38 = arith.constant 0 : index
    %c0_39 = arith.constant 0 : index
    %55 = vector.load %arg12[%c0_38, %c0_39] : memref<1024x128xbf16, #tpu.memory_space<vmem>>, vector<1024x128xbf16>
    %cst_40 = arith.constant dense<0.000000e+00> : vector<16x128xf32>
    %56 = tpu.matmul %54, %55, %cst_40 {dimension_numbers = #tpu.dot_dimension_numbers<[1], [0], [0], [1], [0, 0, 1, 1], [], []>} : vector<16x1024xbf16>, vector<1024x128xbf16>, vector<16x128xf32> -> vector<16x128xf32>
    %c0_41 = arith.constant 0 : index
    %c0_42 = arith.constant 0 : index
    %57 = vector.load %arg13[%c0_41, %c0_42] : memref<1x128xf32, #tpu.memory_space<vmem>>, vector<1x128xf32>
    %58 = vector.broadcast %57 : vector<1x128xf32> to vector<16x128xf32>
    %59 = arith.addf %56, %58 : vector<16x128xf32>
    %cst_43 = arith.constant dense<0xFF800000> : vector<16xf32>
    %60 = vector.multi_reduction <maximumf>, %59, %cst_43 [1] : vector<16x128xf32> to vector<16xf32>
    %61 = vector.shape_cast %60 : vector<16xf32> to vector<16x1xf32>
    %62 = vector.broadcast %61 : vector<16x1xf32> to vector<16x128xf32>
    %63 = arith.subf %59, %62 : vector<16x128xf32>
    %64 = math.exp %63 : vector<16x128xf32>
    %cst_44 = arith.constant dense<0.000000e+00> : vector<16xf32>
    %65 = vector.multi_reduction <add>, %64, %cst_44 [1] : vector<16x128xf32> to vector<16xf32>
    %66 = vector.shape_cast %65 : vector<16xf32> to vector<16x1xf32>
    %67 = vector.broadcast %66 : vector<16x1xf32> to vector<16x128xf32>
    %68 = arith.divf %64, %67 : vector<16x128xf32>
    %c0_45 = arith.constant 0 : index
    %c0_46 = arith.constant 0 : index
    %69 = vector.load %arg14[%c0_45, %c0_46] : memref<16x128xf32, #tpu.memory_space<vmem>>, vector<16x128xf32>
    tpu.vector_store %arg14[%c0_45, %c0_46], %68 {strides = array<i32>} : memref<16x128xf32, #tpu.memory_space<vmem>>, vector<16x128xf32>,
    return
  }
  func.func @transform_0(%arg0: i32) -> (i32, i32) {
    %c0_i32 = arith.constant 0 : i32
    %c0_i32_0 = arith.constant 0 : i32
    return %arg0, %c0_i32 : i32, i32
  }
  func.func @transform_1(%arg0: i32) -> (i32, i32) {
    %c0_i32 = arith.constant 0 : i32
    %c0_i32_0 = arith.constant 0 : i32
    %c0_i32_1 = arith.constant 0 : i32
    return %c0_i32, %c0_i32_0 : i32, i32
  }
  func.func @transform_2(%arg0: i32) -> (i32, i32) {
    %c0_i32 = arith.constant 0 : i32
    %c0_i32_0 = arith.constant 0 : i32
    %c0_i32_1 = arith.constant 0 : i32
    return %c0_i32, %c0_i32_0 : i32, i32
  }
  func.func @transform_3(%arg0: i32) -> (i32, i32) {
    %c0_i32 = arith.constant 0 : i32
    %c0_i32_0 = arith.constant 0 : i32
    %c0_i32_1 = arith.constant 0 : i32
    return %c0_i32, %c0_i32_0 : i32, i32
  }
  func.func @transform_4(%arg0: i32) -> (i32, i32) {
    %c0_i32 = arith.constant 0 : i32
    %c0_i32_0 = arith.constant 0 : i32
    %c0_i32_1 = arith.constant 0 : i32
    return %c0_i32, %c0_i32_0 : i32, i32
  }
  func.func @transform_5(%arg0: i32) -> (i32, i32) {
    %c0_i32 = arith.constant 0 : i32
    %c0_i32_0 = arith.constant 0 : i32
    %c0_i32_1 = arith.constant 0 : i32
    return %c0_i32, %c0_i32_0 : i32, i32
  }
  func.func @transform_6(%arg0: i32) -> (i32, i32) {
    %c0_i32 = arith.constant 0 : i32
    %c0_i32_0 = arith.constant 0 : i32
    %c0_i32_1 = arith.constant 0 : i32
    return %c0_i32, %c0_i32_0 : i32, i32
  }
  func.func @transform_7(%arg0: i32) -> (i32, i32, i32) {
    %c0_i32 = arith.constant 0 : i32
    %c0_i32_0 = arith.constant 0 : i32
    %c0_i32_1 = arith.constant 0 : i32
    %c0_i32_2 = arith.constant 0 : i32
    return %c0_i32, %c0_i32_0, %c0_i32_1 : i32, i32, i32
  }
  func.func @transform_8(%arg0: i32) -> (i32, i32) {
    %c0_i32 = arith.constant 0 : i32
    %c0_i32_0 = arith.constant 0 : i32
    %c0_i32_1 = arith.constant 0 : i32
    return %c0_i32, %c0_i32_0 : i32, i32
  }
  func.func @transform_9(%arg0: i32) -> (i32, i32) {
    %c0_i32 = arith.constant 0 : i32
    %c0_i32_0 = arith.constant 0 : i32
    %c0_i32_1 = arith.constant 0 : i32
    return %c0_i32, %c0_i32_0 : i32, i32
  }
  func.func @transform_10(%arg0: i32) -> (i32, i32) {
    %c0_i32 = arith.constant 0 : i32
    %c0_i32_0 = arith.constant 0 : i32
    %c0_i32_1 = arith.constant 0 : i32
    return %c0_i32, %c0_i32_0 : i32, i32
  }
  func.func @transform_11(%arg0: i32) -> (i32, i32) {
    %c0_i32 = arith.constant 0 : i32
    %c0_i32_0 = arith.constant 0 : i32
    %c0_i32_1 = arith.constant 0 : i32
    return %c0_i32, %c0_i32_0 : i32, i32
  }
  func.func @transform_12(%arg0: i32) -> (i32, i32) {
    %c0_i32 = arith.constant 0 : i32
    %c0_i32_0 = arith.constant 0 : i32
    %c0_i32_1 = arith.constant 0 : i32
    return %c0_i32, %c0_i32_0 : i32, i32
  }
  func.func @transform_13(%arg0: i32) -> (i32, i32) {
    %c0_i32 = arith.constant 0 : i32
    %c0_i32_0 = arith.constant 0 : i32
    return %arg0, %c0_i32 : i32, i32
  }
}

</mosaic_0001>

<bundles_post_ra>
// kernel: actor_forward.1
= control target key start
LH: loop header
LB: loop body
LE: loop exit
PB: predicated region body
PF: predicated region fallthrough
CT: control target
= control target key end

     0   :  { %18 = vsyncpa [#allocation3], 0  ;;  %s16383_s0 = inlined_call_operand.vmem [shape: bf16[48,128], index: 0, kind: input, shape index: {}]   ;;  %s16384_s1 = inlined_call_operand.hbm [shape: bf16[128,512], index: 1, kind: input, shape index: {}]   ;;  %s16385_s2 = inlined_call_operand.hbm [shape: f32[1,512], index: 2, kind: input, shape index: {}]   ;;  %s16386_s3 = inlined_call_operand.hbm [shape: bf16[512,512], index: 3, kind: input, shape index: {}]   ;;  %s16387_s4 = inlined_call_operand.hbm [shape: f32[1,512], index: 4, kind: input, shape index: {}]   ;;  %s16388_s5 = inlined_call_operand.hbm [shape: bf16[512,512], index: 5, kind: input, shape index: {}]   ;;  %s16389_s6 = inlined_call_operand.hbm [shape: f32[1,512], index: 6, kind: input, shape index: {}]   ;;  %s16390_s7 = inlined_call_operand.hbm [shape: bf16[3,512,1024], index: 7, kind: input, shape index: {}]   ;;  %s16391_s8 = inlined_call_operand.hbm [shape: f32[1,1024], index: 8, kind: input, shape index: {}]   ;;  %s16392_s9 = inlined_call_operand.hbm [shape: bf16[1024,1024], index: 9, kind: input, shape index: {}]   ;;  %s16393_s10 = inlined_call_operand.hbm [shape: f32[1,1024], index: 10, kind: input, shape index: {}]   ;;  %s16394_s11 = inlined_call_operand.hbm [shape: bf16[1024,128], index: 11, kind: input, shape index: {}]   ;;  %s16395_s12 = inlined_call_operand.hbm [shape: f32[1,128], index: 12, kind: input, shape index: {}]   ;;  %s16396_s13 = inlined_call_operand.vmem [shape: f32[16,128], index: 13, kind: output, shape index: {}]  }
   0x1   :  { %19 = vsyncpa [#allocation5], 0 }
   0x2   :  { %20 = vsyncpa [#allocation8], 0 }
   0x3   :  { %21 = vsyncpa [#allocation11], 0 }
   0x4   :  { %22 = vsyncpa [#allocation14], 0 }
   0x5   :  { %23 = vsyncpa [#allocation17], 0 }
   0x6   :  { %24 = vsyncpa [#allocation20], 0  ;;  %s15536_s25 = smov [#allocation4]   ;;  %s15537_s27 = smov [#allocation7]  }
   0x7   :  { %s45_s26 = sshll.u32 %s15536_s25, 4  ;;  %s67_s28 = sshll.u32 %s15537_s27, 4  ;;  %s46_s26 = int_to_ptr.vmem [resolvable:$true] %s45_s26  ;;  %s68_s28 = int_to_ptr.vmem [resolvable:$true] %s67_s28 }
   0x8   :  { %s15290_s29 = scalar_lea.vmem %s46_s26, 64  ;;  %p15295_p1 = scmp.lt.s32.totalorder %s46_s26, %s46_s26 }
   0x9   :  { %p15291_p0 = scmp.ne.s32.totalorder %s46_s26, %s15290_s29  ;;  %p15296_p2 = scmp.lt.s32.totalorder %s15290_s29, %s15290_s29 }
   0xb   :  { %p15297_p3 = por %p15296_p2, %p15295_p1 }
   0xd   :  { %p15298_p4 = pnand %p15297_p3, %p15291_p0 }
   0xf   :  { %15301 = shalt.err (!%p15298_p4)
}
  0x10   :  { %48 = dma.hbm_to_vmem [thread:$0]  %s16385_s2, 64, %s46_s26, [#allocation5]  }
  0x11   :  { %s15310_s15 = scalar_lea.vmem %s68_s28, 64  ;;  %p15315_p6 = scmp.lt.s32.totalorder %s68_s28, %s68_s28 }
  0x12   :  { %p15311_p5 = scmp.ne.s32.totalorder %s68_s28, %s15310_s15  ;;  %p15316_p7 = scmp.lt.s32.totalorder %s15310_s15, %s15310_s15 }
  0x14   :  { %p15317_p8 = por %p15316_p7, %p15315_p6 }
  0x16   :  { %p15318_p9 = pnand %p15317_p8, %p15311_p5 }
  0x18   :  { %15321 = shalt.err (!%p15318_p9)
}
  0x19   :  { %70 = dma.hbm_to_vmem [thread:$0]  %s16387_s4, 64, %s68_s28, [#allocation8]  }
  0x1a   :  { %s15538_s18 = smov [#allocation10]   ;;  %s15539_s20 = smov [#allocation13]  }
  0x1b   :  { %s89_s19 = sshll.u32 %s15538_s18, 4  ;;  %s111_s21 = sshll.u32 %s15539_s20, 4  ;;  %s90_s19 = int_to_ptr.vmem [resolvable:$true] %s89_s19  ;;  %s112_s21 = int_to_ptr.vmem [resolvable:$true] %s111_s21 }
  0x1c   :  { %s15330_s22 = scalar_lea.vmem %s90_s19, 64  ;;  %p15335_p11 = scmp.lt.s32.totalorder %s90_s19, %s90_s19 }
  0x1d   :  { %p15331_p10 = scmp.ne.s32.totalorder %s90_s19, %s15330_s22  ;;  %p15336_p12 = scmp.lt.s32.totalorder %s15330_s22, %s15330_s22 }
  0x1f   :  { %p15337_p13 = por %p15336_p12, %p15335_p11 }
  0x21   :  { %p15338_p0 = pnand %p15337_p13, %p15331_p10 }
  0x23   :  { %15341 = shalt.err (!%p15338_p0)
}
  0x24   :  { %92 = dma.hbm_to_vmem [thread:$0]  %s16389_s6, 64, %s90_s19, [#allocation11]  }
  0x25   :  { %s15350_s24 = scalar_lea.vmem %s112_s21, 128  ;;  %p15355_p2 = scmp.lt.s32.totalorder %s112_s21, %s112_s21 }
  0x26   :  { %p15351_p1 = scmp.ne.s32.totalorder %s112_s21, %s15350_s24  ;;  %p15356_p3 = scmp.lt.s32.totalorder %s15350_s24, %s15350_s24 }
  0x28   :  { %p15357_p4 = por %p15356_p3, %p15355_p2 }
  0x2a   :  { %p15358_p5 = pnand %p15357_p4, %p15351_p1 }
  0x2c   :  { %15361 = shalt.err (!%p15358_p5)
}
  0x2d   :  { %114 = dma.hbm_to_vmem [thread:$0]  %s16391_s8, 128, %s112_s21, [#allocation14]  }
  0x2e   :  { %s15540_s26 = smov [#allocation16]   ;;  %s15541_s28 = smov [#allocation2]  }
  0x2f   :  { %s133_s27 = sshll.u32 %s15540_s26, 4  ;;  %s32_s29 = sshll.u32 %s15541_s28, 4  ;;  %s134_s27 = int_to_ptr.vmem [resolvable:$true] %s133_s27  ;;  %s33_s29 = int_to_ptr.vmem [resolvable:$true] %s32_s29 }
  0x30   :  { %s15370_s30 = scalar_lea.vmem %s134_s27, 128  ;;  %p15375_p7 = scmp.lt.s32.totalorder %s134_s27, %s134_s27 }
  0x31   :  { %p15371_p6 = scmp.ne.s32.totalorder %s134_s27, %s15370_s30  ;;  %p15376_p8 = scmp.lt.s32.totalorder %s15370_s30, %s15370_s30 }
  0x33   :  { %p15377_p9 = por %p15376_p8, %p15375_p7 }
  0x35   :  { %p15378_p10 = pnand %p15377_p9, %p15371_p6 }
  0x37   :  { %15381 = shalt.err (!%p15378_p10)
}
  0x38   :  { %136 = dma.hbm_to_vmem [thread:$0]  %s16393_s10, 128, %s134_s27, [#allocation17]  }
  0x39   :  { %s15390_s15 = scalar_lea.vmem %s33_s29, 4096  ;;  %p15395_p12 = scmp.lt.s32.totalorder %s33_s29, %s33_s29 }
  0x3a   :  { %p15391_p11 = scmp.ne.s32.totalorder %s33_s29, %s15390_s15  ;;  %p15396_p13 = scmp.lt.s32.totalorder %s15390_s15, %s15390_s15 }
  0x3c   :  { %p15397_p0 = por %p15396_p13, %p15395_p12 }
  0x3e   :  { %p15398_p1 = pnand %p15397_p0, %p15391_p11 }
  0x40   :  { %15401 = shalt.err (!%p15398_p1)
}
  0x41   :  { %s15542_s8 = smov 256   ;;  %s15543_s16 = smov 16  }
  0x42   :  { %38 = dma.hbm_to_vmem [thread:$0]  %s16384_s1, 4096, %s33_s29, [#allocation3], %s15542_s8, %s15542_s8, %s15543_s16  }
  0x43   :  { %s15544_s19 = smov [#allocation6]   ;;  %s15545_s21 = smov [#allocation9]  }
  0x44   :  { %s54_s20 = sshll.u32 %s15544_s19, 4  ;;  %s76_s22 = sshll.u32 %s15545_s21, 4  ;;  %s55_s20 = int_to_ptr.vmem [resolvable:$true] %s54_s20  ;;  %s77_s22 = int_to_ptr.vmem [resolvable:$true] %s76_s22 }
  0x45   :  { %s15410_s10 = scalar_lea.vmem %s55_s20, 16384  ;;  %p15415_p3 = scmp.lt.s32.totalorder %s55_s20, %s55_s20 }
  0x46   :  { %p15411_p2 = scmp.ne.s32.totalorder %s55_s20, %s15410_s10  ;;  %p15416_p4 = scmp.lt.s32.totalorder %s15410_s10, %s15410_s10 }
  0x48   :  { %p15417_p5 = por %p15416_p4, %p15415_p3 }
  0x4a   :  { %p15418_p6 = pnand %p15417_p5, %p15411_p2 }
  0x4c   :  { %15421 = shalt.err (!%p15418_p6)
}
  0x4d   :  { %60 = dma.hbm_to_vmem [thread:$0]  %s16386_s3, 16384, %s55_s20, [#allocation5], %s15542_s8, %s15542_s8, %s15543_s16  }
  0x4e   :  { %s15430_s24 = scalar_lea.vmem %s77_s22, 16384  ;;  %p15435_p8 = scmp.lt.s32.totalorder %s77_s22, %s77_s22 }
  0x4f   :  { %p15431_p7 = scmp.ne.s32.totalorder %s77_s22, %s15430_s24  ;;  %p15436_p9 = scmp.lt.s32.totalorder %s15430_s24, %s15430_s24 }
  0x51   :  { %p15437_p10 = por %p15436_p9, %p15435_p8 }
  0x53   :  { %p15438_p11 = pnand %p15437_p10, %p15431_p7 }
  0x55   :  { %15441 = shalt.err (!%p15438_p11)
}
  0x56   :  { %82 = dma.hbm_to_vmem [thread:$0]  %s16388_s5, 16384, %s77_s22, [#allocation8], %s15542_s8, %s15542_s8, %s15543_s16  }
  0x57   :  { %s15546_s25 = smov [#allocation12]  }
  0x58   :  { %s98_s26 = sshll.u32 %s15546_s25, 4  ;;  %s99_s26 = int_to_ptr.vmem [resolvable:$true] %s98_s26 }
  0x59   :  { %s15450_s27 = scalar_lea.vmem %s99_s26, 98304  ;;  %p15455_p13 = scmp.lt.s32.totalorder %s99_s26, %s99_s26 }
  0x5a   :  { %p15451_p12 = scmp.ne.s32.totalorder %s99_s26, %s15450_s27  ;;  %p15456_p0 = scmp.lt.s32.totalorder %s15450_s27, %s15450_s27 }
  0x5c   :  { %p15457_p1 = por %p15456_p0, %p15455_p13 }
  0x5e   :  { %p15458_p2 = pnand %p15457_p1, %p15451_p12 }
  0x60   :  { %15461 = shalt.err (!%p15458_p2)
}
  0x61   :  { %s15547_s3 = smov 512   ;;  %s15548_s28 = smov 32  }
  0x62   :  { %104 = dma.hbm_to_vmem [thread:$0]  %s16390_s7, 98304, %s99_s26, [#allocation11], %s15547_s3, %s15547_s3, %s15548_s28  }
  0x63   :  { %s15549_s6 = smov [#allocation15]   ;;  %s15550_s5 = smov [#allocation18]  }
  0x64   :  { %s120_s14 = sshll.u32 %s15549_s6, 4  ;;  %s142_s15 = sshll.u32 %s15550_s5, 4  ;;  %s121_s14 = int_to_ptr.vmem [resolvable:$true] %s120_s14  ;;  %s143_s15 = int_to_ptr.vmem [resolvable:$true] %s142_s15 }
  0x65   :  { %s15470_s8 = scalar_lea.vmem %s121_s14, 65536  ;;  %p15475_p4 = scmp.lt.s32.totalorder %s121_s14, %s121_s14 }
  0x66   :  { %p15471_p3 = scmp.ne.s32.totalorder %s121_s14, %s15470_s8  ;;  %p15476_p5 = scmp.lt.s32.totalorder %s15470_s8, %s15470_s8 }
  0x68   :  { %p15477_p6 = por %p15476_p5, %p15475_p4 }
  0x6a   :  { %p15478_p7 = pnand %p15477_p6, %p15471_p3 }
  0x6c   :  { %15481 = shalt.err (!%p15478_p7)
}
  0x6d   :  { %126 = dma.hbm_to_vmem [thread:$0]  %s16392_s9, 65536, %s121_s14, [#allocation14], %s15547_s3, %s15547_s3, %s15548_s28  }
  0x6e   :  { %s15490_s18 = scalar_lea.vmem %s143_s15, 8192  ;;  %p15495_p9 = scmp.lt.s32.totalorder %s143_s15, %s143_s15 }
  0x6f   :  { %p15491_p8 = scmp.ne.s32.totalorder %s143_s15, %s15490_s18  ;;  %p15496_p10 = scmp.lt.s32.totalorder %s15490_s18, %s15490_s18 }
  0x71   :  { %p15497_p11 = por %p15496_p10, %p15495_p9 }
  0x73   :  { %p15498_p12 = pnand %p15497_p11, %p15491_p8 }
  0x75   :  { %15501 = shalt.err (!%p15498_p12)
}
  0x76   :  { %s15551_s7 = smov 64   ;;  %s15552_s19 = smov 4  }
  0x77   :  { %148 = dma.hbm_to_vmem [thread:$0]  %s16394_s11, 8192, %s143_s15, [#allocation17], %s15551_s7, %s15551_s7, %s15552_s19  }
  0x78   :  { %s15553_s22 = smov [#allocation19]  }
  0x79   :  { %s155_s10 = sshll.u32 %s15553_s22, 4  ;;  %s156_s10 = int_to_ptr.vmem [resolvable:$true] %s155_s10 }
  0x7a   :  { %s15510_s2 = scalar_lea.vmem %s156_s10, 16  ;;  %s15514_s9 = scalar_lea.vmem %s156_s10, 32 }
  0x7b   :  { %p15511_p13 = scmp.ne.s32.totalorder %s156_s10, %s15510_s2  ;;  %p15515_p0 = scmp.lt.s32.totalorder %s156_s10, %s156_s10 }
  0x7c   :  { %p15516_p1 = scmp.lt.s32.totalorder %s15514_s9, %s15510_s2 }
  0x7e   :  { %p15517_p2 = por %p15516_p1, %p15515_p0 }
  0x80   :  { %p15518_p3 = pnand %p15517_p2, %p15511_p13 }
  0x82   :  { %15521 = shalt.err (!%p15518_p3)
}
  0x83   :  { %158 = dma.hbm_to_vmem [thread:$0]  %s16395_s12, 16, %s156_s10, [#allocation20]  }
  0x84   :  { %15522 = dma.done.wait [#allocation3], 4096  }
  0x85   :  { %15523 = vsyncadd [#allocation3], 4294963200 }
  0x86   :  { %15524 = dma.done.wait [#allocation5], 16448  }
  0x87   :  { %15525 = vsyncadd [#allocation5], 4294950848 }
  0x88   :  { %15526 = dma.done.wait [#allocation8], 16448  }
  0x89   :  { %15527 = vsyncadd [#allocation8], 4294950848 }
  0x8a   :  { %15528 = dma.done.wait [#allocation11], 98368  }
  0x8b   :  { %15529 = vsyncadd [#allocation11], 4294868928 }
  0x8c   :  { %15530 = dma.done.wait [#allocation14], 65664  }
  0x8d   :  { %15531 = vsyncadd [#allocation14], 4294901632 }
  0x8e   :  { %15532 = dma.done.wait [#allocation17], 8320  }
  0x8f   :  { %15533 = vsyncadd [#allocation17], 4294958976 }
  0x90   :  { %15534 = dma.done.wait [#allocation20], 16  }
  0x91   :  { %15535 = vsyncadd [#allocation20], 4294967280  ;;  %v15554_v0 = vmov 0   ;;  %v14775_v1 = vld [vmem:[#allocation2 + $0xe4] ss:$16 sps:$4 sm:$0xff]   ;;  %v14824_v44 = vld [vmem:[%s16383_s0 + $0x8] sm:$0xff]  }
  0x92   :  { %466 = vmatprep.mubr.bf16.mxu0 %v15554_v0  ;;  %529 = vmatprep.mubr.bf16.mxu1 %v15554_v0  ;;  %v14777_v2 = vld [vmem:[#allocation2 + $0xec] ss:$16 sps:$4 sm:$0xff]   ;;  %v14779_v3 = vld [vmem:[#allocation2 + $0xe0] ss:$16 sps:$4 sm:$0xff]   ;;  %v14780_v4 = vld [vmem:[#allocation2 + $0xe8] ss:$16 sps:$4 sm:$0xff]  }
  0x93   :  { %434 = vmatprep.subr.bf16.mxu0 %v14775_v1  ;;  %497 = vmatprep.subr.bf16.mxu1 %v14777_v2  ;;  %v14781_v5 = vld [vmem:[#allocation2 + $0xc4] ss:$16 sps:$4 sm:$0xff]   ;;  %v14783_v6 = vld [vmem:[#allocation2 + $0xcc] ss:$16 sps:$4 sm:$0xff]   ;;  %v14785_v7 = vld [vmem:[#allocation2 + $0xc0] ss:$16 sps:$4 sm:$0xff]  }
  0x94   :  { %435 = vmatpush1.bf16.msra.mxu0 %v14779_v3  ;;  %498 = vmatpush1.bf16.msra.mxu1 %v14780_v4  ;;  %v14786_v8 = vld [vmem:[#allocation2 + $0xc8] ss:$16 sps:$4 sm:$0xff]   ;;  %v14787_v9 = vld [vmem:[#allocation2 + $0xa4] ss:$16 sps:$4 sm:$0xff]   ;;  %v14789_v10 = vld [vmem:[#allocation2 + $0xac] ss:$16 sps:$4 sm:$0xff]  }
  0x95   :  { %436 = vmatprep.subr.bf16.mxu0 %v14781_v5  ;;  %499 = vmatprep.subr.bf16.mxu1 %v14783_v6  ;;  %v14791_v11 = vld [vmem:[#allocation2 + $0xa0] ss:$16 sps:$4 sm:$0xff]   ;;  %v14792_v12 = vld [vmem:[#allocation2 + $0xa8] ss:$16 sps:$4 sm:$0xff]   ;;  %v14793_v13 = vld [vmem:[#allocation2 + $0x84] ss:$16 sps:$4 sm:$0xff]  }
  0x96   :  { %v14795_v14 = vld [vmem:[#allocation2 + $0x8c] ss:$16 sps:$4 sm:$0xff]   ;;  %v14797_v15 = vld [vmem:[#allocation2 + $0x80] ss:$16 sps:$4 sm:$0xff]   ;;  %v14798_v16 = vld [vmem:[#allocation2 + $0x88] ss:$16 sps:$4 sm:$0xff]  }
  0x97   :  { %v14799_v17 = vld [vmem:[#allocation2 + $0x64] ss:$16 sps:$4 sm:$0xff]   ;;  %v14801_v18 = vld [vmem:[#allocation2 + $0x6c] ss:$16 sps:$4 sm:$0xff]   ;;  %v14803_v19 = vld [vmem:[#allocation2 + $0x60] ss:$16 sps:$4 sm:$0xff]  }
  0x98   :  { %437 = vmatpush1.bf16.msra.mxu0 %v14785_v7  ;;  %500 = vmatpush1.bf16.msra.mxu1 %v14786_v8  ;;  %v14804_v20 = vld [vmem:[#allocation2 + $0x68] ss:$16 sps:$4 sm:$0xff]   ;;  %v14805_v21 = vld [vmem:[#allocation2 + $0x44] ss:$16 sps:$4 sm:$0xff]   ;;  %v14807_v22 = vld [vmem:[#allocation2 + $0x4c] ss:$16 sps:$4 sm:$0xff]  }
  0x99   :  { %438 = vmatprep.subr.bf16.mxu0 %v14787_v9  ;;  %501 = vmatprep.subr.bf16.mxu1 %v14789_v10  ;;  %v14809_v23 = vld [vmem:[#allocation2 + $0x40] ss:$16 sps:$4 sm:$0xff]   ;;  %v14810_v24 = vld [vmem:[#allocation2 + $0x48] ss:$16 sps:$4 sm:$0xff]   ;;  %v14811_v25 = vld [vmem:[#allocation2 + $0x24] ss:$16 sps:$4 sm:$0xff]  }
  0x9a   :  { %v14813_v26 = vld [vmem:[#allocation2 + $0x2c] ss:$16 sps:$4 sm:$0xff]   ;;  %v14815_v27 = vld [vmem:[#allocation2 + $0x20] ss:$16 sps:$4 sm:$0xff]   ;;  %v14816_v28 = vld [vmem:[#allocation2 + $0x28] ss:$16 sps:$4 sm:$0xff]  }
  0x9b   :  { %v14817_v29 = vld [vmem:[#allocation2 + $0x4] ss:$16 sps:$4 sm:$0xff]   ;;  %v14819_v30 = vld [vmem:[#allocation2 + $0xc] ss:$16 sps:$4 sm:$0xff]   ;;  %v14821_v31 = vld [vmem:[#allocation2] ss:$16 sps:$4 sm:$0xff]  }
  0x9c   :  { %439 = vmatpush1.bf16.msra.mxu0 %v14791_v11  ;;  %502 = vmatpush1.bf16.msra.mxu1 %v14792_v12  ;;  %v14822_v32 = vld [vmem:[#allocation2 + $0x8] ss:$16 sps:$4 sm:$0xff]   ;;  %v14823_v35 = vld [vmem:[%s16383_s0] sm:$0xff]   ;;  %v14825_v53 = vld [vmem:[%s16383_s0 + $0x10] sm:$0xff]  }
  0x9d   :  { %440 = vmatprep.subr.bf16.mxu0 %v14793_v13  ;;  %503 = vmatprep.subr.bf16.mxu1 %v14795_v14  ;;  %v14828_v33 = vld [vmem:[#allocation6 + $0xe4] ss:$16 sps:$4 sm:$0xff]   ;;  %v14826_v36 = vld [vmem:[#allocation6 + $0xe0] ss:$16 sps:$4 sm:$0xff]  }
  0x9e   :  { %v14831_v34 = vld [vmem:[#allocation6 + $0x2e4] ss:$16 sps:$4 sm:$0xff]   ;;  %v14829_v37 = vld [vmem:[#allocation6 + $0x2e0] ss:$16 sps:$4 sm:$0xff]  }
  0x9f   :  { %v14834_v38 = vld [vmem:[#allocation6 + $0xc4] ss:$16 sps:$4 sm:$0xff]   ;;  %v14832_v40 = vld [vmem:[#allocation6 + $0xc0] ss:$16 sps:$4 sm:$0xff]  }
  0xa0   :  { %441 = vmatpush1.bf16.msra.mxu0 %v14797_v15  ;;  %504 = vmatpush1.bf16.msra.mxu1 %v14798_v16  ;;  %v14837_v39 = vld [vmem:[#allocation6 + $0x2c4] ss:$16 sps:$4 sm:$0xff]   ;;  %v14835_v41 = vld [vmem:[#allocation6 + $0x2c0] ss:$16 sps:$4 sm:$0xff]  }
  0xa1   :  { %442 = vmatprep.subr.bf16.mxu0 %v14799_v17  ;;  %505 = vmatprep.subr.bf16.mxu1 %v14801_v18  ;;  %v14840_v42 = vld [vmem:[#allocation6 + $0xa4] ss:$16 sps:$4 sm:$0xff]   ;;  %v14838_v45 = vld [vmem:[#allocation6 + $0xa0] ss:$16 sps:$4 sm:$0xff]  }
  0xa2   :  { %v14843_v43 = vld [vmem:[#allocation6 + $0x2a4] ss:$16 sps:$4 sm:$0xff]   ;;  %v14841_v46 = vld [vmem:[#allocation6 + $0x2a0] ss:$16 sps:$4 sm:$0xff]  }
  0xa3   :  { %v14846_v47 = vld [vmem:[#allocation6 + $0x84] ss:$16 sps:$4 sm:$0xff]   ;;  %v14844_v49 = vld [vmem:[#allocation6 + $0x80] ss:$16 sps:$4 sm:$0xff]  }
  0xa4   :  { %443 = vmatpush1.bf16.msra.mxu0 %v14803_v19  ;;  %506 = vmatpush1.bf16.msra.mxu1 %v14804_v20  ;;  %v14849_v48 = vld [vmem:[#allocation6 + $0x284] ss:$16 sps:$4 sm:$0xff]   ;;  %v14847_v50 = vld [vmem:[#allocation6 + $0x280] ss:$16 sps:$4 sm:$0xff]  }
  0xa5   :  { %444 = vmatprep.subr.bf16.mxu0 %v14805_v21  ;;  %507 = vmatprep.subr.bf16.mxu1 %v14807_v22  ;;  %v14852_v51 = vld [vmem:[#allocation6 + $0x64] ss:$16 sps:$4 sm:$0xff]   ;;  %v14850_v54 = vld [vmem:[#allocation6 + $0x60] ss:$16 sps:$4 sm:$0xff]  }
  0xa6   :  { %v14855_v52 = vld [vmem:[#allocation6 + $0x264] ss:$16 sps:$4 sm:$0xff]   ;;  %v14853_v55 = vld [vmem:[#allocation6 + $0x260] ss:$16 sps:$4 sm:$0xff]  }
  0xa7   :  { %v14858_v56 = vld [vmem:[#allocation6 + $0x44] ss:$16 sps:$4 sm:$0xff]   ;;  %v14856_v58 = vld [vmem:[#allocation6 + $0x40] ss:$16 sps:$4 sm:$0xff]  }
  0xa8   :  { %445 = vmatpush1.bf16.msra.mxu0 %v14809_v23  ;;  %508 = vmatpush1.bf16.msra.mxu1 %v14810_v24  ;;  %v14861_v57 = vld [vmem:[#allocation6 + $0x244] ss:$16 sps:$4 sm:$0xff]   ;;  %v14859_v59 = vld [vmem:[#allocation6 + $0x240] ss:$16 sps:$4 sm:$0xff]  }
  0xa9   :  { %446 = vmatprep.subr.bf16.mxu0 %v14811_v25  ;;  %509 = vmatprep.subr.bf16.mxu1 %v14813_v26  ;;  %v14864_v60 = vld [vmem:[#allocation6 + $0x24] ss:$16 sps:$4 sm:$0xff]   ;;  %v14862_v62 = vld [vmem:[#allocation6 + $0x20] ss:$16 sps:$4 sm:$0xff]  }
  0xaa   :  { %v14867_v61 = vld [vmem:[#allocation6 + $0x224] ss:$16 sps:$4 sm:$0xff]   ;;  %v14865_v63 = vld [vmem:[#allocation6 + $0x220] ss:$16 sps:$4 sm:$0xff]  }
  0xab   :  { %v14873_v1 = vld [vmem:[#allocation6 + $0x204] ss:$16 sps:$4 sm:$0xff]   ;;  %v14868_v2 = vld [vmem:[#allocation6] ss:$16 sps:$4 sm:$0xff]  }
  0xac   :  { %447 = vmatpush1.bf16.msra.mxu0 %v14815_v27  ;;  %510 = vmatpush1.bf16.msra.mxu1 %v14816_v28  ;;  %v14871_v3 = vld [vmem:[#allocation6 + $0x200] ss:$16 sps:$4 sm:$0xff]   ;;  %v14876_v4 = vld [vmem:[#allocation6 + $0x1e4] ss:$16 sps:$4 sm:$0xff]  }
  0xad   :  { %448 = vmatprep.subr.bf16.mxu0 %v14817_v29  ;;  %511 = vmatprep.subr.bf16.mxu1 %v14819_v30  ;;  %v14879_v5 = vld [vmem:[#allocation6 + $0x3e4] ss:$16 sps:$4 sm:$0xff]   ;;  %v14874_v6 = vld [vmem:[#allocation6 + $0x1e0] ss:$16 sps:$4 sm:$0xff]  }
  0xae   :  { %v14877_v7 = vld [vmem:[#allocation6 + $0x3e0] ss:$16 sps:$4 sm:$0xff]   ;;  %v14882_v8 = vld [vmem:[#allocation6 + $0x1c4] ss:$16 sps:$4 sm:$0xff]  }
  0xaf   :  { %v14885_v9 = vld [vmem:[#allocation6 + $0x3c4] ss:$16 sps:$4 sm:$0xff]   ;;  %v14880_v10 = vld [vmem:[#allocation6 + $0x1c0] ss:$16 sps:$4 sm:$0xff]  }
  0xb0   :  { %449 = vmatpush1.bf16.msra.mxu0 %v14821_v31  ;;  %512 = vmatpush1.bf16.msra.mxu1 %v14822_v32  ;;  %v14883_v11 = vld [vmem:[#allocation6 + $0x3c0] ss:$16 sps:$4 sm:$0xff]   ;;  %v14888_v12 = vld [vmem:[#allocation6 + $0x1a4] ss:$16 sps:$4 sm:$0xff]  }
  0xb1   :  { %1386 = vmatprep.subr.bf16.mxu0 %v14828_v33  ;;  %1449 = vmatprep.subr.bf16.mxu1 %v14831_v34  ;;  %v14891_v13 = vld [vmem:[#allocation6 + $0x3a4] ss:$16 sps:$4 sm:$0xff]   ;;  %v14886_v14 = vld [vmem:[#allocation6 + $0x1a0] ss:$16 sps:$4 sm:$0xff]  }
  0xb2   :  { %v14889_v15 = vld [vmem:[#allocation6 + $0x3a0] ss:$16 sps:$4 sm:$0xff]   ;;  %v14894_v16 = vld [vmem:[#allocation6 + $0x184] ss:$16 sps:$4 sm:$0xff]  }
  0xb3   :  { %467 = vmatmul.mubr.bf16.vlgmr.msra.gmra.mxu0 %v14823_v35  ;;  %530 = vmatmul.mubr.bf16.vlgmr.msra.gmra.mxu1 %v14823_v35  ;;  %v14897_v17 = vld [vmem:[#allocation6 + $0x384] ss:$16 sps:$4 sm:$0xff]   ;;  %v14892_v18 = vld [vmem:[#allocation6 + $0x180] ss:$16 sps:$4 sm:$0xff]  }
  0xb4   :  { %476 = vmatprep.mubr.bf16.mxu0 %v15554_v0  ;;  %539 = vmatprep.mubr.bf16.mxu1 %v15554_v0  ;;  %v14895_v19 = vld [vmem:[#allocation6 + $0x380] ss:$16 sps:$4 sm:$0xff]   ;;  %v14900_v20 = vld [vmem:[#allocation6 + $0x164] ss:$16 sps:$4 sm:$0xff]  }
  0xb5   :  { %1387 = vmatpush1.bf16.msra.mxu0 %v14826_v36  ;;  %1450 = vmatpush1.bf16.msra.mxu1 %v14829_v37  ;;  %v14903_v21 = vld [vmem:[#allocation6 + $0x364] ss:$16 sps:$4 sm:$0xff]   ;;  %v14898_v22 = vld [vmem:[#allocation6 + $0x160] ss:$16 sps:$4 sm:$0xff]   ;;  %v14924_v36 = vld [vmem:[#allocation6 + $0xec] ss:$16 sps:$4 sm:$0xff]  }
  0xb6   :  { %1388 = vmatprep.subr.bf16.mxu0 %v14834_v38  ;;  %1451 = vmatprep.subr.bf16.mxu1 %v14837_v39  ;;  %v14901_v23 = vld [vmem:[#allocation6 + $0x360] ss:$16 sps:$4 sm:$0xff]   ;;  %v14906_v24 = vld [vmem:[#allocation6 + $0x144] ss:$16 sps:$4 sm:$0xff]   ;;  %v14927_v37 = vld [vmem:[#allocation6 + $0x2ec] ss:$16 sps:$4 sm:$0xff]   ;;  %v236_v38 = vlaneseq }
  0xb7   :  { %v14909_v25 = vld [vmem:[#allocation6 + $0x344] ss:$16 sps:$4 sm:$0xff]   ;;  %v14904_v26 = vld [vmem:[#allocation6 + $0x140] ss:$16 sps:$4 sm:$0xff]  }
  0xb8   :  { %v14907_v27 = vld [vmem:[#allocation6 + $0x340] ss:$16 sps:$4 sm:$0xff]   ;;  %v14912_v28 = vld [vmem:[#allocation6 + $0x124] ss:$16 sps:$4 sm:$0xff]   ;;  %v15676_v39 = vshrl.u32 %v236_v38, 7 }
  0xb9   :  { %1389 = vmatpush1.bf16.msra.mxu0 %v14832_v40  ;;  %1452 = vmatpush1.bf16.msra.mxu1 %v14835_v41  ;;  %v14915_v29 = vld [vmem:[#allocation6 + $0x324] ss:$16 sps:$4 sm:$0xff]   ;;  %v14910_v30 = vld [vmem:[#allocation6 + $0x120] ss:$16 sps:$4 sm:$0xff]   ;;  %v14928_v38 = vld [vmem:[#allocation6 + $0xc8] ss:$16 sps:$4 sm:$0xff]  }
  0xba   :  { %1390 = vmatprep.subr.bf16.mxu0 %v14840_v42  ;;  %1453 = vmatprep.subr.bf16.mxu1 %v14843_v43  ;;  %v14913_v31 = vld [vmem:[#allocation6 + $0x320] ss:$16 sps:$4 sm:$0xff]   ;;  %v14918_v32 = vld [vmem:[#allocation6 + $0x104] ss:$16 sps:$4 sm:$0xff]   ;;  %v15679_v40 = vsub.s32 1, %v15676_v39  ;;  %v15682_v41 = vsub.s32 3, %v15676_v39 }
  0xbb   :  { %477 = vmatmul.mubr.bf16.gmra.mxu0 %v14824_v44  ;;  %540 = vmatmul.mubr.bf16.gmra.mxu1 %v14824_v44  ;;  %v14921_v33 = vld [vmem:[#allocation6 + $0x304] ss:$16 sps:$4 sm:$0xff]   ;;  %v14916_v34 = vld [vmem:[#allocation6 + $0x100] ss:$16 sps:$4 sm:$0xff]   ;;  %v15685_v42 = vsub.s32 0, %v15676_v39  ;;  %v15688_v43 = vsub.s32 2, %v15676_v39 }
  0xbc   :  { %486 = vmatprep.mubr.bf16.mxu0 %v15554_v0  ;;  %549 = vmatprep.mubr.bf16.mxu1 %v15554_v0  ;;  %v14870_v0 = vld [vmem:[#allocation6 + $0x4] ss:$16 sps:$4 sm:$0xff]   ;;  %v14919_v35 = vld [vmem:[#allocation6 + $0x300] ss:$16 sps:$4 sm:$0xff]   ;;  %v234_v44 = vld [vmem:[#allocation4] sm:$0xf] }
  0xbd   :  { %1391 = vmatpush1.bf16.msra.mxu0 %v14838_v45  ;;  %1454 = vmatpush1.bf16.msra.mxu1 %v14841_v46 }
  0xbe   :  { %1392 = vmatprep.subr.bf16.mxu0 %v14846_v47  ;;  %1455 = vmatprep.subr.bf16.mxu1 %v14849_v48  ;;  %v15691_v47 = vrot.slane %v234_v44, %v15679_v40  ;;  %v15694_v48 = vrot.slane %v234_v44, %v15682_v41 }
  0xc1   :  { %1393 = vmatpush1.bf16.msra.mxu0 %v14844_v49  ;;  %1456 = vmatpush1.bf16.msra.mxu1 %v14847_v50  ;;  %v15697_v49 = vrot.slane %v234_v44, %v15685_v42  ;;  %v15700_v50 = vrot.slane %v234_v44, %v15688_v43  ;;  %v14931_v44 = vld [vmem:[#allocation6 + $0x2c8] ss:$16 sps:$4 sm:$0xff]  }
  0xc2   :  { %1394 = vmatprep.subr.bf16.mxu0 %v14852_v51  ;;  %1457 = vmatprep.subr.bf16.mxu1 %v14855_v52 }
  0xc3   :  { %487 = vmatmul.mubr.bf16.gmra.mxu0 %v14825_v53  ;;  %550 = vmatmul.mubr.bf16.gmra.mxu1 %v14825_v53 }
  0xc5   :  { %1395 = vmatpush1.bf16.msra.mxu0 %v14850_v54  ;;  %1458 = vmatpush1.bf16.msra.mxu1 %v14853_v55 }
  0xc6   :  { %1396 = vmatprep.subr.bf16.mxu0 %v14858_v56  ;;  %1459 = vmatprep.subr.bf16.mxu1 %v14861_v57 }
  0xc9   :  { %1397 = vmatpush1.bf16.msra.mxu0 %v14856_v58  ;;  %1460 = vmatpush1.bf16.msra.mxu1 %v14859_v59 }
  0xca   :  { %1398 = vmatprep.subr.bf16.mxu0 %v14864_v60  ;;  %1461 = vmatprep.subr.bf16.mxu1 %v14867_v61 }
  0xcd   :  { %1399 = vmatpush1.bf16.msra.mxu0 %v14862_v62  ;;  %1462 = vmatpush1.bf16.msra.mxu1 %v14865_v63 }
  0xce   :  { %1400 = vmatprep.subr.bf16.mxu0 %v14870_v0  ;;  %1463 = vmatprep.subr.bf16.mxu1 %v14873_v1 }
  0xd1   :  { %1401 = vmatpush1.bf16.msra.mxu0 %v14868_v2  ;;  %1464 = vmatpush1.bf16.msra.mxu1 %v14871_v3 }
  0xd2   :  { %1402 = vmatprep.subr.bf16.mxu0 %v14876_v4  ;;  %1465 = vmatprep.subr.bf16.mxu1 %v14879_v5 }
  0xd5   :  { %1403 = vmatpush2.bf16.msra.mxu0 %v14874_v6  ;;  %1466 = vmatpush2.bf16.msra.mxu1 %v14877_v7 }
  0xd6   :  { %1404 = vmatprep.subr.bf16.mxu0 %v14882_v8  ;;  %1467 = vmatprep.subr.bf16.mxu1 %v14885_v9 }
  0xd9   :  { %1405 = vmatpush2.bf16.msra.mxu0 %v14880_v10  ;;  %1468 = vmatpush2.bf16.msra.mxu1 %v14883_v11 }
  0xda   :  { %1406 = vmatprep.subr.bf16.mxu0 %v14888_v12  ;;  %1469 = vmatprep.subr.bf16.mxu1 %v14891_v13 }
  0xdd   :  { %1407 = vmatpush2.bf16.msra.mxu0 %v14886_v14  ;;  %1470 = vmatpush2.bf16.msra.mxu1 %v14889_v15 }
  0xde   :  { %1408 = vmatprep.subr.bf16.mxu0 %v14894_v16  ;;  %1471 = vmatprep.subr.bf16.mxu1 %v14897_v17 }
  0xe1   :  { %1409 = vmatpush2.bf16.msra.mxu0 %v14892_v18  ;;  %1472 = vmatpush2.bf16.msra.mxu1 %v14895_v19  ;;  %v14922_v18 = vld [vmem:[#allocation6 + $0xe8] ss:$16 sps:$4 sm:$0xff]  }
  0xe2   :  { %1410 = vmatprep.subr.bf16.mxu0 %v14900_v20  ;;  %1473 = vmatprep.subr.bf16.mxu1 %v14903_v21  ;;  %v14925_v19 = vld [vmem:[#allocation6 + $0x2e8] ss:$16 sps:$4 sm:$0xff]  }
  0xe5   :  { %1411 = vmatpush2.bf16.msra.mxu0 %v14898_v22  ;;  %1474 = vmatpush2.bf16.msra.mxu1 %v14901_v23 }
  0xe6   :  { %1412 = vmatprep.subr.bf16.mxu0 %v14906_v24  ;;  %1475 = vmatprep.subr.bf16.mxu1 %v14909_v25  ;;  %v14930_v25 = vld [vmem:[#allocation6 + $0xcc] ss:$16 sps:$4 sm:$0xff]  }
  0xe9   :  { %1413 = vmatpush2.bf16.msra.mxu0 %v14904_v26  ;;  %1476 = vmatpush2.bf16.msra.mxu1 %v14907_v27  ;;  %v14933_v26 = vld [vmem:[#allocation6 + $0x2cc] ss:$16 sps:$4 sm:$0xff]  }
  0xea   :  { %1414 = vmatprep.subr.bf16.mxu0 %v14912_v28  ;;  %1477 = vmatprep.subr.bf16.mxu1 %v14915_v29 }
  0xed   :  { %1415 = vmatpush2.bf16.msra.mxu0 %v14910_v30  ;;  %1478 = vmatpush2.bf16.msra.mxu1 %v14913_v31 }
  0xee   :  { %1416 = vmatprep.subr.bf16.mxu0 %v14918_v32  ;;  %1479 = vmatprep.subr.bf16.mxu1 %v14921_v33 }
  0xf1   :  { %1417 = vmatpush2.bf16.msra.mxu0 %v14916_v34  ;;  %1480 = vmatpush2.bf16.msra.mxu1 %v14919_v35 }
  0xf2   :  { %1512 = vmatprep.subr.bf16.mxu0 %v14924_v36  ;;  %1575 = vmatprep.subr.bf16.mxu1 %v14927_v37 }
 0x173   :  { %v468_v45 = vpop.f32.mrf.mxu0  ;;  %v531_v46 = vpop.f32.mrf.mxu1 }
 0x174   :  { %v469_v59 = vadd.f32 %v468_v45, %v15697_v49  ;;  %v532_v60 = vadd.f32 %v531_v46, %v15700_v50 }
 0x175   :  { %v470_v51 = vpop.f32.mrf.mxu0  ;;  %v533_v52 = vpop.f32.mrf.mxu1 }
 0x176   :  { %v471_v55 = vadd.f32 %v470_v51, %v15691_v47  ;;  %v534_v56 = vadd.f32 %v533_v52, %v15694_v48  ;;  %v560_v9 = vmax.f32 %v469_v59, 0.0  ;;  %v562_v10 = vmax.f32 %v532_v60, 0.0  ;;  %v14936_v52 = vld [vmem:[#allocation6 + $0xac] ss:$16 sps:$4 sm:$0xff]  }
 0x177   :  { %v472_v53 = vpop.f32.mrf.mxu0  ;;  %v535_v54 = vpop.f32.mrf.mxu1 }
 0x178   :  { %v473_v57 = vadd.f32 %v472_v53, %v15697_v49  ;;  %v536_v58 = vadd.f32 %v535_v54, %v15700_v50  ;;  %v561_v5 = vmax.f32 %v471_v55, 0.0  ;;  %v563_v6 = vmax.f32 %v534_v56, 0.0  ;;  %v14939_v53 = vld [vmem:[#allocation6 + $0x2ac] ss:$16 sps:$4 sm:$0xff]  }
 0x179   :  { %v474_v61 = vpop.f32.mrf.mxu0  ;;  %v537_v62 = vpop.f32.mrf.mxu1 }
 0x17a   :  { %v475_v63 = vadd.f32 %v474_v61, %v15691_v47  ;;  %v538_v0 = vadd.f32 %v537_v62, %v15694_v48  ;;  %v564_v1 = vmax.f32 %v473_v57, 0.0  ;;  %v566_v2 = vmax.f32 %v536_v58, 0.0 }
 0x17b   :  { %v478_v3 = vpop.f32.mrf.mxu0  ;;  %v541_v4 = vpop.f32.mrf.mxu1 }
 0x17c   :  { %v565_v7 = vmax.f32 %v475_v63, 0.0  ;;  %v567_v8 = vmax.f32 %v538_v0, 0.0  ;;  %v479_v11 = vadd.f32 %v478_v3, %v15697_v49  ;;  %v542_v12 = vadd.f32 %v541_v4, %v15700_v50 }
 0x17d   :  { %v480_v13 = vpop.f32.mrf.mxu0  ;;  %v543_v14 = vpop.f32.mrf.mxu1  ;;  %v15717_v20 = vpack.c.bf16 %v564_v1, %v560_v9  ;;  %v15719_v21 = vpack.c.bf16 %v566_v2, %v562_v10  ;;  %v14934_v1 = vld [vmem:[#allocation6 + $0xa8] ss:$16 sps:$4 sm:$0xff]   ;;  %v14945_v9 = vld [vmem:[#allocation6 + $0x28c] ss:$16 sps:$4 sm:$0xff]  }
 0x17e   :  { %v481_v15 = vadd.f32 %v480_v13, %v15691_v47  ;;  %v15713_v16 = vpack.c.bf16 %v565_v7, %v561_v5  ;;  %v15715_v17 = vpack.c.bf16 %v567_v8, %v563_v6  ;;  %v544_v22 = vadd.f32 %v543_v14, %v15694_v48  ;;  %v14937_v5 = vld [vmem:[#allocation6 + $0x2a8] ss:$16 sps:$4 sm:$0xff]   ;;  %v14942_v6 = vld [vmem:[#allocation6 + $0x8c] ss:$16 sps:$4 sm:$0xff]  }
 0x17f   :  { %v482_v23 = vpop.f32.mrf.mxu0  ;;  %v545_v24 = vpop.f32.mrf.mxu1  ;;  %v568_v29 = vmax.f32 %v479_v11, 0.0  ;;  %v570_v30 = vmax.f32 %v542_v12, 0.0 }
 0x180   :  { %v483_v27 = vadd.f32 %v482_v23, %v15697_v49  ;;  %v546_v28 = vadd.f32 %v545_v24, %v15700_v50  ;;  %1418 = vmatprep.mubr.bf16.mxu0 %v15713_v16  ;;  %1481 = vmatprep.mubr.bf16.mxu1 %v15715_v17  ;;  %v569_v31 = vmax.f32 %v481_v15, 0.0  ;;  %v571_v45 = vmax.f32 %v544_v22, 0.0  ;;  %v14943_v23 = vld [vmem:[#allocation6 + $0x288] ss:$16 sps:$4 sm:$0xff]   ;;  %v14948_v24 = vld [vmem:[#allocation6 + $0x6c] ss:$16 sps:$4 sm:$0xff]  }
 0x181   :  { %v484_v32 = vpop.f32.mrf.mxu0  ;;  %v547_v33 = vpop.f32.mrf.mxu1  ;;  %1419 = vmatmul.mubr.bf16.vlgmr.msra.gmra.mxu0 %v15717_v20  ;;  %1482 = vmatmul.mubr.bf16.vlgmr.msra.gmra.mxu1 %v15719_v21 }
 0x182   :  { %v572_v34 = vmax.f32 %v483_v27, 0.0  ;;  %v574_v35 = vmax.f32 %v546_v28, 0.0  ;;  %v485_v36 = vadd.f32 %v484_v32, %v15691_v47  ;;  %v548_v37 = vadd.f32 %v547_v33, %v15694_v48  ;;  %1513 = vmatpush1.bf16.msra.mxu0 %v14922_v18  ;;  %1576 = vmatpush1.bf16.msra.mxu1 %v14925_v19  ;;  %v14951_v28 = vld [vmem:[#allocation6 + $0x26c] ss:$16 sps:$4 sm:$0xff]  }
 0x183   :  { %v488_v46 = vpop.f32.mrf.mxu0  ;;  %v551_v51 = vpop.f32.mrf.mxu1  ;;  %1514 = vmatprep.subr.bf16.mxu0 %v14930_v25  ;;  %1577 = vmatprep.subr.bf16.mxu1 %v14933_v26  ;;  %v14954_v32 = vld [vmem:[#allocation6 + $0x4c] ss:$16 sps:$4 sm:$0xff]  }
 0x184   :  { %v573_v54 = vmax.f32 %v485_v36, 0.0  ;;  %v575_v55 = vmax.f32 %v548_v37, 0.0  ;;  %v15730_v56 = vpack.c.bf16 %v572_v34, %v568_v29  ;;  %v15732_v57 = vpack.c.bf16 %v574_v35, %v570_v30  ;;  %v14946_v30 = vld [vmem:[#allocation6 + $0x68] ss:$16 sps:$4 sm:$0xff]   ;;  %v14957_v33 = vld [vmem:[#allocation6 + $0x24c] ss:$16 sps:$4 sm:$0xff]  }
 0x185   :  { %v489_v58 = vadd.f32 %v488_v46, %v15697_v49  ;;  %v552_v59 = vadd.f32 %v551_v51, %v15700_v50  ;;  %v490_v60 = vpop.f32.mrf.mxu0  ;;  %v553_v61 = vpop.f32.mrf.mxu1  ;;  %v14952_v34 = vld [vmem:[#allocation6 + $0x48] ss:$16 sps:$4 sm:$0xff]   ;;  %v14960_v36 = vld [vmem:[#allocation6 + $0x2c] ss:$16 sps:$4 sm:$0xff]  }
 0x186   :  { %v491_v62 = vadd.f32 %v490_v60, %v15691_v47  ;;  %v554_v63 = vadd.f32 %v553_v61, %v15694_v48  ;;  %1515 = vmatpush1.bf16.msra.mxu0 %v14928_v38  ;;  %1578 = vmatpush1.bf16.msra.mxu1 %v14931_v44  ;;  %v15738_v0 = vpack.c.bf16 %v573_v54, %v569_v31  ;;  %v14949_v31 = vld [vmem:[#allocation6 + $0x268] ss:$16 sps:$4 sm:$0xff]   ;;  %v14963_v37 = vld [vmem:[#allocation6 + $0x22c] ss:$16 sps:$4 sm:$0xff]  }
 0x187   :  { %v492_v2 = vpop.f32.mrf.mxu0  ;;  %v555_v3 = vpop.f32.mrf.mxu1  ;;  %v15740_v4 = vpack.c.bf16 %v575_v55, %v571_v45  ;;  %1516 = vmatprep.subr.bf16.mxu0 %v14936_v52  ;;  %1579 = vmatprep.subr.bf16.mxu1 %v14939_v53  ;;  %v576_v10 = vmax.f32 %v489_v58, 0.0  ;;  %v578_v11 = vmax.f32 %v552_v59, 0.0  ;;  %v14955_v35 = vld [vmem:[#allocation6 + $0x248] ss:$16 sps:$4 sm:$0xff]   ;;  %v14966_v45 = vld [vmem:[#allocation6 + $0xc] ss:$16 sps:$4 sm:$0xff]  }
 0x188   :  { %v493_v7 = vadd.f32 %v492_v2, %v15697_v49  ;;  %v556_v8 = vadd.f32 %v555_v3, %v15700_v50  ;;  %1428 = vmatprep.mubr.bf16.mxu0 %v15738_v0  ;;  %v577_v12 = vmax.f32 %v491_v62, 0.0  ;;  %v579_v13 = vmax.f32 %v554_v63, 0.0  ;;  %v14940_v50 = vld [vmem:[#allocation6 + $0x88] ss:$16 sps:$4 sm:$0xff]   ;;  %v14969_v46 = vld [vmem:[#allocation6 + $0x20c] ss:$16 sps:$4 sm:$0xff]  }
 0x189   :  { %1491 = vmatprep.mubr.bf16.mxu1 %v15740_v4  ;;  %v494_v14 = vpop.f32.mrf.mxu0  ;;  %v557_v15 = vpop.f32.mrf.mxu1  ;;  %1429 = vmatmul.mubr.bf16.gmra.mxu0 %v15730_v56  ;;  %v14958_v38 = vld [vmem:[#allocation6 + $0x28] ss:$16 sps:$4 sm:$0xff]   ;;  %v14972_v52 = vld [vmem:[#allocation6 + $0x1ec] ss:$16 sps:$4 sm:$0xff]  }
 0x18a   :  { %v580_v18 = vmax.f32 %v493_v7, 0.0  ;;  %v582_v19 = vmax.f32 %v556_v8, 0.0  ;;  %v495_v22 = vadd.f32 %v494_v14, %v15691_v47  ;;  %v558_v49 = vadd.f32 %v557_v15, %v15694_v48  ;;  %1492 = vmatmul.mubr.bf16.gmra.mxu1 %v15732_v57  ;;  %1517 = vmatpush1.bf16.msra.mxu0 %v14934_v1  ;;  %v14961_v44 = vld [vmem:[#allocation6 + $0x228] ss:$16 sps:$4 sm:$0xff]   ;;  %v14975_v53 = vld [vmem:[#allocation6 + $0x3ec] ss:$16 sps:$4 sm:$0xff]  }
 0x18b   :  { %1580 = vmatpush1.bf16.msra.mxu1 %v14937_v5  ;;  %1518 = vmatprep.subr.bf16.mxu0 %v14942_v6  ;;  %v14964_v51 = vld [vmem:[#allocation6 + $0x8] ss:$16 sps:$4 sm:$0xff]   ;;  %v14978_v55 = vld [vmem:[#allocation6 + $0x1cc] ss:$16 sps:$4 sm:$0xff]  }
 0x18c   :  { %v581_v25 = vmax.f32 %v495_v22, 0.0  ;;  %v583_v26 = vmax.f32 %v558_v49, 0.0  ;;  %1581 = vmatprep.subr.bf16.mxu1 %v14945_v9  ;;  %v15750_v27 = vpack.c.bf16 %v580_v18, %v576_v10  ;;  %v15752_v29 = vpack.c.bf16 %v582_v19, %v578_v11  ;;  %v14973_v54 = vld [vmem:[#allocation6 + $0x3e8] ss:$16 sps:$4 sm:$0xff]   ;;  %v14981_v58 = vld [vmem:[#allocation6 + $0x3cc] ss:$16 sps:$4 sm:$0xff]  }
 0x18d   :  { %v14976_v59 = vld [vmem:[#allocation6 + $0x1c8] ss:$16 sps:$4 sm:$0xff]   ;;  %v14984_v61 = vld [vmem:[#allocation6 + $0x1ac] ss:$16 sps:$4 sm:$0xff]  }
 0x18e   :  { %1519 = vmatpush1.bf16.msra.mxu0 %v14940_v50  ;;  %v15754_v47 = vpack.c.bf16 %v581_v25, %v577_v12  ;;  %v15756_v48 = vpack.c.bf16 %v583_v26, %v579_v13  ;;  %v14979_v60 = vld [vmem:[#allocation6 + $0x3c8] ss:$16 sps:$4 sm:$0xff]   ;;  %v14987_v62 = vld [vmem:[#allocation6 + $0x3ac] ss:$16 sps:$4 sm:$0xff]   ;;  %v15018_v26 = vld [vmem:[#allocation9 + $0xe0] ss:$16 sps:$4 sm:$0xff]  }
 0x18f   :  { %1582 = vmatpush1.bf16.msra.mxu1 %v14943_v23  ;;  %1520 = vmatprep.subr.bf16.mxu0 %v14948_v24  ;;  %v14982_v63 = vld [vmem:[#allocation6 + $0x1a8] ss:$16 sps:$4 sm:$0xff]   ;;  %v14990_v2 = vld [vmem:[#allocation6 + $0x18c] ss:$16 sps:$4 sm:$0xff]  }
 0x190   :  { %1438 = vmatprep.mubr.bf16.mxu0 %v15754_v47  ;;  %1501 = vmatprep.mubr.bf16.mxu1 %v15756_v48  ;;  %v14985_v1 = vld [vmem:[#allocation6 + $0x3a8] ss:$16 sps:$4 sm:$0xff]   ;;  %v14993_v3 = vld [vmem:[#allocation6 + $0x38c] ss:$16 sps:$4 sm:$0xff]  }
 0x191   :  { %1583 = vmatprep.subr.bf16.mxu1 %v14951_v28  ;;  %1439 = vmatmul.mubr.bf16.gmra.mxu0 %v15750_v27  ;;  %v14988_v5 = vld [vmem:[#allocation6 + $0x188] ss:$16 sps:$4 sm:$0xff]   ;;  %v14996_v7 = vld [vmem:[#allocation6 + $0x16c] ss:$16 sps:$4 sm:$0xff]  }
 0x192   :  { %1502 = vmatmul.mubr.bf16.gmra.mxu1 %v15752_v29  ;;  %1521 = vmatpush1.bf16.msra.mxu0 %v14946_v30  ;;  %v14991_v6 = vld [vmem:[#allocation6 + $0x388] ss:$16 sps:$4 sm:$0xff]   ;;  %v14999_v8 = vld [vmem:[#allocation6 + $0x36c] ss:$16 sps:$4 sm:$0xff]   ;;  %v15021_v30 = vld [vmem:[#allocation9 + $0xc0] ss:$16 sps:$4 sm:$0xff]  }
 0x193   :  { %1584 = vmatpush1.bf16.msra.mxu1 %v14949_v31  ;;  %1544 = vmatprep.mubr.bf16.mxu0 %v15713_v16  ;;  %v14967_v16 = vld [vmem:[#allocation6 + $0x208] ss:$16 sps:$4 sm:$0xff]   ;;  %v15002_v11 = vld [vmem:[#allocation6 + $0x14c] ss:$16 sps:$4 sm:$0xff]  }
 0x194   :  { %1607 = vmatprep.mubr.bf16.mxu1 %v15715_v17  ;;  %1522 = vmatprep.subr.bf16.mxu0 %v14954_v32  ;;  %v14970_v17 = vld [vmem:[#allocation6 + $0x1e8] ss:$16 sps:$4 sm:$0xff]   ;;  %v15005_v12 = vld [vmem:[#allocation6 + $0x34c] ss:$16 sps:$4 sm:$0xff]   ;;  %v15024_v32 = vld [vmem:[#allocation9 + $0xa0] ss:$16 sps:$4 sm:$0xff]  }
 0x195   :  { %1585 = vmatprep.subr.bf16.mxu1 %v14957_v33  ;;  %v14994_v9 = vld [vmem:[#allocation6 + $0x168] ss:$16 sps:$4 sm:$0xff]   ;;  %v15008_v15 = vld [vmem:[#allocation6 + $0x12c] ss:$16 sps:$4 sm:$0xff]  }
 0x196   :  { %1523 = vmatpush1.bf16.msra.mxu0 %v14952_v34  ;;  %v14997_v10 = vld [vmem:[#allocation6 + $0x368] ss:$16 sps:$4 sm:$0xff]   ;;  %v15011_v18 = vld [vmem:[#allocation6 + $0x32c] ss:$16 sps:$4 sm:$0xff]  }
 0x197   :  { %1586 = vmatpush1.bf16.msra.mxu1 %v14955_v35  ;;  %1524 = vmatprep.subr.bf16.mxu0 %v14960_v36  ;;  %v15000_v13 = vld [vmem:[#allocation6 + $0x148] ss:$16 sps:$4 sm:$0xff]   ;;  %v15014_v49 = vld [vmem:[#allocation6 + $0x10c] ss:$16 sps:$4 sm:$0xff]   ;;  %v15066_v35 = vld [vmem:[#allocation9 + $0x2e0] ss:$16 sps:$4 sm:$0xff]  }
 0x198   :  { %1587 = vmatprep.subr.bf16.mxu1 %v14963_v37  ;;  %v15003_v14 = vld [vmem:[#allocation6 + $0x348] ss:$16 sps:$4 sm:$0xff]   ;;  %v15017_v50 = vld [vmem:[#allocation6 + $0x30c] ss:$16 sps:$4 sm:$0xff]   ;;  %v15036_v36 = vld [vmem:[#allocation9 + $0x20] ss:$16 sps:$4 sm:$0xff]  }
 0x199   :  { %v15006_v19 = vld [vmem:[#allocation6 + $0x128] ss:$16 sps:$4 sm:$0xff]  }
 0x19a   :  { %1525 = vmatpush1.bf16.msra.mxu0 %v14958_v38  ;;  %v15009_v22 = vld [vmem:[#allocation6 + $0x328] ss:$16 sps:$4 sm:$0xff]  }
 0x19b   :  { %1588 = vmatpush1.bf16.msra.mxu1 %v14961_v44  ;;  %1526 = vmatprep.subr.bf16.mxu0 %v14966_v45  ;;  %v15012_v23 = vld [vmem:[#allocation6 + $0x108] ss:$16 sps:$4 sm:$0xff]   ;;  %v15078_v44 = vld [vmem:[#allocation9 + $0x2a0] ss:$16 sps:$4 sm:$0xff]  }
 0x19c   :  { %1589 = vmatprep.subr.bf16.mxu1 %v14969_v46  ;;  %v15015_v24 = vld [vmem:[#allocation6 + $0x308] ss:$16 sps:$4 sm:$0xff]   ;;  %v15084_v46 = vld [vmem:[#allocation9 + $0x280] ss:$16 sps:$4 sm:$0xff]  }
 0x19d   :  { %v15020_v25 = vld [vmem:[#allocation9 + $0xe4] ss:$16 sps:$4 sm:$0xff]  }
 0x19e   :  { %1527 = vmatpush1.bf16.msra.mxu0 %v14964_v51  ;;  %v15023_v28 = vld [vmem:[#allocation9 + $0xc4] ss:$16 sps:$4 sm:$0xff]  }
 0x19f   :  { %1590 = vmatpush1.bf16.msra.mxu1 %v14967_v16  ;;  %1528 = vmatprep.subr.bf16.mxu0 %v14972_v52  ;;  %v15026_v31 = vld [vmem:[#allocation9 + $0xa4] ss:$16 sps:$4 sm:$0xff]   ;;  %v15042_v16 = vld [vmem:[#allocation9 + $0x1e0] ss:$16 sps:$4 sm:$0xff]  }
 0x1a0   :  { %1591 = vmatprep.subr.bf16.mxu1 %v14975_v53  ;;  %v15029_v33 = vld [vmem:[#allocation9 + $0x84] ss:$16 sps:$4 sm:$0xff]   ;;  %v15090_v52 = vld [vmem:[#allocation9 + $0x260] ss:$16 sps:$4 sm:$0xff]  }
 0x1a1   :  { %v15035_v34 = vld [vmem:[#allocation9 + $0x44] ss:$16 sps:$4 sm:$0xff]  }
 0x1a2   :  { %1529 = vmatpush2.bf16.msra.mxu0 %v14970_v17  ;;  %v15080_v37 = vld [vmem:[#allocation9 + $0x2a4] ss:$16 sps:$4 sm:$0xff]  }
 0x1a3   :  { %1592 = vmatpush2.bf16.msra.mxu1 %v14973_v54  ;;  %1530 = vmatprep.subr.bf16.mxu0 %v14978_v55  ;;  %v15041_v38 = vld [vmem:[#allocation9 + $0x4] ss:$16 sps:$4 sm:$0xff]   ;;  %v15045_v54 = vld [vmem:[#allocation9 + $0x1c0] ss:$16 sps:$4 sm:$0xff]  }
 0x1a4   :  { %1593 = vmatprep.subr.bf16.mxu1 %v14981_v58  ;;  %v15044_v45 = vld [vmem:[#allocation9 + $0x1e4] ss:$16 sps:$4 sm:$0xff]   ;;  %v15096_v55 = vld [vmem:[#allocation9 + $0x240] ss:$16 sps:$4 sm:$0xff]  }
 0x1a5   :  { %v15092_v51 = vld [vmem:[#allocation9 + $0x264] ss:$16 sps:$4 sm:$0xff]  }
 0x1a6   :  { %1531 = vmatpush2.bf16.msra.mxu0 %v14976_v59  ;;  %v15047_v53 = vld [vmem:[#allocation9 + $0x1c4] ss:$16 sps:$4 sm:$0xff]  }
 0x1a7   :  { %1594 = vmatpush2.bf16.msra.mxu1 %v14979_v60  ;;  %1532 = vmatprep.subr.bf16.mxu0 %v14984_v61  ;;  %v15098_v17 = vld [vmem:[#allocation9 + $0x244] ss:$16 sps:$4 sm:$0xff]   ;;  %v15048_v60 = vld [vmem:[#allocation9 + $0x1a0] ss:$16 sps:$4 sm:$0xff]  }
 0x1a8   :  { %1595 = vmatprep.subr.bf16.mxu1 %v14987_v62  ;;  %v15050_v58 = vld [vmem:[#allocation9 + $0x1a4] ss:$16 sps:$4 sm:$0xff]   ;;  %v15102_v61 = vld [vmem:[#allocation9 + $0x220] ss:$16 sps:$4 sm:$0xff]  }
 0x1a9   :  { %v15104_v59 = vld [vmem:[#allocation9 + $0x224] ss:$16 sps:$4 sm:$0xff]  }
 0x1aa   :  { %1533 = vmatpush2.bf16.msra.mxu0 %v14982_v63  ;;  %v15053_v62 = vld [vmem:[#allocation9 + $0x184] ss:$16 sps:$4 sm:$0xff]  }
 0x1ab   :  { %1596 = vmatpush2.bf16.msra.mxu1 %v14985_v1  ;;  %1534 = vmatprep.subr.bf16.mxu0 %v14990_v2  ;;  %v15110_v63 = vld [vmem:[#allocation9 + $0x204] ss:$16 sps:$4 sm:$0xff]   ;;  %v15051_v1 = vld [vmem:[#allocation9 + $0x180] ss:$16 sps:$4 sm:$0xff]  }
 0x1ac   :  { %1597 = vmatprep.subr.bf16.mxu1 %v14993_v3  ;;  %v15108_v2 = vld [vmem:[#allocation9 + $0x200] ss:$16 sps:$4 sm:$0xff]   ;;  %v15056_v3 = vld [vmem:[#allocation9 + $0x164] ss:$16 sps:$4 sm:$0xff]  }
 0x1ae   :  { %1535 = vmatpush2.bf16.msra.mxu0 %v14988_v5  ;;  %v15116_v5 = vld [vmem:[#allocation9 + $0x3e4] ss:$16 sps:$4 sm:$0xff]  }
 0x1af   :  { %1598 = vmatpush2.bf16.msra.mxu1 %v14991_v6  ;;  %1536 = vmatprep.subr.bf16.mxu0 %v14996_v7  ;;  %v15054_v6 = vld [vmem:[#allocation9 + $0x160] ss:$16 sps:$4 sm:$0xff]  }
 0x1b0   :  { %1599 = vmatprep.subr.bf16.mxu1 %v14999_v8  ;;  %v15114_v7 = vld [vmem:[#allocation9 + $0x3e0] ss:$16 sps:$4 sm:$0xff]   ;;  %v15059_v8 = vld [vmem:[#allocation9 + $0x144] ss:$16 sps:$4 sm:$0xff]  }
 0x1b2   :  { %1537 = vmatpush2.bf16.msra.mxu0 %v14994_v9  ;;  %v15122_v9 = vld [vmem:[#allocation9 + $0x3c4] ss:$16 sps:$4 sm:$0xff]  }
 0x1b3   :  { %1600 = vmatpush2.bf16.msra.mxu1 %v14997_v10  ;;  %1538 = vmatprep.subr.bf16.mxu0 %v15002_v11  ;;  %v15057_v10 = vld [vmem:[#allocation9 + $0x140] ss:$16 sps:$4 sm:$0xff]  }
 0x1b4   :  { %1601 = vmatprep.subr.bf16.mxu1 %v15005_v12  ;;  %v15120_v11 = vld [vmem:[#allocation9 + $0x3c0] ss:$16 sps:$4 sm:$0xff]   ;;  %v15062_v12 = vld [vmem:[#allocation9 + $0x124] ss:$16 sps:$4 sm:$0xff]  }
 0x1b6   :  { %1539 = vmatpush2.bf16.msra.mxu0 %v15000_v13  ;;  %v15128_v13 = vld [vmem:[#allocation9 + $0x3a4] ss:$16 sps:$4 sm:$0xff]  }
 0x1b7   :  { %1602 = vmatpush2.bf16.msra.mxu1 %v15003_v14  ;;  %1540 = vmatprep.subr.bf16.mxu0 %v15008_v15  ;;  %v15060_v14 = vld [vmem:[#allocation9 + $0x120] ss:$16 sps:$4 sm:$0xff]  }
 0x1b8   :  { %1603 = vmatprep.subr.bf16.mxu1 %v15011_v18  ;;  %v15126_v15 = vld [vmem:[#allocation9 + $0x3a0] ss:$16 sps:$4 sm:$0xff]   ;;  %v15065_v18 = vld [vmem:[#allocation9 + $0x104] ss:$16 sps:$4 sm:$0xff]  }
 0x1ba   :  { %1541 = vmatpush2.bf16.msra.mxu0 %v15006_v19  ;;  %v15134_v19 = vld [vmem:[#allocation9 + $0x384] ss:$16 sps:$4 sm:$0xff]  }
 0x1bb   :  { %1604 = vmatpush2.bf16.msra.mxu1 %v15009_v22  ;;  %1542 = vmatprep.subr.bf16.mxu0 %v15014_v49  ;;  %v15063_v22 = vld [vmem:[#allocation9 + $0x100] ss:$16 sps:$4 sm:$0xff]  }
 0x1bc   :  { %1605 = vmatprep.subr.bf16.mxu1 %v15017_v50  ;;  %v15132_v49 = vld [vmem:[#allocation9 + $0x380] ss:$16 sps:$4 sm:$0xff]   ;;  %v15071_v50 = vld [vmem:[#allocation9 + $0xec] ss:$16 sps:$4 sm:$0xff]  }
 0x1be   :  { %1543 = vmatpush2.bf16.msra.mxu0 %v15012_v23  ;;  %v15140_v23 = vld [vmem:[#allocation9 + $0x364] ss:$16 sps:$4 sm:$0xff]  }
 0x1bf   :  { %1606 = vmatpush2.bf16.msra.mxu1 %v15015_v24  ;;  %2464 = vmatprep.subr.bf16.mxu0 %v15020_v25  ;;  %v15138_v24 = vld [vmem:[#allocation9 + $0x360] ss:$16 sps:$4 sm:$0xff]   ;;  %v15146_v25 = vld [vmem:[#allocation9 + $0x344] ss:$16 sps:$4 sm:$0xff]  }
 0x1c1   :  { %1545 = vmatmul.mubr.bf16.vlgmr.msra.gmra.mxu0 %v15717_v20  ;;  %v15027_v20 = vld [vmem:[#allocation9 + $0x80] ss:$16 sps:$4 sm:$0xff]  }
 0x1c2   :  { %1608 = vmatmul.mubr.bf16.vlgmr.msra.gmra.mxu1 %v15719_v21  ;;  %1554 = vmatprep.mubr.bf16.mxu0 %v15738_v0  ;;  %v15032_v21 = vld [vmem:[#allocation9 + $0x64] ss:$16 sps:$4 sm:$0xff]   ;;  %v15030_v0 = vld [vmem:[#allocation9 + $0x60] ss:$16 sps:$4 sm:$0xff]  }
 0x1c3   :  { %1617 = vmatprep.mubr.bf16.mxu1 %v15740_v4  ;;  %2465 = vmatpush1.bf16.msra.mxu0 %v15018_v26  ;;  %v15068_v4 = vld [vmem:[#allocation9 + $0x2e4] ss:$16 sps:$4 sm:$0xff]   ;;  %v15144_v26 = vld [vmem:[#allocation9 + $0x340] ss:$16 sps:$4 sm:$0xff]  }
 0x1c4   :  { %2466 = vmatprep.subr.bf16.mxu0 %v15023_v28  ;;  %2527 = vmatprep.subr.bf16.mxu1 %v15068_v4  ;;  %v15152_v28 = vld [vmem:[#allocation9 + $0x324] ss:$16 sps:$4 sm:$0xff]  }
 0x1c5   :  { %2528 = vmatpush1.bf16.msra.mxu1 %v15066_v35 }
 0x1c7   :  { %2467 = vmatpush1.bf16.msra.mxu0 %v15021_v30  ;;  %v15150_v30 = vld [vmem:[#allocation9 + $0x320] ss:$16 sps:$4 sm:$0xff]  }
 0x1c8   :  { %2468 = vmatprep.subr.bf16.mxu0 %v15026_v31  ;;  %v15158_v31 = vld [vmem:[#allocation9 + $0x304] ss:$16 sps:$4 sm:$0xff]  }
 0x1c9   :  { %1555 = vmatmul.mubr.bf16.gmra.mxu0 %v15730_v56  ;;  %v15033_v56 = vld [vmem:[#allocation9 + $0x40] ss:$16 sps:$4 sm:$0xff]  }
 0x1ca   :  { %1618 = vmatmul.mubr.bf16.gmra.mxu1 %v15732_v57  ;;  %1564 = vmatprep.mubr.bf16.mxu0 %v15754_v47  ;;  %v15074_v57 = vld [vmem:[#allocation9 + $0x2c4] ss:$16 sps:$4 sm:$0xff]  }
 0x1cb   :  { %1627 = vmatprep.mubr.bf16.mxu1 %v15756_v48  ;;  %2469 = vmatpush1.bf16.msra.mxu0 %v15024_v32  ;;  %v15038_v47 = vld [vmem:[#allocation9 + $0x24] ss:$16 sps:$4 sm:$0xff]   ;;  %v15072_v48 = vld [vmem:[#allocation9 + $0x2c0] ss:$16 sps:$4 sm:$0xff]  }
 0x1cc   :  { %2470 = vmatprep.subr.bf16.mxu0 %v15029_v33  ;;  %2529 = vmatprep.subr.bf16.mxu1 %v15074_v57  ;;  %v15156_v32 = vld [vmem:[#allocation9 + $0x300] ss:$16 sps:$4 sm:$0xff]   ;;  %v15164_v33 = vld [vmem:[#allocation9 + $0x2ec] ss:$16 sps:$4 sm:$0xff]  }
 0x1cd   :  { %2530 = vmatpush1.bf16.msra.mxu1 %v15072_v48 }
 0x1ce   :  { %2531 = vmatprep.subr.bf16.mxu1 %v15080_v37 }
 0x1cf   :  { %2471 = vmatpush1.bf16.msra.mxu0 %v15027_v20  ;;  %v15774_v20 = vld [vmem:[#allocation7] sm:$0xf] }
 0x1d0   :  { %2472 = vmatprep.subr.bf16.mxu0 %v15032_v21  ;;  %v15778_v21 = vrot.slane %v15774_v20, %v15679_v40 }
 0x1d1   :  { %1565 = vmatmul.mubr.bf16.gmra.mxu0 %v15750_v27  ;;  %v15039_v27 = vld [vmem:[#allocation9] ss:$16 sps:$4 sm:$0xff]   ;;  %2532 = vmatpush1.bf16.msra.mxu1 %v15078_v44 }
 0x1d2   :  { %1628 = vmatmul.mubr.bf16.gmra.mxu1 %v15752_v29  ;;  %v15086_v29 = vld [vmem:[#allocation9 + $0x284] ss:$16 sps:$4 sm:$0xff]  }
 0x1d3   :  { %2473 = vmatpush1.bf16.msra.mxu0 %v15030_v0  ;;  %2533 = vmatprep.subr.bf16.mxu1 %v15086_v29  ;;  %v729_v0 = vrot.slane %v15774_v20, %v15685_v42 }
 0x1d4   :  { %2474 = vmatprep.subr.bf16.mxu0 %v15035_v34 }
 0x1d5   :  { %2534 = vmatpush1.bf16.msra.mxu1 %v15084_v46 }
 0x1d6   :  { %2535 = vmatprep.subr.bf16.mxu1 %v15092_v51 }
 0x1d7   :  { %2475 = vmatpush1.bf16.msra.mxu0 %v15033_v56 }
 0x1d8   :  { %2476 = vmatprep.subr.bf16.mxu0 %v15038_v47 }
 0x1d9   :  { %2536 = vmatpush1.bf16.msra.mxu1 %v15090_v52 }
 0x1da   :  { %2537 = vmatprep.subr.bf16.mxu1 %v15098_v17 }
 0x1db   :  { %2477 = vmatpush1.bf16.msra.mxu0 %v15036_v36 }
 0x1dc   :  { %2478 = vmatprep.subr.bf16.mxu0 %v15041_v38 }
 0x1dd   :  { %2538 = vmatpush1.bf16.msra.mxu1 %v15096_v55 }
 0x1de   :  { %2539 = vmatprep.subr.bf16.mxu1 %v15104_v59 }
 0x1df   :  { %2479 = vmatpush1.bf16.msra.mxu0 %v15039_v27 }
 0x1e0   :  { %2480 = vmatprep.subr.bf16.mxu0 %v15044_v45 }
 0x1e1   :  { %2540 = vmatpush1.bf16.msra.mxu1 %v15102_v61 }
 0x1e2   :  { %2541 = vmatprep.subr.bf16.mxu1 %v15110_v63 }
 0x1e3   :  { %2481 = vmatpush2.bf16.msra.mxu0 %v15042_v16 }
 0x1e4   :  { %2482 = vmatprep.subr.bf16.mxu0 %v15047_v53 }
 0x1e5   :  { %2542 = vmatpush1.bf16.msra.mxu1 %v15108_v2 }
 0x1e6   :  { %2543 = vmatprep.subr.bf16.mxu1 %v15116_v5 }
 0x1e7   :  { %2483 = vmatpush2.bf16.msra.mxu0 %v15045_v54 }
 0x1e8   :  { %2484 = vmatprep.subr.bf16.mxu0 %v15050_v58 }
 0x1e9   :  { %2544 = vmatpush2.bf16.msra.mxu1 %v15114_v7 }
 0x1ea   :  { %2545 = vmatprep.subr.bf16.mxu1 %v15122_v9  ;;  %v15077_v9 = vld [vmem:[#allocation9 + $0xcc] ss:$16 sps:$4 sm:$0xff]  }
 0x1eb   :  { %2485 = vmatpush2.bf16.msra.mxu0 %v15048_v60 }
 0x1ec   :  { %2486 = vmatprep.subr.bf16.mxu0 %v15053_v62 }
 0x1ed   :  { %2546 = vmatpush2.bf16.msra.mxu1 %v15120_v11 }
 0x1ee   :  { %2547 = vmatprep.subr.bf16.mxu1 %v15128_v13 }
 0x1ef   :  { %2487 = vmatpush2.bf16.msra.mxu0 %v15051_v1 }
 0x1f0   :  { %2488 = vmatprep.subr.bf16.mxu0 %v15056_v3 }
 0x1f1   :  { %2548 = vmatpush2.bf16.msra.mxu1 %v15126_v15 }
 0x1f2   :  { %2549 = vmatprep.subr.bf16.mxu1 %v15134_v19 }
 0x1f3   :  { %2489 = vmatpush2.bf16.msra.mxu0 %v15054_v6  ;;  %v15069_v6 = vld [vmem:[#allocation9 + $0xe8] ss:$16 sps:$4 sm:$0xff]  }
 0x1f4   :  { %2490 = vmatprep.subr.bf16.mxu0 %v15059_v8 }
 0x1f5   :  { %2550 = vmatpush2.bf16.msra.mxu1 %v15132_v49 }
 0x1f6   :  { %2551 = vmatprep.subr.bf16.mxu1 %v15140_v23 }
 0x1f7   :  { %2491 = vmatpush2.bf16.msra.mxu0 %v15057_v10 }
 0x1f8   :  { %2492 = vmatprep.subr.bf16.mxu0 %v15062_v12 }
 0x1f9   :  { %2552 = vmatpush2.bf16.msra.mxu1 %v15138_v24  ;;  %v15083_v24 = vld [vmem:[#allocation9 + $0xac] ss:$16 sps:$4 sm:$0xff]  }
 0x1fa   :  { %2553 = vmatprep.subr.bf16.mxu1 %v15146_v25 }
 0x1fb   :  { %2493 = vmatpush2.bf16.msra.mxu0 %v15060_v14 }
 0x1fc   :  { %2494 = vmatprep.subr.bf16.mxu0 %v15065_v18 }
 0x1fd   :  { %2554 = vmatpush2.bf16.msra.mxu1 %v15144_v26 }
 0x1fe   :  { %2555 = vmatprep.subr.bf16.mxu1 %v15152_v28 }
 0x1ff   :  { %2495 = vmatpush2.bf16.msra.mxu0 %v15063_v22 }
 0x200   :  { %2590 = vmatprep.subr.bf16.mxu0 %v15071_v50  ;;  %v15075_v50 = vld [vmem:[#allocation9 + $0xc8] ss:$16 sps:$4 sm:$0xff]  }
 0x201   :  { %2556 = vmatpush2.bf16.msra.mxu1 %v15150_v30 }
 0x202   :  { %2557 = vmatprep.subr.bf16.mxu1 %v15158_v31 }
 0x205   :  { %2558 = vmatpush2.bf16.msra.mxu1 %v15156_v32 }
 0x206   :  { %2653 = vmatprep.subr.bf16.mxu1 %v15164_v33 }
 0x241   :  { %v1420_v4 = vpop.f32.mrf.mxu0  ;;  %v1483_v34 = vpop.f32.mrf.mxu1 }
 0x242   :  { %v1421_v47 = vadd.f32 %v1420_v4, %v729_v0 }
 0x243   :  { %v1422_v35 = vpop.f32.mrf.mxu0  ;;  %v1485_v56 = vpop.f32.mrf.mxu1 }
 0x244   :  { %v1423_v57 = vadd.f32 %v1422_v35, %v15778_v21  ;;  %v1484_v46 = vadd.f32 %v1483_v34, %v1421_v47  ;;  %v15089_v47 = vld [vmem:[#allocation9 + $0x8c] ss:$16 sps:$4 sm:$0xff]  }
 0x245   :  { %v1424_v48 = vpop.f32.mrf.mxu0  ;;  %v1487_v36 = vpop.f32.mrf.mxu1 }
 0x246   :  { %v1425_v37 = vadd.f32 %v1424_v48, %v729_v0  ;;  %v1486_v44 = vadd.f32 %v1485_v56, %v1423_v57  ;;  %v1638_v61 = vmax.f32 %v1484_v46, 0.0  ;;  %v15081_v56 = vld [vmem:[#allocation9 + $0xa8] ss:$16 sps:$4 sm:$0xff]  }
 0x247   :  { %v1426_v38 = vpop.f32.mrf.mxu0  ;;  %v1489_v45 = vpop.f32.mrf.mxu1 }
 0x248   :  { %v1488_v27 = vadd.f32 %v1487_v36, %v1425_v37  ;;  %v1427_v29 = vadd.f32 %v1426_v38, %v15778_v21  ;;  %v1639_v55 = vmax.f32 %v1486_v44, 0.0 }
 0x249   :  { %v1430_v51 = vpop.f32.mrf.mxu0 }
 0x24a   :  { %v1490_v16 = vadd.f32 %v1489_v45, %v1427_v29  ;;  %v1431_v52 = vadd.f32 %v1430_v51, %v729_v0  ;;  %v1493_v53 = vpop.f32.mrf.mxu1  ;;  %v1642_v17 = vmax.f32 %v1488_v27, 0.0  ;;  %v15087_v29 = vld [vmem:[#allocation9 + $0x88] ss:$16 sps:$4 sm:$0xff]   ;;  %v15095_v45 = vld [vmem:[#allocation9 + $0x6c] ss:$16 sps:$4 sm:$0xff]  }
 0x24b   :  { %v1432_v54 = vpop.f32.mrf.mxu0 }
 0x24c   :  { %v1643_v58 = vmax.f32 %v1490_v16, 0.0  ;;  %v1433_v59 = vadd.f32 %v1432_v54, %v15778_v21  ;;  %v1495_v60 = vpop.f32.mrf.mxu1  ;;  %v1494_v62 = vadd.f32 %v1493_v53, %v1431_v52  ;;  %v15785_v7 = vpack.c.bf16 %v1642_v17, %v1638_v61  ;;  %v15101_v52 = vld [vmem:[#allocation9 + $0x4c] ss:$16 sps:$4 sm:$0xff]   ;;  %v15099_v53 = vld [vmem:[#allocation9 + $0x48] ss:$16 sps:$4 sm:$0xff]  }
 0x24d   :  { %v1434_v63 = vpop.f32.mrf.mxu0  ;;  %v15107_v17 = vld [vmem:[#allocation9 + $0x2c] ss:$16 sps:$4 sm:$0xff]   ;;  %v15105_v54 = vld [vmem:[#allocation9 + $0x28] ss:$16 sps:$4 sm:$0xff]  }
 0x24e   :  { %v1435_v1 = vadd.f32 %v1434_v63, %v729_v0  ;;  %v1496_v2 = vadd.f32 %v1495_v60, %v1433_v59  ;;  %v1497_v3 = vpop.f32.mrf.mxu1  ;;  %v1663_v5 = vpack.c.bf16 %v1643_v58, %v1639_v55  ;;  %v1646_v13 = vmax.f32 %v1494_v62, 0.0  ;;  %v15113_v55 = vld [vmem:[#allocation9 + $0xc] ss:$16 sps:$4 sm:$0xff]   ;;  %v15111_v58 = vld [vmem:[#allocation9 + $0x8] ss:$16 sps:$4 sm:$0xff]  }
 0x24f   :  { %v1436_v8 = vpop.f32.mrf.mxu0  ;;  %v15119_v59 = vld [vmem:[#allocation9 + $0x1ec] ss:$16 sps:$4 sm:$0xff]   ;;  %v15117_v60 = vld [vmem:[#allocation9 + $0x1e8] ss:$16 sps:$4 sm:$0xff]  }
 0x250   :  { %v1437_v10 = vadd.f32 %v1436_v8, %v15778_v21  ;;  %v1498_v11 = vadd.f32 %v1497_v3, %v1435_v1  ;;  %2496 = vmatprep.mubr.bf16.mxu0 %v1663_v5  ;;  %v1499_v12 = vpop.f32.mrf.mxu1  ;;  %v1647_v15 = vmax.f32 %v1496_v2, 0.0  ;;  %v15125_v61 = vld [vmem:[#allocation9 + $0x1cc] ss:$16 sps:$4 sm:$0xff]   ;;  %v15123_v62 = vld [vmem:[#allocation9 + $0x1c8] ss:$16 sps:$4 sm:$0xff]  }
 0x251   :  { %v1440_v14 = vpop.f32.mrf.mxu0  ;;  %2497 = vmatmul.mubr.bf16.vlgmr.msra.gmra.mxu0 %v15785_v7  ;;  %v15131_v63 = vld [vmem:[#allocation9 + $0x1ac] ss:$16 sps:$4 sm:$0xff]   ;;  %v15129_v1 = vld [vmem:[#allocation9 + $0x1a8] ss:$16 sps:$4 sm:$0xff]  }
 0x252   :  { %v1650_v18 = vmax.f32 %v1498_v11, 0.0  ;;  %v1441_v19 = vadd.f32 %v1440_v14, %v729_v0  ;;  %v1500_v22 = vadd.f32 %v1499_v12, %v1437_v10  ;;  %2591 = vmatpush1.bf16.msra.mxu0 %v15069_v6  ;;  %v1503_v49 = vpop.f32.mrf.mxu1  ;;  %v15137_v2 = vld [vmem:[#allocation9 + $0x18c] ss:$16 sps:$4 sm:$0xff]   ;;  %v15135_v3 = vld [vmem:[#allocation9 + $0x188] ss:$16 sps:$4 sm:$0xff]   ;;  %v15809_v10 = vrot.slane %v15774_v20, %v15688_v43 }
 0x253   :  { %v1442_v23 = vpop.f32.mrf.mxu0  ;;  %2592 = vmatprep.subr.bf16.mxu0 %v15077_v9  ;;  %v15141_v6 = vld [vmem:[#allocation9 + $0x168] ss:$16 sps:$4 sm:$0xff]   ;;  %v15149_v8 = vld [vmem:[#allocation9 + $0x14c] ss:$16 sps:$4 sm:$0xff]   ;;  %v15805_v9 = vrot.slane %v15774_v20, %v15682_v41 }
 0x254   :  { %v1651_v25 = vmax.f32 %v1500_v22, 0.0  ;;  %v1443_v26 = vadd.f32 %v1442_v23, %v15778_v21  ;;  %v1505_v28 = vpop.f32.mrf.mxu1  ;;  %v15790_v30 = vpack.c.bf16 %v1650_v18, %v1646_v13  ;;  %v1504_v31 = vadd.f32 %v1503_v49, %v1441_v19  ;;  %v15147_v13 = vld [vmem:[#allocation9 + $0x148] ss:$16 sps:$4 sm:$0xff]  }
 0x255   :  { %v1444_v32 = vpop.f32.mrf.mxu0 }
 0x256   :  { %v1445_v33 = vadd.f32 %v1444_v32, %v729_v0  ;;  %v1506_v4 = vadd.f32 %v1505_v28, %v1443_v26  ;;  %2593 = vmatpush1.bf16.msra.mxu0 %v15075_v50  ;;  %v1507_v34 = vpop.f32.mrf.mxu1  ;;  %v15792_v35 = vpack.c.bf16 %v1651_v25, %v1647_v15  ;;  %v1654_v38 = vmax.f32 %v1504_v31, 0.0  ;;  %v15155_v15 = vld [vmem:[#allocation9 + $0x12c] ss:$16 sps:$4 sm:$0xff]  }
 0x257   :  { %v1446_v57 = vpop.f32.mrf.mxu0  ;;  %2594 = vmatprep.subr.bf16.mxu0 %v15083_v24  ;;  %v15153_v24 = vld [vmem:[#allocation9 + $0x128] ss:$16 sps:$4 sm:$0xff]   ;;  %v15161_v25 = vld [vmem:[#allocation9 + $0x10c] ss:$16 sps:$4 sm:$0xff]  }
 0x258   :  { %v1447_v48 = vadd.f32 %v1446_v57, %v15778_v21  ;;  %v1508_v36 = vadd.f32 %v1507_v34, %v1445_v33  ;;  %2506 = vmatprep.mubr.bf16.mxu0 %v15792_v35  ;;  %v1509_v37 = vpop.f32.mrf.mxu1  ;;  %v1655_v44 = vmax.f32 %v1506_v4, 0.0  ;;  %v15093_v21 = vld [vmem:[#allocation9 + $0x68] ss:$16 sps:$4 sm:$0xff]  }
 0x259   :  { %2507 = vmatmul.mubr.bf16.gmra.mxu0 %v15790_v30  ;;  %v15159_v57 = vld [vmem:[#allocation9 + $0x108] ss:$16 sps:$4 sm:$0xff]  }
 0x25a   :  { %v1658_v0 = vmax.f32 %v1508_v36, 0.0  ;;  %v1510_v27 = vadd.f32 %v1509_v37, %v1447_v48  ;;  %2595 = vmatpush1.bf16.msra.mxu0 %v15081_v56 }
 0x25b   :  { %2596 = vmatprep.subr.bf16.mxu0 %v15089_v47 }
 0x25c   :  { %v1659_v46 = vmax.f32 %v1510_v27, 0.0  ;;  %v15797_v51 = vpack.c.bf16 %v1658_v0, %v1654_v38 }
 0x25e   :  { %2597 = vmatpush1.bf16.msra.mxu0 %v15087_v29  ;;  %v15799_v16 = vpack.c.bf16 %v1659_v46, %v1655_v44 }
 0x25f   :  { %2598 = vmatprep.subr.bf16.mxu0 %v15095_v45 }
 0x260   :  { %2516 = vmatprep.mubr.bf16.mxu0 %v15799_v16 }
 0x261   :  { %2517 = vmatmul.mubr.bf16.gmra.mxu0 %v15797_v51 }
 0x262   :  { %2599 = vmatpush1.bf16.msra.mxu0 %v15093_v21  ;;  %2622 = vmatprep.mubr.bf16.mxu0 %v1663_v5  ;;  %v15143_v5 = vld [vmem:[#allocation9 + $0x16c] ss:$16 sps:$4 sm:$0xff]  }
 0x263   :  { %2600 = vmatprep.subr.bf16.mxu0 %v15101_v52  ;;  %v15162_v52 = vld [vmem:[#allocation9 + $0x2e8] ss:$16 sps:$4 sm:$0xff]  }
 0x266   :  { %2601 = vmatpush1.bf16.msra.mxu0 %v15099_v53 }
 0x267   :  { %2602 = vmatprep.subr.bf16.mxu0 %v15107_v17 }
 0x26a   :  { %2603 = vmatpush1.bf16.msra.mxu0 %v15105_v54  ;;  %v15167_v54 = vld [vmem:[#allocation9 + $0x2cc] ss:$16 sps:$4 sm:$0xff]  }
 0x26b   :  { %2604 = vmatprep.subr.bf16.mxu0 %v15113_v55 }
 0x26e   :  { %2605 = vmatpush1.bf16.msra.mxu0 %v15111_v58 }
 0x26f   :  { %2606 = vmatprep.subr.bf16.mxu0 %v15119_v59 }
 0x272   :  { %2607 = vmatpush2.bf16.msra.mxu0 %v15117_v60 }
 0x273   :  { %2608 = vmatprep.subr.bf16.mxu0 %v15125_v61 }
 0x276   :  { %2609 = vmatpush2.bf16.msra.mxu0 %v15123_v62 }
 0x277   :  { %2610 = vmatprep.subr.bf16.mxu0 %v15131_v63 }
 0x27a   :  { %2611 = vmatpush2.bf16.msra.mxu0 %v15129_v1 }
 0x27b   :  { %2612 = vmatprep.subr.bf16.mxu0 %v15137_v2  ;;  %v15165_v2 = vld [vmem:[#allocation9 + $0x2c8] ss:$16 sps:$4 sm:$0xff]  }
 0x27e   :  { %2613 = vmatpush2.bf16.msra.mxu0 %v15135_v3 }
 0x27f   :  { %2614 = vmatprep.subr.bf16.mxu0 %v15143_v5 }
 0x281   :  { %v1546_v11 = vpop.f32.mrf.mxu0 }
 0x282   :  { %v1609_v12 = vpop.f32.mrf.mxu1  ;;  %2615 = vmatpush2.bf16.msra.mxu0 %v15141_v6  ;;  %v1547_v22 = vadd.f32 %v1546_v11, %v15809_v10  ;;  %v15170_v6 = vld [vmem:[#allocation9 + $0x2ac] ss:$16 sps:$4 sm:$0xff]  }
 0x283   :  { %v1548_v14 = vpop.f32.mrf.mxu0  ;;  %2616 = vmatprep.subr.bf16.mxu0 %v15149_v8 }
 0x284   :  { %v1549_v18 = vadd.f32 %v1548_v14, %v15805_v9  ;;  %v1611_v19 = vpop.f32.mrf.mxu1  ;;  %v1610_v33 = vadd.f32 %v1609_v12, %v1547_v22 }
 0x285   :  { %v1550_v49 = vpop.f32.mrf.mxu0 }
 0x286   :  { %v1551_v50 = vadd.f32 %v1550_v49, %v15809_v10  ;;  %v1613_v23 = vpop.f32.mrf.mxu1  ;;  %2617 = vmatpush2.bf16.msra.mxu0 %v15147_v13  ;;  %v1612_v26 = vadd.f32 %v1611_v19, %v1549_v18  ;;  %v1640_v0 = vmax.f32 %v1610_v33, 0.0 }
 0x287   :  { %v1552_v20 = vpop.f32.mrf.mxu0  ;;  %2618 = vmatprep.subr.bf16.mxu0 %v15155_v15 }
 0x288   :  { %v1614_v28 = vadd.f32 %v1613_v23, %v1551_v50  ;;  %v1553_v31 = vadd.f32 %v1552_v20, %v15805_v9  ;;  %v1615_v32 = vpop.f32.mrf.mxu1  ;;  %v1641_v36 = vmax.f32 %v1612_v26, 0.0  ;;  %v15173_v23 = vld [vmem:[#allocation9 + $0x28c] ss:$16 sps:$4 sm:$0xff]   ;;  %v3065_v26 = vld [vmem:[#allocation12 + $0x9c0] sm:$0xff] }
 0x289   :  { %v1556_v4 = vpop.f32.mrf.mxu0 }
 0x28a   :  { %v1616_v34 = vadd.f32 %v1615_v32, %v1553_v31  ;;  %v1619_v56 = vpop.f32.mrf.mxu1  ;;  %2619 = vmatpush2.bf16.msra.mxu0 %v15153_v24  ;;  %v1644_v47 = vmax.f32 %v1614_v28, 0.0  ;;  %v1557_v27 = vadd.f32 %v1556_v4, %v15809_v10  ;;  %v3069_v28 = vld [vmem:[#allocation12 + $0x9e0] sm:$0xff] }
 0x28b   :  { %v1558_v48 = vpop.f32.mrf.mxu0  ;;  %2620 = vmatprep.subr.bf16.mxu0 %v15161_v25  ;;  %v3057_v31 = vld [vmem:[#allocation12 + $0x980] sm:$0xff]  ;;  %v13379_v33 = vcombine.low %v3065_v26, %v3069_v28  ;;  %v13380_v4 = vcombine.high %v3065_v26, %v3069_v28 }
 0x28c   :  { %v1645_v37 = vmax.f32 %v1616_v34, 0.0  ;;  %v1559_v38 = vadd.f32 %v1558_v48, %v15805_v9  ;;  %v1621_v44 = vpop.f32.mrf.mxu1  ;;  %v15820_v53 = vpack.c.bf16 %v1644_v47, %v1640_v0  ;;  %v1620_v61 = vadd.f32 %v1619_v56, %v1557_v27  ;;  %v3061_v34 = vld [vmem:[#allocation12 + $0x9a0] sm:$0xff]  ;;  %v15176_v48 = vld [vmem:[#allocation9 + $0x26c] ss:$16 sps:$4 sm:$0xff]  }
 0x28d   :  { %v1560_v29 = vpop.f32.mrf.mxu0  ;;  %v3053_v0 = vld [vmem:[#allocation12 + $0x960] sm:$0xff] }
 0x28e   :  { %v1561_v45 = vadd.f32 %v1560_v29, %v15809_v10  ;;  %v1623_v46 = vpop.f32.mrf.mxu1  ;;  %2621 = vmatpush2.bf16.msra.mxu0 %v15159_v57  ;;  %v15818_v21 = vpack.c.bf16 %v1645_v37, %v1641_v36  ;;  %v1622_v55 = vadd.f32 %v1621_v44, %v1559_v38  ;;  %v1648_v14 = vmax.f32 %v1620_v61, 0.0  ;;  %v15171_v57 = vld [vmem:[#allocation9 + $0x288] ss:$16 sps:$4 sm:$0xff]   ;;  %v15182_v61 = vld [vmem:[#allocation9 + $0x22c] ss:$16 sps:$4 sm:$0xff]  }
 0x28f   :  { %v1562_v17 = vpop.f32.mrf.mxu0  ;;  %4545 = vmatprep.subr.bf16.mxu0 %v13380_v4  ;;  %v13371_v38 = vcombine.low %v3057_v31, %v3061_v34  ;;  %v3049_v44 = vld [vmem:[#allocation12 + $0x940] sm:$0xff] }
 0x290   :  { %v1624_v58 = vadd.f32 %v1623_v46, %v1561_v45  ;;  %v1563_v59 = vadd.f32 %v1562_v17, %v15805_v9  ;;  %v1625_v60 = vpop.f32.mrf.mxu1  ;;  %2559 = vmatprep.mubr.bf16.mxu1 %v15818_v21  ;;  %v1649_v8 = vmax.f32 %v1622_v55, 0.0  ;;  %v15174_v29 = vld [vmem:[#allocation9 + $0x268] ss:$16 sps:$4 sm:$0xff]   ;;  %v13364_v17 = vcombine.high %v3049_v44, %v3053_v0 }
 0x291   :  { %v1566_v62 = vpop.f32.mrf.mxu0  ;;  %2560 = vmatmul.mubr.bf16.vlgmr.msra.gmra.mxu1 %v15820_v53  ;;  %2623 = vmatmul.mubr.bf16.vlgmr.msra.gmra.mxu0 %v15785_v7  ;;  %v3041_v45 = vld [vmem:[#allocation12 + $0x900] sm:$0xff] }
 0x292   :  { %v1626_v63 = vadd.f32 %v1625_v60, %v1563_v59  ;;  %v1629_v1 = vpop.f32.mrf.mxu1  ;;  %2654 = vmatpush1.bf16.msra.mxu1 %v15162_v52  ;;  %2632 = vmatprep.mubr.bf16.mxu0 %v15792_v35  ;;  %v1652_v3 = vmax.f32 %v1624_v58, 0.0  ;;  %v1567_v15 = vadd.f32 %v1566_v62, %v15809_v10  ;;  %v15168_v35 = vld [vmem:[#allocation9 + $0x2a8] ss:$16 sps:$4 sm:$0xff]   ;;  %v15179_v52 = vld [vmem:[#allocation9 + $0x24c] ss:$16 sps:$4 sm:$0xff]  }
 0x293   :  { %v1568_v5 = vpop.f32.mrf.mxu0  ;;  %2655 = vmatprep.subr.bf16.mxu1 %v15167_v54  ;;  %4546 = vmatpush1.bf16.msra.mxu0 %v13379_v33  ;;  %v13363_v54 = vcombine.low %v3049_v44, %v3053_v0  ;;  %v15177_v58 = vld [vmem:[#allocation9 + $0x248] ss:$16 sps:$4 sm:$0xff]   ;;  %v15197_v33 = vld [vmem:[#allocation9 + $0x38c] ss:$16 sps:$4 sm:$0xff]  }
 0x294   :  { %v1653_v11 = vmax.f32 %v1626_v63, 0.0  ;;  %v1569_v12 = vadd.f32 %v1568_v5, %v15805_v9  ;;  %v1631_v13 = vpop.f32.mrf.mxu1  ;;  %v15832_v49 = vpack.c.bf16 %v1652_v3, %v1648_v14  ;;  %v3033_v59 = vld [vmem:[#allocation12 + $0x8c0] sm:$0xff] }
 0x295   :  { %v1570_v18 = vpop.f32.mrf.mxu0  ;;  %v3037_v60 = vld [vmem:[#allocation12 + $0x8e0] sm:$0xff] }
 0x296   :  { %v1571_v7 = vadd.f32 %v1570_v18, %v15809_v10  ;;  %v1633_v19 = vpop.f32.mrf.mxu1  ;;  %2656 = vmatpush1.bf16.msra.mxu1 %v15165_v2  ;;  %v15830_v22 = vpack.c.bf16 %v1653_v11, %v1649_v8  ;;  %v1632_v24 = vadd.f32 %v1631_v13, %v1569_v12  ;;  %v1630_v10 = vadd.f32 %v1629_v1, %v1567_v15  ;;  %v15180_v1 = vld [vmem:[#allocation9 + $0x228] ss:$16 sps:$4 sm:$0xff]   ;;  %v15188_v12 = vld [vmem:[#allocation9 + $0x3ec] ss:$16 sps:$4 sm:$0xff]  }
 0x297   :  { %v1572_v50 = vpop.f32.mrf.mxu0  ;;  %2657 = vmatprep.subr.bf16.mxu1 %v15170_v6  ;;  %v13348_v63 = vcombine.high %v3033_v59, %v3037_v60  ;;  %v3025_v2 = vld [vmem:[#allocation12 + $0x880] sm:$0xff]  ;;  %v13347_v5 = vcombine.low %v3033_v59, %v3037_v60 }
 0x298   :  { %v1634_v20 = vadd.f32 %v1633_v19, %v1571_v7  ;;  %v1573_v25 = vadd.f32 %v1572_v50, %v15805_v9  ;;  %2569 = vmatprep.mubr.bf16.mxu1 %v15830_v22  ;;  %v1635_v32 = vpop.f32.mrf.mxu1  ;;  %v13372_v9 = vcombine.high %v3057_v31, %v3061_v34  ;;  %v1657_v36 = vmax.f32 %v1632_v24, 0.0  ;;  %v3029_v3 = vld [vmem:[#allocation12 + $0x8a0] sm:$0xff]  ;;  %v15191_v19 = vld [vmem:[#allocation9 + $0x3cc] ss:$16 sps:$4 sm:$0xff]  }
 0x299   :  { %2570 = vmatmul.mubr.bf16.gmra.mxu1 %v15832_v49  ;;  %2633 = vmatmul.mubr.bf16.gmra.mxu0 %v15790_v30  ;;  %v1656_v30 = vmax.f32 %v1630_v10, 0.0  ;;  %v15183_v6 = vld [vmem:[#allocation9 + $0x208] ss:$16 sps:$4 sm:$0xff]   ;;  %v13339_v13 = vcombine.low %v3025_v2, %v3029_v3 }
 0x29a   :  { %v1636_v56 = vadd.f32 %v1635_v32, %v1573_v25  ;;  %2658 = vmatpush1.bf16.msra.mxu1 %v15168_v35  ;;  %2642 = vmatprep.mubr.bf16.mxu0 %v15799_v16  ;;  %v1660_v47 = vmax.f32 %v1634_v20, 0.0  ;;  %v3045_v16 = vld [vmem:[#allocation12 + $0x920] sm:$0xff]  ;;  %v15194_v25 = vld [vmem:[#allocation9 + $0x3ac] ss:$16 sps:$4 sm:$0xff]  }
 0x29b   :  { %2659 = vmatprep.subr.bf16.mxu1 %v15173_v23  ;;  %4547 = vmatprep.subr.bf16.mxu0 %v13372_v9  ;;  %v13356_v55 = vcombine.high %v3041_v45, %v3045_v16  ;;  %v13355_v62 = vcombine.low %v3041_v45, %v3045_v16  ;;  %v3017_v8 = vld [vmem:[#allocation12 + $0x840] sm:$0xff]  ;;  %v15209_v45 = vld [vmem:[#allocation9 + $0x30c] ss:$16 sps:$4 sm:$0xff]  }
 0x29c   :  { %v1661_v37 = vmax.f32 %v1636_v56, 0.0  ;;  %v15841_v46 = vpack.c.bf16 %v1660_v47, %v1656_v30  ;;  %4548 = vmatpush1.bf16.msra.mxu0 %v13371_v38  ;;  %v3021_v11 = vld [vmem:[#allocation12 + $0x860] sm:$0xff]  ;;  %v15200_v47 = vld [vmem:[#allocation9 + $0x36c] ss:$16 sps:$4 sm:$0xff]  }
 0x29d   :  { %4549 = vmatprep.subr.bf16.mxu0 %v13364_v17  ;;  %v13332_v14 = vcombine.high %v3017_v8, %v3021_v11  ;;  %v15186_v15 = vld [vmem:[#allocation9 + $0x3e8] ss:$16 sps:$4 sm:$0xff]   ;;  %v13331_v35 = vcombine.low %v3017_v8, %v3021_v11  ;;  %v15203_v38 = vld [vmem:[#allocation9 + $0x34c] ss:$16 sps:$4 sm:$0xff]  }
 0x29e   :  { %2660 = vmatpush1.bf16.msra.mxu1 %v15171_v57  ;;  %v15839_v27 = vpack.c.bf16 %v1661_v37, %v1657_v36  ;;  %v3009_v18 = vld [vmem:[#allocation12 + $0x800] sm:$0xff]  ;;  %v15206_v30 = vld [vmem:[#allocation9 + $0x32c] ss:$16 sps:$4 sm:$0xff]  }
 0x29f   :  { %2661 = vmatprep.subr.bf16.mxu1 %v15176_v48  ;;  %v3013_v7 = vld [vmem:[#allocation12 + $0x820] sm:$0xff] }
 0x2a0   :  { %2579 = vmatprep.mubr.bf16.mxu1 %v15839_v27  ;;  %4550 = vmatpush1.bf16.msra.mxu0 %v13363_v54  ;;  %v13324_v50 = vcombine.high %v3009_v18, %v3013_v7  ;;  %v15189_v23 = vld [vmem:[#allocation9 + $0x3c8] ss:$16 sps:$4 sm:$0xff]   ;;  %v13323_v26 = vcombine.low %v3009_v18, %v3013_v7 }
 0x2a1   :  { %2580 = vmatmul.mubr.bf16.gmra.mxu1 %v15841_v46  ;;  %2643 = vmatmul.mubr.bf16.gmra.mxu0 %v15797_v51  ;;  %v15185_v51 = vld [vmem:[#allocation9 + $0x20c] ss:$16 sps:$4 sm:$0xff]   ;;  %v3129_v24 = vld [vmem:[#allocation12 + $0xbc0] sm:$0xff] }
 0x2a2   :  { %2662 = vmatpush1.bf16.msra.mxu1 %v15174_v29  ;;  %2685 = vmatprep.mubr.bf16.mxu1 %v15818_v21  ;;  %v13340_v21 = vcombine.high %v3025_v2, %v3029_v3  ;;  %v3133_v20 = vld [vmem:[#allocation12 + $0xbe0] sm:$0xff] }
 0x2a3   :  { %2663 = vmatprep.subr.bf16.mxu1 %v15179_v52  ;;  %4551 = vmatprep.subr.bf16.mxu0 %v13356_v55  ;;  %v13444_v28 = vcombine.high %v3129_v24, %v3133_v20  ;;  %v15192_v31 = vld [vmem:[#allocation9 + $0x3a8] ss:$16 sps:$4 sm:$0xff]   ;;  %v13443_v4 = vcombine.low %v3129_v24, %v3133_v20 }
 0x2a4   :  { %4552 = vmatpush1.bf16.msra.mxu0 %v13355_v62  ;;  %v3121_v10 = vld [vmem:[#allocation12 + $0xb80] sm:$0xff] }
 0x2a5   :  { %4553 = vmatprep.subr.bf16.mxu0 %v13348_v63  ;;  %v3125_v32 = vld [vmem:[#allocation12 + $0xba0] sm:$0xff] }
 0x2a6   :  { %2664 = vmatpush1.bf16.msra.mxu1 %v15177_v58  ;;  %v13436_v34 = vcombine.high %v3121_v10, %v3125_v32  ;;  %v15195_v56 = vld [vmem:[#allocation9 + $0x388] ss:$16 sps:$4 sm:$0xff]   ;;  %v13435_v48 = vcombine.low %v3121_v10, %v3125_v32 }
 0x2a7   :  { %2665 = vmatprep.subr.bf16.mxu1 %v15182_v61  ;;  %v3113_v57 = vld [vmem:[#allocation12 + $0xb40] sm:$0xff] }
 0x2a8   :  { %4554 = vmatpush1.bf16.msra.mxu0 %v13347_v5  ;;  %v3117_v9 = vld [vmem:[#allocation12 + $0xb60] sm:$0xff] }
 0x2a9   :  { %4555 = vmatprep.subr.bf16.mxu0 %v13340_v21  ;;  %v13428_v36 = vcombine.high %v3113_v57, %v3117_v9  ;;  %v15198_v37 = vld [vmem:[#allocation9 + $0x368] ss:$16 sps:$4 sm:$0xff]   ;;  %v13427_v44 = vcombine.low %v3113_v57, %v3117_v9 }
 0x2aa   :  { %2666 = vmatpush1.bf16.msra.mxu1 %v15180_v1  ;;  %v15201_v0 = vld [vmem:[#allocation9 + $0x348] ss:$16 sps:$4 sm:$0xff]  }
 0x2ab   :  { %2667 = vmatprep.subr.bf16.mxu1 %v15185_v51  ;;  %v15204_v29 = vld [vmem:[#allocation9 + $0x328] ss:$16 sps:$4 sm:$0xff]  }
 0x2ac   :  { %4556 = vmatpush1.bf16.msra.mxu0 %v13339_v13  ;;  %v15207_v16 = vld [vmem:[#allocation9 + $0x308] ss:$16 sps:$4 sm:$0xff]   ;;  %v15854_v13 = vld [vmem:[#allocation12 + $0x9e8] sm:$0xff] }
 0x2ad   :  { %4557 = vmatprep.subr.bf16.mxu0 %v13332_v14  ;;  %v3105_v52 = vld [vmem:[#allocation12 + $0xb00] sm:$0xff] }
 0x2ae   :  { %2668 = vmatpush1.bf16.msra.mxu1 %v15183_v6  ;;  %v3109_v17 = vld [vmem:[#allocation12 + $0xb20] sm:$0xff] }
 0x2af   :  { %2669 = vmatprep.subr.bf16.mxu1 %v15188_v12  ;;  %v13420_v54 = vcombine.high %v3105_v52, %v3109_v17  ;;  %v13419_v55 = vcombine.low %v3105_v52, %v3109_v17  ;;  %v3097_v58 = vld [vmem:[#allocation12 + $0xac0] sm:$0xff]  ;;  %v15852_v12 = vld [vmem:[#allocation12 + $0x9c8] sm:$0xff] }
 0x2b0   :  { %4558 = vmatpush1.bf16.msra.mxu0 %v13331_v35  ;;  %v3101_v59 = vld [vmem:[#allocation12 + $0xae0] sm:$0xff]  ;;  %v13381_v18 = vcombine.low %v15852_v12, %v15854_v13 }
 0x2b1   :  { %4559 = vmatprep.subr.bf16.mxu0 %v13324_v50  ;;  %v13412_v60 = vcombine.high %v3097_v58, %v3101_v59  ;;  %v13411_v61 = vcombine.low %v3097_v58, %v3101_v59  ;;  %v3089_v62 = vld [vmem:[#allocation12 + $0xa80] sm:$0xff]  ;;  %v15860_v59 = vld [vmem:[#allocation10] sm:$0xf] }
 0x2b2   :  { %2670 = vmatpush2.bf16.msra.mxu1 %v15186_v15  ;;  %v3093_v63 = vld [vmem:[#allocation12 + $0xaa0] sm:$0xff]  ;;  %v13382_v15 = vcombine.high %v15852_v12, %v15854_v13  ;;  %v3038_v12 = vld [vmem:[#allocation12 + $0x8e8] sm:$0xff] }
 0x2b3   :  { %2671 = vmatprep.subr.bf16.mxu1 %v15191_v19  ;;  %v13404_v1 = vcombine.high %v3089_v62, %v3093_v63  ;;  %v3085_v2 = vld [vmem:[#allocation12 + $0xa60] sm:$0xff] }
 0x2b4   :  { %4560 = vmatpush1.bf16.msra.mxu0 %v13323_v26  ;;  %v3073_v5 = vld [vmem:[#allocation12 + $0xa00] sm:$0xff] }
 0x2b5   :  { %4561 = vmatprep.subr.bf16.mxu0 %v13444_v28  ;;  %v3077_v21 = vld [vmem:[#allocation12 + $0xa20] sm:$0xff] }
 0x2b6   :  { %2672 = vmatpush2.bf16.msra.mxu1 %v15189_v23  ;;  %v13388_v6 = vcombine.high %v3073_v5, %v3077_v21  ;;  %v13387_v8 = vcombine.low %v3073_v5, %v3077_v21  ;;  %v3197_v11 = vld [vmem:[#allocation12 + $0xde0] sm:$0xff] }
 0x2b7   :  { %2673 = vmatprep.subr.bf16.mxu1 %v15194_v25  ;;  %v3189_v7 = vld [vmem:[#allocation12 + $0xda0] sm:$0xff] }
 0x2b8   :  { %4562 = vmatpush2.bf16.msra.mxu0 %v13443_v4  ;;  %v3177_v50 = vld [vmem:[#allocation12 + $0xd40] sm:$0xff] }
 0x2b9   :  { %4563 = vmatprep.subr.bf16.mxu0 %v13436_v34  ;;  %v3181_v23 = vld [vmem:[#allocation12 + $0xd60] sm:$0xff] }
 0x2ba   :  { %2674 = vmatpush2.bf16.msra.mxu1 %v15192_v31  ;;  %v13491_v24 = vcombine.low %v3177_v50, %v3181_v23  ;;  %v13492_v20 = vcombine.high %v3177_v50, %v3181_v23  ;;  %v3169_v25 = vld [vmem:[#allocation12 + $0xd00] sm:$0xff] }
 0x2bb   :  { %2675 = vmatprep.subr.bf16.mxu1 %v15197_v33  ;;  %v3173_v26 = vld [vmem:[#allocation12 + $0xd20] sm:$0xff] }
 0x2bc   :  { %4564 = vmatpush2.bf16.msra.mxu0 %v13435_v48  ;;  %v13483_v28 = vcombine.low %v3169_v25, %v3173_v26  ;;  %v13484_v31 = vcombine.high %v3169_v25, %v3173_v26  ;;  %v3161_v10 = vld [vmem:[#allocation12 + $0xcc0] sm:$0xff] }
 0x2bd   :  { %4565 = vmatprep.subr.bf16.mxu0 %v13428_v36  ;;  %v3165_v32 = vld [vmem:[#allocation12 + $0xce0] sm:$0xff] }
 0x2be   :  { %2676 = vmatpush2.bf16.msra.mxu1 %v15195_v56  ;;  %v13475_v33 = vcombine.low %v3161_v10, %v3165_v32  ;;  %v13476_v4 = vcombine.high %v3161_v10, %v3165_v32  ;;  %v3153_v34 = vld [vmem:[#allocation12 + $0xc80] sm:$0xff] }
 0x2bf   :  { %2677 = vmatprep.subr.bf16.mxu1 %v15200_v47  ;;  %v3157_v56 = vld [vmem:[#allocation12 + $0xca0] sm:$0xff] }
 0x2c0   :  { %4566 = vmatpush2.bf16.msra.mxu0 %v13427_v44  ;;  %v13467_v57 = vcombine.low %v3153_v34, %v3157_v56  ;;  %v13468_v9 = vcombine.high %v3153_v34, %v3157_v56  ;;  %v3145_v47 = vld [vmem:[#allocation12 + $0xc40] sm:$0xff] }
 0x2c1   :  { %4567 = vmatprep.subr.bf16.mxu0 %v13420_v54  ;;  %v3149_v48 = vld [vmem:[#allocation12 + $0xc60] sm:$0xff] }
 0x2c2   :  { %2678 = vmatpush2.bf16.msra.mxu1 %v15198_v37  ;;  %v13459_v36 = vcombine.low %v3145_v47, %v3149_v48  ;;  %v13460_v37 = vcombine.high %v3145_v47, %v3149_v48  ;;  %v3141_v44 = vld [vmem:[#allocation12 + $0xc20] sm:$0xff] }
 0x2c3   :  { %2679 = vmatprep.subr.bf16.mxu1 %v15203_v38  ;;  %v3137_v38 = vld [vmem:[#allocation12 + $0xc00] sm:$0xff] }
 0x2c4   :  { %4568 = vmatpush2.bf16.msra.mxu0 %v13419_v55  ;;  %v3249_v17 = vld [vmem:[#allocation12 + $0xf80] sm:$0xff] }
 0x2c5   :  { %4569 = vmatprep.subr.bf16.mxu0 %v13412_v60  ;;  %v3253_v54 = vld [vmem:[#allocation12 + $0xfa0] sm:$0xff] }
 0x2c6   :  { %2680 = vmatpush2.bf16.msra.mxu1 %v15201_v0  ;;  %v13451_v0 = vcombine.low %v3137_v38, %v3141_v44  ;;  %v13563_v55 = vcombine.low %v3249_v17, %v3253_v54  ;;  %v13564_v58 = vcombine.high %v3249_v17, %v3253_v54  ;;  %v3241_v60 = vld [vmem:[#allocation12 + $0xf40] sm:$0xff]  ;;  %v15894_v17 = vrot.slane %v15860_v59, %v15682_v41 }
 0x2c7   :  { %2681 = vmatprep.subr.bf16.mxu1 %v15206_v30  ;;  %v13452_v30 = vcombine.high %v3137_v38, %v3141_v44  ;;  %v3209_v26 = vld [vmem:[#allocation12 + $0xe40] sm:$0xff] }
 0x2c8   :  { %4570 = vmatpush2.bf16.msra.mxu0 %v13411_v61  ;;  %v3245_v61 = vld [vmem:[#allocation12 + $0xf60] sm:$0xff] }
 0x2c9   :  { %4571 = vmatprep.subr.bf16.mxu0 %v13404_v1  ;;  %v15864_v1 = vrot.slane %v15860_v59, %v15685_v42  ;;  %v3205_v34 = vld [vmem:[#allocation12 + $0xe20] sm:$0xff] }
 0x2ca   :  { %2682 = vmatpush2.bf16.msra.mxu1 %v15204_v29  ;;  %v3257_v29 = vld [vmem:[#allocation12 + $0xfc0] sm:$0xff] }
 0x2cb   :  { %2683 = vmatprep.subr.bf16.mxu1 %v15209_v45  ;;  %v3261_v45 = vld [vmem:[#allocation12 + $0xfe0] sm:$0xff] }
 0x2cc   :  { %v13572_v52 = vcombine.high %v3257_v29, %v3261_v45 }
 0x2ce   :  { %2684 = vmatpush2.bf16.msra.mxu1 %v15207_v16  ;;  %v13571_v16 = vcombine.low %v3257_v29, %v3261_v45 }
 0x2d1   :  { %2686 = vmatmul.mubr.bf16.vlgmr.msra.gmra.mxu1 %v15820_v53  ;;  %v13403_v53 = vcombine.low %v3089_v62, %v3093_v63  ;;  %v13555_v62 = vcombine.low %v3241_v60, %v3245_v61  ;;  %v13556_v63 = vcombine.high %v3241_v60, %v3245_v61 }
 0x2d2   :  { %2695 = vmatprep.mubr.bf16.mxu1 %v15830_v22  ;;  %v3081_v22 = vld [vmem:[#allocation12 + $0xa40] sm:$0xff] }
 0x2d3   :  { %4572 = vmatpush2.bf16.msra.mxu0 %v13403_v53  ;;  %v13396_v3 = vcombine.high %v3081_v22, %v3085_v2  ;;  %v13395_v51 = vcombine.low %v3081_v22, %v3085_v2  ;;  %v3233_v53 = vld [vmem:[#allocation12 + $0xf00] sm:$0xff]  ;;  %v15868_v2 = vrot.slane %v15860_v59, %v15679_v40 }
 0x2d4   :  { %v3237_v22 = vld [vmem:[#allocation12 + $0xf20] sm:$0xff] }
 0x2d5   :  { %4573 = vmatprep.subr.bf16.mxu0 %v13396_v3  ;;  %v13548_v3 = vcombine.high %v3233_v53, %v3237_v22  ;;  %v13547_v5 = vcombine.low %v3233_v53, %v3237_v22 }
 0x2d7   :  { %4574 = vmatpush2.bf16.msra.mxu0 %v13395_v51 }
 0x2d8   :  { %4575 = vmatprep.subr.bf16.mxu0 %v13388_v6 }
 0x2d9   :  { %2696 = vmatmul.mubr.bf16.gmra.mxu1 %v15832_v49  ;;  %v3193_v49 = vld [vmem:[#allocation12 + $0xdc0] sm:$0xff] }
 0x2da   :  { %2705 = vmatprep.mubr.bf16.mxu1 %v15839_v27  ;;  %v13508_v27 = vcombine.high %v3193_v49, %v3197_v11  ;;  %v13507_v14 = vcombine.low %v3193_v49, %v3197_v11  ;;  %v3229_v49 = vld [vmem:[#allocation12 + $0xee0] sm:$0xff] }
 0x2db   :  { %4576 = vmatpush2.bf16.msra.mxu0 %v13387_v8  ;;  %v3225_v8 = vld [vmem:[#allocation12 + $0xec0] sm:$0xff] }
 0x2dc   :  { %4588 = vmatprep.subr.bf16.mxu1 %v13508_v27  ;;  %4631 = vmatprep.subr.bf16.mxu0 %v13382_v15  ;;  %v13540_v27 = vcombine.high %v3225_v8, %v3229_v49  ;;  %v13539_v15 = vcombine.low %v3225_v8, %v3229_v49 }
 0x2dd   :  { %4589 = vmatpush1.bf16.msra.mxu1 %v13507_v14 }
 0x2e1   :  { %2706 = vmatmul.mubr.bf16.gmra.mxu1 %v15841_v46  ;;  %v3185_v46 = vld [vmem:[#allocation12 + $0xd80] sm:$0xff] }
 0x2e2   :  { %v13500_v19 = vcombine.high %v3185_v46, %v3189_v7  ;;  %v13499_v35 = vcombine.low %v3185_v46, %v3189_v7 }
 0x2e4   :  { %4590 = vmatprep.subr.bf16.mxu1 %v13500_v19  ;;  %v3217_v19 = vld [vmem:[#allocation12 + $0xe80] sm:$0xff] }
 0x2e5   :  { %4591 = vmatpush1.bf16.msra.mxu1 %v13499_v35  ;;  %v3221_v35 = vld [vmem:[#allocation12 + $0xea0] sm:$0xff] }
 0x2e6   :  { %4592 = vmatprep.subr.bf16.mxu1 %v13492_v20  ;;  %v13532_v23 = vcombine.high %v3217_v19, %v3221_v35  ;;  %v13531_v20 = vcombine.low %v3217_v19, %v3221_v35 }
 0x2e9   :  { %4593 = vmatpush1.bf16.msra.mxu1 %v13491_v24 }
 0x2ea   :  { %4594 = vmatprep.subr.bf16.mxu1 %v13484_v31 }
 0x2ed   :  { %4595 = vmatpush1.bf16.msra.mxu1 %v13483_v28  ;;  %v3213_v28 = vld [vmem:[#allocation12 + $0xe60] sm:$0xff] }
 0x2ee   :  { %4596 = vmatprep.subr.bf16.mxu1 %v13476_v4  ;;  %v13524_v31 = vcombine.high %v3209_v26, %v3213_v28  ;;  %v13523_v32 = vcombine.low %v3209_v26, %v3213_v28  ;;  %v3201_v4 = vld [vmem:[#allocation12 + $0xe00] sm:$0xff] }
 0x2ef   :  { %v13516_v56 = vcombine.high %v3201_v4, %v3205_v34 }
 0x2f1   :  { %4597 = vmatpush1.bf16.msra.mxu1 %v13475_v33 }
 0x2f2   :  { %4598 = vmatprep.subr.bf16.mxu1 %v13468_v9  ;;  %v13515_v9 = vcombine.low %v3201_v4, %v3205_v34 }
 0x2f5   :  { %4599 = vmatpush1.bf16.msra.mxu1 %v13467_v57 }
 0x2f6   :  { %4600 = vmatprep.subr.bf16.mxu1 %v13460_v37  ;;  %v15877_v37 = vld [vmem:[#allocation12 + $0xde8] sm:$0xff] }
 0x2f9   :  { %4601 = vmatpush1.bf16.msra.mxu1 %v13459_v36  ;;  %v15875_v36 = vld [vmem:[#allocation12 + $0xdc8] sm:$0xff] }
 0x2fa   :  { %4602 = vmatprep.subr.bf16.mxu1 %v13452_v30  ;;  %v13510_v44 = vcombine.high %v15875_v36, %v15877_v37  ;;  %v13509_v30 = vcombine.low %v15875_v36, %v15877_v37 }
 0x2fd   :  { %4603 = vmatpush1.bf16.msra.mxu1 %v13451_v0 }
 0x2fe   :  { %4604 = vmatprep.subr.bf16.mxu1 %v13572_v52  ;;  %v15890_v52 = vrot.slane %v15860_v59, %v15688_v43 }
 0x301   :  { %4605 = vmatpush2.bf16.msra.mxu1 %v13571_v16 }
 0x302   :  { %4606 = vmatprep.subr.bf16.mxu1 %v13564_v58 }
 0x305   :  { %4607 = vmatpush2.bf16.msra.mxu1 %v13563_v55 }
 0x306   :  { %4608 = vmatprep.subr.bf16.mxu1 %v13556_v63 }
 0x309   :  { %4609 = vmatpush2.bf16.msra.mxu1 %v13555_v62 }
 0x30a   :  { %4610 = vmatprep.subr.bf16.mxu1 %v13548_v3 }
 0x30d   :  { %4611 = vmatpush2.bf16.msra.mxu1 %v13547_v5 }
 0x30e   :  { %4612 = vmatprep.subr.bf16.mxu1 %v13540_v27 }
 0x311   :  { %v2498_v51 = vpop.f32.mrf.mxu0  ;;  %4613 = vmatpush2.bf16.msra.mxu1 %v13539_v15 }
 0x312   :  { %v2499_v21 = vadd.f32 %v2498_v51, %v15864_v1  ;;  %4614 = vmatprep.subr.bf16.mxu1 %v13532_v23 }
 0x313   :  { %v2500_v6 = vpop.f32.mrf.mxu0 }
 0x314   :  { %v2501_v11 = vadd.f32 %v2500_v6, %v15868_v2 }
 0x315   :  { %v2502_v14 = vpop.f32.mrf.mxu0  ;;  %4615 = vmatpush2.bf16.msra.mxu1 %v13531_v20 }
 0x316   :  { %v2503_v46 = vadd.f32 %v2502_v14, %v15864_v1  ;;  %4616 = vmatprep.subr.bf16.mxu1 %v13524_v31 }
 0x317   :  { %v2504_v7 = vpop.f32.mrf.mxu0 }
 0x318   :  { %v2505_v50 = vadd.f32 %v2504_v7, %v15868_v2 }
 0x319   :  { %v2508_v24 = vpop.f32.mrf.mxu0  ;;  %4617 = vmatpush2.bf16.msra.mxu1 %v13523_v32 }
 0x31a   :  { %4618 = vmatprep.subr.bf16.mxu1 %v13516_v56 }
 0x31b   :  { %v2510_v25 = vpop.f32.mrf.mxu0 }
 0x31c   :  { %v2511_v23 = vadd.f32 %v2510_v25, %v15868_v2 }
 0x31d   :  { %v2512_v10 = vpop.f32.mrf.mxu0  ;;  %4619 = vmatpush2.bf16.msra.mxu1 %v13515_v9 }
 0x31e   :  { %4674 = vmatprep.subr.bf16.mxu1 %v13510_v44  ;;  %v2513_v20 = vadd.f32 %v2512_v10, %v15864_v1 }
 0x31f   :  { %v2514_v33 = vpop.f32.mrf.mxu0 }
 0x320   :  { %v2515_v32 = vadd.f32 %v2514_v33, %v15868_v2 }
 0x321   :  { %v2518_v57 = vpop.f32.mrf.mxu0 }
 0x322   :  { %v2519_v47 = vadd.f32 %v2518_v57, %v15864_v1 }
 0x323   :  { %v2520_v48 = vpop.f32.mrf.mxu0 }
 0x324   :  { %v2521_v38 = vadd.f32 %v2520_v48, %v15868_v2 }
 0x325   :  { %v2522_v0 = vpop.f32.mrf.mxu0 }
 0x326   :  { %v2523_v29 = vadd.f32 %v2522_v0, %v15864_v1 }
 0x327   :  { %v2524_v45 = vpop.f32.mrf.mxu0 }
 0x328   :  { %v15886_v16 = vadd.f32 %v2524_v45, %v15868_v2 }
 0x351   :  { %v2561_v54 = vpop.f32.mrf.mxu1  ;;  %v2624_v55 = vpop.f32.mrf.mxu0 }
 0x352   :  { %v2562_v58 = vadd.f32 %v2561_v54, %v2499_v21  ;;  %v15897_v60 = vadd.f32 %v2624_v55, %v15890_v52  ;;  %v3062_v55 = vld [vmem:[#allocation12 + $0x9a8] sm:$0xff] }
 0x353   :  { %v2563_v61 = vpop.f32.mrf.mxu1  ;;  %v2626_v62 = vpop.f32.mrf.mxu0 }
 0x354   :  { %v2564_v63 = vadd.f32 %v2563_v61, %v2501_v11  ;;  %v15900_v53 = vadd.f32 %v2626_v62, %v15894_v17  ;;  %v2716_v8 = vmax.f32 %v2562_v58, 0.0 }
 0x355   :  { %v2565_v22 = vpop.f32.mrf.mxu1  ;;  %v2628_v3 = vpop.f32.mrf.mxu0 }
 0x356   :  { %v2566_v51 = vadd.f32 %v2565_v22, %v2503_v46  ;;  %v15903_v5 = vadd.f32 %v2628_v3, %v15890_v52  ;;  %v2717_v11 = vmax.f32 %v2564_v63, 0.0 }
 0x357   :  { %v2567_v59 = vpop.f32.mrf.mxu1  ;;  %v2630_v6 = vpop.f32.mrf.mxu0 }
 0x358   :  { %v2720_v49 = vmax.f32 %v2566_v51, 0.0  ;;  %v2568_v21 = vadd.f32 %v2567_v59, %v2505_v50  ;;  %v15906_v27 = vadd.f32 %v2630_v6, %v15894_v17  ;;  %v2509_v50 = vadd.f32 %v2508_v24, %v15864_v1  ;;  %v3058_v24 = vld [vmem:[#allocation12 + $0x988] sm:$0xff] }
 0x359   :  { %v2571_v14 = vpop.f32.mrf.mxu1  ;;  %v15908_v15 = vpop.f32.mrf.mxu0  ;;  %v13374_v51 = vcombine.high %v3058_v24, %v3062_v55  ;;  %v3050_v6 = vld [vmem:[#allocation12 + $0x948] sm:$0xff] }
 0x35a   :  { %v15910_v7 = vpack.c.bf16 %v2720_v49, %v2716_v8  ;;  %v2721_v19 = vmax.f32 %v2568_v21, 0.0  ;;  %v2572_v56 = vadd.f32 %v2571_v14, %v2509_v50  ;;  %v3054_v8 = vld [vmem:[#allocation12 + $0x968] sm:$0xff] }
 0x35b   :  { %v2573_v35 = vpop.f32.mrf.mxu1  ;;  %v15912_v46 = vpop.f32.mrf.mxu0  ;;  %v3046_v50 = vld [vmem:[#allocation12 + $0x928] sm:$0xff] }
 0x35c   :  { %v15916_v26 = vpack.c.bf16 %v2721_v19, %v2717_v11  ;;  %v2574_v4 = vadd.f32 %v2573_v35, %v2511_v23  ;;  %v2724_v58 = vmax.f32 %v2572_v56, 0.0  ;;  %v13366_v11 = vcombine.high %v3050_v6, %v3054_v8  ;;  %v3030_v56 = vld [vmem:[#allocation12 + $0x8a8] sm:$0xff] }
 0x35d   :  { %v2575_v28 = vpop.f32.mrf.mxu1  ;;  %v15919_v31 = vpop.f32.mrf.mxu0 }
 0x35e   :  { %v2576_v34 = vadd.f32 %v2575_v28, %v2513_v20  ;;  %v2725_v10 = vmax.f32 %v2574_v4, 0.0  ;;  %v3042_v20 = vld [vmem:[#allocation12 + $0x908] sm:$0xff] }
 0x35f   :  { %v2577_v57 = vpop.f32.mrf.mxu1  ;;  %v15922_v9 = vpop.f32.mrf.mxu0  ;;  %v3034_v4 = vld [vmem:[#allocation12 + $0x8c8] sm:$0xff]  ;;  %v13357_v13 = vcombine.low %v3042_v20, %v3046_v50 }
 0x360   :  { %v2578_v48 = vadd.f32 %v2577_v57, %v2515_v32  ;;  %v2728_v44 = vmax.f32 %v2576_v34, 0.0  ;;  %v13365_v32 = vcombine.low %v3050_v6, %v3054_v8  ;;  %v3026_v34 = vld [vmem:[#allocation12 + $0x888] sm:$0xff]  ;;  %v13349_v57 = vcombine.low %v3034_v4, %v3038_v12 }
 0x361   :  { %v2581_v25 = vpop.f32.mrf.mxu1  ;;  %v2644_v0 = vpop.f32.mrf.mxu0  ;;  %v3114_v8 = vld [vmem:[#allocation12 + $0xb48] sm:$0xff] }
 0x362   :  { %v2729_v45 = vmax.f32 %v2578_v48, 0.0  ;;  %v2582_v54 = vadd.f32 %v2581_v25, %v2519_v47  ;;  %v15925_v1 = vadd.f32 %v2644_v0, %v15890_v52  ;;  %v15931_v63 = vpack.c.bf16 %v2728_v44, %v2724_v58  ;;  %v3018_v44 = vld [vmem:[#allocation12 + $0x848] sm:$0xff] }
 0x363   :  { %v2583_v2 = vpop.f32.mrf.mxu1  ;;  %v15927_v33 = vpop.f32.mrf.mxu0  ;;  %v13342_v48 = vcombine.high %v3026_v34, %v3030_v56  ;;  %v3022_v25 = vld [vmem:[#allocation12 + $0x868] sm:$0xff]  ;;  %v13341_v0 = vcombine.low %v3026_v34, %v3030_v56 }
 0x364   :  { %v15929_v61 = vpack.c.bf16 %v2729_v45, %v2725_v10  ;;  %v2584_v62 = vadd.f32 %v2583_v2, %v2521_v38  ;;  %v2732_v21 = vmax.f32 %v2582_v54, 0.0  ;;  %v13334_v10 = vcombine.high %v3018_v44, %v3022_v25  ;;  %v3010_v45 = vld [vmem:[#allocation12 + $0x808] sm:$0xff] }
 0x365   :  { %v2585_v22 = vpop.f32.mrf.mxu1  ;;  %v2648_v3 = vpop.f32.mrf.mxu0  ;;  %v3014_v54 = vld [vmem:[#allocation12 + $0x828] sm:$0xff] }
 0x366   :  { %v2586_v59 = vadd.f32 %v2585_v22, %v2523_v29  ;;  %v15934_v47 = vadd.f32 %v2648_v3, %v15890_v52  ;;  %4577 = vmatprep.mubr.bf16.mxu0 %v15929_v61  ;;  %v13373_v29 = vcombine.low %v3058_v24, %v3062_v55  ;;  %v2733_v19 = vmax.f32 %v2584_v62, 0.0  ;;  %v3130_v58 = vld [vmem:[#allocation12 + $0xbc8] sm:$0xff] }
 0x367   :  { %v2587_v49 = vpop.f32.mrf.mxu1  ;;  %4578 = vmatmul.mubr.bf16.vlgmr.msra.gmra.mxu0 %v15931_v63  ;;  %v13333_v24 = vcombine.low %v3018_v44, %v3022_v25  ;;  %v13326_v55 = vcombine.high %v3010_v45, %v3014_v54  ;;  %v3134_v2 = vld [vmem:[#allocation12 + $0xbe8] sm:$0xff]  ;;  %v13325_v62 = vcombine.low %v3010_v45, %v3014_v54 }
 0x368   :  { %v2736_v14 = vmax.f32 %v2586_v59, 0.0  ;;  %v2588_v38 = vadd.f32 %v2587_v49, %v15886_v16  ;;  %4632 = vmatpush1.bf16.msra.mxu0 %v13381_v18  ;;  %4663 = vmatprep.mubr.bf16.mxu0 %v15929_v61  ;;  %v13358_v16 = vcombine.high %v3042_v20, %v3046_v50  ;;  %v13350_v18 = vcombine.high %v3034_v4, %v3038_v12  ;;  %v3122_v3 = vld [vmem:[#allocation12 + $0xb88] sm:$0xff] }
 0x369   :  { %4633 = vmatprep.subr.bf16.mxu0 %v13374_v51  ;;  %v13446_v22 = vcombine.high %v3130_v58, %v3134_v2  ;;  %v3126_v51 = vld [vmem:[#allocation12 + $0xba8] sm:$0xff]  ;;  %v13445_v59 = vcombine.low %v3130_v58, %v3134_v2 }
 0x36a   :  { %v15943_v35 = vpack.c.bf16 %v2736_v14, %v2732_v21  ;;  %v2737_v23 = vmax.f32 %v2588_v38, 0.0  ;;  %v13438_v6 = vcombine.high %v3122_v3, %v3126_v51  ;;  %v3118_v49 = vld [vmem:[#allocation12 + $0xb68] sm:$0xff]  ;;  %v13437_v21 = vcombine.low %v3122_v3, %v3126_v51 }
 0x36b   :  { %v13430_v14 = vcombine.high %v3114_v8, %v3118_v49  ;;  %v3106_v38 = vld [vmem:[#allocation12 + $0xb08] sm:$0xff] }
 0x36c   :  { %v15945_v28 = vpack.c.bf16 %v2737_v23, %v2733_v19  ;;  %4634 = vmatpush1.bf16.msra.mxu0 %v13373_v29  ;;  %v3110_v29 = vld [vmem:[#allocation12 + $0xb28] sm:$0xff] }
 0x36d   :  { %4635 = vmatprep.subr.bf16.mxu0 %v13366_v11  ;;  %v13429_v11 = vcombine.low %v3114_v8, %v3118_v49  ;;  %v13422_v19 = vcombine.high %v3106_v38, %v3110_v29  ;;  %v3098_v23 = vld [vmem:[#allocation12 + $0xac8] sm:$0xff]  ;;  %v13421_v50 = vcombine.low %v3106_v38, %v3110_v29  ;;  %v2635_v8 = vadd.f32 %v15908_v15, %v15890_v52 }
 0x36e   :  { %v3102_v20 = vld [vmem:[#allocation12 + $0xae8] sm:$0xff] }
 0x36f   :  { %v3090_v12 = vld [vmem:[#allocation12 + $0xa88] sm:$0xff]  ;;  %v13413_v56 = vcombine.low %v3098_v23, %v3102_v20 }
 0x370   :  { %4636 = vmatpush1.bf16.msra.mxu0 %v13365_v32  ;;  %v3082_v25 = vld [vmem:[#allocation12 + $0xa48] sm:$0xff] }
 0x371   :  { %4637 = vmatprep.subr.bf16.mxu0 %v13358_v16  ;;  %v13414_v16 = vcombine.high %v3098_v23, %v3102_v20  ;;  %v3078_v3 = vld [vmem:[#allocation12 + $0xa28] sm:$0xff] }
 0x374   :  { %4638 = vmatpush1.bf16.msra.mxu0 %v13357_v13  ;;  %v3094_v13 = vld [vmem:[#allocation12 + $0xaa8] sm:$0xff] }
 0x375   :  { %4639 = vmatprep.subr.bf16.mxu0 %v13350_v18 }
 0x378   :  { %4640 = vmatpush1.bf16.msra.mxu0 %v13349_v57 }
 0x379   :  { %4641 = vmatprep.subr.bf16.mxu0 %v13342_v48  ;;  %v13406_v48 = vcombine.high %v3090_v12, %v3094_v13 }
 0x37c   :  { %4642 = vmatpush1.bf16.msra.mxu0 %v13341_v0  ;;  %v3086_v0 = vld [vmem:[#allocation12 + $0xa68] sm:$0xff] }
 0x37d   :  { %4643 = vmatprep.subr.bf16.mxu0 %v13334_v10  ;;  %v13398_v58 = vcombine.high %v3082_v25, %v3086_v0 }
 0x380   :  { %4644 = vmatpush1.bf16.msra.mxu0 %v13333_v24 }
 0x381   :  { %4645 = vmatprep.subr.bf16.mxu0 %v13326_v55 }
 0x384   :  { %4646 = vmatpush1.bf16.msra.mxu0 %v13325_v62 }
 0x385   :  { %4647 = vmatprep.subr.bf16.mxu0 %v13446_v22  ;;  %v3074_v22 = vld [vmem:[#allocation12 + $0xa08] sm:$0xff] }
 0x386   :  { %v13389_v20 = vcombine.low %v3074_v22, %v3078_v3 }
 0x388   :  { %4648 = vmatpush2.bf16.msra.mxu0 %v13445_v59  ;;  %v2639_v59 = vadd.f32 %v15919_v31, %v15890_v52 }
 0x389   :  { %4649 = vmatprep.subr.bf16.mxu0 %v13438_v6 }
 0x38c   :  { %4650 = vmatpush2.bf16.msra.mxu0 %v13437_v21  ;;  %v13390_v21 = vcombine.high %v3074_v22, %v3078_v3 }
 0x38d   :  { %4651 = vmatprep.subr.bf16.mxu0 %v13430_v14  ;;  %v2641_v14 = vadd.f32 %v15922_v9, %v15894_v17 }
 0x390   :  { %4652 = vmatpush2.bf16.msra.mxu0 %v13429_v11  ;;  %v3067_v11 = vld [vmem:[#allocation12 + $0x9d0] sm:$0xff] }
 0x391   :  { %v2687_v32 = vpop.f32.mrf.mxu1  ;;  %4653 = vmatprep.subr.bf16.mxu0 %v13422_v19 }
 0x392   :  { %v2688_v4 = vadd.f32 %v2687_v32, %v15897_v60  ;;  %v13405_v60 = vcombine.low %v3090_v12, %v3094_v13  ;;  %v3186_v12 = vld [vmem:[#allocation12 + $0xd88] sm:$0xff] }
 0x393   :  { %v2689_v18 = vpop.f32.mrf.mxu1 }
 0x394   :  { %v2690_v34 = vadd.f32 %v2689_v18, %v15900_v53  ;;  %4654 = vmatpush2.bf16.msra.mxu0 %v13421_v50  ;;  %v2718_v45 = vmax.f32 %v2688_v4, 0.0  ;;  %v3190_v18 = vld [vmem:[#allocation12 + $0xda8] sm:$0xff] }
 0x395   :  { %v2691_v57 = vpop.f32.mrf.mxu1  ;;  %4655 = vmatprep.subr.bf16.mxu0 %v13414_v16 }
 0x396   :  { %v2692_v44 = vadd.f32 %v2691_v57, %v15903_v5  ;;  %v2719_v53 = vmax.f32 %v2690_v34, 0.0  ;;  %v2637_v5 = vadd.f32 %v15912_v46, %v15894_v17  ;;  %v3071_v46 = vld [vmem:[#allocation12 + $0x9f0] sm:$0xff] }
 0x397   :  { %v2693_v10 = vpop.f32.mrf.mxu1  ;;  %v13384_v16 = vcombine.high %v3067_v11, %v3071_v46  ;;  %v3059_v34 = vld [vmem:[#allocation12 + $0x990] sm:$0xff] }
 0x398   :  { %v2722_v54 = vmax.f32 %v2692_v44, 0.0  ;;  %v2694_v24 = vadd.f32 %v2693_v10, %v15906_v27  ;;  %4656 = vmatpush2.bf16.msra.mxu0 %v13413_v56  ;;  %v13397_v27 = vcombine.low %v3082_v25, %v3086_v0  ;;  %v3063_v56 = vld [vmem:[#allocation12 + $0x9b0] sm:$0xff]  ;;  %v13383_v25 = vcombine.low %v3067_v11, %v3071_v46 }
 0x399   :  { %v2697_v55 = vpop.f32.mrf.mxu1  ;;  %4657 = vmatprep.subr.bf16.mxu0 %v13406_v48  ;;  %v13376_v10 = vcombine.high %v3059_v34, %v3063_v56 }
 0x39a   :  { %v15951_v2 = vpack.c.bf16 %v2722_v54, %v2718_v45  ;;  %v2723_v62 = vmax.f32 %v2694_v24, 0.0  ;;  %v2698_v19 = vadd.f32 %v2697_v55, %v2635_v8  ;;  %v3178_v45 = vld [vmem:[#allocation12 + $0xd48] sm:$0xff]  ;;  %v3051_v24 = vld [vmem:[#allocation12 + $0x950] sm:$0xff] }
 0x39b   :  { %v2699_v51 = vpop.f32.mrf.mxu1  ;;  %v3182_v54 = vld [vmem:[#allocation12 + $0xd68] sm:$0xff] }
 0x39c   :  { %v15957_v6 = vpack.c.bf16 %v2723_v62, %v2719_v53  ;;  %4658 = vmatpush2.bf16.msra.mxu0 %v13405_v60  ;;  %v2700_v38 = vadd.f32 %v2699_v51, %v2637_v5  ;;  %v2726_v13 = vmax.f32 %v2698_v19, 0.0  ;;  %v3055_v60 = vld [vmem:[#allocation12 + $0x970] sm:$0xff]  ;;  %v13375_v53 = vcombine.low %v3059_v34, %v3063_v56  ;;  %v3170_v51 = vld [vmem:[#allocation12 + $0xd08] sm:$0xff] }
 0x39d   :  { %v2701_v49 = vpop.f32.mrf.mxu1  ;;  %4659 = vmatprep.subr.bf16.mxu0 %v13398_v58  ;;  %v13494_v62 = vcombine.high %v3178_v45, %v3182_v54  ;;  %v13368_v3 = vcombine.high %v3051_v24, %v3055_v60  ;;  %v3174_v5 = vld [vmem:[#allocation12 + $0xd28] sm:$0xff]  ;;  %v13493_v36 = vcombine.low %v3178_v45, %v3182_v54  ;;  %v13367_v37 = vcombine.low %v3051_v24, %v3055_v60  ;;  %v3015_v45 = vld [vmem:[#allocation12 + $0x830] sm:$0xff] }
 0x39e   :  { %v2702_v29 = vadd.f32 %v2701_v49, %v2639_v59  ;;  %v2727_v52 = vmax.f32 %v2700_v38, 0.0  ;;  %v3043_v59 = vld [vmem:[#allocation12 + $0x910] sm:$0xff]  ;;  %v3162_v49 = vld [vmem:[#allocation12 + $0xcc8] sm:$0xff] }
 0x39f   :  { %v2703_v23 = vpop.f32.mrf.mxu1  ;;  %v3039_v38 = vld [vmem:[#allocation12 + $0x8f0] sm:$0xff] }
 0x3a0   :  { %v2704_v31 = vadd.f32 %v2703_v23, %v2641_v14  ;;  %4660 = vmatpush2.bf16.msra.mxu0 %v13397_v27  ;;  %v2730_v50 = vmax.f32 %v2702_v29, 0.0  ;;  %v3047_v27 = vld [vmem:[#allocation12 + $0x930] sm:$0xff]  ;;  %v13485_v29 = vcombine.low %v3170_v51, %v3174_v5  ;;  %v3154_v23 = vld [vmem:[#allocation12 + $0xc88] sm:$0xff] }
 0x3a1   :  { %v2707_v32 = vpop.f32.mrf.mxu1  ;;  %4661 = vmatprep.subr.bf16.mxu0 %v13390_v21  ;;  %v13360_v8 = vcombine.high %v3043_v59, %v3047_v27  ;;  %v3166_v21 = vld [vmem:[#allocation12 + $0xce8] sm:$0xff]  ;;  %v3035_v14 = vld [vmem:[#allocation12 + $0x8d0] sm:$0xff]  ;;  %v13359_v11 = vcombine.low %v3043_v59, %v3047_v27 }
 0x3a2   :  { %v2731_v15 = vmax.f32 %v2704_v31, 0.0  ;;  %v2708_v4 = vadd.f32 %v2707_v32, %v15925_v1  ;;  %v15968_v48 = vpack.c.bf16 %v2730_v50, %v2726_v13  ;;  %v13502_v1 = vcombine.high %v3186_v12, %v3190_v18  ;;  %v3158_v31 = vld [vmem:[#allocation12 + $0xca8] sm:$0xff]  ;;  %v3031_v50 = vld [vmem:[#allocation12 + $0x8b0] sm:$0xff] }
 0x3a3   :  { %v15964_v9 = vpop.f32.mrf.mxu1  ;;  %v13478_v46 = vcombine.high %v3162_v49, %v3166_v21  ;;  %v13352_v19 = vcombine.high %v3035_v14, %v3039_v38  ;;  %v13477_v32 = vcombine.low %v3162_v49, %v3166_v21  ;;  %v3019_v13 = vld [vmem:[#allocation12 + $0x850] sm:$0xff]  ;;  %v13469_v34 = vcombine.low %v3154_v23, %v3158_v31  ;;  %v3250_v27 = vld [vmem:[#allocation12 + $0xf88] sm:$0xff] }
 0x3a4   :  { %v15966_v57 = vpack.c.bf16 %v2731_v15, %v2727_v52  ;;  %4662 = vmatpush2.bf16.msra.mxu0 %v13389_v20  ;;  %v2734_v55 = vmax.f32 %v2708_v4, 0.0  ;;  %v3027_v20 = vld [vmem:[#allocation12 + $0x890] sm:$0xff]  ;;  %v13470_v52 = vcombine.high %v3154_v23, %v3158_v31  ;;  %v3146_v4 = vld [vmem:[#allocation12 + $0xc48] sm:$0xff] }
 0x3a5   :  { %v2711_v44 = vpop.f32.mrf.mxu1  ;;  %4717 = vmatprep.subr.bf16.mxu0 %v13384_v16  ;;  %v13351_v16 = vcombine.low %v3035_v14, %v3039_v38  ;;  %v13344_v15 = vcombine.high %v3027_v20, %v3031_v50  ;;  %v13343_v56 = vcombine.low %v3027_v20, %v3031_v50  ;;  %v3242_v38 = vld [vmem:[#allocation12 + $0xf48] sm:$0xff] }
 0x3a6   :  { %v2712_v0 = vadd.f32 %v2711_v44, %v15934_v47  ;;  %4620 = vmatprep.mubr.bf16.mxu1 %v15966_v57  ;;  %v13501_v47 = vcombine.low %v3186_v12, %v3190_v18  ;;  %v3150_v12 = vld [vmem:[#allocation12 + $0xc68] sm:$0xff]  ;;  %v3023_v18 = vld [vmem:[#allocation12 + $0x870] sm:$0xff] }
 0x3a7   :  { %4621 = vmatmul.mubr.bf16.vlgmr.msra.gmra.mxu1 %v15968_v48  ;;  %4664 = vmatmul.mubr.bf16.vlgmr.msra.gmra.mxu0 %v15931_v63  ;;  %v13462_v44 = vcombine.high %v3146_v4, %v3150_v12  ;;  %v13461_v54 = vcombine.low %v3146_v4, %v3150_v12  ;;  %v13335_v24 = vcombine.low %v3019_v13, %v3023_v18  ;;  %v3234_v50 = vld [vmem:[#allocation12 + $0xf08] sm:$0xff] }
 0x3a8   :  { %v2738_v58 = vmax.f32 %v2712_v0, 0.0  ;;  %4675 = vmatpush1.bf16.msra.mxu1 %v13509_v30  ;;  %4706 = vmatprep.mubr.bf16.mxu1 %v15966_v57  ;;  %v13486_v30 = vcombine.high %v3170_v51, %v3174_v5  ;;  %v3138_v0 = vld [vmem:[#allocation12 + $0xc08] sm:$0xff] }
 0x3a9   :  { %4718 = vmatpush1.bf16.msra.mxu0 %v13383_v25  ;;  %4749 = vmatprep.mubr.bf16.mxu0 %v15929_v61  ;;  %v13336_v25 = vcombine.high %v3019_v13, %v3023_v18  ;;  %v3226_v18 = vld [vmem:[#allocation12 + $0xec8] sm:$0xff] }
 0x3aa   :  { %v15979_v22 = vpack.c.bf16 %v2738_v58, %v2734_v55  ;;  %4676 = vmatprep.subr.bf16.mxu1 %v13502_v1  ;;  %4719 = vmatprep.subr.bf16.mxu0 %v13376_v10  ;;  %v3142_v1 = vld [vmem:[#allocation12 + $0xc28] sm:$0xff]  ;;  %v3011_v10 = vld [vmem:[#allocation12 + $0x810] sm:$0xff] }
 0x3ab   :  { %v13454_v60 = vcombine.high %v3138_v0, %v3142_v1  ;;  %v13328_v55 = vcombine.high %v3011_v10, %v3015_v45  ;;  %v3258_v58 = vld [vmem:[#allocation12 + $0xfc8] sm:$0xff]  ;;  %v13327_v51 = vcombine.low %v3011_v10, %v3015_v45 }
 0x3ac   :  { %4677 = vmatpush1.bf16.msra.mxu1 %v13501_v47  ;;  %v3262_v47 = vld [vmem:[#allocation12 + $0xfe8] sm:$0xff] }
 0x3ad   :  { %4720 = vmatpush1.bf16.msra.mxu0 %v13375_v53  ;;  %4678 = vmatprep.subr.bf16.mxu1 %v13494_v62  ;;  %v3131_v53 = vld [vmem:[#allocation12 + $0xbd0] sm:$0xff]  ;;  %v13574_v5 = vcombine.high %v3258_v58, %v3262_v47  ;;  %v3218_v45 = vld [vmem:[#allocation12 + $0xe88] sm:$0xff] }
 0x3ae   :  { %4721 = vmatprep.subr.bf16.mxu0 %v13368_v3  ;;  %v3135_v62 = vld [vmem:[#allocation12 + $0xbf0] sm:$0xff]  ;;  %v13453_v3 = vcombine.low %v3138_v0, %v3142_v1 }
 0x3af   :  { %v13448_v59 = vcombine.high %v3131_v53, %v3135_v62  ;;  %v13447_v49 = vcombine.low %v3131_v53, %v3135_v62  ;;  %v3210_v62 = vld [vmem:[#allocation12 + $0xe48] sm:$0xff] }
 0x3b0   :  { %4679 = vmatpush1.bf16.msra.mxu1 %v13493_v36  ;;  %v3254_v36 = vld [vmem:[#allocation12 + $0xfa8] sm:$0xff] }
 0x3b1   :  { %4722 = vmatpush1.bf16.msra.mxu0 %v13367_v37  ;;  %4680 = vmatprep.subr.bf16.mxu1 %v13486_v30  ;;  %v3123_v37 = vld [vmem:[#allocation12 + $0xb90] sm:$0xff]  ;;  %v13566_v21 = vcombine.high %v3250_v27, %v3254_v36 }
 0x3b2   :  { %4723 = vmatprep.subr.bf16.mxu0 %v13360_v8  ;;  %v3127_v30 = vld [vmem:[#allocation12 + $0xbb0] sm:$0xff]  ;;  %v13573_v8 = vcombine.low %v3258_v58, %v3262_v47 }
 0x3b3   :  { %v13440_v14 = vcombine.high %v3123_v37, %v3127_v30  ;;  %v13439_v23 = vcombine.low %v3123_v37, %v3127_v30  ;;  %v3202_v30 = vld [vmem:[#allocation12 + $0xe08] sm:$0xff] }
 0x3b4   :  { %4681 = vmatpush1.bf16.msra.mxu1 %v13485_v29  ;;  %v3246_v29 = vld [vmem:[#allocation12 + $0xf68] sm:$0xff] }
 0x3b5   :  { %4724 = vmatpush1.bf16.msra.mxu0 %v13359_v11  ;;  %4682 = vmatprep.subr.bf16.mxu1 %v13478_v46  ;;  %v3115_v11 = vld [vmem:[#allocation12 + $0xb50] sm:$0xff]  ;;  %v13558_v31 = vcombine.high %v3242_v38, %v3246_v29 }
 0x3b6   :  { %4725 = vmatprep.subr.bf16.mxu0 %v13352_v19  ;;  %v3119_v46 = vld [vmem:[#allocation12 + $0xb70] sm:$0xff]  ;;  %v13565_v19 = vcombine.low %v3250_v27, %v3254_v36 }
 0x3b7   :  { %v13432_v20 = vcombine.high %v3115_v11, %v3119_v46  ;;  %v13431_v4 = vcombine.low %v3115_v11, %v3119_v46  ;;  %v3195_v46 = vld [vmem:[#allocation12 + $0xdd0] sm:$0xff] }
 0x3b8   :  { %4683 = vmatpush1.bf16.msra.mxu1 %v13477_v32  ;;  %v3238_v32 = vld [vmem:[#allocation12 + $0xf28] sm:$0xff] }
 0x3b9   :  { %4726 = vmatpush1.bf16.msra.mxu0 %v13351_v16  ;;  %4684 = vmatprep.subr.bf16.mxu1 %v13470_v52  ;;  %v3107_v16 = vld [vmem:[#allocation12 + $0xb10] sm:$0xff]  ;;  %v13550_v12 = vcombine.high %v3234_v50, %v3238_v32 }
 0x3ba   :  { %4727 = vmatprep.subr.bf16.mxu0 %v13344_v15  ;;  %v3111_v52 = vld [vmem:[#allocation12 + $0xb30] sm:$0xff]  ;;  %v13557_v15 = vcombine.low %v3242_v38, %v3246_v29 }
 0x3bb   :  { %v13424_v13 = vcombine.high %v3107_v16, %v3111_v52  ;;  %v13423_v0 = vcombine.low %v3107_v16, %v3111_v52  ;;  %v3187_v52 = vld [vmem:[#allocation12 + $0xd90] sm:$0xff] }
 0x3bc   :  { %4685 = vmatpush1.bf16.msra.mxu1 %v13469_v34  ;;  %v3230_v34 = vld [vmem:[#allocation12 + $0xee8] sm:$0xff] }
 0x3bd   :  { %4728 = vmatpush1.bf16.msra.mxu0 %v13343_v56  ;;  %4686 = vmatprep.subr.bf16.mxu1 %v13462_v44  ;;  %v3099_v56 = vld [vmem:[#allocation12 + $0xad0] sm:$0xff]  ;;  %v13542_v1 = vcombine.high %v3226_v18, %v3230_v34 }
 0x3be   :  { %4729 = vmatprep.subr.bf16.mxu0 %v13336_v25  ;;  %v3103_v44 = vld [vmem:[#allocation12 + $0xaf0] sm:$0xff]  ;;  %v13549_v25 = vcombine.low %v3234_v50, %v3238_v32 }
 0x3bf   :  { %v13416_v10 = vcombine.high %v3099_v56, %v3103_v44  ;;  %v13415_v58 = vcombine.low %v3099_v56, %v3103_v44  ;;  %v3179_v56 = vld [vmem:[#allocation12 + $0xd50] sm:$0xff] }
 0x3c0   :  { %4687 = vmatpush1.bf16.msra.mxu1 %v13461_v54  ;;  %v3222_v54 = vld [vmem:[#allocation12 + $0xea8] sm:$0xff]  ;;  %v3183_v44 = vld [vmem:[#allocation12 + $0xd70] sm:$0xff] }
 0x3c1   :  { %4730 = vmatpush1.bf16.msra.mxu0 %v13335_v24  ;;  %4688 = vmatprep.subr.bf16.mxu1 %v13454_v60  ;;  %v3091_v24 = vld [vmem:[#allocation12 + $0xa90] sm:$0xff]  ;;  %v13534_v47 = vcombine.high %v3218_v45, %v3222_v54 }
 0x3c2   :  { %4731 = vmatprep.subr.bf16.mxu0 %v13328_v55  ;;  %v3095_v60 = vld [vmem:[#allocation12 + $0xab0] sm:$0xff]  ;;  %v13541_v55 = vcombine.low %v3226_v18, %v3230_v34 }
 0x3c3   :  { %v13408_v53 = vcombine.high %v3091_v24, %v3095_v60  ;;  %v13407_v27 = vcombine.low %v3091_v24, %v3095_v60  ;;  %v3171_v60 = vld [vmem:[#allocation12 + $0xd10] sm:$0xff] }
 0x3c4   :  { %4689 = vmatpush1.bf16.msra.mxu1 %v13453_v3  ;;  %v3214_v3 = vld [vmem:[#allocation12 + $0xe68] sm:$0xff] }
 0x3c5   :  { %4732 = vmatpush1.bf16.msra.mxu0 %v13327_v51  ;;  %4690 = vmatprep.subr.bf16.mxu1 %v13574_v5  ;;  %v3083_v51 = vld [vmem:[#allocation12 + $0xa50] sm:$0xff]  ;;  %v13526_v36 = vcombine.high %v3210_v62, %v3214_v3 }
 0x3c6   :  { %4733 = vmatprep.subr.bf16.mxu0 %v13448_v59  ;;  %v3087_v5 = vld [vmem:[#allocation12 + $0xa70] sm:$0xff]  ;;  %v13533_v59 = vcombine.low %v3218_v45, %v3222_v54  ;;  %v13496_v54 = vcombine.high %v3179_v56, %v3183_v44 }
 0x3c7   :  { %v13400_v37 = vcombine.high %v3083_v51, %v3087_v5  ;;  %v13399_v38 = vcombine.low %v3083_v51, %v3087_v5  ;;  %v3163_v5 = vld [vmem:[#allocation12 + $0xcd0] sm:$0xff] }
 0x3c8   :  { %4691 = vmatpush2.bf16.msra.mxu1 %v13573_v8  ;;  %v3206_v8 = vld [vmem:[#allocation12 + $0xe28] sm:$0xff] }
 0x3c9   :  { %4734 = vmatpush2.bf16.msra.mxu0 %v13447_v49  ;;  %4692 = vmatprep.subr.bf16.mxu1 %v13566_v21  ;;  %v3075_v49 = vld [vmem:[#allocation12 + $0xa10] sm:$0xff]  ;;  %v13518_v29 = vcombine.high %v3202_v30, %v3206_v8 }
 0x3ca   :  { %4735 = vmatprep.subr.bf16.mxu0 %v13440_v14  ;;  %v3079_v21 = vld [vmem:[#allocation12 + $0xa30] sm:$0xff]  ;;  %v13525_v14 = vcombine.low %v3210_v62, %v3214_v3 }
 0x3cb   :  { %v13392_v11 = vcombine.high %v3075_v49, %v3079_v21  ;;  %v13391_v50 = vcombine.low %v3075_v49, %v3079_v21  ;;  %v3155_v49 = vld [vmem:[#allocation12 + $0xc90] sm:$0xff] }
 0x3cc   :  { %4693 = vmatpush2.bf16.msra.mxu1 %v13565_v19  ;;  %v3199_v19 = vld [vmem:[#allocation12 + $0xdf0] sm:$0xff] }
 0x3cd   :  { %4736 = vmatpush2.bf16.msra.mxu0 %v13439_v23  ;;  %4694 = vmatprep.subr.bf16.mxu1 %v13558_v31  ;;  %v3068_v23 = vld [vmem:[#allocation12 + $0x9d8] sm:$0xff]  ;;  %v13512_v32 = vcombine.high %v3195_v46, %v3199_v19  ;;  %v3159_v21 = vld [vmem:[#allocation12 + $0xcb0] sm:$0xff] }
 0x3ce   :  { %4737 = vmatprep.subr.bf16.mxu0 %v13432_v20  ;;  %v3072_v31 = vld [vmem:[#allocation12 + $0x9f8] sm:$0xff]  ;;  %v13517_v20 = vcombine.low %v3202_v30, %v3206_v8 }
 0x3cf   :  { %v13386_v16 = vcombine.high %v3068_v23, %v3072_v31  ;;  %v13385_v18 = vcombine.low %v3068_v23, %v3072_v31  ;;  %v3147_v23 = vld [vmem:[#allocation12 + $0xc50] sm:$0xff] }
 0x3d0   :  { %4695 = vmatpush2.bf16.msra.mxu1 %v13557_v15  ;;  %v3191_v15 = vld [vmem:[#allocation12 + $0xdb0] sm:$0xff] }
 0x3d1   :  { %4738 = vmatpush2.bf16.msra.mxu0 %v13431_v4  ;;  %4696 = vmatprep.subr.bf16.mxu1 %v13550_v12  ;;  %v13511_v4 = vcombine.low %v3195_v46, %v3199_v19  ;;  %v3060_v12 = vld [vmem:[#allocation12 + $0x998] sm:$0xff]  ;;  %v13504_v34 = vcombine.high %v3187_v52, %v3191_v15  ;;  %v13472_v46 = vcombine.high %v3155_v49, %v3159_v21  ;;  %v3151_v31 = vld [vmem:[#allocation12 + $0xc70] sm:$0xff] }
 0x3d2   :  { %4739 = vmatprep.subr.bf16.mxu0 %v13424_v13  ;;  %v3064_v13 = vld [vmem:[#allocation12 + $0x9b8] sm:$0xff] }
 0x3d3   :  { %v13377_v45 = vcombine.low %v3060_v12, %v3064_v13 }
 0x3d4   :  { %4697 = vmatpush2.bf16.msra.mxu1 %v13549_v25  ;;  %v13378_v25 = vcombine.high %v3060_v12, %v3064_v13  ;;  %v3143_v12 = vld [vmem:[#allocation12 + $0xc30] sm:$0xff]  ;;  %v3012_v13 = vld [vmem:[#allocation12 + $0x818] sm:$0xff] }
 0x3d5   :  { %4740 = vmatpush2.bf16.msra.mxu0 %v13423_v0  ;;  %4698 = vmatprep.subr.bf16.mxu1 %v13542_v1  ;;  %v3052_v0 = vld [vmem:[#allocation12 + $0x958] sm:$0xff] }
 0x3d6   :  { %4741 = vmatprep.subr.bf16.mxu0 %v13416_v10  ;;  %v3056_v1 = vld [vmem:[#allocation12 + $0x978] sm:$0xff]  ;;  %v13503_v10 = vcombine.low %v3187_v52, %v3191_v15  ;;  %v13464_v52 = vcombine.high %v3147_v23, %v3151_v31 }
 0x3d7   :  { %v13370_v24 = vcombine.high %v3052_v0, %v3056_v1  ;;  %v13369_v62 = vcombine.low %v3052_v0, %v3056_v1  ;;  %v3259_v0 = vld [vmem:[#allocation12 + $0xfd0] sm:$0xff] }
 0x3d8   :  { %4699 = vmatpush2.bf16.msra.mxu1 %v13541_v55  ;;  %v3175_v55 = vld [vmem:[#allocation12 + $0xd30] sm:$0xff] }
 0x3d9   :  { %4742 = vmatpush2.bf16.msra.mxu0 %v13415_v58  ;;  %4700 = vmatprep.subr.bf16.mxu1 %v13534_v47  ;;  %v3044_v58 = vld [vmem:[#allocation12 + $0x918] sm:$0xff]  ;;  %v13488_v3 = vcombine.high %v3171_v60, %v3175_v55  ;;  %v3263_v1 = vld [vmem:[#allocation12 + $0xff0] sm:$0xff] }
 0x3da   :  { %4743 = vmatprep.subr.bf16.mxu0 %v13408_v53  ;;  %v3048_v47 = vld [vmem:[#allocation12 + $0x938] sm:$0xff]  ;;  %v13495_v53 = vcombine.low %v3179_v56, %v3183_v44 }
 0x3db   :  { %v13362_v51 = vcombine.high %v3044_v58, %v3048_v47 }
 0x3dc   :  { %4701 = vmatpush2.bf16.msra.mxu1 %v13533_v59  ;;  %v3167_v59 = vld [vmem:[#allocation12 + $0xcf0] sm:$0xff] }
 0x3dd   :  { %4744 = vmatpush2.bf16.msra.mxu0 %v13407_v27  ;;  %4702 = vmatprep.subr.bf16.mxu1 %v13526_v36  ;;  %v3036_v27 = vld [vmem:[#allocation12 + $0x8d8] sm:$0xff]  ;;  %v13480_v30 = vcombine.high %v3163_v5, %v3167_v59 }
 0x3de   :  { %4745 = vmatprep.subr.bf16.mxu0 %v13400_v37  ;;  %v3040_v36 = vld [vmem:[#allocation12 + $0x8f8] sm:$0xff]  ;;  %v13361_v37 = vcombine.low %v3044_v58, %v3048_v47  ;;  %v3251_v58 = vld [vmem:[#allocation12 + $0xf90] sm:$0xff] }
 0x3df   :  { %v13354_v8 = vcombine.high %v3036_v27, %v3040_v36  ;;  %v3255_v47 = vld [vmem:[#allocation12 + $0xfb0] sm:$0xff] }
 0x3e0   :  { %4703 = vmatpush2.bf16.msra.mxu1 %v13525_v14  ;;  %v3028_v14 = vld [vmem:[#allocation12 + $0x898] sm:$0xff] }
 0x3e1   :  { %4746 = vmatpush2.bf16.msra.mxu0 %v13399_v38  ;;  %4704 = vmatprep.subr.bf16.mxu1 %v13518_v29  ;;  %v3032_v38 = vld [vmem:[#allocation12 + $0x8b8] sm:$0xff]  ;;  %v13479_v29 = vcombine.low %v3163_v5, %v3167_v59  ;;  %v13568_v5 = vcombine.high %v3251_v58, %v3255_v47 }
 0x3e2   :  { %4747 = vmatprep.subr.bf16.mxu0 %v13392_v11  ;;  %v13353_v11 = vcombine.low %v3036_v27, %v3040_v36  ;;  %v13346_v19 = vcombine.high %v3028_v14, %v3032_v38  ;;  %v3243_v27 = vld [vmem:[#allocation12 + $0xf50] sm:$0xff] }
 0x3e3   :  { %v3247_v36 = vld [vmem:[#allocation12 + $0xf70] sm:$0xff] }
 0x3e4   :  { %4705 = vmatpush2.bf16.msra.mxu1 %v13517_v20  ;;  %v3020_v20 = vld [vmem:[#allocation12 + $0x858] sm:$0xff] }
 0x3e5   :  { %4748 = vmatpush2.bf16.msra.mxu0 %v13391_v50  ;;  %4760 = vmatprep.subr.bf16.mxu1 %v13512_v32  ;;  %v3024_v50 = vld [vmem:[#allocation12 + $0x878] sm:$0xff]  ;;  %v13471_v32 = vcombine.low %v3155_v49, %v3159_v21  ;;  %v13560_v49 = vcombine.high %v3243_v27, %v3247_v36 }
 0x3e6   :  { %4803 = vmatprep.subr.bf16.mxu0 %v13386_v16  ;;  %v13345_v16 = vcombine.low %v3028_v14, %v3032_v38  ;;  %v13338_v15 = vcombine.high %v3020_v20, %v3024_v50  ;;  %v13337_v56 = vcombine.low %v3020_v20, %v3024_v50  ;;  %v3235_v14 = vld [vmem:[#allocation12 + $0xf10] sm:$0xff] }
 0x3e7   :  { %4707 = vmatmul.mubr.bf16.vlgmr.msra.gmra.mxu1 %v15968_v48  ;;  %v3239_v38 = vld [vmem:[#allocation12 + $0xf30] sm:$0xff] }
 0x3e8   :  { %4750 = vmatmul.mubr.bf16.vlgmr.msra.gmra.mxu0 %v15931_v63  ;;  %4761 = vmatpush1.bf16.msra.mxu1 %v13511_v4  ;;  %v3139_v4 = vld [vmem:[#allocation12 + $0xc10] sm:$0xff] }
 0x3e9   :  { %4792 = vmatprep.mubr.bf16.mxu1 %v15966_v57  ;;  %4804 = vmatpush1.bf16.msra.mxu0 %v13385_v18  ;;  %v3016_v18 = vld [vmem:[#allocation12 + $0x838] sm:$0xff]  ;;  %v13456_v44 = vcombine.high %v3139_v4, %v3143_v12  ;;  %v3227_v20 = vld [vmem:[#allocation12 + $0xed0] sm:$0xff] }
 0x3ea   :  { %4835 = vmatprep.mubr.bf16.mxu0 %v15929_v61  ;;  %4762 = vmatprep.subr.bf16.mxu1 %v13504_v34  ;;  %v13487_v61 = vcombine.low %v3171_v60, %v3175_v55  ;;  %v13463_v34 = vcombine.low %v3147_v23, %v3151_v31  ;;  %v13576_v60 = vcombine.high %v3259_v0, %v3263_v1  ;;  %v3231_v50 = vld [vmem:[#allocation12 + $0xef0] sm:$0xff] }
 0x3eb   :  { %4805 = vmatprep.subr.bf16.mxu0 %v13378_v25  ;;  %v13330_v25 = vcombine.high %v3012_v13, %v3016_v18  ;;  %v13552_v23 = vcombine.high %v3235_v14, %v3239_v38 }
 0x3ec   :  { %4763 = vmatpush1.bf16.msra.mxu1 %v13503_v10  ;;  %v3132_v10 = vld [vmem:[#allocation12 + $0xbd8] sm:$0xff] }
 0x3ed   :  { %4806 = vmatpush1.bf16.msra.mxu0 %v13377_v45  ;;  %4764 = vmatprep.subr.bf16.mxu1 %v13496_v54  ;;  %v3136_v45 = vld [vmem:[#allocation12 + $0xbf8] sm:$0xff]  ;;  %v13455_v54 = vcombine.low %v3139_v4, %v3143_v12  ;;  %v13544_v4 = vcombine.high %v3227_v20, %v3231_v50 }
 0x3ee   :  { %4807 = vmatprep.subr.bf16.mxu0 %v13370_v24  ;;  %v13329_v24 = vcombine.low %v3012_v13, %v3016_v18  ;;  %v13450_v55 = vcombine.high %v3132_v10, %v3136_v45  ;;  %v3219_v13 = vld [vmem:[#allocation12 + $0xe90] sm:$0xff] }
 0x3ef   :  { %v3223_v18 = vld [vmem:[#allocation12 + $0xeb0] sm:$0xff] }
 0x3f0   :  { %4765 = vmatpush1.bf16.msra.mxu1 %v13495_v53  ;;  %v3124_v53 = vld [vmem:[#allocation12 + $0xb98] sm:$0xff] }
 0x3f1   :  { %4808 = vmatpush1.bf16.msra.mxu0 %v13369_v62  ;;  %4766 = vmatprep.subr.bf16.mxu1 %v13488_v3  ;;  %v3128_v62 = vld [vmem:[#allocation12 + $0xbb8] sm:$0xff]  ;;  %v13575_v3 = vcombine.low %v3259_v0, %v3263_v1  ;;  %v13536_v0 = vcombine.high %v3219_v13, %v3223_v18 }
 0x3f2   :  { %4809 = vmatprep.subr.bf16.mxu0 %v13362_v51  ;;  %v13449_v51 = vcombine.low %v3132_v10, %v3136_v45  ;;  %v13442_v59 = vcombine.high %v3124_v53, %v3128_v62  ;;  %v3211_v10 = vld [vmem:[#allocation12 + $0xe50] sm:$0xff] }
 0x3f3   :  { %v3215_v45 = vld [vmem:[#allocation12 + $0xe70] sm:$0xff] }
 0x3f4   :  { %4767 = vmatpush1.bf16.msra.mxu1 %v13487_v61  ;;  %v3116_v61 = vld [vmem:[#allocation12 + $0xb58] sm:$0xff] }
 0x3f5   :  { %4810 = vmatpush1.bf16.msra.mxu0 %v13361_v37  ;;  %4768 = vmatprep.subr.bf16.mxu1 %v13480_v30  ;;  %v3120_v37 = vld [vmem:[#allocation12 + $0xb78] sm:$0xff]  ;;  %v13567_v30 = vcombine.low %v3251_v58, %v3255_v47  ;;  %v13528_v58 = vcombine.high %v3211_v10, %v3215_v45 }
 0x3f6   :  { %4811 = vmatprep.subr.bf16.mxu0 %v13354_v8  ;;  %v13441_v8 = vcombine.low %v3124_v53, %v3128_v62  ;;  %v13434_v21 = vcombine.high %v3116_v61, %v3120_v37  ;;  %v3203_v53 = vld [vmem:[#allocation12 + $0xe10] sm:$0xff] }
 0x3f7   :  { %v3207_v62 = vld [vmem:[#allocation12 + $0xe30] sm:$0xff] }
 0x3f8   :  { %4769 = vmatpush1.bf16.msra.mxu1 %v13479_v29  ;;  %v3108_v29 = vld [vmem:[#allocation12 + $0xb18] sm:$0xff] }
 0x3f9   :  { %4812 = vmatpush1.bf16.msra.mxu0 %v13353_v11  ;;  %4770 = vmatprep.subr.bf16.mxu1 %v13472_v46  ;;  %v3112_v11 = vld [vmem:[#allocation12 + $0xb38] sm:$0xff]  ;;  %v13559_v46 = vcombine.low %v3243_v27, %v3247_v36  ;;  %v13520_v27 = vcombine.high %v3203_v53, %v3207_v62 }
 0x3fa   :  { %4813 = vmatprep.subr.bf16.mxu0 %v13346_v19  ;;  %v13433_v19 = vcombine.low %v3116_v61, %v3120_v37  ;;  %v13426_v31 = vcombine.high %v3108_v29, %v3112_v11  ;;  %v3196_v61 = vld [vmem:[#allocation12 + $0xdd8] sm:$0xff] }
 0x3fb   :  { %v3200_v37 = vld [vmem:[#allocation12 + $0xdf8] sm:$0xff] }
 0x3fc   :  { %4771 = vmatpush1.bf16.msra.mxu1 %v13471_v32  ;;  %v3100_v32 = vld [vmem:[#allocation12 + $0xad8] sm:$0xff] }
 0x3fd   :  { %4814 = vmatpush1.bf16.msra.mxu0 %v13345_v16  ;;  %4772 = vmatprep.subr.bf16.mxu1 %v13464_v52  ;;  %v3104_v16 = vld [vmem:[#allocation12 + $0xaf8] sm:$0xff]  ;;  %v13551_v52 = vcombine.low %v3235_v14, %v3239_v38  ;;  %v13514_v14 = vcombine.high %v3196_v61, %v3200_v37 }
 0x3fe   :  { %4815 = vmatprep.subr.bf16.mxu0 %v13338_v15  ;;  %v13425_v15 = vcombine.low %v3108_v29, %v3112_v11  ;;  %v13418_v12 = vcombine.high %v3100_v32, %v3104_v16  ;;  %v3188_v29 = vld [vmem:[#allocation12 + $0xd98] sm:$0xff] }
 0x3ff   :  { %v3192_v11 = vld [vmem:[#allocation12 + $0xdb8] sm:$0xff] }
 0x400   :  { %4773 = vmatpush1.bf16.msra.mxu1 %v13463_v34  ;;  %v3092_v34 = vld [vmem:[#allocation12 + $0xa98] sm:$0xff] }
 0x401   :  { %4816 = vmatpush1.bf16.msra.mxu0 %v13337_v56  ;;  %4774 = vmatprep.subr.bf16.mxu1 %v13456_v44  ;;  %v3096_v56 = vld [vmem:[#allocation12 + $0xab8] sm:$0xff]  ;;  %v13543_v44 = vcombine.low %v3227_v20, %v3231_v50  ;;  %v13506_v20 = vcombine.high %v3188_v29, %v3192_v11 }
 0x402   :  { %4817 = vmatprep.subr.bf16.mxu0 %v13330_v25  ;;  %v13417_v25 = vcombine.low %v3100_v32, %v3104_v16  ;;  %v13410_v1 = vcombine.high %v3092_v34, %v3096_v56  ;;  %v3180_v50 = vld [vmem:[#allocation12 + $0xd58] sm:$0xff] }
 0x403   :  { %v3184_v32 = vld [vmem:[#allocation12 + $0xd78] sm:$0xff] }
 0x404   :  { %4775 = vmatpush1.bf16.msra.mxu1 %v13455_v54  ;;  %v3084_v54 = vld [vmem:[#allocation12 + $0xa58] sm:$0xff] }
 0x405   :  { %4818 = vmatpush1.bf16.msra.mxu0 %v13329_v24  ;;  %4776 = vmatprep.subr.bf16.mxu1 %v13576_v60  ;;  %v3088_v24 = vld [vmem:[#allocation12 + $0xa78] sm:$0xff]  ;;  %v13535_v60 = vcombine.low %v3219_v13, %v3223_v18  ;;  %v13498_v13 = vcombine.high %v3180_v50, %v3184_v32 }
 0x406   :  { %4819 = vmatprep.subr.bf16.mxu0 %v13450_v55  ;;  %v13409_v55 = vcombine.low %v3092_v34, %v3096_v56  ;;  %v13402_v47 = vcombine.high %v3084_v54, %v3088_v24  ;;  %v3172_v34 = vld [vmem:[#allocation12 + $0xd18] sm:$0xff] }
 0x407   :  { %v3176_v56 = vld [vmem:[#allocation12 + $0xd38] sm:$0xff] }
 0x408   :  { %4777 = vmatpush2.bf16.msra.mxu1 %v13575_v3  ;;  %v3076_v3 = vld [vmem:[#allocation12 + $0xa18] sm:$0xff] }
 0x409   :  { %4820 = vmatpush2.bf16.msra.mxu0 %v13449_v51  ;;  %4778 = vmatprep.subr.bf16.mxu1 %v13568_v5  ;;  %v3080_v51 = vld [vmem:[#allocation12 + $0xa38] sm:$0xff]  ;;  %v13527_v5 = vcombine.low %v3211_v10, %v3215_v45 }
 0x40a   :  { %4821 = vmatprep.subr.bf16.mxu0 %v13442_v59  ;;  %v13401_v59 = vcombine.low %v3084_v54, %v3088_v24  ;;  %v13394_v36 = vcombine.high %v3076_v3, %v3080_v51  ;;  %v3164_v10 = vld [vmem:[#allocation12 + $0xcd8] sm:$0xff]  ;;  %v2776_v54 = vld [vmem:[#allocation12 + $0xc0] sm:$0xff] }
 0x40b   :  { %v3168_v45 = vld [vmem:[#allocation12 + $0xcf8] sm:$0xff]  ;;  %v2780_v24 = vld [vmem:[#allocation12 + $0xe0] sm:$0xff] }
 0x40c   :  { %4779 = vmatpush2.bf16.msra.mxu1 %v13567_v30  ;;  %v2808_v30 = vld [vmem:[#allocation12 + $0x1c0] sm:$0xff] }
 0x40d   :  { %4822 = vmatpush2.bf16.msra.mxu0 %v13441_v8  ;;  %4780 = vmatprep.subr.bf16.mxu1 %v13560_v49  ;;  %v2812_v8 = vld [vmem:[#allocation12 + $0x1e0] sm:$0xff]  ;;  %v13519_v49 = vcombine.low %v3203_v53, %v3207_v62  ;;  %v3156_v53 = vld [vmem:[#allocation12 + $0xc98] sm:$0xff] }
 0x40e   :  { %4823 = vmatprep.subr.bf16.mxu0 %v13434_v21  ;;  %v13393_v21 = vcombine.low %v3076_v3, %v3080_v51  ;;  %v13636_v38 = vcombine.high %v2808_v30, %v2812_v8  ;;  %v3160_v62 = vld [vmem:[#allocation12 + $0xcb8] sm:$0xff]  ;;  %v2768_v3 = vld [vmem:[#allocation12 + $0x80] sm:$0xff] }
 0x40f   :  { %v2772_v51 = vld [vmem:[#allocation12 + $0xa0] sm:$0xff] }
 0x410   :  { %4781 = vmatpush2.bf16.msra.mxu1 %v13559_v46  ;;  %v13513_v46 = vcombine.low %v3196_v61, %v3200_v37  ;;  %v3148_v61 = vld [vmem:[#allocation12 + $0xc58] sm:$0xff] }
 0x411   :  { %4824 = vmatpush2.bf16.msra.mxu0 %v13433_v19  ;;  %4782 = vmatprep.subr.bf16.mxu1 %v13552_v23  ;;  %v2800_v19 = vld [vmem:[#allocation12 + $0x180] sm:$0xff]  ;;  %v3152_v37 = vld [vmem:[#allocation12 + $0xc78] sm:$0xff] }
 0x412   :  { %4825 = vmatprep.subr.bf16.mxu0 %v13426_v31  ;;  %v2804_v23 = vld [vmem:[#allocation12 + $0x1a0] sm:$0xff]  ;;  %v13635_v31 = vcombine.low %v2808_v30, %v2812_v8 }
 0x413   :  { %v13628_v16 = vcombine.high %v2800_v19, %v2804_v23  ;;  %v2760_v30 = vld [vmem:[#allocation12 + $0x40] sm:$0xff] }
 0x414   :  { %4783 = vmatpush2.bf16.msra.mxu1 %v13551_v52  ;;  %v2792_v52 = vld [vmem:[#allocation12 + $0x140] sm:$0xff] }
 0x415   :  { %4826 = vmatpush2.bf16.msra.mxu0 %v13425_v15  ;;  %4784 = vmatprep.subr.bf16.mxu1 %v13544_v4  ;;  %v2796_v15 = vld [vmem:[#allocation12 + $0x160] sm:$0xff]  ;;  %v13505_v4 = vcombine.low %v3188_v29, %v3192_v11  ;;  %v3140_v29 = vld [vmem:[#allocation12 + $0xc18] sm:$0xff] }
 0x416   :  { %4827 = vmatprep.subr.bf16.mxu0 %v13418_v12  ;;  %v13627_v12 = vcombine.low %v2800_v19, %v2804_v23  ;;  %v13620_v18 = vcombine.high %v2792_v52, %v2796_v15  ;;  %v2764_v8 = vld [vmem:[#allocation12 + $0x60] sm:$0xff]  ;;  %v3144_v11 = vld [vmem:[#allocation12 + $0xc38] sm:$0xff]  ;;  %v13465_v23 = vcombine.low %v3148_v61, %v3152_v37 }
 0x417   :  { %v2756_v19 = vld [vmem:[#allocation12 + $0x20] sm:$0xff] }
 0x418   :  { %4785 = vmatpush2.bf16.msra.mxu1 %v13543_v44  ;;  %v2784_v44 = vld [vmem:[#allocation12 + $0x100] sm:$0xff] }
 0x419   :  { %4828 = vmatpush2.bf16.msra.mxu0 %v13417_v25  ;;  %4786 = vmatprep.subr.bf16.mxu1 %v13536_v0  ;;  %v2788_v25 = vld [vmem:[#allocation12 + $0x120] sm:$0xff]  ;;  %v13497_v0 = vcombine.low %v3180_v50, %v3184_v32  ;;  %v3260_v32 = vld [vmem:[#allocation12 + $0xfd8] sm:$0xff] }
 0x41a   :  { %4829 = vmatprep.subr.bf16.mxu0 %v13410_v1  ;;  %v13490_v1 = vcombine.high %v3172_v34, %v3176_v56 }
 0x41c   :  { %4787 = vmatpush2.bf16.msra.mxu1 %v13535_v60  ;;  %v13489_v60 = vcombine.low %v3172_v34, %v3176_v56  ;;  %v3252_v34 = vld [vmem:[#allocation12 + $0xf98] sm:$0xff] }
 0x41d   :  { %4830 = vmatpush2.bf16.msra.mxu0 %v13409_v55  ;;  %4788 = vmatprep.subr.bf16.mxu1 %v13528_v58  ;;  %v13611_v55 = vcombine.low %v2784_v44, %v2788_v25  ;;  %v13482_v58 = vcombine.high %v3164_v10, %v3168_v45  ;;  %v3256_v56 = vld [vmem:[#allocation12 + $0xfb8] sm:$0xff] }
 0x41e   :  { %4831 = vmatprep.subr.bf16.mxu0 %v13402_v47  ;;  %v13604_v47 = vcombine.high %v2776_v54, %v2780_v24 }
 0x420   :  { %4789 = vmatpush2.bf16.msra.mxu1 %v13527_v5  ;;  %v13481_v5 = vcombine.low %v3164_v10, %v3168_v45  ;;  %v3244_v10 = vld [vmem:[#allocation12 + $0xf58] sm:$0xff] }
 0x421   :  { %4832 = vmatpush2.bf16.msra.mxu0 %v13401_v59  ;;  %4790 = vmatprep.subr.bf16.mxu1 %v13520_v27  ;;  %v13603_v59 = vcombine.low %v2776_v54, %v2780_v24  ;;  %v13474_v27 = vcombine.high %v3156_v53, %v3160_v62  ;;  %v3248_v45 = vld [vmem:[#allocation12 + $0xf78] sm:$0xff]  ;;  %v2856_v54 = vld [vmem:[#allocation12 + $0x340] sm:$0xff] }
 0x422   :  { %4833 = vmatprep.subr.bf16.mxu0 %v13394_v36  ;;  %v13596_v36 = vcombine.high %v2768_v3, %v2772_v51  ;;  %v2860_v24 = vld [vmem:[#allocation12 + $0x360] sm:$0xff] }
 0x424   :  { %4791 = vmatpush2.bf16.msra.mxu1 %v13519_v49  ;;  %v13473_v49 = vcombine.low %v3156_v53, %v3160_v62  ;;  %v3236_v53 = vld [vmem:[#allocation12 + $0xf18] sm:$0xff] }
 0x425   :  { %4834 = vmatpush2.bf16.msra.mxu0 %v13393_v21  ;;  %4846 = vmatprep.subr.bf16.mxu1 %v13514_v14  ;;  %v13595_v21 = vcombine.low %v2768_v3, %v2772_v51  ;;  %v13466_v14 = vcombine.high %v3148_v61, %v3152_v37  ;;  %v3240_v62 = vld [vmem:[#allocation12 + $0xf38] sm:$0xff]  ;;  %v2848_v3 = vld [vmem:[#allocation12 + $0x300] sm:$0xff] }
 0x426   :  { %6169 = vmatprep.subr.bf16.mxu0 %v13636_v38  ;;  %v13588_v38 = vcombine.high %v2760_v30, %v2764_v8  ;;  %v2852_v51 = vld [vmem:[#allocation12 + $0x320] sm:$0xff]  ;;  %v3228_v61 = vld [vmem:[#allocation12 + $0xed8] sm:$0xff] }
 0x427   :  { %4793 = vmatmul.mubr.bf16.vlgmr.msra.gmra.mxu1 %v15968_v48  ;;  %v3232_v37 = vld [vmem:[#allocation12 + $0xef8] sm:$0xff] }
 0x428   :  { %4836 = vmatmul.mubr.bf16.vlgmr.msra.gmra.mxu0 %v15931_v63  ;;  %4847 = vmatpush1.bf16.msra.mxu1 %v13513_v46  ;;  %v13619_v63 = vcombine.low %v2792_v52, %v2796_v15  ;;  %v2752_v46 = vld [vmem:[#allocation12] sm:$0xff] }
 0x429   :  { %4878 = vmatprep.mubr.bf16.mxu1 %v15966_v57  ;;  %6170 = vmatpush1.bf16.msra.mxu0 %v13635_v31  ;;  %v13612_v57 = vcombine.high %v2784_v44, %v2788_v25  ;;  %v13587_v31 = vcombine.low %v2760_v30, %v2764_v8  ;;  %v13580_v50 = vcombine.high %v2752_v46, %v2756_v19  ;;  %v2872_v52 = vld [vmem:[#allocation12 + $0x3c0] sm:$0xff] }
 0x42a   :  { %6201 = vmatprep.mubr.bf16.mxu0 %v15916_v26  ;;  %4848 = vmatprep.subr.bf16.mxu1 %v13506_v20  ;;  %v13458_v20 = vcombine.high %v3140_v29, %v3144_v11  ;;  %v2876_v15 = vld [vmem:[#allocation12 + $0x3e0] sm:$0xff] }
 0x42b   :  { %6171 = vmatprep.subr.bf16.mxu0 %v13628_v16  ;;  %v3264_v16 = vld [vmem:[#allocation12 + $0xff8] sm:$0xff]  ;;  %v2864_v44 = vld [vmem:[#allocation12 + $0x380] sm:$0xff] }
 0x42c   :  { %4849 = vmatpush1.bf16.msra.mxu1 %v13505_v4  ;;  %v13457_v4 = vcombine.low %v3140_v29, %v3144_v11  ;;  %v2868_v25 = vld [vmem:[#allocation12 + $0x3a0] sm:$0xff]  ;;  %v3220_v29 = vld [vmem:[#allocation12 + $0xe98] sm:$0xff] }
 0x42d   :  { %6172 = vmatpush1.bf16.msra.mxu0 %v13627_v12  ;;  %4850 = vmatprep.subr.bf16.mxu1 %v13498_v13  ;;  %v13579_v12 = vcombine.low %v2752_v46, %v2756_v19  ;;  %v13578_v13 = vcombine.high %v3260_v32, %v3264_v16  ;;  %v2840_v30 = vld [vmem:[#allocation12 + $0x2c0] sm:$0xff]  ;;  %v3224_v11 = vld [vmem:[#allocation12 + $0xeb8] sm:$0xff] }
 0x42e   :  { %6173 = vmatprep.subr.bf16.mxu0 %v13620_v18  ;;  %v13700_v18 = vcombine.high %v2872_v52, %v2876_v15  ;;  %v2844_v8 = vld [vmem:[#allocation12 + $0x2e0] sm:$0xff] }
 0x42f   :  { %v2832_v46 = vld [vmem:[#allocation12 + $0x280] sm:$0xff] }
 0x430   :  { %4851 = vmatpush1.bf16.msra.mxu1 %v13497_v0  ;;  %v13577_v0 = vcombine.low %v3260_v32, %v3264_v16  ;;  %v2836_v19 = vld [vmem:[#allocation12 + $0x2a0] sm:$0xff]  ;;  %v3212_v32 = vld [vmem:[#allocation12 + $0xe58] sm:$0xff] }
 0x431   :  { %6174 = vmatpush1.bf16.msra.mxu0 %v13619_v63  ;;  %4852 = vmatprep.subr.bf16.mxu1 %v13490_v1  ;;  %v13699_v63 = vcombine.low %v2872_v52, %v2876_v15  ;;  %v13570_v1 = vcombine.high %v3252_v34, %v3256_v56  ;;  %v3216_v16 = vld [vmem:[#allocation12 + $0xe78] sm:$0xff]  ;;  %v2824_v52 = vld [vmem:[#allocation12 + $0x240] sm:$0xff] }
 0x432   :  { %6175 = vmatprep.subr.bf16.mxu0 %v13612_v57  ;;  %v13692_v57 = vcombine.high %v2864_v44, %v2868_v25  ;;  %v2828_v15 = vld [vmem:[#allocation12 + $0x260] sm:$0xff] }
 0x434   :  { %4853 = vmatpush1.bf16.msra.mxu1 %v13489_v60  ;;  %v13569_v60 = vcombine.low %v3252_v34, %v3256_v56  ;;  %v3204_v34 = vld [vmem:[#allocation12 + $0xe18] sm:$0xff] }
 0x435   :  { %6176 = vmatpush1.bf16.msra.mxu0 %v13611_v55  ;;  %4854 = vmatprep.subr.bf16.mxu1 %v13482_v58  ;;  %v13691_v55 = vcombine.low %v2864_v44, %v2868_v25  ;;  %v13562_v58 = vcombine.high %v3244_v10, %v3248_v45  ;;  %v3208_v56 = vld [vmem:[#allocation12 + $0xe38] sm:$0xff]  ;;  %v2816_v44 = vld [vmem:[#allocation12 + $0x200] sm:$0xff] }
 0x436   :  { %6177 = vmatprep.subr.bf16.mxu0 %v13604_v47  ;;  %v13684_v47 = vcombine.high %v2856_v54, %v2860_v24  ;;  %v2820_v25 = vld [vmem:[#allocation12 + $0x220] sm:$0xff] }
 0x438   :  { %4855 = vmatpush1.bf16.msra.mxu1 %v13481_v5  ;;  %v13561_v5 = vcombine.low %v3244_v10, %v3248_v45  ;;  %v2936_v10 = vld [vmem:[#allocation12 + $0x5c0] sm:$0xff] }
 0x439   :  { %6178 = vmatpush1.bf16.msra.mxu0 %v13603_v59  ;;  %4856 = vmatprep.subr.bf16.mxu1 %v13474_v27  ;;  %v13683_v59 = vcombine.low %v2856_v54, %v2860_v24  ;;  %v13554_v27 = vcombine.high %v3236_v53, %v3240_v62  ;;  %v2940_v45 = vld [vmem:[#allocation12 + $0x5e0] sm:$0xff]  ;;  %v2809_v54 = vld [vmem:[#allocation12 + $0x1c8] sm:$0xff] }
 0x43a   :  { %6179 = vmatprep.subr.bf16.mxu0 %v13596_v36  ;;  %v13676_v36 = vcombine.high %v2848_v3, %v2852_v51  ;;  %v2813_v24 = vld [vmem:[#allocation12 + $0x1e8] sm:$0xff] }
 0x43c   :  { %4857 = vmatpush1.bf16.msra.mxu1 %v13473_v49  ;;  %v13553_v49 = vcombine.low %v3236_v53, %v3240_v62  ;;  %v15989_v53 = vpop.f32.mrf.mxu0  ;;  %v2928_v62 = vld [vmem:[#allocation12 + $0x580] sm:$0xff] }
 0x43d   :  { %6180 = vmatpush1.bf16.msra.mxu0 %v13595_v21  ;;  %4858 = vmatprep.subr.bf16.mxu1 %v13466_v14  ;;  %v13675_v21 = vcombine.low %v2848_v3, %v2852_v51  ;;  %v13546_v14 = vcombine.high %v3228_v61, %v3232_v37  ;;  %v2932_v3 = vld [vmem:[#allocation12 + $0x5a0] sm:$0xff]  ;;  %v13763_v51 = vcombine.low %v2936_v10, %v2940_v45 }
 0x43e   :  { %6181 = vmatprep.subr.bf16.mxu0 %v13588_v38  ;;  %v13668_v38 = vcombine.high %v2840_v30, %v2844_v8 }
 0x440   :  { %4859 = vmatpush1.bf16.msra.mxu1 %v13465_v23  ;;  %v13545_v23 = vcombine.low %v3228_v61, %v3232_v37  ;;  %v13637_v61 = vcombine.low %v2809_v54, %v2813_v24  ;;  %v13756_v37 = vcombine.high %v2928_v62, %v2932_v3 }
 0x441   :  { %6182 = vmatpush1.bf16.msra.mxu0 %v13587_v31  ;;  %4860 = vmatprep.subr.bf16.mxu1 %v13458_v20  ;;  %v13667_v31 = vcombine.low %v2840_v30, %v2844_v8  ;;  %v13538_v20 = vcombine.high %v3220_v29, %v3224_v11  ;;  %v2920_v30 = vld [vmem:[#allocation12 + $0x540] sm:$0xff] }
 0x442   :  { %6183 = vmatprep.subr.bf16.mxu0 %v13580_v50  ;;  %v13660_v50 = vcombine.high %v2832_v46, %v2836_v19  ;;  %v2924_v8 = vld [vmem:[#allocation12 + $0x560] sm:$0xff] }
 0x444   :  { %4861 = vmatpush1.bf16.msra.mxu1 %v13457_v4  ;;  %v13537_v4 = vcombine.low %v3220_v29, %v3224_v11  ;;  %v13755_v11 = vcombine.low %v2928_v62, %v2932_v3  ;;  %v2892_v62 = vld [vmem:[#allocation12 + $0x460] sm:$0xff]  ;;  %v2761_v3 = vld [vmem:[#allocation12 + $0x48] sm:$0xff] }
 0x445   :  { %6184 = vmatpush1.bf16.msra.mxu0 %v13579_v12  ;;  %4862 = vmatprep.subr.bf16.mxu1 %v13578_v13  ;;  %v13659_v12 = vcombine.low %v2832_v46, %v2836_v19  ;;  %v13530_v13 = vcombine.high %v3212_v32, %v3216_v16 }
 0x446   :  { %6185 = vmatprep.subr.bf16.mxu0 %v13700_v18  ;;  %v13652_v18 = vcombine.high %v2824_v52, %v2828_v15 }
 0x448   :  { %4863 = vmatpush2.bf16.msra.mxu1 %v13577_v0  ;;  %v13529_v0 = vcombine.low %v3212_v32, %v3216_v16  ;;  %v2916_v32 = vld [vmem:[#allocation12 + $0x520] sm:$0xff]  ;;  %v2785_v16 = vld [vmem:[#allocation12 + $0x108] sm:$0xff] }
 0x449   :  { %6186 = vmatpush2.bf16.msra.mxu0 %v13699_v63  ;;  %4864 = vmatprep.subr.bf16.mxu1 %v13570_v1  ;;  %v13651_v63 = vcombine.low %v2824_v52, %v2828_v15  ;;  %v13522_v1 = vcombine.high %v3204_v34, %v3208_v56  ;;  %v2789_v52 = vld [vmem:[#allocation12 + $0x128] sm:$0xff]  ;;  %v13747_v15 = vcombine.low %v2920_v30, %v2924_v8 }
 0x44a   :  { %6187 = vmatprep.subr.bf16.mxu0 %v13692_v57  ;;  %v13644_v57 = vcombine.high %v2816_v44, %v2820_v25 }
 0x44c   :  { %4865 = vmatpush2.bf16.msra.mxu1 %v13569_v60  ;;  %v13521_v60 = vcombine.low %v3204_v34, %v3208_v56  ;;  %v2908_v34 = vld [vmem:[#allocation12 + $0x4e0] sm:$0xff]  ;;  %v2777_v56 = vld [vmem:[#allocation12 + $0xc8] sm:$0xff] }
 0x44d   :  { %6188 = vmatpush2.bf16.msra.mxu0 %v13691_v55  ;;  %4866 = vmatprep.subr.bf16.mxu1 %v13562_v58  ;;  %v13643_v55 = vcombine.low %v2816_v44, %v2820_v25  ;;  %v13764_v58 = vcombine.high %v2936_v10, %v2940_v45  ;;  %v2781_v44 = vld [vmem:[#allocation12 + $0xe8] sm:$0xff]  ;;  %v2900_v10 = vld [vmem:[#allocation12 + $0x4a0] sm:$0xff] }
 0x44e   :  { %6189 = vmatprep.subr.bf16.mxu0 %v13684_v47  ;;  %v13638_v47 = vcombine.high %v2809_v54, %v2813_v24  ;;  %v2769_v45 = vld [vmem:[#allocation12 + $0x88] sm:$0xff] }
 0x44f   :  { %v2773_v54 = vld [vmem:[#allocation12 + $0xa8] sm:$0xff] }
 0x450   :  { %4867 = vmatpush2.bf16.msra.mxu1 %v13561_v5  ;;  %v2801_v5 = vld [vmem:[#allocation12 + $0x188] sm:$0xff] }
 0x451   :  { %6190 = vmatpush2.bf16.msra.mxu0 %v13683_v59  ;;  %4868 = vmatprep.subr.bf16.mxu1 %v13554_v27  ;;  %v2805_v59 = vld [vmem:[#allocation12 + $0x1a8] sm:$0xff]  ;;  %v15991_v27 = vpop.f32.mrf.mxu1 }
 0x452   :  { %6191 = vmatprep.subr.bf16.mxu0 %v13676_v36  ;;  %v4579_v36 = vpop.f32.mrf.mxu0 }
 0x454   :  { %4869 = vmatpush2.bf16.msra.mxu1 %v13553_v49  ;;  %v4581_v46 = vpop.f32.mrf.mxu0 }
 0x455   :  { %6192 = vmatpush2.bf16.msra.mxu0 %v13675_v21  ;;  %4870 = vmatprep.subr.bf16.mxu1 %v13546_v14  ;;  %v13630_v21 = vcombine.high %v2801_v5, %v2805_v59  ;;  %v2793_v14 = vld [vmem:[#allocation12 + $0x148] sm:$0xff] }
 0x456   :  { %6193 = vmatprep.subr.bf16.mxu0 %v13668_v38  ;;  %v2797_v38 = vld [vmem:[#allocation12 + $0x168] sm:$0xff] }
 0x458   :  { %4871 = vmatpush2.bf16.msra.mxu1 %v13545_v23  ;;  %v13629_v23 = vcombine.low %v2801_v5, %v2805_v59  ;;  %v13597_v59 = vcombine.low %v2769_v45, %v2773_v54 }
 0x459   :  { %6194 = vmatpush2.bf16.msra.mxu0 %v13667_v31  ;;  %4872 = vmatprep.subr.bf16.mxu1 %v13538_v20  ;;  %v13748_v31 = vcombine.high %v2920_v30, %v2924_v8  ;;  %v13622_v20 = vcombine.high %v2793_v14, %v2797_v38  ;;  %v2884_v30 = vld [vmem:[#allocation12 + $0x420] sm:$0xff]  ;;  %v2753_v8 = vld [vmem:[#allocation12 + $0x8] sm:$0xff] }
 0x45a   :  { %6195 = vmatprep.subr.bf16.mxu0 %v13660_v50  ;;  %v2912_v50 = vld [vmem:[#allocation12 + $0x500] sm:$0xff] }
 0x45b   :  { %v13739_v25 = vcombine.low %v2912_v50, %v2916_v32 }
 0x45c   :  { %4873 = vmatpush2.bf16.msra.mxu1 %v13537_v4  ;;  %v13621_v4 = vcombine.low %v2793_v14, %v2797_v38 }
 0x45d   :  { %6196 = vmatpush2.bf16.msra.mxu0 %v13659_v12  ;;  %4874 = vmatprep.subr.bf16.mxu1 %v13530_v13  ;;  %v13740_v12 = vcombine.high %v2912_v50, %v2916_v32  ;;  %v13614_v13 = vcombine.high %v2785_v16, %v2789_v52 }
 0x45e   :  { %6197 = vmatprep.subr.bf16.mxu0 %v13652_v18  ;;  %v2904_v18 = vld [vmem:[#allocation12 + $0x4c0] sm:$0xff] }
 0x45f   :  { %v13731_v24 = vcombine.low %v2904_v18, %v2908_v34 }
 0x460   :  { %4875 = vmatpush2.bf16.msra.mxu1 %v13529_v0  ;;  %v13613_v0 = vcombine.low %v2785_v16, %v2789_v52  ;;  %v2992_v52 = vld [vmem:[#allocation12 + $0x780] sm:$0xff] }
 0x461   :  { %6198 = vmatpush2.bf16.msra.mxu0 %v13651_v63  ;;  %4876 = vmatprep.subr.bf16.mxu1 %v13522_v1  ;;  %v13732_v63 = vcombine.high %v2904_v18, %v2908_v34  ;;  %v13606_v1 = vcombine.high %v2777_v56, %v2781_v44 }
 0x462   :  { %6199 = vmatprep.subr.bf16.mxu0 %v13644_v57  ;;  %v2896_v57 = vld [vmem:[#allocation12 + $0x480] sm:$0xff] }
 0x463   :  { %v13723_v5 = vcombine.low %v2896_v57, %v2900_v10 }
 0x464   :  { %4877 = vmatpush2.bf16.msra.mxu1 %v13521_v60  ;;  %v13605_v60 = vcombine.low %v2777_v56, %v2781_v44  ;;  %v2984_v44 = vld [vmem:[#allocation12 + $0x740] sm:$0xff] }
 0x465   :  { %6200 = vmatpush2.bf16.msra.mxu0 %v13643_v55  ;;  %6212 = vmatprep.subr.bf16.mxu1 %v13764_v58  ;;  %v13724_v55 = vcombine.high %v2896_v57, %v2900_v10  ;;  %v13598_v58 = vcombine.high %v2769_v45, %v2773_v54  ;;  %v2976_v54 = vld [vmem:[#allocation12 + $0x700] sm:$0xff] }
 0x466   :  { %6255 = vmatprep.subr.bf16.mxu0 %v13638_v47  ;;  %v2888_v47 = vld [vmem:[#allocation12 + $0x440] sm:$0xff] }
 0x467   :  { %4879 = vmatmul.mubr.bf16.vlgmr.msra.gmra.mxu1 %v15968_v48  ;;  %v4622_v49 = vpop.f32.mrf.mxu1 }
 0x468   :  { %v15994_v29 = vadd.f32 %v4622_v49, %v4579_v36  ;;  %6202 = vmatmul.mubr.bf16.vlgmr.msra.gmra.mxu0 %v15910_v7  ;;  %6213 = vmatpush1.bf16.msra.mxu1 %v13763_v51  ;;  %v2765_v51 = vld [vmem:[#allocation12 + $0x68] sm:$0xff]  ;;  %v13716_v36 = vcombine.high %v2888_v47, %v2892_v62 }
 0x469   :  { %6244 = vmatprep.mubr.bf16.mxu1 %v15957_v6  ;;  %6256 = vmatpush1.bf16.msra.mxu0 %v13637_v61  ;;  %v4624_v19 = vpop.f32.mrf.mxu1  ;;  %v13590_v61 = vcombine.high %v2761_v3, %v2765_v51  ;;  %v2757_v49 = vld [vmem:[#allocation12 + $0x28] sm:$0xff]  ;;  %v13589_v14 = vcombine.low %v2761_v3, %v2765_v51  ;;  %v2968_v51 = vld [vmem:[#allocation12 + $0x6c0] sm:$0xff] }
 0x46a   :  { %6287 = vmatprep.mubr.bf16.mxu0 %v15916_v26  ;;  %v15999_v48 = vadd.f32 %v4624_v19, %v4581_v46  ;;  %6214 = vmatprep.subr.bf16.mxu1 %v13756_v37  ;;  %v2880_v37 = vld [vmem:[#allocation12 + $0x400] sm:$0xff]  ;;  %v13581_v50 = vcombine.low %v2753_v8, %v2757_v49 }
 0x46b   :  { %6257 = vmatprep.subr.bf16.mxu0 %v13630_v21  ;;  %v13715_v21 = vcombine.low %v2888_v47, %v2892_v62  ;;  %v13708_v38 = vcombine.high %v2880_v37, %v2884_v30  ;;  %v3000_v46 = vld [vmem:[#allocation12 + $0x7c0] sm:$0xff] }
 0x46c   :  { %6215 = vmatpush1.bf16.msra.mxu1 %v13755_v11  ;;  %v13582_v11 = vcombine.high %v2753_v8, %v2757_v49  ;;  %v3004_v19 = vld [vmem:[#allocation12 + $0x7e0] sm:$0xff] }
 0x46d   :  { %6258 = vmatpush1.bf16.msra.mxu0 %v13629_v23  ;;  %6216 = vmatprep.subr.bf16.mxu1 %v13748_v31  ;;  %v2873_v23 = vld [vmem:[#allocation12 + $0x3c8] sm:$0xff]  ;;  %v13828_v32 = vcombine.high %v3000_v46, %v3004_v19  ;;  %v2960_v49 = vld [vmem:[#allocation12 + $0x680] sm:$0xff] }
 0x46e   :  { %6259 = vmatprep.subr.bf16.mxu0 %v13622_v20  ;;  %v2877_v31 = vld [vmem:[#allocation12 + $0x3e8] sm:$0xff]  ;;  %v13707_v20 = vcombine.low %v2880_v37, %v2884_v30 }
 0x46f   :  { %v13702_v16 = vcombine.high %v2873_v23, %v2877_v31  ;;  %v13701_v18 = vcombine.low %v2873_v23, %v2877_v31  ;;  %v2952_v31 = vld [vmem:[#allocation12 + $0x640] sm:$0xff] }
 0x470   :  { %6217 = vmatpush1.bf16.msra.mxu1 %v13747_v15  ;;  %v2996_v15 = vld [vmem:[#allocation12 + $0x7a0] sm:$0xff] }
 0x471   :  { %6260 = vmatpush1.bf16.msra.mxu0 %v13621_v4  ;;  %6218 = vmatprep.subr.bf16.mxu1 %v13740_v12  ;;  %v2865_v4 = vld [vmem:[#allocation12 + $0x388] sm:$0xff]  ;;  %v13820_v34 = vcombine.high %v2992_v52, %v2996_v15 }
 0x472   :  { %6261 = vmatprep.subr.bf16.mxu0 %v13614_v13  ;;  %v2869_v12 = vld [vmem:[#allocation12 + $0x3a8] sm:$0xff]  ;;  %v13827_v13 = vcombine.low %v3000_v46, %v3004_v19 }
 0x473   :  { %v13694_v56 = vcombine.high %v2865_v4, %v2869_v12  ;;  %v13693_v57 = vcombine.low %v2865_v4, %v2869_v12  ;;  %v2944_v12 = vld [vmem:[#allocation12 + $0x600] sm:$0xff] }
 0x474   :  { %6219 = vmatpush1.bf16.msra.mxu1 %v13739_v25  ;;  %v2988_v25 = vld [vmem:[#allocation12 + $0x760] sm:$0xff] }
 0x475   :  { %6262 = vmatpush1.bf16.msra.mxu0 %v13613_v0  ;;  %6220 = vmatprep.subr.bf16.mxu1 %v13732_v63  ;;  %v2857_v0 = vld [vmem:[#allocation12 + $0x348] sm:$0xff]  ;;  %v13812_v10 = vcombine.high %v2984_v44, %v2988_v25 }
 0x476   :  { %6263 = vmatprep.subr.bf16.mxu0 %v13606_v1  ;;  %v2861_v63 = vld [vmem:[#allocation12 + $0x368] sm:$0xff]  ;;  %v13819_v1 = vcombine.low %v2992_v52, %v2996_v15 }
 0x477   :  { %v13686_v45 = vcombine.high %v2857_v0, %v2861_v63  ;;  %v13685_v47 = vcombine.low %v2857_v0, %v2861_v63 }
 0x478   :  { %6221 = vmatpush1.bf16.msra.mxu1 %v13731_v24  ;;  %v2980_v24 = vld [vmem:[#allocation12 + $0x720] sm:$0xff] }
 0x479   :  { %6264 = vmatpush1.bf16.msra.mxu0 %v13605_v60  ;;  %6222 = vmatprep.subr.bf16.mxu1 %v13724_v55  ;;  %v2849_v60 = vld [vmem:[#allocation12 + $0x308] sm:$0xff]  ;;  %v13804_v62 = vcombine.high %v2976_v54, %v2980_v24 }
 0x47a   :  { %6265 = vmatprep.subr.bf16.mxu0 %v13598_v58  ;;  %v2853_v55 = vld [vmem:[#allocation12 + $0x328] sm:$0xff]  ;;  %v13811_v58 = vcombine.low %v2984_v44, %v2988_v25 }
 0x47b   :  { %v13678_v3 = vcombine.high %v2849_v60, %v2853_v55  ;;  %v13677_v37 = vcombine.low %v2849_v60, %v2853_v55  ;;  %v16005_v55 = vpop.f32.mrf.mxu1 }
 0x47c   :  { %6223 = vmatpush1.bf16.msra.mxu1 %v13723_v5  ;;  %v2972_v5 = vld [vmem:[#allocation12 + $0x6e0] sm:$0xff] }
 0x47d   :  { %6266 = vmatpush1.bf16.msra.mxu0 %v13597_v59  ;;  %6224 = vmatprep.subr.bf16.mxu1 %v13716_v36  ;;  %v2841_v59 = vld [vmem:[#allocation12 + $0x2c8] sm:$0xff]  ;;  %v13796_v30 = vcombine.high %v2968_v51, %v2972_v5 }
 0x47e   :  { %6267 = vmatprep.subr.bf16.mxu0 %v13590_v61  ;;  %v2845_v36 = vld [vmem:[#allocation12 + $0x2e8] sm:$0xff]  ;;  %v13803_v61 = vcombine.low %v2976_v54, %v2980_v24  ;;  %v2814_v54 = vld [vmem:[#allocation12 + $0x1f0] sm:$0xff] }
 0x47f   :  { %v13670_v8 = vcombine.high %v2841_v59, %v2845_v36  ;;  %v13669_v46 = vcombine.low %v2841_v59, %v2845_v36  ;;  %v2802_v59 = vld [vmem:[#allocation12 + $0x190] sm:$0xff] }
 0x480   :  { %6225 = vmatpush1.bf16.msra.mxu1 %v13715_v21  ;;  %v2964_v21 = vld [vmem:[#allocation12 + $0x6a0] sm:$0xff]  ;;  %v2806_v36 = vld [vmem:[#allocation12 + $0x1b0] sm:$0xff] }
 0x481   :  { %6268 = vmatpush1.bf16.msra.mxu0 %v13589_v14  ;;  %6226 = vmatprep.subr.bf16.mxu1 %v13708_v38  ;;  %v2833_v14 = vld [vmem:[#allocation12 + $0x288] sm:$0xff]  ;;  %v13788_v19 = vcombine.high %v2960_v49, %v2964_v21 }
 0x482   :  { %6269 = vmatprep.subr.bf16.mxu0 %v13582_v11  ;;  %v2837_v38 = vld [vmem:[#allocation12 + $0x2a8] sm:$0xff]  ;;  %v13795_v11 = vcombine.low %v2968_v51, %v2972_v5 }
 0x483   :  { %v13662_v23 = vcombine.high %v2833_v14, %v2837_v38  ;;  %v13661_v52 = vcombine.low %v2833_v14, %v2837_v38  ;;  %v2933_v51 = vld [vmem:[#allocation12 + $0x5a8] sm:$0xff]  ;;  %v13632_v38 = vcombine.high %v2802_v59, %v2806_v36 }
 0x484   :  { %6227 = vmatpush1.bf16.msra.mxu1 %v13707_v20  ;;  %v2956_v20 = vld [vmem:[#allocation12 + $0x660] sm:$0xff] }
 0x485   :  { %6270 = vmatpush1.bf16.msra.mxu0 %v13581_v50  ;;  %6228 = vmatprep.subr.bf16.mxu1 %v13828_v32  ;;  %v2825_v50 = vld [vmem:[#allocation12 + $0x248] sm:$0xff]  ;;  %v13780_v15 = vcombine.high %v2952_v31, %v2956_v20  ;;  %v13779_v44 = vcombine.low %v2952_v31, %v2956_v20 }
 0x486   :  { %6271 = vmatprep.subr.bf16.mxu0 %v13702_v16  ;;  %v2829_v32 = vld [vmem:[#allocation12 + $0x268] sm:$0xff]  ;;  %v13787_v16 = vcombine.low %v2960_v49, %v2964_v21 }
 0x487   :  { %v13654_v4 = vcombine.high %v2825_v50, %v2829_v32  ;;  %v13653_v25 = vcombine.low %v2825_v50, %v2829_v32  ;;  %v2921_v49 = vld [vmem:[#allocation12 + $0x548] sm:$0xff]  ;;  %v13631_v50 = vcombine.low %v2802_v59, %v2806_v36  ;;  %v2770_v36 = vld [vmem:[#allocation12 + $0x90] sm:$0xff] }
 0x488   :  { %6229 = vmatpush2.bf16.msra.mxu1 %v13827_v13  ;;  %v2948_v13 = vld [vmem:[#allocation12 + $0x620] sm:$0xff]  ;;  %v2925_v21 = vld [vmem:[#allocation12 + $0x568] sm:$0xff] }
 0x489   :  { %6272 = vmatpush2.bf16.msra.mxu0 %v13701_v18  ;;  %6230 = vmatprep.subr.bf16.mxu1 %v13820_v34  ;;  %v16001_v18 = vpop.f32.mrf.mxu0  ;;  %v2817_v34 = vld [vmem:[#allocation12 + $0x208] sm:$0xff]  ;;  %v13772_v0 = vcombine.high %v2944_v12, %v2948_v13  ;;  %v13771_v24 = vcombine.low %v2944_v12, %v2948_v13  ;;  %v13750_v32 = vcombine.high %v2921_v49, %v2925_v21  ;;  %v2786_v13 = vld [vmem:[#allocation12 + $0x110] sm:$0xff] }
 0x48a   :  { %6273 = vmatprep.subr.bf16.mxu0 %v13694_v56  ;;  %v2821_v56 = vld [vmem:[#allocation12 + $0x228] sm:$0xff] }
 0x48b   :  { %v13646_v63 = vcombine.high %v2817_v34, %v2821_v56  ;;  %v2901_v59 = vld [vmem:[#allocation12 + $0x4a8] sm:$0xff] }
 0x48c   :  { %6231 = vmatpush2.bf16.msra.mxu1 %v13819_v1  ;;  %v2937_v1 = vld [vmem:[#allocation12 + $0x5c8] sm:$0xff] }
 0x48d   :  { %6274 = vmatpush2.bf16.msra.mxu0 %v13693_v57  ;;  %6232 = vmatprep.subr.bf16.mxu1 %v13812_v10  ;;  %v2941_v57 = vld [vmem:[#allocation12 + $0x5e8] sm:$0xff]  ;;  %v16003_v10 = vpop.f32.mrf.mxu0 }
 0x48e   :  { %6275 = vmatprep.subr.bf16.mxu0 %v13686_v45  ;;  %v2810_v45 = vld [vmem:[#allocation12 + $0x1d0] sm:$0xff]  ;;  %v13765_v5 = vcombine.low %v2937_v1, %v2941_v57 }
 0x48f   :  { %v4665_v60 = vpop.f32.mrf.mxu0 }
 0x490   :  { %6233 = vmatpush2.bf16.msra.mxu1 %v13811_v58  ;;  %v13645_v58 = vcombine.low %v2817_v34, %v2821_v56  ;;  %v2790_v34 = vld [vmem:[#allocation12 + $0x130] sm:$0xff] }
 0x491   :  { %6276 = vmatpush2.bf16.msra.mxu0 %v13685_v47  ;;  %6234 = vmatprep.subr.bf16.mxu1 %v13804_v62  ;;  %v13766_v47 = vcombine.high %v2937_v1, %v2941_v57  ;;  %v13640_v62 = vcombine.high %v2810_v45, %v2814_v54 }
 0x492   :  { %6277 = vmatprep.subr.bf16.mxu0 %v13678_v3  ;;  %v2929_v3 = vld [vmem:[#allocation12 + $0x588] sm:$0xff] }
 0x494   :  { %6235 = vmatpush2.bf16.msra.mxu1 %v13803_v61  ;;  %v4667_v61 = vpop.f32.mrf.mxu0 }
 0x495   :  { %6278 = vmatpush2.bf16.msra.mxu0 %v13677_v37  ;;  %6236 = vmatprep.subr.bf16.mxu1 %v13796_v30  ;;  %v16007_v37 = vpop.f32.mrf.mxu1  ;;  %v13639_v30 = vcombine.low %v2810_v45, %v2814_v54  ;;  %v13616_v45 = vcombine.high %v2786_v13, %v2790_v34  ;;  %v2905_v54 = vld [vmem:[#allocation12 + $0x4c8] sm:$0xff] }
 0x496   :  { %6279 = vmatprep.subr.bf16.mxu0 %v13670_v8  ;;  %v13758_v8 = vcombine.high %v2929_v3, %v2933_v51  ;;  %v4669_v31 = vpop.f32.mrf.mxu0 }
 0x498   :  { %6237 = vmatpush2.bf16.msra.mxu1 %v13795_v11  ;;  %v2794_v11 = vld [vmem:[#allocation12 + $0x150] sm:$0xff] }
 0x499   :  { %6280 = vmatpush2.bf16.msra.mxu0 %v13669_v46  ;;  %6238 = vmatprep.subr.bf16.mxu1 %v13788_v19  ;;  %v2798_v46 = vld [vmem:[#allocation12 + $0x170] sm:$0xff] }
 0x49a   :  { %6281 = vmatprep.subr.bf16.mxu0 %v13662_v23  ;;  %v13757_v23 = vcombine.low %v2929_v3, %v2933_v51 }
 0x49c   :  { %6239 = vmatpush2.bf16.msra.mxu1 %v13787_v16 }
 0x49d   :  { %6282 = vmatpush2.bf16.msra.mxu0 %v13661_v52  ;;  %6240 = vmatprep.subr.bf16.mxu1 %v13780_v15  ;;  %v13624_v52 = vcombine.high %v2794_v11, %v2798_v46  ;;  %v2913_v15 = vld [vmem:[#allocation12 + $0x508] sm:$0xff] }
 0x49e   :  { %6283 = vmatprep.subr.bf16.mxu0 %v13654_v4  ;;  %v2917_v4 = vld [vmem:[#allocation12 + $0x528] sm:$0xff] }
 0x49f   :  { %v13742_v1 = vcombine.high %v2913_v15, %v2917_v4 }
 0x4a0   :  { %6241 = vmatpush2.bf16.msra.mxu1 %v13779_v44  ;;  %v13749_v44 = vcombine.low %v2921_v49, %v2925_v21 }
 0x4a1   :  { %6284 = vmatpush2.bf16.msra.mxu0 %v13653_v25  ;;  %6242 = vmatprep.subr.bf16.mxu1 %v13772_v0  ;;  %v4671_v25 = vpop.f32.mrf.mxu0 }
 0x4a2   :  { %6285 = vmatprep.subr.bf16.mxu0 %v13646_v63  ;;  %v13623_v63 = vcombine.low %v2794_v11, %v2798_v46  ;;  %v2762_v11 = vld [vmem:[#allocation12 + $0x50] sm:$0xff] }
 0x4a3   :  { %v2766_v46 = vld [vmem:[#allocation12 + $0x70] sm:$0xff] }
 0x4a4   :  { %6243 = vmatpush2.bf16.msra.mxu1 %v13771_v24  ;;  %v2909_v24 = vld [vmem:[#allocation12 + $0x4e8] sm:$0xff] }
 0x4a5   :  { %6286 = vmatpush2.bf16.msra.mxu0 %v13645_v58  ;;  %6298 = vmatprep.subr.bf16.mxu1 %v13766_v47  ;;  %v2782_v58 = vld [vmem:[#allocation12 + $0xf0] sm:$0xff]  ;;  %v13741_v47 = vcombine.low %v2913_v15, %v2917_v4  ;;  %v13734_v3 = vcombine.high %v2905_v54, %v2909_v24 }
 0x4a6   :  { %6341 = vmatprep.subr.bf16.mxu0 %v13640_v62  ;;  %v13615_v62 = vcombine.low %v2786_v13, %v2790_v34  ;;  %v2754_v15 = vld [vmem:[#allocation12 + $0x10] sm:$0xff]  ;;  %v13591_v13 = vcombine.low %v2762_v11, %v2766_v46 }
 0x4a7   :  { %v4708_v14 = vpop.f32.mrf.mxu1  ;;  %6245 = vmatmul.mubr.bf16.vlgmr.msra.gmra.mxu1 %v15951_v2  ;;  %v2758_v4 = vld [vmem:[#allocation12 + $0x30] sm:$0xff] }
 0x4a8   :  { %v16010_v19 = vadd.f32 %v4708_v14, %v4665_v60  ;;  %6288 = vmatmul.mubr.bf16.vlgmr.msra.gmra.mxu0 %v15910_v7  ;;  %6299 = vmatpush1.bf16.msra.mxu1 %v13765_v5  ;;  %v2778_v60 = vld [vmem:[#allocation12 + $0xd0] sm:$0xff]  ;;  %v2897_v5 = vld [vmem:[#allocation12 + $0x488] sm:$0xff] }
 0x4a9   :  { %6330 = vmatprep.mubr.bf16.mxu1 %v15957_v6  ;;  %v4710_v20 = vpop.f32.mrf.mxu1  ;;  %6342 = vmatpush1.bf16.msra.mxu0 %v13639_v30  ;;  %v13608_v51 = vcombine.high %v2778_v60, %v2782_v58  ;;  %v13733_v30 = vcombine.low %v2905_v54, %v2909_v24  ;;  %v13726_v49 = vcombine.high %v2897_v5, %v2901_v59  ;;  %v2889_v14 = vld [vmem:[#allocation12 + $0x448] sm:$0xff] }
 0x4aa   :  { %v16014_v16 = vadd.f32 %v4710_v20, %v4667_v61  ;;  %6373 = vmatprep.mubr.bf16.mxu0 %v15916_v26  ;;  %6300 = vmatprep.subr.bf16.mxu1 %v13758_v8  ;;  %v2774_v61 = vld [vmem:[#allocation12 + $0xb0] sm:$0xff]  ;;  %v13607_v8 = vcombine.low %v2778_v60, %v2782_v58  ;;  %v13583_v54 = vcombine.low %v2754_v15, %v2758_v4  ;;  %v2993_v58 = vld [vmem:[#allocation12 + $0x788] sm:$0xff] }
 0x4ab   :  { %v4712_v12 = vpop.f32.mrf.mxu1  ;;  %6343 = vmatprep.subr.bf16.mxu0 %v13632_v38  ;;  %v13600_v21 = vcombine.high %v2770_v36, %v2774_v61  ;;  %v2893_v38 = vld [vmem:[#allocation12 + $0x468] sm:$0xff] }
 0x4ac   :  { %v16017_v56 = vadd.f32 %v4712_v12, %v4669_v31  ;;  %6301 = vmatpush1.bf16.msra.mxu1 %v13757_v23  ;;  %v13725_v23 = vcombine.low %v2897_v5, %v2901_v59  ;;  %v13599_v31 = vcombine.low %v2770_v36, %v2774_v61  ;;  %v13718_v20 = vcombine.high %v2889_v14, %v2893_v38  ;;  %v2985_v61 = vld [vmem:[#allocation12 + $0x748] sm:$0xff] }
 0x4ad   :  { %v4714_v0 = vpop.f32.mrf.mxu1  ;;  %6344 = vmatpush1.bf16.msra.mxu0 %v13631_v50  ;;  %6302 = vmatprep.subr.bf16.mxu1 %v13750_v32  ;;  %v13592_v50 = vcombine.high %v2762_v11, %v2766_v46  ;;  %v2881_v32 = vld [vmem:[#allocation12 + $0x408] sm:$0xff]  ;;  %v13717_v12 = vcombine.low %v2889_v14, %v2893_v38 }
 0x4ae   :  { %v16019_v57 = vadd.f32 %v4714_v0, %v4671_v25  ;;  %6345 = vmatprep.subr.bf16.mxu0 %v13624_v52  ;;  %v2885_v52 = vld [vmem:[#allocation12 + $0x428] sm:$0xff] }
 0x4af   :  { %v13710_v34 = vcombine.high %v2881_v32, %v2885_v52  ;;  %v3001_v25 = vld [vmem:[#allocation12 + $0x7c8] sm:$0xff] }
 0x4b0   :  { %6303 = vmatpush1.bf16.msra.mxu1 %v13749_v44  ;;  %v13584_v44 = vcombine.high %v2754_v15, %v2758_v4  ;;  %v3005_v0 = vld [vmem:[#allocation12 + $0x7e8] sm:$0xff] }
 0x4b1   :  { %6346 = vmatpush1.bf16.msra.mxu0 %v13623_v63  ;;  %6304 = vmatprep.subr.bf16.mxu1 %v13742_v1  ;;  %v2874_v63 = vld [vmem:[#allocation12 + $0x3d0] sm:$0xff]  ;;  %v13830_v24 = vcombine.high %v3001_v25, %v3005_v0  ;;  %v2977_v46 = vld [vmem:[#allocation12 + $0x708] sm:$0xff] }
 0x4b2   :  { %6347 = vmatprep.subr.bf16.mxu0 %v13616_v45  ;;  %v2878_v1 = vld [vmem:[#allocation12 + $0x3f0] sm:$0xff]  ;;  %v13709_v45 = vcombine.low %v2881_v32, %v2885_v52  ;;  %v2969_v4 = vld [vmem:[#allocation12 + $0x6c8] sm:$0xff] }
 0x4b3   :  { %v13704_v60 = vcombine.high %v2874_v63, %v2878_v1  ;;  %v13703_v5 = vcombine.low %v2874_v63, %v2878_v1  ;;  %v2961_v1 = vld [vmem:[#allocation12 + $0x688] sm:$0xff] }
 0x4b4   :  { %6305 = vmatpush1.bf16.msra.mxu1 %v13741_v47  ;;  %v2997_v47 = vld [vmem:[#allocation12 + $0x7a8] sm:$0xff] }
 0x4b5   :  { %6348 = vmatpush1.bf16.msra.mxu0 %v13615_v62  ;;  %6306 = vmatprep.subr.bf16.mxu1 %v13734_v3  ;;  %v2866_v62 = vld [vmem:[#allocation12 + $0x390] sm:$0xff]  ;;  %v13822_v59 = vcombine.high %v2993_v58, %v2997_v47 }
 0x4b6   :  { %6349 = vmatprep.subr.bf16.mxu0 %v13608_v51  ;;  %v2870_v3 = vld [vmem:[#allocation12 + $0x3b0] sm:$0xff]  ;;  %v13829_v51 = vcombine.low %v3001_v25, %v3005_v0 }
 0x4b7   :  { %v13696_v36 = vcombine.high %v2866_v62, %v2870_v3  ;;  %v13695_v14 = vcombine.low %v2866_v62, %v2870_v3  ;;  %v2953_v3 = vld [vmem:[#allocation12 + $0x648] sm:$0xff] }
 0x4b8   :  { %6307 = vmatpush1.bf16.msra.mxu1 %v13733_v30  ;;  %v2989_v30 = vld [vmem:[#allocation12 + $0x768] sm:$0xff] }
 0x4b9   :  { %6350 = vmatpush1.bf16.msra.mxu0 %v13607_v8  ;;  %6308 = vmatprep.subr.bf16.mxu1 %v13726_v49  ;;  %v2858_v8 = vld [vmem:[#allocation12 + $0x350] sm:$0xff]  ;;  %v13814_v38 = vcombine.high %v2985_v61, %v2989_v30 }
 0x4ba   :  { %6351 = vmatprep.subr.bf16.mxu0 %v13600_v21  ;;  %v2862_v49 = vld [vmem:[#allocation12 + $0x370] sm:$0xff]  ;;  %v13821_v21 = vcombine.low %v2993_v58, %v2997_v47 }
 0x4bb   :  { %v13688_v11 = vcombine.high %v2858_v8, %v2862_v49  ;;  %v13687_v32 = vcombine.low %v2858_v8, %v2862_v49  ;;  %v2945_v49 = vld [vmem:[#allocation12 + $0x608] sm:$0xff] }
 0x4bc   :  { %6309 = vmatpush1.bf16.msra.mxu1 %v13725_v23  ;;  %v2981_v23 = vld [vmem:[#allocation12 + $0x728] sm:$0xff] }
 0x4bd   :  { %6352 = vmatpush1.bf16.msra.mxu0 %v13599_v31  ;;  %6310 = vmatprep.subr.bf16.mxu1 %v13718_v20  ;;  %v2850_v31 = vld [vmem:[#allocation12 + $0x310] sm:$0xff]  ;;  %v13806_v52 = vcombine.high %v2977_v46, %v2981_v23 }
 0x4be   :  { %6353 = vmatprep.subr.bf16.mxu0 %v13592_v50  ;;  %v2854_v20 = vld [vmem:[#allocation12 + $0x330] sm:$0xff]  ;;  %v13813_v50 = vcombine.low %v2985_v61, %v2989_v30 }
 0x4bf   :  { %v13680_v15 = vcombine.high %v2850_v31, %v2854_v20  ;;  %v13679_v25 = vcombine.low %v2850_v31, %v2854_v20  ;;  %v2938_v20 = vld [vmem:[#allocation12 + $0x5d0] sm:$0xff] }
 0x4c0   :  { %6311 = vmatpush1.bf16.msra.mxu1 %v13717_v12  ;;  %v2973_v12 = vld [vmem:[#allocation12 + $0x6e8] sm:$0xff] }
 0x4c1   :  { %6354 = vmatpush1.bf16.msra.mxu0 %v13591_v13  ;;  %6312 = vmatprep.subr.bf16.mxu1 %v13710_v34  ;;  %v2842_v13 = vld [vmem:[#allocation12 + $0x2d0] sm:$0xff]  ;;  %v13798_v0 = vcombine.high %v2969_v4, %v2973_v12 }
 0x4c2   :  { %6355 = vmatprep.subr.bf16.mxu0 %v13584_v44  ;;  %v2846_v34 = vld [vmem:[#allocation12 + $0x2f0] sm:$0xff]  ;;  %v13805_v44 = vcombine.low %v2977_v46, %v2981_v23 }
 0x4c3   :  { %v13672_v63 = vcombine.high %v2842_v13, %v2846_v34  ;;  %v13671_v58 = vcombine.low %v2842_v13, %v2846_v34 }
 0x4c4   :  { %6313 = vmatpush1.bf16.msra.mxu1 %v13709_v45  ;;  %v2965_v45 = vld [vmem:[#allocation12 + $0x6a8] sm:$0xff] }
 0x4c5   :  { %6356 = vmatpush1.bf16.msra.mxu0 %v13583_v54  ;;  %6314 = vmatprep.subr.bf16.mxu1 %v13830_v24  ;;  %v2834_v54 = vld [vmem:[#allocation12 + $0x290] sm:$0xff]  ;;  %v13790_v47 = vcombine.high %v2961_v1, %v2965_v45 }
 0x4c6   :  { %6357 = vmatprep.subr.bf16.mxu0 %v13704_v60  ;;  %v2838_v24 = vld [vmem:[#allocation12 + $0x2b0] sm:$0xff]  ;;  %v13797_v60 = vcombine.low %v2969_v4, %v2973_v12  ;;  %v4751_v4 = vpop.f32.mrf.mxu0 }
 0x4c7   :  { %v13664_v62 = vcombine.high %v2834_v54, %v2838_v24  ;;  %v13663_v61 = vcombine.low %v2834_v54, %v2838_v24 }
 0x4c8   :  { %6315 = vmatpush2.bf16.msra.mxu1 %v13829_v51  ;;  %v2957_v51 = vld [vmem:[#allocation12 + $0x668] sm:$0xff] }
 0x4c9   :  { %6358 = vmatpush2.bf16.msra.mxu0 %v13703_v5  ;;  %6316 = vmatprep.subr.bf16.mxu1 %v13822_v59  ;;  %v2826_v5 = vld [vmem:[#allocation12 + $0x250] sm:$0xff]  ;;  %v13782_v30 = vcombine.high %v2953_v3, %v2957_v51 }
 0x4ca   :  { %6359 = vmatprep.subr.bf16.mxu0 %v13696_v36  ;;  %v2830_v59 = vld [vmem:[#allocation12 + $0x270] sm:$0xff]  ;;  %v13789_v36 = vcombine.low %v2961_v1, %v2965_v45  ;;  %v2807_v1 = vld [vmem:[#allocation12 + $0x1b8] sm:$0xff]  ;;  %v4753_v45 = vpop.f32.mrf.mxu0 }
 0x4cb   :  { %v13656_v8 = vcombine.high %v2826_v5, %v2830_v59  ;;  %v13655_v46 = vcombine.low %v2826_v5, %v2830_v59 }
 0x4cc   :  { %6317 = vmatpush2.bf16.msra.mxu1 %v13821_v21  ;;  %v2949_v21 = vld [vmem:[#allocation12 + $0x628] sm:$0xff] }
 0x4cd   :  { %6360 = vmatpush2.bf16.msra.mxu0 %v13695_v14  ;;  %6318 = vmatprep.subr.bf16.mxu1 %v13814_v38  ;;  %v2818_v14 = vld [vmem:[#allocation12 + $0x210] sm:$0xff]  ;;  %v13774_v23 = vcombine.high %v2945_v49, %v2949_v21 }
 0x4ce   :  { %6361 = vmatprep.subr.bf16.mxu0 %v13688_v11  ;;  %v2822_v38 = vld [vmem:[#allocation12 + $0x230] sm:$0xff]  ;;  %v13781_v11 = vcombine.low %v2953_v3, %v2957_v51  ;;  %v2795_v3 = vld [vmem:[#allocation12 + $0x158] sm:$0xff] }
 0x4cf   :  { %v13648_v31 = vcombine.high %v2818_v14, %v2822_v38  ;;  %v13647_v12 = vcombine.low %v2818_v14, %v2822_v38  ;;  %v2799_v51 = vld [vmem:[#allocation12 + $0x178] sm:$0xff]  ;;  %v2914_v14 = vld [vmem:[#allocation12 + $0x510] sm:$0xff] }
 0x4d0   :  { %6319 = vmatpush2.bf16.msra.mxu1 %v13813_v50  ;;  %v2942_v50 = vld [vmem:[#allocation12 + $0x5f0] sm:$0xff] }
 0x4d1   :  { %6362 = vmatpush2.bf16.msra.mxu0 %v13687_v32  ;;  %6320 = vmatprep.subr.bf16.mxu1 %v13806_v52  ;;  %v2811_v32 = vld [vmem:[#allocation12 + $0x1d8] sm:$0xff]  ;;  %v13768_v13 = vcombine.high %v2938_v20, %v2942_v50  ;;  %v2918_v38 = vld [vmem:[#allocation12 + $0x530] sm:$0xff] }
 0x4d2   :  { %6363 = vmatprep.subr.bf16.mxu0 %v13680_v15  ;;  %v2815_v52 = vld [vmem:[#allocation12 + $0x1f8] sm:$0xff]  ;;  %v13773_v15 = vcombine.low %v2945_v49, %v2949_v21  ;;  %v13626_v21 = vcombine.high %v2795_v3, %v2799_v51 }
 0x4d3   :  { %v13642_v34 = vcombine.high %v2811_v32, %v2815_v52  ;;  %v13641_v54 = vcombine.low %v2811_v32, %v2815_v52  ;;  %v13625_v52 = vcombine.low %v2795_v3, %v2799_v51  ;;  %v2890_v51 = vld [vmem:[#allocation12 + $0x450] sm:$0xff] }
 0x4d4   :  { %6321 = vmatpush2.bf16.msra.mxu1 %v13805_v44  ;;  %v2930_v44 = vld [vmem:[#allocation12 + $0x590] sm:$0xff] }
 0x4d5   :  { %6364 = vmatpush2.bf16.msra.mxu0 %v13679_v25  ;;  %6322 = vmatprep.subr.bf16.mxu1 %v13798_v0  ;;  %v2934_v25 = vld [vmem:[#allocation12 + $0x5b0] sm:$0xff]  ;;  %v13767_v0 = vcombine.low %v2938_v20, %v2942_v50 }
 0x4d6   :  { %6365 = vmatprep.subr.bf16.mxu0 %v13672_v63  ;;  %v2803_v63 = vld [vmem:[#allocation12 + $0x198] sm:$0xff]  ;;  %v13760_v24 = vcombine.high %v2930_v44, %v2934_v25  ;;  %v13759_v59 = vcombine.low %v2930_v44, %v2934_v25  ;;  %v13743_v25 = vcombine.low %v2914_v14, %v2918_v38 }
 0x4d7   :  { %v2783_v44 = vld [vmem:[#allocation12 + $0xf8] sm:$0xff] }
 0x4d8   :  { %6323 = vmatpush2.bf16.msra.mxu1 %v13797_v60  ;;  %v2922_v60 = vld [vmem:[#allocation12 + $0x550] sm:$0xff] }
 0x4d9   :  { %6366 = vmatpush2.bf16.msra.mxu0 %v13671_v58  ;;  %6324 = vmatprep.subr.bf16.mxu1 %v13790_v47  ;;  %v2926_v58 = vld [vmem:[#allocation12 + $0x570] sm:$0xff] }
 0x4da   :  { %6367 = vmatprep.subr.bf16.mxu0 %v13664_v62  ;;  %v13634_v62 = vcombine.high %v2803_v63, %v2807_v1  ;;  %v13751_v20 = vcombine.low %v2922_v60, %v2926_v58 }
 0x4dc   :  { %6325 = vmatpush2.bf16.msra.mxu1 %v13789_v36  ;;  %v4755_v36 = vpop.f32.mrf.mxu0 }
 0x4dd   :  { %6368 = vmatpush2.bf16.msra.mxu0 %v13663_v61  ;;  %6326 = vmatprep.subr.bf16.mxu1 %v13782_v30  ;;  %v13633_v30 = vcombine.low %v2803_v63, %v2807_v1 }
 0x4de   :  { %6369 = vmatprep.subr.bf16.mxu0 %v13656_v8  ;;  %v13752_v8 = vcombine.high %v2922_v60, %v2926_v58  ;;  %v4757_v50 = vpop.f32.mrf.mxu0  ;;  %v2775_v60 = vld [vmem:[#allocation12 + $0xb8] sm:$0xff] }
 0x4e0   :  { %6327 = vmatpush2.bf16.msra.mxu1 %v13781_v11 }
 0x4e1   :  { %6370 = vmatpush2.bf16.msra.mxu0 %v13655_v46  ;;  %6328 = vmatprep.subr.bf16.mxu1 %v13774_v23  ;;  %v2787_v46 = vld [vmem:[#allocation12 + $0x118] sm:$0xff] }
 0x4e2   :  { %6371 = vmatprep.subr.bf16.mxu0 %v13648_v31  ;;  %v2791_v23 = vld [vmem:[#allocation12 + $0x138] sm:$0xff] }
 0x4e4   :  { %6329 = vmatpush2.bf16.msra.mxu1 %v13773_v15  ;;  %v13744_v15 = vcombine.high %v2914_v14, %v2918_v38  ;;  %v2882_v38 = vld [vmem:[#allocation12 + $0x410] sm:$0xff] }
 0x4e5   :  { %6372 = vmatpush2.bf16.msra.mxu0 %v13647_v12  ;;  %6384 = vmatprep.subr.bf16.mxu1 %v13768_v13  ;;  %v2906_v12 = vld [vmem:[#allocation12 + $0x4d0] sm:$0xff] }
 0x4e6   :  { %6427 = vmatprep.subr.bf16.mxu0 %v13642_v34  ;;  %v2910_v13 = vld [vmem:[#allocation12 + $0x4f0] sm:$0xff]  ;;  %v2779_v34 = vld [vmem:[#allocation12 + $0xd8] sm:$0xff] }
 0x4e7   :  { %v4794_v47 = vpop.f32.mrf.mxu1  ;;  %6331 = vmatmul.mubr.bf16.vlgmr.msra.gmra.mxu1 %v15951_v2  ;;  %v13736_v63 = vcombine.high %v2906_v12, %v2910_v13  ;;  %v13610_v1 = vcombine.high %v2779_v34, %v2783_v44  ;;  %v13735_v58 = vcombine.low %v2906_v12, %v2910_v13  ;;  %v2875_v12 = vld [vmem:[#allocation12 + $0x3d8] sm:$0xff] }
 0x4e8   :  { %v16022_v5 = vadd.f32 %v4794_v47, %v4751_v4  ;;  %6374 = vmatmul.mubr.bf16.vlgmr.msra.gmra.mxu0 %v15910_v7  ;;  %6385 = vmatpush1.bf16.msra.mxu1 %v13767_v0  ;;  %v13617_v0 = vcombine.low %v2787_v46, %v2791_v23  ;;  %v13609_v47 = vcombine.low %v2779_v34, %v2783_v44  ;;  %v2879_v13 = vld [vmem:[#allocation12 + $0x3f8] sm:$0xff] }
 0x4e9   :  { %6416 = vmatprep.mubr.bf16.mxu1 %v15957_v6  ;;  %v4796_v61 = vpop.f32.mrf.mxu1  ;;  %6428 = vmatpush1.bf16.msra.mxu0 %v13641_v54  ;;  %v2902_v54 = vld [vmem:[#allocation12 + $0x4b0] sm:$0xff] }
 0x4ea   :  { %v16026_v49 = vadd.f32 %v4796_v61, %v4753_v45  ;;  %6459 = vmatprep.mubr.bf16.mxu0 %v15916_v26  ;;  %6386 = vmatprep.subr.bf16.mxu1 %v13760_v24  ;;  %v13618_v26 = vcombine.high %v2787_v46, %v2791_v23  ;;  %v2898_v45 = vld [vmem:[#allocation12 + $0x490] sm:$0xff]  ;;  %v2771_v24 = vld [vmem:[#allocation12 + $0x98] sm:$0xff] }
 0x4eb   :  { %v4798_v11 = vpop.f32.mrf.mxu1  ;;  %6429 = vmatprep.subr.bf16.mxu0 %v13634_v62  ;;  %v13728_v62 = vcombine.high %v2898_v45, %v2902_v54  ;;  %v13602_v3 = vcombine.high %v2771_v24, %v2775_v60  ;;  %v2767_v61 = vld [vmem:[#allocation12 + $0x78] sm:$0xff] }
 0x4ec   :  { %v16029_v31 = vadd.f32 %v4798_v11, %v4755_v36  ;;  %6387 = vmatpush1.bf16.msra.mxu1 %v13759_v59  ;;  %v2894_v59 = vld [vmem:[#allocation12 + $0x470] sm:$0xff]  ;;  %v2763_v36 = vld [vmem:[#allocation12 + $0x58] sm:$0xff] }
 0x4ed   :  { %v4800_v32 = vpop.f32.mrf.mxu1  ;;  %6430 = vmatpush1.bf16.msra.mxu0 %v13633_v30  ;;  %6388 = vmatprep.subr.bf16.mxu1 %v13752_v8  ;;  %v13727_v30 = vcombine.low %v2898_v45, %v2902_v54  ;;  %v13601_v8 = vcombine.low %v2771_v24, %v2775_v60  ;;  %v13594_v14 = vcombine.high %v2763_v36, %v2767_v61  ;;  %v2886_v11 = vld [vmem:[#allocation12 + $0x430] sm:$0xff]  ;;  %v2755_v46 = vld [vmem:[#allocation12 + $0x18] sm:$0xff] }
 0x4ee   :  { %v16031_v4 = vadd.f32 %v4800_v32, %v4757_v50  ;;  %6431 = vmatprep.subr.bf16.mxu0 %v13626_v21  ;;  %v13720_v21 = vcombine.high %v2890_v51, %v2894_v59  ;;  %v2759_v23 = vld [vmem:[#allocation12 + $0x38] sm:$0xff]  ;;  %v13593_v50 = vcombine.low %v2763_v36, %v2767_v61  ;;  %v13712_v32 = vcombine.high %v2882_v38, %v2886_v11 }
 0x4ef   :  { %v13711_v34 = vcombine.low %v2882_v38, %v2886_v11  ;;  %v13585_v44 = vcombine.low %v2755_v46, %v2759_v23  ;;  %v2867_v45 = vld [vmem:[#allocation12 + $0x398] sm:$0xff]  ;;  %v13705_v60 = vcombine.low %v2875_v12, %v2879_v13 }
 0x4f0   :  { %6389 = vmatpush1.bf16.msra.mxu1 %v13751_v20  ;;  %v13719_v20 = vcombine.low %v2890_v51, %v2894_v59  ;;  %v2871_v54 = vld [vmem:[#allocation12 + $0x3b8] sm:$0xff] }
 0x4f1   :  { %6432 = vmatpush1.bf16.msra.mxu0 %v13625_v52  ;;  %6390 = vmatprep.subr.bf16.mxu1 %v13744_v15  ;;  %v13586_v52 = vcombine.high %v2755_v46, %v2759_v23  ;;  %v3002_v15 = vld [vmem:[#allocation12 + $0x7d0] sm:$0xff]  ;;  %v2859_v51 = vld [vmem:[#allocation12 + $0x358] sm:$0xff]  ;;  %v13697_v61 = vcombine.low %v2867_v45, %v2871_v54 }
 0x4f2   :  { %6433 = vmatprep.subr.bf16.mxu0 %v13618_v26  ;;  %v3006_v26 = vld [vmem:[#allocation12 + $0x7f0] sm:$0xff]  ;;  %v2863_v59 = vld [vmem:[#allocation12 + $0x378] sm:$0xff] }
 0x4f3   :  { %v13831_v24 = vcombine.low %v3002_v15, %v3006_v26  ;;  %v2851_v38 = vld [vmem:[#allocation12 + $0x318] sm:$0xff]  ;;  %v13689_v23 = vcombine.low %v2859_v51, %v2863_v59 }
 0x4f4   :  { %6391 = vmatpush1.bf16.msra.mxu1 %v13743_v25  ;;  %v13832_v25 = vcombine.high %v3002_v15, %v3006_v26  ;;  %v2855_v11 = vld [vmem:[#allocation12 + $0x338] sm:$0xff] }
 0x4f5   :  { %6434 = vmatpush1.bf16.msra.mxu0 %v13617_v0  ;;  %6392 = vmatprep.subr.bf16.mxu1 %v13736_v63  ;;  %v13706_v0 = vcombine.high %v2875_v12, %v2879_v13  ;;  %v2994_v63 = vld [vmem:[#allocation12 + $0x790] sm:$0xff]  ;;  %v2843_v15 = vld [vmem:[#allocation12 + $0x2d8] sm:$0xff]  ;;  %v13681_v13 = vcombine.low %v2851_v38, %v2855_v11 }
 0x4f6   :  { %6435 = vmatprep.subr.bf16.mxu0 %v13610_v1  ;;  %v2998_v1 = vld [vmem:[#allocation12 + $0x7b0] sm:$0xff]  ;;  %v2847_v26 = vld [vmem:[#allocation12 + $0x2f8] sm:$0xff] }
 0x4f7   :  { %v13823_v36 = vcombine.low %v2994_v63, %v2998_v1 }
 0x4f8   :  { %6393 = vmatpush1.bf16.msra.mxu1 %v13735_v58  ;;  %v13824_v58 = vcombine.high %v2994_v63, %v2998_v1  ;;  %v2835_v63 = vld [vmem:[#allocation12 + $0x298] sm:$0xff] }
 0x4f9   :  { %6436 = vmatpush1.bf16.msra.mxu0 %v13609_v47  ;;  %6394 = vmatprep.subr.bf16.mxu1 %v13728_v62  ;;  %v13698_v47 = vcombine.high %v2867_v45, %v2871_v54  ;;  %v2986_v62 = vld [vmem:[#allocation12 + $0x750] sm:$0xff]  ;;  %v2839_v1 = vld [vmem:[#allocation12 + $0x2b8] sm:$0xff]  ;;  %v13673_v54 = vcombine.low %v2843_v15, %v2847_v26 }
 0x4fa   :  { %6437 = vmatprep.subr.bf16.mxu0 %v13602_v3  ;;  %v2990_v3 = vld [vmem:[#allocation12 + $0x770] sm:$0xff] }
 0x4fb   :  { %v13815_v46 = vcombine.low %v2986_v62, %v2990_v3 }
 0x4fc   :  { %6395 = vmatpush1.bf16.msra.mxu1 %v13727_v30  ;;  %v13816_v30 = vcombine.high %v2986_v62, %v2990_v3  ;;  %v2827_v62 = vld [vmem:[#allocation12 + $0x258] sm:$0xff] }
 0x4fd   :  { %6438 = vmatpush1.bf16.msra.mxu0 %v13601_v8  ;;  %6396 = vmatprep.subr.bf16.mxu1 %v13720_v21  ;;  %v13690_v8 = vcombine.high %v2859_v51, %v2863_v59  ;;  %v2978_v21 = vld [vmem:[#allocation12 + $0x710] sm:$0xff]  ;;  %v2831_v3 = vld [vmem:[#allocation12 + $0x278] sm:$0xff]  ;;  %v13665_v59 = vcombine.low %v2835_v63, %v2839_v1 }
 0x4fe   :  { %6439 = vmatprep.subr.bf16.mxu0 %v13594_v14  ;;  %v2982_v14 = vld [vmem:[#allocation12 + $0x730] sm:$0xff] }
 0x4ff   :  { %v13807_v12 = vcombine.low %v2978_v21, %v2982_v14 }
 0x500   :  { %6397 = vmatpush1.bf16.msra.mxu1 %v13719_v20  ;;  %v13808_v20 = vcombine.high %v2978_v21, %v2982_v14  ;;  %v2819_v21 = vld [vmem:[#allocation12 + $0x218] sm:$0xff] }
 0x501   :  { %6440 = vmatpush1.bf16.msra.mxu0 %v13593_v50  ;;  %6398 = vmatprep.subr.bf16.mxu1 %v13712_v32  ;;  %v13682_v50 = vcombine.high %v2851_v38, %v2855_v11  ;;  %v2970_v32 = vld [vmem:[#allocation12 + $0x6d0] sm:$0xff]  ;;  %v2823_v14 = vld [vmem:[#allocation12 + $0x238] sm:$0xff]  ;;  %v13657_v11 = vcombine.low %v2827_v62, %v2831_v3 }
 0x502   :  { %6441 = vmatprep.subr.bf16.mxu0 %v13586_v52  ;;  %v2974_v52 = vld [vmem:[#allocation12 + $0x6f0] sm:$0xff] }
 0x503   :  { %v13799_v45 = vcombine.low %v2970_v32, %v2974_v52 }
 0x504   :  { %6399 = vmatpush1.bf16.msra.mxu1 %v13711_v34  ;;  %v13800_v34 = vcombine.high %v2970_v32, %v2974_v52  ;;  %v6570_v32 = vld [vmem:[#allocation12 + $0x11c0] sm:$0xff] }
 0x505   :  { %6442 = vmatpush1.bf16.msra.mxu0 %v13585_v44  ;;  %6400 = vmatprep.subr.bf16.mxu1 %v13832_v25  ;;  %v13674_v44 = vcombine.high %v2843_v15, %v2847_v26  ;;  %v2962_v25 = vld [vmem:[#allocation12 + $0x690] sm:$0xff]  ;;  %v6574_v52 = vld [vmem:[#allocation12 + $0x11e0] sm:$0xff]  ;;  %v4837_v26 = vpop.f32.mrf.mxu0 }
 0x506   :  { %6443 = vmatprep.subr.bf16.mxu0 %v13706_v0  ;;  %v2966_v0 = vld [vmem:[#allocation12 + $0x6b0] sm:$0xff] }
 0x507   :  { %v13791_v51 = vcombine.low %v2962_v25, %v2966_v0 }
 0x508   :  { %6401 = vmatpush2.bf16.msra.mxu1 %v13831_v24  ;;  %v13792_v24 = vcombine.high %v2962_v25, %v2966_v0  ;;  %v2935_v25 = vld [vmem:[#allocation12 + $0x5b8] sm:$0xff] }
 0x509   :  { %6444 = vmatpush2.bf16.msra.mxu0 %v13705_v60  ;;  %6402 = vmatprep.subr.bf16.mxu1 %v13824_v58  ;;  %v13666_v60 = vcombine.high %v2835_v63, %v2839_v1  ;;  %v2954_v58 = vld [vmem:[#allocation12 + $0x650] sm:$0xff]  ;;  %v6562_v63 = vld [vmem:[#allocation12 + $0x1180] sm:$0xff] }
 0x50a   :  { %6445 = vmatprep.subr.bf16.mxu0 %v13698_v47  ;;  %v2958_v47 = vld [vmem:[#allocation12 + $0x670] sm:$0xff]  ;;  %v6566_v1 = vld [vmem:[#allocation12 + $0x11a0] sm:$0xff] }
 0x50b   :  { %v13783_v38 = vcombine.low %v2954_v58, %v2958_v47 }
 0x50c   :  { %6403 = vmatpush2.bf16.msra.mxu1 %v13823_v36  ;;  %v13784_v36 = vcombine.high %v2954_v58, %v2958_v47  ;;  %v2927_v58 = vld [vmem:[#allocation12 + $0x578] sm:$0xff] }
 0x50d   :  { %6446 = vmatpush2.bf16.msra.mxu0 %v13697_v61  ;;  %6404 = vmatprep.subr.bf16.mxu1 %v13816_v30  ;;  %v13658_v61 = vcombine.high %v2827_v62, %v2831_v3  ;;  %v2946_v30 = vld [vmem:[#allocation12 + $0x610] sm:$0xff]  ;;  %v13884_v62 = vcombine.high %v6562_v63, %v6566_v1  ;;  %v6554_v3 = vld [vmem:[#allocation12 + $0x1140] sm:$0xff] }
 0x50e   :  { %6447 = vmatprep.subr.bf16.mxu0 %v13690_v8  ;;  %v2950_v8 = vld [vmem:[#allocation12 + $0x630] sm:$0xff] }
 0x50f   :  { %v13775_v15 = vcombine.low %v2946_v30, %v2950_v8 }
 0x510   :  { %6405 = vmatpush2.bf16.msra.mxu1 %v13815_v46  ;;  %v13776_v46 = vcombine.high %v2946_v30, %v2950_v8  ;;  %v13883_v8 = vcombine.low %v6562_v63, %v6566_v1 }
 0x511   :  { %6448 = vmatpush2.bf16.msra.mxu0 %v13689_v23  ;;  %6406 = vmatprep.subr.bf16.mxu1 %v13808_v20  ;;  %v13650_v23 = vcombine.high %v2819_v21, %v2823_v14  ;;  %v2939_v20 = vld [vmem:[#allocation12 + $0x5d8] sm:$0xff] }
 0x512   :  { %6449 = vmatprep.subr.bf16.mxu0 %v13682_v50  ;;  %v2943_v50 = vld [vmem:[#allocation12 + $0x5f8] sm:$0xff] }
 0x513   :  { %v13769_v0 = vcombine.low %v2939_v20, %v2943_v50 }
 0x514   :  { %6407 = vmatpush2.bf16.msra.mxu1 %v13807_v12  ;;  %v13649_v12 = vcombine.low %v2819_v21, %v2823_v14 }
 0x515   :  { %6450 = vmatpush2.bf16.msra.mxu0 %v13681_v13  ;;  %6408 = vmatprep.subr.bf16.mxu1 %v13800_v34  ;;  %v13770_v13 = vcombine.high %v2939_v20, %v2943_v50  ;;  %v13892_v34 = vcombine.high %v6570_v32, %v6574_v52  ;;  %v6550_v20 = vld [vmem:[#allocation12 + $0x1120] sm:$0xff] }
 0x516   :  { %6451 = vmatprep.subr.bf16.mxu0 %v13674_v44  ;;  %v2931_v44 = vld [vmem:[#allocation12 + $0x598] sm:$0xff] }
 0x518   :  { %6409 = vmatpush2.bf16.msra.mxu1 %v13799_v45  ;;  %v4839_v45 = vpop.f32.mrf.mxu0 }
 0x519   :  { %6452 = vmatpush2.bf16.msra.mxu0 %v13673_v54  ;;  %6410 = vmatprep.subr.bf16.mxu1 %v13792_v24  ;;  %v13891_v54 = vcombine.low %v6570_v32, %v6574_v52  ;;  %v13762_v24 = vcombine.high %v2931_v44, %v2935_v25 }
 0x51a   :  { %6453 = vmatprep.subr.bf16.mxu0 %v13666_v60  ;;  %v2923_v60 = vld [vmem:[#allocation12 + $0x558] sm:$0xff] }
 0x51b   :  { %v13754_v21 = vcombine.high %v2923_v60, %v2927_v58 }
 0x51c   :  { %6411 = vmatpush2.bf16.msra.mxu1 %v13791_v51  ;;  %v6558_v51 = vld [vmem:[#allocation12 + $0x1160] sm:$0xff] }
 0x51d   :  { %6454 = vmatpush2.bf16.msra.mxu0 %v13665_v59  ;;  %6412 = vmatprep.subr.bf16.mxu1 %v13784_v36  ;;  %v13761_v36 = vcombine.low %v2931_v44, %v2935_v25  ;;  %v2911_v44 = vld [vmem:[#allocation12 + $0x4f8] sm:$0xff]  ;;  %v6538_v25 = vld [vmem:[#allocation12 + $0x10c0] sm:$0xff] }
 0x51e   :  { %6455 = vmatprep.subr.bf16.mxu0 %v13658_v61  ;;  %v4841_v61 = vpop.f32.mrf.mxu0 }
 0x520   :  { %6413 = vmatpush2.bf16.msra.mxu1 %v13783_v38  ;;  %v13876_v38 = vcombine.high %v6554_v3, %v6558_v51  ;;  %v4843_v32 = vpop.f32.mrf.mxu0 }
 0x521   :  { %6456 = vmatpush2.bf16.msra.mxu0 %v13657_v11  ;;  %6414 = vmatprep.subr.bf16.mxu1 %v13776_v46  ;;  %v2915_v11 = vld [vmem:[#allocation12 + $0x518] sm:$0xff] }
 0x522   :  { %6457 = vmatprep.subr.bf16.mxu0 %v13650_v23  ;;  %v2919_v46 = vld [vmem:[#allocation12 + $0x538] sm:$0xff] }
 0x523   :  { %v13745_v63 = vcombine.low %v2915_v11, %v2919_v46 }
 0x524   :  { %6415 = vmatpush2.bf16.msra.mxu1 %v13775_v15  ;;  %v13875_v15 = vcombine.low %v6554_v3, %v6558_v51 }
 0x525   :  { %6458 = vmatpush2.bf16.msra.mxu0 %v13649_v12  ;;  %6470 = vmatprep.subr.bf16.mxu1 %v13770_v13 }
 0x526   :  { %8050 = vmatprep.subr.bf16.mxu0 %v13892_v34  ;;  %v2907_v34 = vld [vmem:[#allocation12 + $0x4d8] sm:$0xff] }
 0x527   :  { %v4880_v47 = vpop.f32.mrf.mxu1  ;;  %6417 = vmatmul.mubr.bf16.vlgmr.msra.gmra.mxu1 %v15951_v2 }
 0x528   :  { %v16034_v59 = vadd.f32 %v4880_v47, %v4837_v26  ;;  %6460 = vmatmul.mubr.bf16.vlgmr.msra.gmra.mxu0 %v15910_v7  ;;  %6471 = vmatpush1.bf16.msra.mxu1 %v13769_v0  ;;  %v6546_v7 = vld [vmem:[#allocation12 + $0x1100] sm:$0xff]  ;;  %v13746_v26 = vcombine.high %v2915_v11, %v2919_v46 }
 0x529   :  { %6502 = vmatprep.mubr.bf16.mxu1 %v15957_v6  ;;  %v4882_v30 = vpop.f32.mrf.mxu1  ;;  %8051 = vmatpush1.bf16.msra.mxu0 %v13891_v54  ;;  %v13753_v6 = vcombine.low %v2923_v60, %v2927_v58  ;;  %v13868_v13 = vcombine.high %v6546_v7, %v6550_v20  ;;  %v6542_v0 = vld [vmem:[#allocation12 + $0x10e0] sm:$0xff]  ;;  %v13867_v1 = vcombine.low %v6546_v7, %v6550_v20  ;;  %v2903_v60 = vld [vmem:[#allocation12 + $0x4b8] sm:$0xff] }
 0x52a   :  { %v16038_v14 = vadd.f32 %v4882_v30, %v4839_v45  ;;  %8082 = vmatprep.mubr.bf16.mxu0 %v15945_v28  ;;  %6472 = vmatprep.subr.bf16.mxu1 %v13762_v24  ;;  %v13738_v45 = vcombine.high %v2907_v34, %v2911_v44  ;;  %v13860_v54 = vcombine.high %v6538_v25, %v6542_v0  ;;  %v2899_v24 = vld [vmem:[#allocation12 + $0x498] sm:$0xff]  ;;  %v6530_v58 = vld [vmem:[#allocation12 + $0x1080] sm:$0xff] }
 0x52b   :  { %v4884_v23 = vpop.f32.mrf.mxu1  ;;  %8052 = vmatprep.subr.bf16.mxu0 %v13884_v62  ;;  %v6534_v47 = vld [vmem:[#allocation12 + $0x10a0] sm:$0xff]  ;;  %v13737_v62 = vcombine.low %v2907_v34, %v2911_v44  ;;  %v13859_v3 = vcombine.low %v6538_v25, %v6542_v0  ;;  %v13730_v51 = vcombine.high %v2899_v24, %v2903_v60  ;;  %v2895_v30 = vld [vmem:[#allocation12 + $0x478] sm:$0xff] }
 0x52c   :  { %v16041_v50 = vadd.f32 %v4884_v23, %v4841_v61  ;;  %6473 = vmatpush1.bf16.msra.mxu1 %v13761_v36  ;;  %v13852_v36 = vcombine.high %v6530_v58, %v6534_v47  ;;  %v2891_v61 = vld [vmem:[#allocation12 + $0x458] sm:$0xff]  ;;  %v13851_v11 = vcombine.low %v6530_v58, %v6534_v47  ;;  %v6634_v25 = vld [vmem:[#allocation12 + $0x13c0] sm:$0xff] }
 0x52d   :  { %v4886_v52 = vpop.f32.mrf.mxu1  ;;  %8053 = vmatpush1.bf16.msra.mxu0 %v13883_v8  ;;  %6474 = vmatprep.subr.bf16.mxu1 %v13754_v21  ;;  %v6522_v8 = vld [vmem:[#allocation12 + $0x1040] sm:$0xff]  ;;  %v13722_v46 = vcombine.high %v2891_v61, %v2895_v30  ;;  %v2883_v7 = vld [vmem:[#allocation12 + $0x418] sm:$0xff] }
 0x52e   :  { %v16043_v12 = vadd.f32 %v4886_v52, %v4843_v32  ;;  %8054 = vmatprep.subr.bf16.mxu0 %v13876_v38  ;;  %v6526_v21 = vld [vmem:[#allocation12 + $0x1060] sm:$0xff]  ;;  %v13729_v38 = vcombine.low %v2899_v24, %v2903_v60  ;;  %v2887_v20 = vld [vmem:[#allocation12 + $0x438] sm:$0xff]  ;;  %v13721_v52 = vcombine.low %v2891_v61, %v2895_v30 }
 0x52f   :  { %v13844_v23 = vcombine.high %v6522_v8, %v6526_v21  ;;  %v6518_v32 = vld [vmem:[#allocation12 + $0x1020] sm:$0xff]  ;;  %v3003_v34 = vld [vmem:[#allocation12 + $0x7d8] sm:$0xff] }
 0x530   :  { %6475 = vmatpush1.bf16.msra.mxu1 %v13753_v6  ;;  %v6514_v6 = vld [vmem:[#allocation12 + $0x1000] sm:$0xff]  ;;  %v3007_v44 = vld [vmem:[#allocation12 + $0x7f8] sm:$0xff] }
 0x531   :  { %8055 = vmatpush1.bf16.msra.mxu0 %v13875_v15  ;;  %6476 = vmatprep.subr.bf16.mxu1 %v13746_v26  ;;  %v13843_v15 = vcombine.low %v6522_v8, %v6526_v21  ;;  %v13714_v26 = vcombine.high %v2883_v7, %v2887_v20  ;;  %v6638_v0 = vld [vmem:[#allocation12 + $0x13e0] sm:$0xff]  ;;  %v2995_v24 = vld [vmem:[#allocation12 + $0x798] sm:$0xff] }
 0x532   :  { %8056 = vmatprep.subr.bf16.mxu0 %v13868_v13  ;;  %v13836_v13 = vcombine.high %v6514_v6, %v6518_v32  ;;  %v2999_v60 = vld [vmem:[#allocation12 + $0x7b8] sm:$0xff]  ;;  %v6626_v58 = vld [vmem:[#allocation12 + $0x1380] sm:$0xff] }
 0x533   :  { %v6630_v47 = vld [vmem:[#allocation12 + $0x13a0] sm:$0xff]  ;;  %v2987_v61 = vld [vmem:[#allocation12 + $0x758] sm:$0xff] }
 0x534   :  { %6477 = vmatpush1.bf16.msra.mxu1 %v13745_v63  ;;  %v13713_v63 = vcombine.low %v2883_v7, %v2887_v20  ;;  %v2991_v30 = vld [vmem:[#allocation12 + $0x778] sm:$0xff]  ;;  %v6618_v8 = vld [vmem:[#allocation12 + $0x1340] sm:$0xff] }
 0x535   :  { %8057 = vmatpush1.bf16.msra.mxu0 %v13867_v1  ;;  %6478 = vmatprep.subr.bf16.mxu1 %v13738_v45  ;;  %v13835_v1 = vcombine.low %v6514_v6, %v6518_v32  ;;  %v13834_v45 = vcombine.high %v3003_v34, %v3007_v44  ;;  %v6622_v21 = vld [vmem:[#allocation12 + $0x1360] sm:$0xff]  ;;  %v2979_v7 = vld [vmem:[#allocation12 + $0x718] sm:$0xff] }
 0x536   :  { %8058 = vmatprep.subr.bf16.mxu0 %v13860_v54  ;;  %v13956_v54 = vcombine.high %v6634_v25, %v6638_v0  ;;  %v2983_v20 = vld [vmem:[#allocation12 + $0x738] sm:$0xff]  ;;  %v6610_v6 = vld [vmem:[#allocation12 + $0x1300] sm:$0xff] }
 0x537   :  { %v6614_v32 = vld [vmem:[#allocation12 + $0x1320] sm:$0xff] }
 0x538   :  { %6479 = vmatpush1.bf16.msra.mxu1 %v13737_v62  ;;  %v13833_v62 = vcombine.low %v3003_v34, %v3007_v44  ;;  %v2971_v34 = vld [vmem:[#allocation12 + $0x6d8] sm:$0xff] }
 0x539   :  { %8059 = vmatpush1.bf16.msra.mxu0 %v13859_v3  ;;  %6480 = vmatprep.subr.bf16.mxu1 %v13730_v51  ;;  %v13955_v3 = vcombine.low %v6634_v25, %v6638_v0  ;;  %v13826_v51 = vcombine.high %v2995_v24, %v2999_v60  ;;  %v2975_v44 = vld [vmem:[#allocation12 + $0x6f8] sm:$0xff]  ;;  %v6602_v25 = vld [vmem:[#allocation12 + $0x12c0] sm:$0xff] }
 0x53a   :  { %8060 = vmatprep.subr.bf16.mxu0 %v13852_v36  ;;  %v13948_v36 = vcombine.high %v6626_v58, %v6630_v47  ;;  %v6606_v0 = vld [vmem:[#allocation12 + $0x12e0] sm:$0xff] }
 0x53c   :  { %6481 = vmatpush1.bf16.msra.mxu1 %v13729_v38  ;;  %v13825_v38 = vcombine.low %v2995_v24, %v2999_v60  ;;  %v2963_v24 = vld [vmem:[#allocation12 + $0x698] sm:$0xff] }
 0x53d   :  { %8061 = vmatpush1.bf16.msra.mxu0 %v13851_v11  ;;  %6482 = vmatprep.subr.bf16.mxu1 %v13722_v46  ;;  %v13947_v11 = vcombine.low %v6626_v58, %v6630_v47  ;;  %v13818_v46 = vcombine.high %v2987_v61, %v2991_v30  ;;  %v2967_v60 = vld [vmem:[#allocation12 + $0x6b8] sm:$0xff]  ;;  %v6594_v58 = vld [vmem:[#allocation12 + $0x1280] sm:$0xff] }
 0x53e   :  { %8062 = vmatprep.subr.bf16.mxu0 %v13844_v23  ;;  %v13940_v23 = vcombine.high %v6618_v8, %v6622_v21  ;;  %v6598_v47 = vld [vmem:[#allocation12 + $0x12a0] sm:$0xff] }
 0x540   :  { %6483 = vmatpush1.bf16.msra.mxu1 %v13721_v52  ;;  %v13817_v52 = vcombine.low %v2987_v61, %v2991_v30  ;;  %v2955_v61 = vld [vmem:[#allocation12 + $0x658] sm:$0xff] }
 0x541   :  { %8063 = vmatpush1.bf16.msra.mxu0 %v13843_v15  ;;  %6484 = vmatprep.subr.bf16.mxu1 %v13714_v26  ;;  %v13939_v15 = vcombine.low %v6618_v8, %v6622_v21  ;;  %v13810_v26 = vcombine.high %v2979_v7, %v2983_v20  ;;  %v2959_v30 = vld [vmem:[#allocation12 + $0x678] sm:$0xff]  ;;  %v6586_v8 = vld [vmem:[#allocation12 + $0x1240] sm:$0xff] }
 0x542   :  { %8064 = vmatprep.subr.bf16.mxu0 %v13836_v13  ;;  %v13932_v13 = vcombine.high %v6610_v6, %v6614_v32  ;;  %v6590_v21 = vld [vmem:[#allocation12 + $0x1260] sm:$0xff] }
 0x544   :  { %6485 = vmatpush1.bf16.msra.mxu1 %v13713_v63  ;;  %v13809_v63 = vcombine.low %v2979_v7, %v2983_v20  ;;  %v13908_v7 = vcombine.high %v6586_v8, %v6590_v21  ;;  %v2947_v20 = vld [vmem:[#allocation12 + $0x618] sm:$0xff] }
 0x545   :  { %8065 = vmatpush1.bf16.msra.mxu0 %v13835_v1  ;;  %6486 = vmatprep.subr.bf16.mxu1 %v13834_v45  ;;  %v13931_v1 = vcombine.low %v6610_v6, %v6614_v32  ;;  %v13802_v45 = vcombine.high %v2971_v34, %v2975_v44  ;;  %v2951_v6 = vld [vmem:[#allocation12 + $0x638] sm:$0xff]  ;;  %v6578_v32 = vld [vmem:[#allocation12 + $0x1200] sm:$0xff] }
 0x546   :  { %8066 = vmatprep.subr.bf16.mxu0 %v13956_v54  ;;  %v13924_v54 = vcombine.high %v6602_v25, %v6606_v0 }
 0x548   :  { %6487 = vmatpush2.bf16.msra.mxu1 %v13833_v62  ;;  %v13801_v62 = vcombine.low %v2971_v34, %v2975_v44  ;;  %v13778_v34 = vcombine.high %v2947_v20, %v2951_v6 }
 0x549   :  { %8067 = vmatpush2.bf16.msra.mxu0 %v13955_v3  ;;  %6488 = vmatprep.subr.bf16.mxu1 %v13826_v51  ;;  %v13923_v3 = vcombine.low %v6602_v25, %v6606_v0  ;;  %v13794_v51 = vcombine.high %v2963_v24, %v2967_v60  ;;  %v6698_v0 = vld [vmem:[#allocation12 + $0x15c0] sm:$0xff] }
 0x54a   :  { %8068 = vmatprep.subr.bf16.mxu0 %v13948_v36  ;;  %v13916_v36 = vcombine.high %v6594_v58, %v6598_v47 }
 0x54c   :  { %6489 = vmatpush2.bf16.msra.mxu1 %v13825_v38  ;;  %v13793_v38 = vcombine.low %v2963_v24, %v2967_v60  ;;  %v6575_v24 = vld [vmem:[#allocation12 + $0x11e8] sm:$0xff]  ;;  %v13777_v60 = vcombine.low %v2947_v20, %v2951_v6 }
 0x54d   :  { %8069 = vmatpush2.bf16.msra.mxu0 %v13947_v11  ;;  %6490 = vmatprep.subr.bf16.mxu1 %v13818_v46  ;;  %v13915_v11 = vcombine.low %v6594_v58, %v6598_v47  ;;  %v13786_v46 = vcombine.high %v2955_v61, %v2959_v30  ;;  %v6555_v20 = vld [vmem:[#allocation12 + $0x1148] sm:$0xff] }
 0x54e   :  { %8070 = vmatprep.subr.bf16.mxu0 %v13940_v23  ;;  %v16045_v23 = vpop.f32.mrf.mxu0  ;;  %v6559_v6 = vld [vmem:[#allocation12 + $0x1168] sm:$0xff] }
 0x550   :  { %6491 = vmatpush2.bf16.msra.mxu1 %v13817_v52  ;;  %v6582_v52 = vld [vmem:[#allocation12 + $0x1220] sm:$0xff]  ;;  %v16049_v44 = vpop.f32.mrf.mxu0 }
 0x551   :  { %8071 = vmatpush2.bf16.msra.mxu0 %v13939_v15  ;;  %6492 = vmatprep.subr.bf16.mxu1 %v13810_v26  ;;  %v13785_v15 = vcombine.low %v2955_v61, %v2959_v30  ;;  %v2651_v26 = vadd.f32 %v15989_v53, %v15894_v17  ;;  %v13900_v25 = vcombine.high %v6578_v32, %v6582_v52  ;;  %v6694_v61 = vld [vmem:[#allocation12 + $0x15a0] sm:$0xff] }
 0x552   :  { %8072 = vmatprep.subr.bf16.mxu0 %v13932_v13  ;;  %v13907_v13 = vcombine.low %v6586_v8, %v6590_v21  ;;  %v13899_v58 = vcombine.low %v6578_v32, %v6582_v52 }
 0x554   :  { %6493 = vmatpush2.bf16.msra.mxu1 %v13809_v63  ;;  %v6702_v63 = vld [vmem:[#allocation12 + $0x15e0] sm:$0xff] }
 0x555   :  { %8073 = vmatpush2.bf16.msra.mxu0 %v13931_v1  ;;  %6494 = vmatprep.subr.bf16.mxu1 %v13802_v45  ;;  %v2647_v1 = vadd.f32 %v15927_v33, %v15894_v17  ;;  %v2714_v45 = vadd.f32 %v15991_v27, %v2651_v26  ;;  %v14020_v47 = vcombine.high %v6698_v0, %v6702_v63  ;;  %v6563_v33 = vld [vmem:[#allocation12 + $0x1188] sm:$0xff] }
 0x556   :  { %8074 = vmatprep.subr.bf16.mxu0 %v13924_v54  ;;  %v6571_v54 = vld [vmem:[#allocation12 + $0x11c8] sm:$0xff]  ;;  %v14019_v17 = vcombine.low %v6698_v0, %v6702_v63  ;;  %v6678_v0 = vld [vmem:[#allocation12 + $0x1520] sm:$0xff] }
 0x557   :  { %v2710_v53 = vadd.f32 %v15964_v9, %v2647_v1  ;;  %v6567_v27 = vld [vmem:[#allocation12 + $0x11a8] sm:$0xff]  ;;  %v13893_v8 = vcombine.low %v6571_v54, %v6575_v24 }
 0x558   :  { %6495 = vmatpush2.bf16.msra.mxu1 %v13801_v62  ;;  %v16055_v62 = vpop.f32.mrf.mxu0  ;;  %v13885_v26 = vcombine.low %v6563_v33, %v6567_v27  ;;  %v6547_v1 = vld [vmem:[#allocation12 + $0x1108] sm:$0xff] }
 0x559   :  { %8075 = vmatpush2.bf16.msra.mxu0 %v13923_v3  ;;  %6496 = vmatprep.subr.bf16.mxu1 %v13794_v51  ;;  %v13894_v3 = vcombine.high %v6571_v54, %v6575_v24  ;;  %v2739_v51 = vmax.f32 %v2714_v45, 0.0  ;;  %v2735_v30 = vmax.f32 %v2710_v53, 0.0  ;;  %v6551_v45 = vld [vmem:[#allocation12 + $0x1128] sm:$0xff] }
 0x55a   :  { %8076 = vmatprep.subr.bf16.mxu0 %v13916_v36  ;;  %v6690_v36 = vld [vmem:[#allocation12 + $0x1580] sm:$0xff]  ;;  %v16057_v9 = vpop.f32.mrf.mxu0 }
 0x55b   :  { %v14012_v21 = vcombine.high %v6690_v36, %v6694_v61  ;;  %v14011_v52 = vcombine.low %v6690_v36, %v6694_v61  ;;  %v6539_v36 = vld [vmem:[#allocation12 + $0x10c8] sm:$0xff] }
 0x55c   :  { %6497 = vmatpush2.bf16.msra.mxu1 %v13793_v38  ;;  %v6682_v38 = vld [vmem:[#allocation12 + $0x1540] sm:$0xff]  ;;  %v6543_v61 = vld [vmem:[#allocation12 + $0x10e8] sm:$0xff] }
 0x55d   :  { %8077 = vmatpush2.bf16.msra.mxu0 %v13915_v11  ;;  %6498 = vmatprep.subr.bf16.mxu1 %v13786_v46  ;;  %v6686_v11 = vld [vmem:[#allocation12 + $0x1560] sm:$0xff]  ;;  %v16059_v46 = vpack.c.bf16 %v2739_v51, %v2735_v30 }
 0x55e   :  { %8078 = vmatprep.subr.bf16.mxu0 %v13908_v7  ;;  %v13886_v7 = vcombine.high %v6563_v33, %v6567_v27  ;;  %v14003_v54 = vcombine.low %v6682_v38, %v6686_v11  ;;  %v6670_v51 = vld [vmem:[#allocation12 + $0x14e0] sm:$0xff]  ;;  %v13862_v27 = vcombine.high %v6539_v36, %v6543_v61 }
 0x55f   :  { %v6658_v30 = vld [vmem:[#allocation12 + $0x1480] sm:$0xff] }
 0x560   :  { %6499 = vmatpush2.bf16.msra.mxu1 %v13785_v15 }
 0x561   :  { %8079 = vmatpush2.bf16.msra.mxu0 %v13907_v13  ;;  %6500 = vmatprep.subr.bf16.mxu1 %v13778_v34  ;;  %v14004_v13 = vcombine.high %v6682_v38, %v6686_v11  ;;  %v6535_v38 = vld [vmem:[#allocation12 + $0x10a8] sm:$0xff] }
 0x562   :  { %8080 = vmatprep.subr.bf16.mxu0 %v13900_v25  ;;  %v6674_v25 = vld [vmem:[#allocation12 + $0x1500] sm:$0xff] }
 0x563   :  { %v13996_v53 = vcombine.high %v6674_v25, %v6678_v0 }
 0x564   :  { %6501 = vmatpush2.bf16.msra.mxu1 %v13777_v60  ;;  %v13877_v60 = vcombine.low %v6555_v20, %v6559_v6 }
 0x565   :  { %8081 = vmatpush2.bf16.msra.mxu0 %v13899_v58  ;;  %8093 = vmatprep.subr.bf16.mxu1 %v14020_v47  ;;  %v13870_v47 = vcombine.high %v6547_v1, %v6551_v45 }
 0x566   :  { %8136 = vmatprep.subr.bf16.mxu0 %v13894_v3  ;;  %v6666_v3 = vld [vmem:[#allocation12 + $0x14c0] sm:$0xff] }
 0x567   :  { %6503 = vmatmul.mubr.bf16.vlgmr.msra.gmra.mxu1 %v15951_v2  ;;  %v13878_v2 = vcombine.high %v6555_v20, %v6559_v6  ;;  %v13988_v33 = vcombine.high %v6666_v3, %v6670_v51  ;;  %v13987_v11 = vcombine.low %v6666_v3, %v6670_v51  ;;  %v6650_v6 = vld [vmem:[#allocation12 + $0x1440] sm:$0xff]  ;;  %v6635_v51 = vld [vmem:[#allocation12 + $0x13c8] sm:$0xff] }
 0x568   :  { %v6289_v32 = vpop.f32.mrf.mxu0  ;;  %8083 = vmatmul.mubr.bf16.vlgmr.msra.gmra.mxu0 %v15943_v35  ;;  %8094 = vmatpush1.bf16.msra.mxu1 %v14019_v17  ;;  %v13995_v17 = vcombine.low %v6674_v25, %v6678_v0  ;;  %v6642_v0 = vld [vmem:[#allocation12 + $0x1400] sm:$0xff] }
 0x569   :  { %v16064_v15 = vadd.f32 %v6289_v32, %v16010_v19  ;;  %8125 = vmatprep.mubr.bf16.mxu1 %v16059_v46  ;;  %8137 = vmatpush1.bf16.msra.mxu0 %v13893_v8  ;;  %v6662_v8 = vld [vmem:[#allocation12 + $0x14a0] sm:$0xff] }
 0x56a   :  { %8168 = vmatprep.mubr.bf16.mxu0 %v15945_v28  ;;  %v6291_v34 = vpop.f32.mrf.mxu0  ;;  %8095 = vmatprep.subr.bf16.mxu1 %v14012_v21  ;;  %v6531_v21 = vld [vmem:[#allocation12 + $0x1088] sm:$0xff]  ;;  %v6654_v32 = vld [vmem:[#allocation12 + $0x1460] sm:$0xff] }
 0x56b   :  { %v16069_v63 = vadd.f32 %v6291_v34, %v16014_v16  ;;  %8138 = vmatprep.subr.bf16.mxu0 %v13886_v7  ;;  %v13980_v7 = vcombine.high %v6658_v30, %v6662_v8  ;;  %v13854_v20 = vcombine.high %v6531_v21, %v6535_v38  ;;  %v13853_v34 = vcombine.low %v6531_v21, %v6535_v38  ;;  %v6766_v3 = vld [vmem:[#allocation12 + $0x17e0] sm:$0xff]  ;;  %v6631_v21 = vld [vmem:[#allocation12 + $0x13a8] sm:$0xff] }
 0x56c   :  { %v6293_v19 = vpop.f32.mrf.mxu0  ;;  %8096 = vmatpush1.bf16.msra.mxu1 %v14011_v52  ;;  %v6523_v52 = vld [vmem:[#allocation12 + $0x1048] sm:$0xff] }
 0x56d   :  { %v16072_v24 = vadd.f32 %v6293_v19, %v16017_v56  ;;  %8139 = vmatpush1.bf16.msra.mxu0 %v13885_v26  ;;  %8097 = vmatprep.subr.bf16.mxu1 %v14004_v13  ;;  %v13869_v56 = vcombine.low %v6547_v1, %v6551_v45  ;;  %v6527_v26 = vld [vmem:[#allocation12 + $0x1068] sm:$0xff]  ;;  %v13979_v13 = vcombine.low %v6658_v30, %v6662_v8  ;;  %v6646_v1 = vld [vmem:[#allocation12 + $0x1420] sm:$0xff] }
 0x56e   :  { %v6295_v58 = vpop.f32.mrf.mxu0  ;;  %8140 = vmatprep.subr.bf16.mxu0 %v13878_v2  ;;  %v13972_v2 = vcombine.high %v6650_v6, %v6654_v32  ;;  %v13846_v25 = vcombine.high %v6523_v52, %v6527_v26  ;;  %v6515_v45 = vld [vmem:[#allocation12 + $0x1008] sm:$0xff]  ;;  %v6758_v30 = vld [vmem:[#allocation12 + $0x17a0] sm:$0xff] }
 0x56f   :  { %v16075_v16 = vadd.f32 %v6295_v58, %v16019_v57  ;;  %v13861_v57 = vcombine.low %v6539_v36, %v6543_v61  ;;  %v6519_v19 = vld [vmem:[#allocation12 + $0x1028] sm:$0xff]  ;;  %v13963_v61 = vcombine.low %v6642_v0, %v6646_v1 }
 0x570   :  { %8098 = vmatpush1.bf16.msra.mxu1 %v14003_v54  ;;  %v13971_v54 = vcombine.low %v6650_v6, %v6654_v32  ;;  %v13838_v58 = vcombine.high %v6515_v45, %v6519_v19  ;;  %v6639_v36 = vld [vmem:[#allocation12 + $0x13e8] sm:$0xff]  ;;  %v6750_v6 = vld [vmem:[#allocation12 + $0x1760] sm:$0xff] }
 0x571   :  { %8141 = vmatpush1.bf16.msra.mxu0 %v13877_v60  ;;  %8099 = vmatprep.subr.bf16.mxu1 %v13996_v53  ;;  %v13845_v60 = vcombine.low %v6523_v52, %v6527_v26  ;;  %v13964_v53 = vcombine.high %v6642_v0, %v6646_v1  ;;  %v6627_v8 = vld [vmem:[#allocation12 + $0x1388] sm:$0xff]  ;;  %v6742_v0 = vld [vmem:[#allocation12 + $0x1720] sm:$0xff] }
 0x572   :  { %8142 = vmatprep.subr.bf16.mxu0 %v13870_v47  ;;  %v6762_v47 = vld [vmem:[#allocation12 + $0x17c0] sm:$0xff]  ;;  %v6619_v32 = vld [vmem:[#allocation12 + $0x1348] sm:$0xff] }
 0x573   :  { %v14083_v38 = vcombine.low %v6762_v47, %v6766_v3  ;;  %v6623_v52 = vld [vmem:[#allocation12 + $0x1368] sm:$0xff] }
 0x574   :  { %8100 = vmatpush1.bf16.msra.mxu1 %v13995_v17  ;;  %v13837_v17 = vcombine.low %v6515_v45, %v6519_v19  ;;  %v6611_v1 = vld [vmem:[#allocation12 + $0x1308] sm:$0xff] }
 0x575   :  { %8143 = vmatpush1.bf16.msra.mxu0 %v13869_v56  ;;  %8101 = vmatprep.subr.bf16.mxu1 %v13988_v33  ;;  %v14084_v56 = vcombine.high %v6762_v47, %v6766_v3  ;;  %v13958_v33 = vcombine.high %v6635_v51, %v6639_v36  ;;  %v6615_v45 = vld [vmem:[#allocation12 + $0x1328] sm:$0xff]  ;;  %v6734_v47 = vld [vmem:[#allocation12 + $0x16e0] sm:$0xff] }
 0x576   :  { %8144 = vmatprep.subr.bf16.mxu0 %v13862_v27  ;;  %v6754_v27 = vld [vmem:[#allocation12 + $0x1780] sm:$0xff]  ;;  %v6603_v3 = vld [vmem:[#allocation12 + $0x12c8] sm:$0xff] }
 0x577   :  { %v14075_v26 = vcombine.low %v6754_v27, %v6758_v30 }
 0x578   :  { %8102 = vmatpush1.bf16.msra.mxu1 %v13987_v11  ;;  %v13957_v11 = vcombine.low %v6635_v51, %v6639_v36  ;;  %v6607_v51 = vld [vmem:[#allocation12 + $0x12e8] sm:$0xff] }
 0x579   :  { %8145 = vmatpush1.bf16.msra.mxu0 %v13861_v57  ;;  %8103 = vmatprep.subr.bf16.mxu1 %v13980_v7  ;;  %v14076_v57 = vcombine.high %v6754_v27, %v6758_v30  ;;  %v13950_v7 = vcombine.high %v6627_v8, %v6631_v21  ;;  %v6726_v27 = vld [vmem:[#allocation12 + $0x16a0] sm:$0xff]  ;;  %v6595_v30 = vld [vmem:[#allocation12 + $0x1288] sm:$0xff] }
 0x57a   :  { %8146 = vmatprep.subr.bf16.mxu0 %v13854_v20  ;;  %v6746_v20 = vld [vmem:[#allocation12 + $0x1740] sm:$0xff] }
 0x57b   :  { %v14067_v19 = vcombine.low %v6746_v20, %v6750_v6 }
 0x57c   :  { %8104 = vmatpush1.bf16.msra.mxu1 %v13979_v13  ;;  %v13949_v13 = vcombine.low %v6627_v8, %v6631_v21  ;;  %v6599_v8 = vld [vmem:[#allocation12 + $0x12a8] sm:$0xff] }
 0x57d   :  { %8147 = vmatpush1.bf16.msra.mxu0 %v13853_v34  ;;  %8105 = vmatprep.subr.bf16.mxu1 %v13972_v2  ;;  %v14068_v34 = vcombine.high %v6746_v20, %v6750_v6  ;;  %v13942_v2 = vcombine.high %v6619_v32, %v6623_v52  ;;  %v6718_v20 = vld [vmem:[#allocation12 + $0x1660] sm:$0xff]  ;;  %v6587_v6 = vld [vmem:[#allocation12 + $0x1248] sm:$0xff] }
 0x57e   :  { %8148 = vmatprep.subr.bf16.mxu0 %v13846_v25  ;;  %v6738_v25 = vld [vmem:[#allocation12 + $0x1700] sm:$0xff] }
 0x57f   :  { %v14059_v36 = vcombine.low %v6738_v25, %v6742_v0 }
 0x580   :  { %8106 = vmatpush1.bf16.msra.mxu1 %v13971_v54  ;;  %v13941_v54 = vcombine.low %v6619_v32, %v6623_v52  ;;  %v6591_v32 = vld [vmem:[#allocation12 + $0x1268] sm:$0xff] }
 0x581   :  { %8149 = vmatpush1.bf16.msra.mxu0 %v13845_v60  ;;  %8107 = vmatprep.subr.bf16.mxu1 %v13964_v53  ;;  %v14060_v60 = vcombine.high %v6738_v25, %v6742_v0  ;;  %v13934_v53 = vcombine.high %v6611_v1, %v6615_v45  ;;  %v6706_v25 = vld [vmem:[#allocation12 + $0x1600] sm:$0xff] }
 0x582   :  { %8150 = vmatprep.subr.bf16.mxu0 %v13838_v58  ;;  %v6730_v58 = vld [vmem:[#allocation12 + $0x16c0] sm:$0xff] }
 0x583   :  { %v14051_v21 = vcombine.low %v6730_v58, %v6734_v47  ;;  %v6710_v0 = vld [vmem:[#allocation12 + $0x1620] sm:$0xff] }
 0x584   :  { %8108 = vmatpush1.bf16.msra.mxu1 %v13963_v61  ;;  %v13933_v61 = vcombine.low %v6611_v1, %v6615_v45  ;;  %v6579_v1 = vld [vmem:[#allocation12 + $0x1208] sm:$0xff] }
 0x585   :  { %8151 = vmatpush1.bf16.msra.mxu0 %v13837_v17  ;;  %8109 = vmatprep.subr.bf16.mxu1 %v14084_v56  ;;  %v14052_v17 = vcombine.high %v6730_v58, %v6734_v47  ;;  %v13926_v56 = vcombine.high %v6603_v3, %v6607_v51  ;;  %v6583_v45 = vld [vmem:[#allocation12 + $0x1228] sm:$0xff] }
 0x586   :  { %8152 = vmatprep.subr.bf16.mxu0 %v13958_v33  ;;  %v6722_v33 = vld [vmem:[#allocation12 + $0x1680] sm:$0xff]  ;;  %v13902_v58 = vcombine.high %v6579_v1, %v6583_v45  ;;  %v6699_v47 = vld [vmem:[#allocation12 + $0x15c8] sm:$0xff] }
 0x587   :  { %v14043_v52 = vcombine.low %v6722_v33, %v6726_v27 }
 0x588   :  { %8110 = vmatpush2.bf16.msra.mxu1 %v14083_v38  ;;  %v13925_v38 = vcombine.low %v6603_v3, %v6607_v51  ;;  %v6703_v3 = vld [vmem:[#allocation12 + $0x15e8] sm:$0xff]  ;;  %v6572_v51 = vld [vmem:[#allocation12 + $0x11d0] sm:$0xff] }
 0x589   :  { %8153 = vmatpush2.bf16.msra.mxu0 %v13957_v11  ;;  %8111 = vmatprep.subr.bf16.mxu1 %v14076_v57  ;;  %v14044_v11 = vcombine.high %v6722_v33, %v6726_v27  ;;  %v13918_v57 = vcombine.high %v6595_v30, %v6599_v8  ;;  %v14022_v33 = vcombine.high %v6699_v47, %v6703_v3 }
 0x58a   :  { %8154 = vmatprep.subr.bf16.mxu0 %v13950_v7  ;;  %v6714_v7 = vld [vmem:[#allocation12 + $0x1640] sm:$0xff] }
 0x58c   :  { %8112 = vmatpush2.bf16.msra.mxu1 %v14075_v26  ;;  %v16077_v26 = vpop.f32.mrf.mxu1 }
 0x58d   :  { %8155 = vmatpush2.bf16.msra.mxu0 %v13949_v13  ;;  %8113 = vmatprep.subr.bf16.mxu1 %v14068_v34  ;;  %v13917_v13 = vcombine.low %v6595_v30, %v6599_v8  ;;  %v14036_v34 = vcombine.high %v6714_v7, %v6718_v20  ;;  %v6691_v30 = vld [vmem:[#allocation12 + $0x1588] sm:$0xff] }
 0x58e   :  { %8156 = vmatprep.subr.bf16.mxu0 %v13942_v2  ;;  %v13910_v2 = vcombine.high %v6587_v6, %v6591_v32  ;;  %v6695_v8 = vld [vmem:[#allocation12 + $0x15a8] sm:$0xff] }
 0x590   :  { %8114 = vmatpush2.bf16.msra.mxu1 %v14067_v19  ;;  %v14035_v19 = vcombine.low %v6714_v7, %v6718_v20  ;;  %v14014_v20 = vcombine.high %v6691_v30, %v6695_v8 }
 0x591   :  { %8157 = vmatpush2.bf16.msra.mxu0 %v13941_v54  ;;  %8115 = vmatprep.subr.bf16.mxu1 %v14060_v60  ;;  %v16079_v54 = vpop.f32.mrf.mxu1  ;;  %v13909_v60 = vcombine.low %v6587_v6, %v6591_v32  ;;  %v6683_v6 = vld [vmem:[#allocation12 + $0x1548] sm:$0xff] }
 0x592   :  { %8158 = vmatprep.subr.bf16.mxu0 %v13934_v53  ;;  %v14028_v53 = vcombine.high %v6706_v25, %v6710_v0  ;;  %v6687_v32 = vld [vmem:[#allocation12 + $0x1568] sm:$0xff] }
 0x594   :  { %8116 = vmatpush2.bf16.msra.mxu1 %v14059_v36  ;;  %v6576_v36 = vld [vmem:[#allocation12 + $0x11f0] sm:$0xff] }
 0x595   :  { %8159 = vmatpush2.bf16.msra.mxu0 %v13933_v61  ;;  %8117 = vmatprep.subr.bf16.mxu1 %v14052_v17  ;;  %v14027_v61 = vcombine.low %v6706_v25, %v6710_v0  ;;  %v16081_v17 = vpop.f32.mrf.mxu1  ;;  %v13896_v27 = vcombine.high %v6572_v51, %v6576_v36  ;;  %v13895_v7 = vcombine.low %v6572_v51, %v6576_v36  ;;  %v6679_v51 = vld [vmem:[#allocation12 + $0x1528] sm:$0xff] }
 0x596   :  { %8160 = vmatprep.subr.bf16.mxu0 %v13926_v56  ;;  %v13901_v56 = vcombine.low %v6579_v1, %v6583_v45  ;;  %v14013_v1 = vcombine.low %v6691_v30, %v6695_v8 }
 0x598   :  { %8118 = vmatpush2.bf16.msra.mxu1 %v14051_v21  ;;  %v14021_v21 = vcombine.low %v6699_v47, %v6703_v3  ;;  %v6675_v3 = vld [vmem:[#allocation12 + $0x1508] sm:$0xff] }
 0x599   :  { %8161 = vmatpush2.bf16.msra.mxu0 %v13925_v38  ;;  %8119 = vmatprep.subr.bf16.mxu1 %v14044_v11  ;;  %v6564_v38 = vld [vmem:[#allocation12 + $0x1190] sm:$0xff] }
 0x59a   :  { %8162 = vmatprep.subr.bf16.mxu0 %v13918_v57  ;;  %v6568_v11 = vld [vmem:[#allocation12 + $0x11b0] sm:$0xff]  ;;  %v16083_v57 = vpop.f32.mrf.mxu1 }
 0x59c   :  { %8120 = vmatpush2.bf16.msra.mxu1 %v14043_v52 }
 0x59d   :  { %8163 = vmatpush2.bf16.msra.mxu0 %v13917_v13  ;;  %8121 = vmatprep.subr.bf16.mxu1 %v14036_v34  ;;  %v13888_v13 = vcombine.high %v6564_v38, %v6568_v11  ;;  %v6556_v34 = vld [vmem:[#allocation12 + $0x1150] sm:$0xff] }
 0x59e   :  { %8164 = vmatprep.subr.bf16.mxu0 %v13910_v2  ;;  %v6560_v2 = vld [vmem:[#allocation12 + $0x1170] sm:$0xff] }
 0x59f   :  { %v13880_v47 = vcombine.high %v6556_v34, %v6560_v2 }
 0x5a0   :  { %8122 = vmatpush2.bf16.msra.mxu1 %v14035_v19 }
 0x5a1   :  { %8165 = vmatpush2.bf16.msra.mxu0 %v13909_v60  ;;  %8123 = vmatprep.subr.bf16.mxu1 %v14028_v53  ;;  %v13887_v60 = vcombine.low %v6564_v38, %v6568_v11  ;;  %v14006_v53 = vcombine.high %v6683_v6, %v6687_v32  ;;  %v13998_v38 = vcombine.high %v6675_v3, %v6679_v51 }
 0x5a2   :  { %8166 = vmatprep.subr.bf16.mxu0 %v13902_v58 }
 0x5a4   :  { %8124 = vmatpush2.bf16.msra.mxu1 %v14027_v61  ;;  %v6548_v61 = vld [vmem:[#allocation12 + $0x1110] sm:$0xff] }
 0x5a5   :  { %8167 = vmatpush2.bf16.msra.mxu0 %v13901_v56  ;;  %8179 = vmatprep.subr.bf16.mxu1 %v14022_v33  ;;  %v6552_v56 = vld [vmem:[#allocation12 + $0x1130] sm:$0xff] }
 0x5a6   :  { %8222 = vmatprep.subr.bf16.mxu0 %v13896_v27 }
 0x5a7   :  { %v6332_v52 = vpop.f32.mrf.mxu1  ;;  %8126 = vmatmul.mubr.bf16.vlgmr.msra.gmra.mxu1 %v15979_v22 }
 0x5a8   :  { %v16087_v25 = vadd.f32 %v6332_v52, %v16064_v15  ;;  %v6375_v0 = vpop.f32.mrf.mxu0  ;;  %8169 = vmatmul.mubr.bf16.vlgmr.msra.gmra.mxu0 %v15943_v35  ;;  %8180 = vmatpush1.bf16.msra.mxu1 %v14021_v21  ;;  %v13879_v21 = vcombine.low %v6556_v34, %v6560_v2 }
 0x5a9   :  { %v16091_v45 = vadd.f32 %v6375_v0, %v16022_v5  ;;  %8211 = vmatprep.mubr.bf16.mxu1 %v16059_v46  ;;  %v6334_v19 = vpop.f32.mrf.mxu1  ;;  %8223 = vmatpush1.bf16.msra.mxu0 %v13895_v7  ;;  %v13872_v7 = vcombine.high %v6548_v61, %v6552_v56  ;;  %v6663_v0 = vld [vmem:[#allocation12 + $0x14a8] sm:$0xff] }
 0x5aa   :  { %v16095_v58 = vadd.f32 %v6334_v19, %v16069_v63  ;;  %8254 = vmatprep.mubr.bf16.mxu0 %v15945_v28  ;;  %v6377_v15 = vpop.f32.mrf.mxu0  ;;  %8181 = vmatprep.subr.bf16.mxu1 %v14014_v20  ;;  %v14005_v63 = vcombine.low %v6683_v6, %v6687_v32  ;;  %v6667_v20 = vld [vmem:[#allocation12 + $0x14c8] sm:$0xff]  ;;  %v6540_v6 = vld [vmem:[#allocation12 + $0x10d0] sm:$0xff] }
 0x5ab   :  { %v16099_v36 = vadd.f32 %v6377_v15, %v16026_v49  ;;  %v6336_v5 = vpop.f32.mrf.mxu1  ;;  %8224 = vmatprep.subr.bf16.mxu0 %v13888_v13  ;;  %v6544_v32 = vld [vmem:[#allocation12 + $0x10f0] sm:$0xff]  ;;  %v13871_v13 = vcombine.low %v6548_v61, %v6552_v56 }
 0x5ac   :  { %v16102_v33 = vadd.f32 %v6336_v5, %v16072_v24  ;;  %v6379_v27 = vpop.f32.mrf.mxu0  ;;  %8182 = vmatpush1.bf16.msra.mxu1 %v14013_v1  ;;  %v6671_v24 = vld [vmem:[#allocation12 + $0x14e8] sm:$0xff]  ;;  %v13864_v2 = vcombine.high %v6540_v6, %v6544_v32  ;;  %v6532_v1 = vld [vmem:[#allocation12 + $0x1090] sm:$0xff] }
 0x5ad   :  { %v16105_v30 = vadd.f32 %v6379_v27, %v16029_v31  ;;  %v6338_v8 = vpop.f32.mrf.mxu1  ;;  %8225 = vmatpush1.bf16.msra.mxu0 %v13887_v60  ;;  %8183 = vmatprep.subr.bf16.mxu1 %v14006_v53  ;;  %v13997_v31 = vcombine.low %v6675_v3, %v6679_v51  ;;  %v13990_v34 = vcombine.high %v6667_v20, %v6671_v24  ;;  %v6536_v19 = vld [vmem:[#allocation12 + $0x10b0] sm:$0xff]  ;;  %v6655_v3 = vld [vmem:[#allocation12 + $0x1468] sm:$0xff] }
 0x5ae   :  { %v16108_v49 = vadd.f32 %v6338_v8, %v16075_v16  ;;  %v6381_v11 = vpop.f32.mrf.mxu0  ;;  %8226 = vmatprep.subr.bf16.mxu0 %v13880_v47  ;;  %v6659_v16 = vld [vmem:[#allocation12 + $0x1488] sm:$0xff]  ;;  %v13989_v60 = vcombine.low %v6667_v20, %v6671_v24  ;;  %v13856_v15 = vcombine.high %v6532_v1, %v6536_v19  ;;  %v6524_v51 = vld [vmem:[#allocation12 + $0x1050] sm:$0xff]  ;;  %v13855_v56 = vcombine.low %v6532_v1, %v6536_v19 }
 0x5af   :  { %v16111_v52 = vadd.f32 %v6381_v11, %v16031_v4  ;;  %v13863_v4 = vcombine.low %v6540_v6, %v6544_v32  ;;  %v13982_v53 = vcombine.high %v6659_v16, %v6663_v0  ;;  %v6651_v47 = vld [vmem:[#allocation12 + $0x1448] sm:$0xff]  ;;  %v6528_v5 = vld [vmem:[#allocation12 + $0x1070] sm:$0xff]  ;;  %v13981_v61 = vcombine.low %v6659_v16, %v6663_v0 }
 0x5b0   :  { %8184 = vmatpush1.bf16.msra.mxu1 %v14005_v63  ;;  %v13974_v27 = vcombine.high %v6651_v47, %v6655_v3  ;;  %v13848_v63 = vcombine.high %v6524_v51, %v6528_v5  ;;  %v6643_v8 = vld [vmem:[#allocation12 + $0x1408] sm:$0xff]  ;;  %v6520_v11 = vld [vmem:[#allocation12 + $0x1030] sm:$0xff]  ;;  %v13847_v20 = vcombine.low %v6524_v51, %v6528_v5 }
 0x5b1   :  { %8227 = vmatpush1.bf16.msra.mxu0 %v13879_v21  ;;  %8185 = vmatprep.subr.bf16.mxu1 %v13998_v38  ;;  %v6647_v21 = vld [vmem:[#allocation12 + $0x1428] sm:$0xff]  ;;  %v6516_v38 = vld [vmem:[#allocation12 + $0x1010] sm:$0xff] }
 0x5b2   :  { %8228 = vmatprep.subr.bf16.mxu0 %v13872_v7  ;;  %v13973_v7 = vcombine.low %v6651_v47, %v6655_v3  ;;  %v13966_v24 = vcombine.high %v6643_v8, %v6647_v21  ;;  %v13840_v6 = vcombine.high %v6516_v38, %v6520_v11  ;;  %v6763_v32 = vld [vmem:[#allocation12 + $0x17c8] sm:$0xff]  ;;  %v13839_v16 = vcombine.low %v6516_v38, %v6520_v11 }
 0x5b3   :  { %v6755_v19 = vld [vmem:[#allocation12 + $0x1788] sm:$0xff] }
 0x5b4   :  { %8186 = vmatpush1.bf16.msra.mxu1 %v13997_v31  ;;  %v6767_v31 = vld [vmem:[#allocation12 + $0x17e8] sm:$0xff] }
 0x5b5   :  { %8229 = vmatpush1.bf16.msra.mxu0 %v13871_v13  ;;  %8187 = vmatprep.subr.bf16.mxu1 %v13990_v34  ;;  %v6636_v13 = vld [vmem:[#allocation12 + $0x13d0] sm:$0xff]  ;;  %v14086_v0 = vcombine.high %v6763_v32, %v6767_v31  ;;  %v6747_v5 = vld [vmem:[#allocation12 + $0x1748] sm:$0xff] }
 0x5b6   :  { %8230 = vmatprep.subr.bf16.mxu0 %v13864_v2  ;;  %v6640_v34 = vld [vmem:[#allocation12 + $0x13f0] sm:$0xff]  ;;  %v13965_v2 = vcombine.low %v6643_v8, %v6647_v21  ;;  %v6739_v11 = vld [vmem:[#allocation12 + $0x1708] sm:$0xff] }
 0x5b7   :  { %v13960_v1 = vcombine.high %v6636_v13, %v6640_v34  ;;  %v13959_v47 = vcombine.low %v6636_v13, %v6640_v34  ;;  %v6731_v34 = vld [vmem:[#allocation12 + $0x16c8] sm:$0xff] }
 0x5b8   :  { %8188 = vmatpush1.bf16.msra.mxu1 %v13989_v60  ;;  %v6759_v60 = vld [vmem:[#allocation12 + $0x17a8] sm:$0xff] }
 0x5b9   :  { %8231 = vmatpush1.bf16.msra.mxu0 %v13863_v4  ;;  %8189 = vmatprep.subr.bf16.mxu1 %v13982_v53  ;;  %v6628_v4 = vld [vmem:[#allocation12 + $0x1390] sm:$0xff]  ;;  %v14078_v3 = vcombine.high %v6755_v19, %v6759_v60 }
 0x5ba   :  { %8232 = vmatprep.subr.bf16.mxu0 %v13856_v15  ;;  %v6632_v53 = vld [vmem:[#allocation12 + $0x13b0] sm:$0xff]  ;;  %v14085_v15 = vcombine.low %v6763_v32, %v6767_v31 }
 0x5bb   :  { %v13952_v51 = vcombine.high %v6628_v4, %v6632_v53  ;;  %v13951_v8 = vcombine.low %v6628_v4, %v6632_v53  ;;  %v6723_v53 = vld [vmem:[#allocation12 + $0x1688] sm:$0xff] }
 0x5bc   :  { %8190 = vmatpush1.bf16.msra.mxu1 %v13981_v61  ;;  %v6751_v61 = vld [vmem:[#allocation12 + $0x1768] sm:$0xff] }
 0x5bd   :  { %8233 = vmatpush1.bf16.msra.mxu0 %v13855_v56  ;;  %8191 = vmatprep.subr.bf16.mxu1 %v13974_v27  ;;  %v6620_v56 = vld [vmem:[#allocation12 + $0x1350] sm:$0xff]  ;;  %v14070_v21 = vcombine.high %v6747_v5, %v6751_v61 }
 0x5be   :  { %8234 = vmatprep.subr.bf16.mxu0 %v13848_v63  ;;  %v6624_v27 = vld [vmem:[#allocation12 + $0x1370] sm:$0xff]  ;;  %v14077_v63 = vcombine.low %v6755_v19, %v6759_v60 }
 0x5bf   :  { %v13944_v38 = vcombine.high %v6620_v56, %v6624_v27  ;;  %v13943_v32 = vcombine.low %v6620_v56, %v6624_v27  ;;  %v6715_v27 = vld [vmem:[#allocation12 + $0x1648] sm:$0xff] }
 0x5c0   :  { %8192 = vmatpush1.bf16.msra.mxu1 %v13973_v7  ;;  %v6743_v7 = vld [vmem:[#allocation12 + $0x1728] sm:$0xff] }
 0x5c1   :  { %8235 = vmatpush1.bf16.msra.mxu0 %v13847_v20  ;;  %8193 = vmatprep.subr.bf16.mxu1 %v13966_v24  ;;  %v6612_v20 = vld [vmem:[#allocation12 + $0x1310] sm:$0xff]  ;;  %v14062_v31 = vcombine.high %v6739_v11, %v6743_v7 }
 0x5c2   :  { %8236 = vmatprep.subr.bf16.mxu0 %v13840_v6  ;;  %v6616_v24 = vld [vmem:[#allocation12 + $0x1330] sm:$0xff]  ;;  %v14069_v6 = vcombine.low %v6747_v5, %v6751_v61 }
 0x5c3   :  { %v13936_v13 = vcombine.high %v6612_v20, %v6616_v24  ;;  %v13935_v19 = vcombine.low %v6612_v20, %v6616_v24  ;;  %v6707_v24 = vld [vmem:[#allocation12 + $0x1608] sm:$0xff] }
 0x5c4   :  { %8194 = vmatpush1.bf16.msra.mxu1 %v13965_v2  ;;  %v6735_v2 = vld [vmem:[#allocation12 + $0x16e8] sm:$0xff] }
 0x5c5   :  { %8237 = vmatpush1.bf16.msra.mxu0 %v13839_v16  ;;  %8195 = vmatprep.subr.bf16.mxu1 %v14086_v0  ;;  %v6604_v16 = vld [vmem:[#allocation12 + $0x12d0] sm:$0xff]  ;;  %v14054_v60 = vcombine.high %v6731_v34, %v6735_v2 }
 0x5c6   :  { %8238 = vmatprep.subr.bf16.mxu0 %v13960_v1  ;;  %v6608_v0 = vld [vmem:[#allocation12 + $0x12f0] sm:$0xff]  ;;  %v14061_v1 = vcombine.low %v6739_v11, %v6743_v7 }
 0x5c7   :  { %v13928_v4 = vcombine.high %v6604_v16, %v6608_v0  ;;  %v13927_v5 = vcombine.low %v6604_v16, %v6608_v0  ;;  %v6700_v0 = vld [vmem:[#allocation12 + $0x15d0] sm:$0xff] }
 0x5c8   :  { %8196 = vmatpush2.bf16.msra.mxu1 %v14085_v15  ;;  %v6727_v15 = vld [vmem:[#allocation12 + $0x16a8] sm:$0xff] }
 0x5c9   :  { %8239 = vmatpush2.bf16.msra.mxu0 %v13959_v47  ;;  %8197 = vmatprep.subr.bf16.mxu1 %v14078_v3  ;;  %v6596_v47 = vld [vmem:[#allocation12 + $0x1290] sm:$0xff]  ;;  %v14046_v61 = vcombine.high %v6723_v53, %v6727_v15 }
 0x5ca   :  { %8240 = vmatprep.subr.bf16.mxu0 %v13952_v51  ;;  %v6600_v3 = vld [vmem:[#allocation12 + $0x12b0] sm:$0xff]  ;;  %v14053_v51 = vcombine.low %v6731_v34, %v6735_v2 }
 0x5cb   :  { %v13920_v56 = vcombine.high %v6596_v47, %v6600_v3  ;;  %v13919_v11 = vcombine.low %v6596_v47, %v6600_v3  ;;  %v6692_v3 = vld [vmem:[#allocation12 + $0x1590] sm:$0xff] }
 0x5cc   :  { %8198 = vmatpush2.bf16.msra.mxu1 %v14077_v63  ;;  %v6719_v63 = vld [vmem:[#allocation12 + $0x1668] sm:$0xff] }
 0x5cd   :  { %8241 = vmatpush2.bf16.msra.mxu0 %v13951_v8  ;;  %8199 = vmatprep.subr.bf16.mxu1 %v14070_v21  ;;  %v6588_v8 = vld [vmem:[#allocation12 + $0x1250] sm:$0xff]  ;;  %v14038_v7 = vcombine.high %v6715_v27, %v6719_v63 }
 0x5ce   :  { %8242 = vmatprep.subr.bf16.mxu0 %v13944_v38  ;;  %v6592_v21 = vld [vmem:[#allocation12 + $0x1270] sm:$0xff]  ;;  %v14045_v38 = vcombine.low %v6723_v53, %v6727_v15 }
 0x5cf   :  { %v13912_v20 = vcombine.high %v6588_v8, %v6592_v21  ;;  %v13911_v34 = vcombine.low %v6588_v8, %v6592_v21  ;;  %v6684_v8 = vld [vmem:[#allocation12 + $0x1550] sm:$0xff] }
 0x5d0   :  { %8200 = vmatpush2.bf16.msra.mxu1 %v14069_v6  ;;  %v6711_v6 = vld [vmem:[#allocation12 + $0x1628] sm:$0xff]  ;;  %v6688_v21 = vld [vmem:[#allocation12 + $0x1570] sm:$0xff] }
 0x5d1   :  { %8243 = vmatpush2.bf16.msra.mxu0 %v13943_v32  ;;  %8201 = vmatprep.subr.bf16.mxu1 %v14062_v31  ;;  %v6580_v32 = vld [vmem:[#allocation12 + $0x1210] sm:$0xff]  ;;  %v14030_v2 = vcombine.high %v6707_v24, %v6711_v6 }
 0x5d2   :  { %8244 = vmatprep.subr.bf16.mxu0 %v13936_v13  ;;  %v6584_v31 = vld [vmem:[#allocation12 + $0x1230] sm:$0xff]  ;;  %v14037_v13 = vcombine.low %v6715_v27, %v6719_v63 }
 0x5d3   :  { %v13904_v16 = vcombine.high %v6580_v32, %v6584_v31  ;;  %v13903_v53 = vcombine.low %v6580_v32, %v6584_v31 }
 0x5d4   :  { %8202 = vmatpush2.bf16.msra.mxu1 %v14061_v1  ;;  %v6704_v1 = vld [vmem:[#allocation12 + $0x15f0] sm:$0xff] }
 0x5d5   :  { %8245 = vmatpush2.bf16.msra.mxu0 %v13935_v19  ;;  %8203 = vmatprep.subr.bf16.mxu1 %v14054_v60  ;;  %v6573_v19 = vld [vmem:[#allocation12 + $0x11d8] sm:$0xff]  ;;  %v14024_v15 = vcombine.high %v6700_v0, %v6704_v1 }
 0x5d6   :  { %8246 = vmatprep.subr.bf16.mxu0 %v13928_v4  ;;  %v6577_v60 = vld [vmem:[#allocation12 + $0x11f8] sm:$0xff]  ;;  %v14029_v4 = vcombine.low %v6707_v24, %v6711_v6 }
 0x5d7   :  { %v13898_v47 = vcombine.high %v6573_v19, %v6577_v60  ;;  %v13897_v27 = vcombine.low %v6573_v19, %v6577_v60  ;;  %v6680_v19 = vld [vmem:[#allocation12 + $0x1530] sm:$0xff] }
 0x5d8   :  { %8204 = vmatpush2.bf16.msra.mxu1 %v14053_v51  ;;  %v6696_v51 = vld [vmem:[#allocation12 + $0x15b0] sm:$0xff] }
 0x5d9   :  { %8247 = vmatpush2.bf16.msra.mxu0 %v13927_v5  ;;  %8205 = vmatprep.subr.bf16.mxu1 %v14046_v61  ;;  %v14023_v5 = vcombine.low %v6700_v0, %v6704_v1  ;;  %v6565_v61 = vld [vmem:[#allocation12 + $0x1198] sm:$0xff]  ;;  %v14016_v63 = vcombine.high %v6692_v3, %v6696_v51  ;;  %v14015_v32 = vcombine.low %v6692_v3, %v6696_v51  ;;  %v6676_v1 = vld [vmem:[#allocation12 + $0x1510] sm:$0xff] }
 0x5da   :  { %8248 = vmatprep.subr.bf16.mxu0 %v13920_v56  ;;  %v6569_v56 = vld [vmem:[#allocation12 + $0x11b8] sm:$0xff] }
 0x5dc   :  { %8206 = vmatpush2.bf16.msra.mxu1 %v14045_v38 }
 0x5dd   :  { %8249 = vmatpush2.bf16.msra.mxu0 %v13919_v11  ;;  %8207 = vmatprep.subr.bf16.mxu1 %v14038_v7  ;;  %v13890_v11 = vcombine.high %v6565_v61, %v6569_v56  ;;  %v6557_v7 = vld [vmem:[#allocation12 + $0x1158] sm:$0xff] }
 0x5de   :  { %8250 = vmatprep.subr.bf16.mxu0 %v13912_v20  ;;  %v6561_v20 = vld [vmem:[#allocation12 + $0x1178] sm:$0xff] }
 0x5df   :  { %v13882_v0 = vcombine.high %v6557_v7, %v6561_v20  ;;  %v13881_v51 = vcombine.low %v6557_v7, %v6561_v20  ;;  %v6664_v20 = vld [vmem:[#allocation12 + $0x14b0] sm:$0xff] }
 0x5e0   :  { %8208 = vmatpush2.bf16.msra.mxu1 %v14037_v13 }
 0x5e1   :  { %8251 = vmatpush2.bf16.msra.mxu0 %v13911_v34  ;;  %8209 = vmatprep.subr.bf16.mxu1 %v14030_v2  ;;  %v13889_v34 = vcombine.low %v6565_v61, %v6569_v56  ;;  %v14008_v2 = vcombine.high %v6684_v8, %v6688_v21 }
 0x5e2   :  { %8252 = vmatprep.subr.bf16.mxu0 %v13904_v16 }
 0x5e4   :  { %8210 = vmatpush2.bf16.msra.mxu1 %v14029_v4  ;;  %v6549_v4 = vld [vmem:[#allocation12 + $0x1118] sm:$0xff] }
 0x5e5   :  { %8253 = vmatpush2.bf16.msra.mxu0 %v13903_v53  ;;  %8265 = vmatprep.subr.bf16.mxu1 %v14024_v15  ;;  %v6553_v53 = vld [vmem:[#allocation12 + $0x1138] sm:$0xff] }
 0x5e6   :  { %8308 = vmatprep.subr.bf16.mxu0 %v13898_v47  ;;  %v13874_v56 = vcombine.high %v6549_v4, %v6553_v53 }
 0x5e7   :  { %v6418_v38 = vpop.f32.mrf.mxu1  ;;  %8212 = vmatmul.mubr.bf16.vlgmr.msra.gmra.mxu1 %v15979_v22 }
 0x5e8   :  { %v16115_v24 = vadd.f32 %v6418_v38, %v16091_v45  ;;  %v6461_v6 = vpop.f32.mrf.mxu0  ;;  %8255 = vmatmul.mubr.bf16.vlgmr.msra.gmra.mxu0 %v15943_v35  ;;  %8266 = vmatpush1.bf16.msra.mxu1 %v14023_v5  ;;  %v14000_v5 = vcombine.high %v6676_v1, %v6680_v19  ;;  %v13873_v38 = vcombine.low %v6549_v4, %v6553_v53 }
 0x5e9   :  { %v16119_v31 = vadd.f32 %v6461_v6, %v16034_v59  ;;  %8297 = vmatprep.mubr.bf16.mxu1 %v16059_v46  ;;  %v6420_v13 = vpop.f32.mrf.mxu1  ;;  %8309 = vmatpush1.bf16.msra.mxu0 %v13897_v27  ;;  %v6668_v27 = vld [vmem:[#allocation12 + $0x14d0] sm:$0xff]  ;;  %v6533_v6 = vld [vmem:[#allocation12 + $0x1098] sm:$0xff] }
 0x5ea   :  { %v16123_v16 = vadd.f32 %v6420_v13, %v16099_v36  ;;  %8340 = vmatprep.mubr.bf16.mxu0 %v15945_v28  ;;  %v6463_v45 = vpop.f32.mrf.mxu0  ;;  %8267 = vmatprep.subr.bf16.mxu1 %v14016_v63  ;;  %v14007_v36 = vcombine.low %v6684_v8, %v6688_v21  ;;  %v6541_v8 = vld [vmem:[#allocation12 + $0x10d8] sm:$0xff] }
 0x5eb   :  { %v16127_v60 = vadd.f32 %v6463_v45, %v16038_v14  ;;  %v6422_v59 = vpop.f32.mrf.mxu1  ;;  %8310 = vmatprep.subr.bf16.mxu0 %v13890_v11  ;;  %v6545_v21 = vld [vmem:[#allocation12 + $0x10f8] sm:$0xff]  ;;  %v6652_v45 = vld [vmem:[#allocation12 + $0x1450] sm:$0xff] }
 0x5ec   :  { %v16130_v15 = vadd.f32 %v6422_v59, %v16105_v30  ;;  %v6465_v47 = vpop.f32.mrf.mxu0  ;;  %8268 = vmatpush1.bf16.msra.mxu1 %v14015_v32  ;;  %v6672_v30 = vld [vmem:[#allocation12 + $0x14f0] sm:$0xff]  ;;  %v13866_v7 = vcombine.high %v6541_v8, %v6545_v21  ;;  %v6537_v32 = vld [vmem:[#allocation12 + $0x10b8] sm:$0xff] }
 0x5ed   :  { %v16133_v28 = vadd.f32 %v6465_v47, %v16041_v50  ;;  %v6424_v3 = vpop.f32.mrf.mxu1  ;;  %8311 = vmatpush1.bf16.msra.mxu0 %v13889_v34  ;;  %8269 = vmatprep.subr.bf16.mxu1 %v14008_v2  ;;  %v13999_v50 = vcombine.low %v6676_v1, %v6680_v19  ;;  %v13992_v11 = vcombine.high %v6668_v27, %v6672_v30  ;;  %v6525_v1 = vld [vmem:[#allocation12 + $0x1058] sm:$0xff] }
 0x5ee   :  { %v16136_v14 = vadd.f32 %v6424_v3, %v16111_v52  ;;  %v6467_v61 = vpop.f32.mrf.mxu0  ;;  %8312 = vmatprep.subr.bf16.mxu0 %v13882_v0  ;;  %v6660_v52 = vld [vmem:[#allocation12 + $0x1490] sm:$0xff]  ;;  %v13991_v13 = vcombine.low %v6668_v27, %v6672_v30  ;;  %v13858_v2 = vcombine.high %v6533_v6, %v6537_v32  ;;  %v6529_v19 = vld [vmem:[#allocation12 + $0x1078] sm:$0xff]  ;;  %v13857_v4 = vcombine.low %v6533_v6, %v6537_v32 }
 0x5ef   :  { %v16139_v63 = vadd.f32 %v6467_v61, %v16043_v12  ;;  %v13865_v12 = vcombine.low %v6541_v8, %v6545_v21  ;;  %v13984_v34 = vcombine.high %v6660_v52, %v6664_v20  ;;  %v6656_v0 = vld [vmem:[#allocation12 + $0x1470] sm:$0xff]  ;;  %v13983_v59 = vcombine.low %v6660_v52, %v6664_v20 }
 0x5f0   :  { %8270 = vmatpush1.bf16.msra.mxu1 %v14007_v36  ;;  %v13976_v53 = vcombine.high %v6652_v45, %v6656_v0  ;;  %v13850_v47 = vcombine.high %v6525_v1, %v6529_v19  ;;  %v6644_v36 = vld [vmem:[#allocation12 + $0x1410] sm:$0xff]  ;;  %v13975_v61 = vcombine.low %v6652_v45, %v6656_v0 }
 0x5f1   :  { %8313 = vmatpush1.bf16.msra.mxu0 %v13881_v51  ;;  %8271 = vmatprep.subr.bf16.mxu1 %v14000_v5  ;;  %v6648_v3 = vld [vmem:[#allocation12 + $0x1430] sm:$0xff]  ;;  %v6517_v51 = vld [vmem:[#allocation12 + $0x1018] sm:$0xff] }
 0x5f2   :  { %8314 = vmatprep.subr.bf16.mxu0 %v13874_v56  ;;  %v6521_v5 = vld [vmem:[#allocation12 + $0x1038] sm:$0xff]  ;;  %v13849_v56 = vcombine.low %v6525_v1, %v6529_v19  ;;  %v13968_v27 = vcombine.high %v6644_v36, %v6648_v3  ;;  %v6764_v8 = vld [vmem:[#allocation12 + $0x17d0] sm:$0xff] }
 0x5f3   :  { %v13842_v30 = vcombine.high %v6517_v51, %v6521_v5  ;;  %v6768_v21 = vld [vmem:[#allocation12 + $0x17f0] sm:$0xff] }
 0x5f4   :  { %8272 = vmatpush1.bf16.msra.mxu1 %v13999_v50  ;;  %v6637_v50 = vld [vmem:[#allocation12 + $0x13d8] sm:$0xff]  ;;  %v14088_v52 = vcombine.high %v6764_v8, %v6768_v21  ;;  %v6756_v6 = vld [vmem:[#allocation12 + $0x1790] sm:$0xff] }
 0x5f5   :  { %8315 = vmatpush1.bf16.msra.mxu0 %v13873_v38  ;;  %8273 = vmatprep.subr.bf16.mxu1 %v13992_v11  ;;  %v6641_v38 = vld [vmem:[#allocation12 + $0x13f8] sm:$0xff]  ;;  %v13967_v11 = vcombine.low %v6644_v36, %v6648_v3  ;;  %v6760_v32 = vld [vmem:[#allocation12 + $0x17b0] sm:$0xff] }
 0x5f6   :  { %8316 = vmatprep.subr.bf16.mxu0 %v13866_v7  ;;  %v13841_v7 = vcombine.low %v6517_v51, %v6521_v5  ;;  %v13962_v20 = vcombine.high %v6637_v50, %v6641_v38  ;;  %v14080_v45 = vcombine.high %v6756_v6, %v6760_v32  ;;  %v6748_v1 = vld [vmem:[#allocation12 + $0x1750] sm:$0xff] }
 0x5f7   :  { %v6752_v19 = vld [vmem:[#allocation12 + $0x1770] sm:$0xff] }
 0x5f8   :  { %8274 = vmatpush1.bf16.msra.mxu1 %v13991_v13  ;;  %v6629_v13 = vld [vmem:[#allocation12 + $0x1398] sm:$0xff]  ;;  %v14072_v36 = vcombine.high %v6748_v1, %v6752_v19  ;;  %v6740_v51 = vld [vmem:[#allocation12 + $0x1710] sm:$0xff] }
 0x5f9   :  { %8317 = vmatpush1.bf16.msra.mxu0 %v13865_v12  ;;  %8275 = vmatprep.subr.bf16.mxu1 %v13984_v34  ;;  %v6633_v12 = vld [vmem:[#allocation12 + $0x13b8] sm:$0xff]  ;;  %v14087_v34 = vcombine.low %v6764_v8, %v6768_v21  ;;  %v6744_v5 = vld [vmem:[#allocation12 + $0x1730] sm:$0xff] }
 0x5fa   :  { %8318 = vmatprep.subr.bf16.mxu0 %v13858_v2  ;;  %v13961_v2 = vcombine.low %v6637_v50, %v6641_v38  ;;  %v13954_v0 = vcombine.high %v6629_v13, %v6633_v12  ;;  %v14064_v8 = vcombine.high %v6740_v51, %v6744_v5  ;;  %v6732_v50 = vld [vmem:[#allocation12 + $0x16d0] sm:$0xff] }
 0x5fb   :  { %v6736_v38 = vld [vmem:[#allocation12 + $0x16f0] sm:$0xff] }
 0x5fc   :  { %8276 = vmatpush1.bf16.msra.mxu1 %v13983_v59  ;;  %v6621_v59 = vld [vmem:[#allocation12 + $0x1358] sm:$0xff] }
 0x5fd   :  { %8319 = vmatpush1.bf16.msra.mxu0 %v13857_v4  ;;  %8277 = vmatprep.subr.bf16.mxu1 %v13976_v53  ;;  %v6625_v4 = vld [vmem:[#allocation12 + $0x1378] sm:$0xff]  ;;  %v14079_v53 = vcombine.low %v6756_v6, %v6760_v32  ;;  %v14056_v6 = vcombine.high %v6732_v50, %v6736_v38 }
 0x5fe   :  { %8320 = vmatprep.subr.bf16.mxu0 %v13850_v47  ;;  %v13953_v47 = vcombine.low %v6629_v13, %v6633_v12  ;;  %v13946_v3 = vcombine.high %v6621_v59, %v6625_v4  ;;  %v6724_v13 = vld [vmem:[#allocation12 + $0x1690] sm:$0xff] }
 0x5ff   :  { %v6728_v12 = vld [vmem:[#allocation12 + $0x16b0] sm:$0xff] }
 0x600   :  { %8278 = vmatpush1.bf16.msra.mxu1 %v13975_v61  ;;  %v6613_v61 = vld [vmem:[#allocation12 + $0x1318] sm:$0xff] }
 0x601   :  { %8321 = vmatpush1.bf16.msra.mxu0 %v13849_v56  ;;  %8279 = vmatprep.subr.bf16.mxu1 %v13968_v27  ;;  %v6617_v56 = vld [vmem:[#allocation12 + $0x1338] sm:$0xff]  ;;  %v14071_v27 = vcombine.low %v6748_v1, %v6752_v19  ;;  %v14048_v1 = vcombine.high %v6724_v13, %v6728_v12 }
 0x602   :  { %8322 = vmatprep.subr.bf16.mxu0 %v13842_v30  ;;  %v13945_v30 = vcombine.low %v6621_v59, %v6625_v4  ;;  %v13938_v21 = vcombine.high %v6613_v61, %v6617_v56  ;;  %v6716_v59 = vld [vmem:[#allocation12 + $0x1650] sm:$0xff] }
 0x603   :  { %v6720_v4 = vld [vmem:[#allocation12 + $0x1670] sm:$0xff] }
 0x604   :  { %8280 = vmatpush1.bf16.msra.mxu1 %v13967_v11  ;;  %v6605_v11 = vld [vmem:[#allocation12 + $0x12d8] sm:$0xff] }
 0x605   :  { %8323 = vmatpush1.bf16.msra.mxu0 %v13841_v7  ;;  %8281 = vmatprep.subr.bf16.mxu1 %v14088_v52  ;;  %v6609_v7 = vld [vmem:[#allocation12 + $0x12f8] sm:$0xff]  ;;  %v14063_v52 = vcombine.low %v6740_v51, %v6744_v5  ;;  %v14040_v51 = vcombine.high %v6716_v59, %v6720_v4 }
 0x606   :  { %8324 = vmatprep.subr.bf16.mxu0 %v13962_v20  ;;  %v13937_v20 = vcombine.low %v6613_v61, %v6617_v56  ;;  %v13930_v32 = vcombine.high %v6605_v11, %v6609_v7  ;;  %v6708_v61 = vld [vmem:[#allocation12 + $0x1610] sm:$0xff] }
 0x607   :  { %v6712_v56 = vld [vmem:[#allocation12 + $0x1630] sm:$0xff] }
 0x608   :  { %8282 = vmatpush2.bf16.msra.mxu1 %v14087_v34  ;;  %v6597_v34 = vld [vmem:[#allocation12 + $0x1298] sm:$0xff] }
 0x609   :  { %8325 = vmatpush2.bf16.msra.mxu0 %v13961_v2  ;;  %8283 = vmatprep.subr.bf16.mxu1 %v14080_v45  ;;  %v6601_v2 = vld [vmem:[#allocation12 + $0x12b8] sm:$0xff]  ;;  %v14055_v45 = vcombine.low %v6732_v50, %v6736_v38  ;;  %v14032_v50 = vcombine.high %v6708_v61, %v6712_v56 }
 0x60a   :  { %8326 = vmatprep.subr.bf16.mxu0 %v13954_v0  ;;  %v13929_v0 = vcombine.low %v6605_v11, %v6609_v7  ;;  %v13922_v19 = vcombine.high %v6597_v34, %v6601_v2  ;;  %v6701_v11 = vld [vmem:[#allocation12 + $0x15d8] sm:$0xff] }
 0x60b   :  { %v6705_v7 = vld [vmem:[#allocation12 + $0x15f8] sm:$0xff] }
 0x60c   :  { %8284 = vmatpush2.bf16.msra.mxu1 %v14079_v53  ;;  %v6589_v53 = vld [vmem:[#allocation12 + $0x1258] sm:$0xff] }
 0x60d   :  { %8327 = vmatpush2.bf16.msra.mxu0 %v13953_v47  ;;  %8285 = vmatprep.subr.bf16.mxu1 %v14072_v36  ;;  %v6593_v47 = vld [vmem:[#allocation12 + $0x1278] sm:$0xff]  ;;  %v14047_v36 = vcombine.low %v6724_v13, %v6728_v12  ;;  %v14026_v13 = vcombine.high %v6701_v11, %v6705_v7 }
 0x60e   :  { %8328 = vmatprep.subr.bf16.mxu0 %v13946_v3  ;;  %v13921_v3 = vcombine.low %v6597_v34, %v6601_v2  ;;  %v13914_v5 = vcombine.high %v6589_v53, %v6593_v47  ;;  %v6693_v12 = vld [vmem:[#allocation12 + $0x1598] sm:$0xff] }
 0x60f   :  { %v6697_v34 = vld [vmem:[#allocation12 + $0x15b8] sm:$0xff] }
 0x610   :  { %8286 = vmatpush2.bf16.msra.mxu1 %v14071_v27  ;;  %v6581_v27 = vld [vmem:[#allocation12 + $0x1218] sm:$0xff] }
 0x611   :  { %8329 = vmatpush2.bf16.msra.mxu0 %v13945_v30  ;;  %8287 = vmatprep.subr.bf16.mxu1 %v14064_v8  ;;  %v6585_v30 = vld [vmem:[#allocation12 + $0x1238] sm:$0xff]  ;;  %v14039_v8 = vcombine.low %v6716_v59, %v6720_v4 }
 0x612   :  { %8330 = vmatprep.subr.bf16.mxu0 %v13938_v21  ;;  %v13913_v21 = vcombine.low %v6589_v53, %v6593_v47  ;;  %v13906_v38 = vcombine.high %v6581_v27, %v6585_v30  ;;  %v6685_v59 = vld [vmem:[#allocation12 + $0x1558] sm:$0xff] }
 0x613   :  { %v6689_v4 = vld [vmem:[#allocation12 + $0x1578] sm:$0xff] }
 0x614   :  { %8288 = vmatpush2.bf16.msra.mxu1 %v14063_v52  ;;  %v8548_v52 = vld [vmem:[#allocation15 + $0x1c0] sm:$0xff] }
 0x615   :  { %8331 = vmatpush2.bf16.msra.mxu0 %v13937_v20  ;;  %8289 = vmatprep.subr.bf16.mxu1 %v14056_v6  ;;  %v8552_v20 = vld [vmem:[#allocation15 + $0x1e0] sm:$0xff]  ;;  %v14031_v6 = vcombine.low %v6708_v61, %v6712_v56 }
 0x616   :  { %8332 = vmatprep.subr.bf16.mxu0 %v13930_v32  ;;  %v13905_v32 = vcombine.low %v6581_v27, %v6585_v30  ;;  %v14148_v2 = vcombine.high %v8548_v52, %v8552_v20  ;;  %v14147_v53 = vcombine.low %v8548_v52, %v8552_v20  ;;  %v8536_v61 = vld [vmem:[#allocation15 + $0x160] sm:$0xff]  ;;  %v14010_v27 = vcombine.high %v6685_v59, %v6689_v4 }
 0x618   :  { %8290 = vmatpush2.bf16.msra.mxu1 %v14055_v45  ;;  %v14025_v45 = vcombine.low %v6701_v11, %v6705_v7  ;;  %v14009_v11 = vcombine.low %v6685_v59, %v6689_v4  ;;  %v8524_v7 = vld [vmem:[#allocation15 + $0x100] sm:$0xff] }
 0x619   :  { %8333 = vmatpush2.bf16.msra.mxu0 %v13929_v0  ;;  %8291 = vmatprep.subr.bf16.mxu1 %v14048_v1  ;;  %v8540_v0 = vld [vmem:[#allocation15 + $0x180] sm:$0xff] }
 0x61a   :  { %8334 = vmatprep.subr.bf16.mxu0 %v13922_v19  ;;  %v8544_v1 = vld [vmem:[#allocation15 + $0x1a0] sm:$0xff]  ;;  %v14018_v19 = vcombine.high %v6693_v12, %v6697_v34 }
 0x61b   :  { %v8508_v4 = vld [vmem:[#allocation15 + $0x80] sm:$0xff] }
 0x61c   :  { %8292 = vmatpush2.bf16.msra.mxu1 %v14047_v36  ;;  %v14140_v36 = vcombine.high %v8540_v0, %v8544_v1 }
 0x61d   :  { %8335 = vmatpush2.bf16.msra.mxu0 %v13921_v3  ;;  %8293 = vmatprep.subr.bf16.mxu1 %v14040_v51  ;;  %v14017_v51 = vcombine.low %v6693_v12, %v6697_v34 }
 0x61e   :  { %8336 = vmatprep.subr.bf16.mxu0 %v13914_v5  ;;  %v8532_v5 = vld [vmem:[#allocation15 + $0x140] sm:$0xff] }
 0x620   :  { %8294 = vmatpush2.bf16.msra.mxu1 %v14039_v8  ;;  %v6677_v8 = vld [vmem:[#allocation12 + $0x1518] sm:$0xff] }
 0x621   :  { %8337 = vmatpush2.bf16.msra.mxu0 %v13913_v21  ;;  %8295 = vmatprep.subr.bf16.mxu1 %v14032_v50  ;;  %v6681_v21 = vld [vmem:[#allocation12 + $0x1538] sm:$0xff]  ;;  %v14139_v50 = vcombine.low %v8540_v0, %v8544_v1 }
 0x622   :  { %8338 = vmatprep.subr.bf16.mxu0 %v13906_v38  ;;  %v14132_v38 = vcombine.high %v8532_v5, %v8536_v61  ;;  %v14002_v20 = vcombine.high %v6677_v8, %v6681_v21  ;;  %v14001_v34 = vcombine.low %v6677_v8, %v6681_v21  ;;  %v6661_v0 = vld [vmem:[#allocation12 + $0x1498] sm:$0xff]  ;;  %v8504_v8 = vld [vmem:[#allocation15 + $0x60] sm:$0xff] }
 0x623   :  { %v6665_v1 = vld [vmem:[#allocation12 + $0x14b8] sm:$0xff] }
 0x624   :  { %8296 = vmatpush2.bf16.msra.mxu1 %v14031_v6  ;;  %v6669_v6 = vld [vmem:[#allocation12 + $0x14d8] sm:$0xff] }
 0x625   :  { %8339 = vmatpush2.bf16.msra.mxu0 %v13905_v32  ;;  %8351 = vmatprep.subr.bf16.mxu1 %v14026_v13  ;;  %v6673_v32 = vld [vmem:[#allocation12 + $0x14f8] sm:$0xff]  ;;  %v14131_v13 = vcombine.low %v8532_v5, %v8536_v61 }
 0x626   :  { %11606 = vmatprep.subr.bf16.mxu0 %v14148_v2  ;;  %v8520_v2 = vld [vmem:[#allocation15 + $0xe0] sm:$0xff] }
 0x627   :  { %v6504_v47 = vpop.f32.mrf.mxu1  ;;  %8298 = vmatmul.mubr.bf16.vlgmr.msra.gmra.mxu1 %v15979_v22 }
 0x628   :  { %v16143_v3 = vadd.f32 %v6504_v47, %v16119_v31  ;;  %8341 = vmatmul.mubr.bf16.vlgmr.msra.gmra.mxu0 %v15943_v35  ;;  %8352 = vmatpush1.bf16.msra.mxu1 %v14025_v45  ;;  %v13994_v45 = vcombine.high %v6669_v6, %v6673_v32  ;;  %v13986_v47 = vcombine.high %v6661_v0, %v6665_v1 }
 0x629   :  { %8383 = vmatprep.mubr.bf16.mxu1 %v16059_v46  ;;  %v6506_v56 = vpop.f32.mrf.mxu1  ;;  %8353 = vmatprep.subr.bf16.mxu1 %v14018_v19  ;;  %v8528_v46 = vld [vmem:[#allocation15 + $0x120] sm:$0xff] }
 0x62a   :  { %v16148_v30 = vadd.f32 %v6506_v56, %v16127_v60  ;;  %11607 = vmatpush1.bf16.msra.mxu0 %v14147_v53  ;;  %v14124_v12 = vcombine.high %v8524_v7, %v8528_v46  ;;  %v14123_v19 = vcombine.low %v8524_v7, %v8528_v46  ;;  %v8512_v53 = vld [vmem:[#allocation15 + $0xa0] sm:$0xff]  ;;  %v13985_v56 = vcombine.low %v6661_v0, %v6665_v1  ;;  %v6757_v0 = vld [vmem:[#allocation12 + $0x1798] sm:$0xff] }
 0x62b   :  { %v6508_v31 = vpop.f32.mrf.mxu1  ;;  %11608 = vmatprep.subr.bf16.mxu0 %v14140_v36  ;;  %v6653_v36 = vld [vmem:[#allocation12 + $0x1458] sm:$0xff]  ;;  %v14108_v61 = vcombine.high %v8508_v4, %v8512_v53  ;;  %v8492_v46 = vld [vmem:[#allocation15] sm:$0xff] }
 0x62c   :  { %v16151_v35 = vadd.f32 %v6508_v31, %v16133_v28  ;;  %8354 = vmatpush1.bf16.msra.mxu1 %v14017_v51  ;;  %v8516_v28 = vld [vmem:[#allocation15 + $0xc0] sm:$0xff]  ;;  %v6657_v51 = vld [vmem:[#allocation12 + $0x1478] sm:$0xff] }
 0x62d   :  { %v6510_v52 = vpop.f32.mrf.mxu1  ;;  %8355 = vmatprep.subr.bf16.mxu1 %v14010_v27  ;;  %v14116_v59 = vcombine.high %v8516_v28, %v8520_v2  ;;  %v14115_v5 = vcombine.low %v8516_v28, %v8520_v2  ;;  %v8500_v27 = vld [vmem:[#allocation15 + $0x40] sm:$0xff]  ;;  %v13978_v21 = vcombine.high %v6653_v36, %v6657_v51  ;;  %v6649_v31 = vld [vmem:[#allocation12 + $0x1438] sm:$0xff]  ;;  %v13977_v7 = vcombine.low %v6653_v36, %v6657_v51 }
 0x62e   :  { %v16154_v60 = vadd.f32 %v6510_v52, %v16139_v63  ;;  %11609 = vmatpush1.bf16.msra.mxu0 %v14139_v50  ;;  %v13993_v63 = vcombine.low %v6669_v6, %v6673_v32  ;;  %v6645_v50 = vld [vmem:[#allocation12 + $0x1418] sm:$0xff]  ;;  %v8496_v52 = vld [vmem:[#allocation15 + $0x20] sm:$0xff] }
 0x62f   :  { %11610 = vmatprep.subr.bf16.mxu0 %v14132_v38  ;;  %v14107_v38 = vcombine.low %v8508_v4, %v8512_v53  ;;  %v6765_v6 = vld [vmem:[#allocation12 + $0x17d8] sm:$0xff]  ;;  %v8612_v28 = vld [vmem:[#allocation15 + $0x3c0] sm:$0xff] }
 0x630   :  { %8356 = vmatpush1.bf16.msra.mxu1 %v14009_v11  ;;  %v14100_v11 = vcombine.high %v8500_v27, %v8504_v8  ;;  %v6769_v32 = vld [vmem:[#allocation12 + $0x17f8] sm:$0xff]  ;;  %v8616_v2 = vld [vmem:[#allocation15 + $0x3e0] sm:$0xff] }
 0x631   :  { %8357 = vmatprep.subr.bf16.mxu1 %v14002_v20  ;;  %v13970_v20 = vcombine.high %v6645_v50, %v6649_v31  ;;  %v6761_v1 = vld [vmem:[#allocation12 + $0x17b8] sm:$0xff]  ;;  %v8604_v4 = vld [vmem:[#allocation15 + $0x380] sm:$0xff] }
 0x632   :  { %11611 = vmatpush1.bf16.msra.mxu0 %v14131_v13  ;;  %v14099_v13 = vcombine.low %v8500_v27, %v8504_v8  ;;  %v8608_v53 = vld [vmem:[#allocation15 + $0x3a0] sm:$0xff]  ;;  %v6749_v36 = vld [vmem:[#allocation12 + $0x1758] sm:$0xff] }
 0x633   :  { %11612 = vmatprep.subr.bf16.mxu0 %v14124_v12  ;;  %v14092_v12 = vcombine.high %v8492_v46, %v8496_v52  ;;  %v6753_v51 = vld [vmem:[#allocation12 + $0x1778] sm:$0xff]  ;;  %v8596_v27 = vld [vmem:[#allocation15 + $0x340] sm:$0xff] }
 0x634   :  { %8358 = vmatpush1.bf16.msra.mxu1 %v14001_v34  ;;  %v13969_v34 = vcombine.low %v6645_v50, %v6649_v31  ;;  %v8600_v8 = vld [vmem:[#allocation15 + $0x360] sm:$0xff]  ;;  %v6741_v50 = vld [vmem:[#allocation12 + $0x1718] sm:$0xff] }
 0x635   :  { %8359 = vmatprep.subr.bf16.mxu1 %v13994_v45  ;;  %v14090_v45 = vcombine.high %v6765_v6, %v6769_v32  ;;  %v6745_v31 = vld [vmem:[#allocation12 + $0x1738] sm:$0xff] }
 0x636   :  { %11613 = vmatpush1.bf16.msra.mxu0 %v14123_v19  ;;  %v14091_v19 = vcombine.low %v8492_v46, %v8496_v52  ;;  %v8588_v46 = vld [vmem:[#allocation15 + $0x300] sm:$0xff] }
 0x637   :  { %11614 = vmatprep.subr.bf16.mxu0 %v14116_v59  ;;  %v14212_v59 = vcombine.high %v8612_v28, %v8616_v2  ;;  %v8592_v52 = vld [vmem:[#allocation15 + $0x320] sm:$0xff] }
 0x638   :  { %8360 = vmatpush1.bf16.msra.mxu1 %v13993_v63  ;;  %v14089_v63 = vcombine.low %v6765_v6, %v6769_v32  ;;  %v6733_v6 = vld [vmem:[#allocation12 + $0x16d8] sm:$0xff] }
 0x639   :  { %8361 = vmatprep.subr.bf16.mxu1 %v13986_v47  ;;  %v14082_v47 = vcombine.high %v6757_v0, %v6761_v1  ;;  %v6737_v32 = vld [vmem:[#allocation12 + $0x16f8] sm:$0xff] }
 0x63a   :  { %11615 = vmatpush1.bf16.msra.mxu0 %v14115_v5  ;;  %v14211_v5 = vcombine.low %v8612_v28, %v8616_v2  ;;  %v8580_v28 = vld [vmem:[#allocation15 + $0x2c0] sm:$0xff] }
 0x63b   :  { %11616 = vmatprep.subr.bf16.mxu0 %v14108_v61  ;;  %v14204_v61 = vcombine.high %v8604_v4, %v8608_v53  ;;  %v8584_v2 = vld [vmem:[#allocation15 + $0x2e0] sm:$0xff] }
 0x63c   :  { %8362 = vmatpush1.bf16.msra.mxu1 %v13985_v56  ;;  %v14081_v56 = vcombine.low %v6757_v0, %v6761_v1  ;;  %v6725_v0 = vld [vmem:[#allocation12 + $0x1698] sm:$0xff] }
 0x63d   :  { %8363 = vmatprep.subr.bf16.mxu1 %v13978_v21  ;;  %v14074_v21 = vcombine.high %v6749_v36, %v6753_v51  ;;  %v6729_v1 = vld [vmem:[#allocation12 + $0x16b8] sm:$0xff] }
 0x63e   :  { %11617 = vmatpush1.bf16.msra.mxu0 %v14107_v38  ;;  %v14203_v38 = vcombine.low %v8604_v4, %v8608_v53  ;;  %v8572_v4 = vld [vmem:[#allocation15 + $0x280] sm:$0xff] }
 0x63f   :  { %11618 = vmatprep.subr.bf16.mxu0 %v14100_v11  ;;  %v14196_v11 = vcombine.high %v8596_v27, %v8600_v8  ;;  %v8576_v53 = vld [vmem:[#allocation15 + $0x2a0] sm:$0xff] }
 0x640   :  { %8364 = vmatpush1.bf16.msra.mxu1 %v13977_v7  ;;  %v14073_v7 = vcombine.low %v6749_v36, %v6753_v51  ;;  %v6717_v36 = vld [vmem:[#allocation12 + $0x1658] sm:$0xff] }
 0x641   :  { %8365 = vmatprep.subr.bf16.mxu1 %v13970_v20  ;;  %v14066_v20 = vcombine.high %v6741_v50, %v6745_v31  ;;  %v6721_v51 = vld [vmem:[#allocation12 + $0x1678] sm:$0xff] }
 0x642   :  { %11619 = vmatpush1.bf16.msra.mxu0 %v14099_v13  ;;  %v14195_v13 = vcombine.low %v8596_v27, %v8600_v8  ;;  %v8564_v27 = vld [vmem:[#allocation15 + $0x240] sm:$0xff] }
 0x643   :  { %11620 = vmatprep.subr.bf16.mxu0 %v14092_v12  ;;  %v14188_v12 = vcombine.high %v8588_v46, %v8592_v52  ;;  %v8568_v8 = vld [vmem:[#allocation15 + $0x260] sm:$0xff] }
 0x644   :  { %8366 = vmatpush1.bf16.msra.mxu1 %v13969_v34  ;;  %v14065_v34 = vcombine.low %v6741_v50, %v6745_v31  ;;  %v6709_v50 = vld [vmem:[#allocation12 + $0x1618] sm:$0xff] }
 0x645   :  { %8367 = vmatprep.subr.bf16.mxu1 %v14090_v45  ;;  %v14058_v45 = vcombine.high %v6733_v6, %v6737_v32  ;;  %v6713_v31 = vld [vmem:[#allocation12 + $0x1638] sm:$0xff] }
 0x646   :  { %11621 = vmatpush1.bf16.msra.mxu0 %v14091_v19  ;;  %v14187_v19 = vcombine.low %v8588_v46, %v8592_v52  ;;  %v8556_v46 = vld [vmem:[#allocation15 + $0x200] sm:$0xff] }
 0x647   :  { %11622 = vmatprep.subr.bf16.mxu0 %v14212_v59  ;;  %v14180_v59 = vcombine.high %v8580_v28, %v8584_v2  ;;  %v8560_v52 = vld [vmem:[#allocation15 + $0x220] sm:$0xff] }
 0x648   :  { %8368 = vmatpush2.bf16.msra.mxu1 %v14089_v63  ;;  %v14057_v63 = vcombine.low %v6733_v6, %v6737_v32  ;;  %v14163_v6 = vcombine.low %v8564_v27, %v8568_v8  ;;  %v8676_v32 = vld [vmem:[#allocation15 + $0x5c0] sm:$0xff] }
 0x649   :  { %8369 = vmatprep.subr.bf16.mxu1 %v14082_v47  ;;  %v14050_v47 = vcombine.high %v6725_v0, %v6729_v1 }
 0x64a   :  { %11623 = vmatpush2.bf16.msra.mxu0 %v14211_v5  ;;  %v14179_v5 = vcombine.low %v8580_v28, %v8584_v2  ;;  %v16156_v28 = vld [vmem:[#allocation15 + $0x9c0] sm:$0xff] }
 0x64b   :  { %11624 = vmatprep.subr.bf16.mxu0 %v14204_v61  ;;  %v14172_v61 = vcombine.high %v8572_v4, %v8576_v53  ;;  %v16158_v2 = vld [vmem:[#allocation15 + $0x9e0] sm:$0xff] }
 0x64c   :  { %8370 = vmatpush2.bf16.msra.mxu1 %v14081_v56  ;;  %v14049_v56 = vcombine.low %v6725_v0, %v6729_v1  ;;  %v14155_v1 = vcombine.low %v8556_v46, %v8560_v52 }
 0x64d   :  { %8371 = vmatprep.subr.bf16.mxu1 %v14074_v21  ;;  %v14042_v21 = vcombine.high %v6717_v36, %v6721_v51 }
 0x64e   :  { %11625 = vmatpush2.bf16.msra.mxu0 %v14203_v38  ;;  %v14171_v38 = vcombine.low %v8572_v4, %v8576_v53 }
 0x64f   :  { %11626 = vmatprep.subr.bf16.mxu0 %v14196_v11  ;;  %v14164_v11 = vcombine.high %v8564_v27, %v8568_v8  ;;  %v6206_v27 = vadd.f32 %v16049_v44, %v15999_v48 }
 0x650   :  { %8372 = vmatpush2.bf16.msra.mxu1 %v14073_v7  ;;  %v14041_v7 = vcombine.low %v6717_v36, %v6721_v51  ;;  %v8660_v36 = vld [vmem:[#allocation15 + $0x540] sm:$0xff] }
 0x651   :  { %8373 = vmatprep.subr.bf16.mxu1 %v14066_v20  ;;  %v14034_v20 = vcombine.high %v6709_v50, %v6713_v31  ;;  %v8664_v51 = vld [vmem:[#allocation15 + $0x560] sm:$0xff] }
 0x652   :  { %11627 = vmatpush2.bf16.msra.mxu0 %v14195_v13  ;;  %v8680_v13 = vld [vmem:[#allocation15 + $0x5e0] sm:$0xff] }
 0x653   :  { %11628 = vmatprep.subr.bf16.mxu0 %v14188_v12  ;;  %v14156_v12 = vcombine.high %v8556_v46, %v8560_v52  ;;  %v14276_v0 = vcombine.high %v8676_v32, %v8680_v13  ;;  %v14275_v4 = vcombine.low %v8676_v32, %v8680_v13 }
 0x654   :  { %8374 = vmatpush2.bf16.msra.mxu1 %v14065_v34  ;;  %v14033_v34 = vcombine.low %v6709_v50, %v6713_v31 }
 0x655   :  { %8375 = vmatprep.subr.bf16.mxu1 %v14058_v45  ;;  %v8084_v45 = vpop.f32.mrf.mxu0 }
 0x656   :  { %11629 = vmatpush2.bf16.msra.mxu0 %v14187_v19  ;;  %v8668_v19 = vld [vmem:[#allocation15 + $0x580] sm:$0xff] }
 0x657   :  { %11630 = vmatprep.subr.bf16.mxu0 %v14180_v59  ;;  %v8672_v59 = vld [vmem:[#allocation15 + $0x5a0] sm:$0xff]  ;;  %v8086_v53 = vpop.f32.mrf.mxu0 }
 0x658   :  { %8376 = vmatpush2.bf16.msra.mxu1 %v14057_v63  ;;  %v14404_v63 = vcombine.high %v16156_v28, %v16158_v2  ;;  %v14267_v8 = vcombine.low %v8668_v19, %v8672_v59 }
 0x659   :  { %8377 = vmatprep.subr.bf16.mxu1 %v14050_v47  ;;  %v14268_v47 = vcombine.high %v8668_v19, %v8672_v59  ;;  %v8088_v31 = vpop.f32.mrf.mxu0 }
 0x65a   :  { %11631 = vmatpush2.bf16.msra.mxu0 %v14179_v5  ;;  %v4627_v5 = vadd.f32 %v16005_v55, %v16001_v18  ;;  %v14260_v55 = vcombine.high %v8660_v36, %v8664_v51 }
 0x65b   :  { %11632 = vmatprep.subr.bf16.mxu0 %v14172_v61 }
 0x65c   :  { %8378 = vmatpush2.bf16.msra.mxu1 %v14049_v56  ;;  %v4629_v56 = vadd.f32 %v16007_v37, %v16003_v10  ;;  %v6208_v50 = vadd.f32 %v16055_v62, %v4627_v5  ;;  %v8652_v37 = vld [vmem:[#allocation15 + $0x500] sm:$0xff] }
 0x65d   :  { %8379 = vmatprep.subr.bf16.mxu1 %v14042_v21  ;;  %v6204_v21 = vadd.f32 %v16045_v23, %v15994_v29 }
 0x65e   :  { %11633 = vmatpush2.bf16.msra.mxu0 %v14171_v38  ;;  %v6210_v48 = vadd.f32 %v16057_v9, %v4629_v56  ;;  %v6251_v29 = vadd.f32 %v16081_v17, %v6208_v50  ;;  %v8796_v56 = vld [vmem:[#allocation15 + $0x980] sm:$0xff] }
 0x65f   :  { %11634 = vmatprep.subr.bf16.mxu0 %v14164_v11  ;;  %v16173_v11 = vld [vmem:[#allocation13] sm:$0xff]  ;;  %v6247_v44 = vadd.f32 %v16077_v26, %v6204_v21 }
 0x660   :  { %8380 = vmatpush2.bf16.msra.mxu1 %v14041_v7  ;;  %v8656_v7 = vld [vmem:[#allocation15 + $0x520] sm:$0xff]  ;;  %v8419_v46 = vrot.slane %v16173_v11, %v15679_v40  ;;  %v8415_v32 = vrot.slane %v16173_v11, %v15685_v42  ;;  %v6253_v26 = vadd.f32 %v16083_v57, %v6210_v48 }
 0x661   :  { %8381 = vmatprep.subr.bf16.mxu1 %v14034_v20  ;;  %v14259_v20 = vcombine.low %v8660_v36, %v8664_v51  ;;  %v14252_v9 = vcombine.high %v8652_v37, %v8656_v7  ;;  %v14251_v59 = vcombine.low %v8652_v37, %v8656_v7  ;;  %v8640_v36 = vld [vmem:[#allocation15 + $0x4a0] sm:$0xff]  ;;  %v16191_v37 = vld [vmem:[#allocation15 + $0x1e8] sm:$0xff] }
 0x662   :  { %11635 = vmatpush2.bf16.msra.mxu0 %v14163_v6  ;;  %v8788_v48 = vld [vmem:[#allocation15 + $0x940] sm:$0xff] }
 0x663   :  { %11636 = vmatprep.subr.bf16.mxu0 %v14156_v12 }
 0x664   :  { %8382 = vmatpush2.bf16.msra.mxu1 %v14033_v34  ;;  %v8644_v34 = vld [vmem:[#allocation15 + $0x4c0] sm:$0xff] }
 0x665   :  { %11649 = vmatprep.subr.bf16.mxu1 %v14276_v0 }
 0x666   :  { %11637 = vmatpush2.bf16.msra.mxu0 %v14155_v1 }
 0x667   :  { %v8127_v61 = vpop.f32.mrf.mxu1  ;;  %8384 = vmatmul.mubr.bf16.vlgmr.msra.gmra.mxu1 %v15979_v22  ;;  %11692 = vmatprep.subr.bf16.mxu0 %v14404_v63  ;;  %v6249_v22 = vadd.f32 %v16079_v54, %v6206_v27  ;;  %v8090_v54 = vpop.f32.mrf.mxu0  ;;  %v8800_v27 = vld [vmem:[#allocation15 + $0x9a0] sm:$0xff] }
 0x668   :  { %11650 = vmatpush1.bf16.msra.mxu1 %v14275_v4  ;;  %v8128_v38 = vadd.f32 %v8127_v61, %v8084_v45  ;;  %v8648_v45 = vld [vmem:[#allocation15 + $0x4e0] sm:$0xff] }
 0x669   :  { %v8129_v18 = vpop.f32.mrf.mxu1  ;;  %11651 = vmatprep.subr.bf16.mxu1 %v14268_v47  ;;  %v14244_v4 = vcombine.high %v8644_v34, %v8648_v45  ;;  %v8636_v47 = vld [vmem:[#allocation15 + $0x480] sm:$0xff]  ;;  %v14243_v57 = vcombine.low %v8644_v34, %v8648_v45 }
 0x66a   :  { %v8130_v10 = vadd.f32 %v8129_v18, %v8086_v53  ;;  %v8394_v6 = vadd.f32 %v8128_v38, %v6247_v44  ;;  %v14236_v21 = vcombine.high %v8636_v47, %v8640_v36  ;;  %v8632_v38 = vld [vmem:[#allocation15 + $0x460] sm:$0xff]  ;;  %v14403_v18 = vcombine.low %v16156_v28, %v16158_v2 }
 0x66b   :  { %v8131_v23 = vpop.f32.mrf.mxu1  ;;  %v14235_v7 = vcombine.low %v8636_v47, %v8640_v36  ;;  %v8792_v44 = vld [vmem:[#allocation15 + $0x960] sm:$0xff] }
 0x66c   :  { %v8395_v62 = vadd.f32 %v8130_v10, %v6249_v22  ;;  %v8132_v52 = vadd.f32 %v8131_v23, %v8088_v31  ;;  %11652 = vmatpush1.bf16.msra.mxu1 %v14267_v8  ;;  %v8452_v63 = vadd.f32 %v8415_v32, %v8394_v6  ;;  %v8628_v31 = vld [vmem:[#allocation15 + $0x440] sm:$0xff]  ;;  %v14396_v10 = vcombine.high %v8796_v56, %v8800_v27 }
 0x66d   :  { %v8133_v13 = vpop.f32.mrf.mxu1  ;;  %11653 = vmatprep.subr.bf16.mxu1 %v14260_v55  ;;  %v16187_v55 = vld [vmem:[#allocation15 + $0x1c8] sm:$0xff]  ;;  %v14228_v28 = vcombine.high %v8628_v31, %v8632_v38  ;;  %v8620_v2 = vld [vmem:[#allocation15 + $0x400] sm:$0xff] }
 0x66e   :  { %v8402_v12 = vadd.f32 %v8132_v52, %v6251_v29  ;;  %v8134_v17 = vadd.f32 %v8133_v13, %v8090_v54  ;;  %v8453_v0 = vadd.f32 %v8419_v46, %v8395_v62  ;;  %v8468_v8 = vmax.f32 %v8452_v63, 0.0  ;;  %v8624_v23 = vld [vmem:[#allocation15 + $0x420] sm:$0xff] }
 0x66f   :  { %v14149_v29 = vcombine.low %v16187_v55, %v16191_v37  ;;  %v14395_v62 = vcombine.low %v8796_v56, %v8800_v27  ;;  %v14227_v52 = vcombine.low %v8628_v31, %v8632_v38  ;;  %v8784_v54 = vld [vmem:[#allocation15 + $0x920] sm:$0xff]  ;;  %v14220_v6 = vcombine.high %v8620_v2, %v8624_v23 }
 0x670   :  { %v8460_v1 = vadd.f32 %v8415_v32, %v8402_v12  ;;  %v8403_v19 = vadd.f32 %v8134_v17, %v6253_v26  ;;  %11654 = vmatpush1.bf16.msra.mxu1 %v14259_v20  ;;  %v8469_v5 = vmax.f32 %v8453_v0, 0.0  ;;  %v8780_v20 = vld [vmem:[#allocation15 + $0x900] sm:$0xff]  ;;  %v14219_v12 = vcombine.low %v8620_v2, %v8624_v23 }
 0x671   :  { %11655 = vmatprep.subr.bf16.mxu1 %v14252_v9  ;;  %v8740_v32 = vld [vmem:[#allocation15 + $0x7c0] sm:$0xff]  ;;  %v14387_v9 = vcombine.low %v8788_v48, %v8792_v44  ;;  %v14380_v26 = vcombine.high %v8780_v20, %v8784_v54 }
 0x672   :  { %v8461_v53 = vadd.f32 %v8419_v46, %v8403_v19  ;;  %v8476_v51 = vmax.f32 %v8460_v1, 0.0  ;;  %v14388_v46 = vcombine.high %v8788_v48, %v8792_v44  ;;  %v8744_v13 = vld [vmem:[#allocation15 + $0x7e0] sm:$0xff]  ;;  %v14379_v19 = vcombine.low %v8780_v20, %v8784_v54 }
 0x673   :  { %v8772_v17 = vld [vmem:[#allocation15 + $0x8c0] sm:$0xff]  ;;  %v14340_v45 = vcombine.high %v8740_v32, %v8744_v13  ;;  %v14339_v63 = vcombine.low %v8740_v32, %v8744_v13 }
 0x674   :  { %v8477_v61 = vmax.f32 %v8461_v53, 0.0  ;;  %11656 = vmatpush1.bf16.msra.mxu1 %v14251_v59  ;;  %v16189_v22 = vpack.c.bf16 %v8476_v51, %v8468_v8  ;;  %v8776_v34 = vld [vmem:[#allocation15 + $0x8e0] sm:$0xff] }
 0x675   :  { %11657 = vmatprep.subr.bf16.mxu1 %v14244_v4  ;;  %v8732_v0 = vld [vmem:[#allocation15 + $0x780] sm:$0xff]  ;;  %v14372_v59 = vcombine.high %v8772_v17, %v8776_v34 }
 0x676   :  { %v16183_v50 = vpack.c.bf16 %v8477_v61, %v8469_v5  ;;  %v8736_v1 = vld [vmem:[#allocation15 + $0x7a0] sm:$0xff]  ;;  %v14371_v5 = vcombine.low %v8772_v17, %v8776_v34 }
 0x677   :  { %v8764_v4 = vld [vmem:[#allocation15 + $0x880] sm:$0xff]  ;;  %v14332_v47 = vcombine.high %v8732_v0, %v8736_v1 }
 0x678   :  { %11638 = vmatprep.mubr.bf16.mxu0 %v16183_v50  ;;  %11658 = vmatpush1.bf16.msra.mxu1 %v14243_v57  ;;  %v8768_v53 = vld [vmem:[#allocation15 + $0x8a0] sm:$0xff]  ;;  %v14331_v57 = vcombine.low %v8732_v0, %v8736_v1 }
 0x679   :  { %11639 = vmatmul.mubr.bf16.vlgmr.msra.gmra.mxu0 %v16189_v22  ;;  %11659 = vmatprep.subr.bf16.mxu1 %v14236_v21  ;;  %v8724_v36 = vld [vmem:[#allocation15 + $0x740] sm:$0xff]  ;;  %v14364_v61 = vcombine.high %v8764_v4, %v8768_v53  ;;  %v14363_v38 = vcombine.low %v8764_v4, %v8768_v53 }
 0x67a   :  { %11693 = vmatpush1.bf16.msra.mxu0 %v14403_v18  ;;  %v8728_v51 = vld [vmem:[#allocation15 + $0x760] sm:$0xff] }
 0x67b   :  { %11694 = vmatprep.subr.bf16.mxu0 %v14396_v10  ;;  %v8756_v56 = vld [vmem:[#allocation15 + $0x840] sm:$0xff]  ;;  %v14324_v8 = vcombine.high %v8724_v36, %v8728_v51  ;;  %v14323_v10 = vcombine.low %v8724_v36, %v8728_v51 }
 0x67c   :  { %11660 = vmatpush1.bf16.msra.mxu1 %v14235_v7  ;;  %v8760_v27 = vld [vmem:[#allocation15 + $0x860] sm:$0xff] }
 0x67d   :  { %11661 = vmatprep.subr.bf16.mxu1 %v14228_v28  ;;  %v8716_v21 = vld [vmem:[#allocation15 + $0x700] sm:$0xff]  ;;  %v14356_v18 = vcombine.high %v8756_v56, %v8760_v27  ;;  %v14355_v23 = vcombine.low %v8756_v56, %v8760_v27 }
 0x67e   :  { %11695 = vmatpush1.bf16.msra.mxu0 %v14395_v62  ;;  %v8720_v31 = vld [vmem:[#allocation15 + $0x720] sm:$0xff] }
 0x67f   :  { %11696 = vmatprep.subr.bf16.mxu0 %v14388_v46  ;;  %v8748_v7 = vld [vmem:[#allocation15 + $0x800] sm:$0xff]  ;;  %v14316_v44 = vcombine.high %v8716_v21, %v8720_v31  ;;  %v14315_v46 = vcombine.low %v8716_v21, %v8720_v31 }
 0x680   :  { %11662 = vmatpush1.bf16.msra.mxu1 %v14227_v52  ;;  %v8752_v48 = vld [vmem:[#allocation15 + $0x820] sm:$0xff] }
 0x681   :  { %11663 = vmatprep.subr.bf16.mxu1 %v14220_v6  ;;  %v8708_v28 = vld [vmem:[#allocation15 + $0x6c0] sm:$0xff]  ;;  %v14348_v62 = vcombine.high %v8748_v7, %v8752_v48  ;;  %v14347_v13 = vcombine.low %v8748_v7, %v8752_v48  ;;  %v8170_v48 = vpop.f32.mrf.mxu0 }
 0x682   :  { %11697 = vmatpush1.bf16.msra.mxu0 %v14387_v9  ;;  %v8712_v2 = vld [vmem:[#allocation15 + $0x6e0] sm:$0xff] }
 0x683   :  { %11698 = vmatprep.subr.bf16.mxu0 %v14380_v26  ;;  %v8868_v52 = vld [vmem:[#allocation15 + $0xbc0] sm:$0xff]  ;;  %v14308_v54 = vcombine.high %v8708_v28, %v8712_v2  ;;  %v14307_v26 = vcombine.low %v8708_v28, %v8712_v2 }
 0x684   :  { %11664 = vmatpush1.bf16.msra.mxu1 %v14219_v12  ;;  %v8872_v20 = vld [vmem:[#allocation15 + $0xbe0] sm:$0xff] }
 0x685   :  { %11665 = vmatprep.subr.bf16.mxu1 %v14340_v45  ;;  %v8700_v6 = vld [vmem:[#allocation15 + $0x680] sm:$0xff]  ;;  %v14468_v9 = vcombine.high %v8868_v52, %v8872_v20  ;;  %v14467_v1 = vcombine.low %v8868_v52, %v8872_v20 }
 0x686   :  { %11699 = vmatpush1.bf16.msra.mxu0 %v14379_v19  ;;  %v8704_v32 = vld [vmem:[#allocation15 + $0x6a0] sm:$0xff] }
 0x687   :  { %11700 = vmatprep.subr.bf16.mxu0 %v14372_v59  ;;  %v8860_v12 = vld [vmem:[#allocation15 + $0xb80] sm:$0xff]  ;;  %v14300_v34 = vcombine.high %v8700_v6, %v8704_v32  ;;  %v14299_v59 = vcombine.low %v8700_v6, %v8704_v32 }
 0x688   :  { %11666 = vmatpush2.bf16.msra.mxu1 %v14339_v63  ;;  %v8864_v17 = vld [vmem:[#allocation15 + $0xba0] sm:$0xff] }
 0x689   :  { %11667 = vmatprep.subr.bf16.mxu1 %v14332_v47  ;;  %v8692_v45 = vld [vmem:[#allocation15 + $0x640] sm:$0xff]  ;;  %v14460_v19 = vcombine.high %v8860_v12, %v8864_v17  ;;  %v14459_v51 = vcombine.low %v8860_v12, %v8864_v17  ;;  %v8423_v17 = vrot.slane %v16173_v11, %v15688_v43 }
 0x68a   :  { %11701 = vmatpush1.bf16.msra.mxu0 %v14371_v5  ;;  %v8696_v0 = vld [vmem:[#allocation15 + $0x660] sm:$0xff] }
 0x68b   :  { %11702 = vmatprep.subr.bf16.mxu0 %v14364_v61  ;;  %v8852_v63 = vld [vmem:[#allocation15 + $0xb40] sm:$0xff]  ;;  %v14292_v53 = vcombine.high %v8692_v45, %v8696_v0  ;;  %v14291_v61 = vcombine.low %v8692_v45, %v8696_v0 }
 0x68c   :  { %11668 = vmatpush2.bf16.msra.mxu1 %v14331_v57  ;;  %v8856_v4 = vld [vmem:[#allocation15 + $0xb60] sm:$0xff] }
 0x68d   :  { %11669 = vmatprep.subr.bf16.mxu1 %v14324_v8  ;;  %v8684_v47 = vld [vmem:[#allocation15 + $0x600] sm:$0xff]  ;;  %v14452_v5 = vcombine.high %v8852_v63, %v8856_v4  ;;  %v14451_v8 = vcombine.low %v8852_v63, %v8856_v4 }
 0x68e   :  { %11703 = vmatpush1.bf16.msra.mxu0 %v14363_v38  ;;  %v8688_v36 = vld [vmem:[#allocation15 + $0x620] sm:$0xff] }
 0x68f   :  { %11704 = vmatprep.subr.bf16.mxu0 %v14356_v18  ;;  %v8844_v57 = vld [vmem:[#allocation15 + $0xb00] sm:$0xff]  ;;  %v14284_v27 = vcombine.high %v8684_v47, %v8688_v36  ;;  %v14283_v18 = vcombine.low %v8684_v47, %v8688_v36 }
 0x690   :  { %11670 = vmatpush2.bf16.msra.mxu1 %v14323_v10  ;;  %v8848_v56 = vld [vmem:[#allocation15 + $0xb20] sm:$0xff] }
 0x691   :  { %11671 = vmatprep.subr.bf16.mxu1 %v14316_v44  ;;  %v16197_v21 = vld [vmem:[#allocation15 + $0xdc0] sm:$0xff]  ;;  %v14444_v38 = vcombine.high %v8844_v57, %v8848_v56  ;;  %v14443_v28 = vcombine.low %v8844_v57, %v8848_v56 }
 0x692   :  { %11705 = vmatpush1.bf16.msra.mxu0 %v14355_v23  ;;  %v16199_v31 = vld [vmem:[#allocation15 + $0xde0] sm:$0xff] }
 0x693   :  { %11706 = vmatprep.subr.bf16.mxu0 %v14348_v62  ;;  %v8836_v10 = vld [vmem:[#allocation15 + $0xac0] sm:$0xff]  ;;  %v14532_v44 = vcombine.high %v16197_v21, %v16199_v31 }
 0x694   :  { %11672 = vmatpush2.bf16.msra.mxu1 %v14315_v46  ;;  %v8840_v7 = vld [vmem:[#allocation15 + $0xae0] sm:$0xff]  ;;  %v8172_v46 = vpop.f32.mrf.mxu0 }
 0x695   :  { %11673 = vmatprep.subr.bf16.mxu1 %v14308_v54  ;;  %v14436_v2 = vcombine.high %v8836_v10, %v8840_v7  ;;  %v8828_v23 = vld [vmem:[#allocation15 + $0xa80] sm:$0xff]  ;;  %v14435_v52 = vcombine.low %v8836_v10, %v8840_v7  ;;  %v14150_v7 = vcombine.high %v16187_v55, %v16191_v37  ;;  %v8513_v55 = vld [vmem:[#allocation15 + $0xa8] sm:$0xff] }
 0x696   :  { %11707 = vmatpush1.bf16.msra.mxu0 %v14347_v13  ;;  %v8832_v62 = vld [vmem:[#allocation15 + $0xaa0] sm:$0xff] }
 0x697   :  { %11708 = vmatprep.subr.bf16.mxu0 %v14468_v9  ;;  %v14428_v54 = vcombine.high %v8828_v23, %v8832_v62  ;;  %v8820_v32 = vld [vmem:[#allocation15 + $0xa40] sm:$0xff]  ;;  %v8174_v9 = vpop.f32.mrf.mxu0  ;;  %v14427_v45 = vcombine.low %v8828_v23, %v8832_v62  ;;  %v16219_v62 = vld [vmem:[#allocation15 + $0x5c8] sm:$0xff] }
 0x698   :  { %11674 = vmatpush2.bf16.msra.mxu1 %v14307_v26  ;;  %v8824_v13 = vld [vmem:[#allocation15 + $0xa60] sm:$0xff] }
 0x699   :  { %11675 = vmatprep.subr.bf16.mxu1 %v14300_v34  ;;  %v8812_v4 = vld [vmem:[#allocation15 + $0xa00] sm:$0xff]  ;;  %v8176_v47 = vpop.f32.mrf.mxu0 }
 0x69a   :  { %11709 = vmatpush2.bf16.msra.mxu0 %v14467_v1  ;;  %v14420_v1 = vcombine.high %v8820_v32, %v8824_v13 }
 0x69b   :  { %11710 = vmatprep.subr.bf16.mxu0 %v14460_v19 }
 0x69c   :  { %11676 = vmatpush2.bf16.msra.mxu1 %v14299_v59  ;;  %v8427_v59 = vrot.slane %v16173_v11, %v15682_v41 }
 0x69d   :  { %11677 = vmatprep.subr.bf16.mxu1 %v14292_v53  ;;  %v8816_v53 = vld [vmem:[#allocation15 + $0xa20] sm:$0xff] }
 0x69e   :  { %11711 = vmatpush2.bf16.msra.mxu0 %v14459_v51  ;;  %v14412_v57 = vcombine.high %v8812_v4, %v8816_v53  ;;  %v14411_v10 = vcombine.low %v8812_v4, %v8816_v53  ;;  %v8888_v4 = vld [vmem:[#allocation15 + $0xc60] sm:$0xff] }
 0x69f   :  { %11712 = vmatprep.subr.bf16.mxu0 %v14452_v5 }
 0x6a0   :  { %11678 = vmatpush2.bf16.msra.mxu1 %v14291_v61  ;;  %v14419_v61 = vcombine.low %v8820_v32, %v8824_v13 }
 0x6a1   :  { %11679 = vmatprep.subr.bf16.mxu1 %v14284_v27 }
 0x6a2   :  { %11713 = vmatpush2.bf16.msra.mxu0 %v14451_v8 }
 0x6a3   :  { %11714 = vmatprep.subr.bf16.mxu0 %v14444_v38 }
 0x6a4   :  { %11680 = vmatpush2.bf16.msra.mxu1 %v14283_v18 }
 0x6a5   :  { %11735 = vmatprep.subr.bf16.mxu1 %v14532_v44 }
 0x6a6   :  { %11715 = vmatpush2.bf16.msra.mxu0 %v14443_v28  ;;  %v8924_v28 = vld [vmem:[#allocation15 + $0xd80] sm:$0xff] }
 0x6a7   :  { %v8213_v20 = vpop.f32.mrf.mxu1  ;;  %11716 = vmatprep.subr.bf16.mxu0 %v14436_v2  ;;  %v8928_v2 = vld [vmem:[#allocation15 + $0xda0] sm:$0xff] }
 0x6a8   :  { %v8214_v6 = vadd.f32 %v8213_v20, %v8170_v48  ;;  %v8916_v20 = vld [vmem:[#allocation15 + $0xd40] sm:$0xff]  ;;  %v14523_v32 = vcombine.low %v8924_v28, %v8928_v2 }
 0x6a9   :  { %v8215_v26 = vpop.f32.mrf.mxu1 }
 0x6aa   :  { %v8396_v12 = vadd.f32 %v8214_v6, %v16087_v25  ;;  %v8216_v34 = vadd.f32 %v8215_v26, %v8172_v46  ;;  %11717 = vmatpush2.bf16.msra.mxu0 %v14435_v52  ;;  %v16221_v46 = vld [vmem:[#allocation15 + $0x5e8] sm:$0xff]  ;;  %v14524_v52 = vcombine.high %v8924_v28, %v8928_v2  ;;  %v8972_v28 = vld [vmem:[#allocation15 + $0xf00] sm:$0xff] }
 0x6ab   :  { %v8217_v0 = vpop.f32.mrf.mxu1  ;;  %11718 = vmatprep.subr.bf16.mxu0 %v14428_v54  ;;  %v8920_v54 = vld [vmem:[#allocation15 + $0xd60] sm:$0xff]  ;;  %v14277_v6 = vcombine.low %v16219_v62, %v16221_v46 }
 0x6ac   :  { %v8397_v19 = vadd.f32 %v8216_v34, %v16095_v58  ;;  %v8218_v63 = vadd.f32 %v8217_v0, %v8174_v9  ;;  %v8454_v25 = vadd.f32 %v8423_v17, %v8396_v12  ;;  %v14516_v13 = vcombine.high %v8916_v20, %v8920_v54  ;;  %v8900_v12 = vld [vmem:[#allocation15 + $0xcc0] sm:$0xff] }
 0x6ad   :  { %v8219_v36 = vpop.f32.mrf.mxu1  ;;  %v14515_v9 = vcombine.low %v8916_v20, %v8920_v54  ;;  %v8892_v0 = vld [vmem:[#allocation15 + $0xc80] sm:$0xff] }
 0x6ae   :  { %v8404_v51 = vadd.f32 %v8218_v63, %v16102_v33  ;;  %v8220_v5 = vadd.f32 %v8219_v36, %v8176_v47  ;;  %11719 = vmatpush2.bf16.msra.mxu0 %v14427_v45  ;;  %v8455_v56 = vadd.f32 %v8427_v59, %v8397_v19  ;;  %v8470_v8 = vmax.f32 %v8454_v25, 0.0  ;;  %v8884_v63 = vld [vmem:[#allocation15 + $0xc40] sm:$0xff] }
 0x6af   :  { %11720 = vmatprep.subr.bf16.mxu0 %v14420_v1  ;;  %v8896_v1 = vld [vmem:[#allocation15 + $0xca0] sm:$0xff]  ;;  %v14484_v47 = vcombine.high %v8884_v63, %v8888_v4 }
 0x6b0   :  { %v8462_v27 = vadd.f32 %v8423_v17, %v8404_v51  ;;  %v8405_v58 = vadd.f32 %v8220_v5, %v16108_v49  ;;  %v8471_v48 = vmax.f32 %v8455_v56, 0.0  ;;  %v14531_v49 = vcombine.low %v16197_v21, %v16199_v31  ;;  %v8908_v21 = vld [vmem:[#allocation15 + $0xd00] sm:$0xff] }
 0x6b1   :  { %v8912_v31 = vld [vmem:[#allocation15 + $0xd20] sm:$0xff]  ;;  %v14491_v53 = vcombine.low %v8892_v0, %v8896_v1  ;;  %v14483_v51 = vcombine.low %v8884_v63, %v8888_v4 }
 0x6b2   :  { %v8478_v38 = vmax.f32 %v8462_v27, 0.0  ;;  %v8463_v18 = vadd.f32 %v8427_v59, %v8405_v58  ;;  %11721 = vmatpush2.bf16.msra.mxu0 %v14419_v61  ;;  %v14508_v26 = vcombine.high %v8908_v21, %v8912_v31  ;;  %v8904_v17 = vld [vmem:[#allocation15 + $0xce0] sm:$0xff]  ;;  %v14507_v34 = vcombine.low %v8908_v21, %v8912_v31 }
 0x6b3   :  { %11722 = vmatprep.subr.bf16.mxu0 %v14412_v57  ;;  %v14500_v45 = vcombine.high %v8900_v12, %v8904_v17  ;;  %v14499_v19 = vcombine.low %v8900_v12, %v8904_v17  ;;  %v14492_v59 = vcombine.high %v8892_v0, %v8896_v1  ;;  %v8876_v36 = vld [vmem:[#allocation15 + $0xc00] sm:$0xff]  ;;  %v8430_v12 = vsub.s32 4, %v15676_v39 }
 0x6b4   :  { %v16213_v33 = vpack.c.bf16 %v8478_v38, %v8470_v8  ;;  %v8479_v44 = vmax.f32 %v8463_v18, 0.0  ;;  %v8880_v25 = vld [vmem:[#allocation15 + $0xc20] sm:$0xff]  ;;  %v8434_v1 = vsub.s32 5, %v15676_v39 }
 0x6b5   :  { %v14476_v5 = vcombine.high %v8876_v36, %v8880_v25  ;;  %v8996_v61 = vld [vmem:[#allocation15 + $0xfc0] sm:$0xff]  ;;  %v14475_v56 = vcombine.low %v8876_v36, %v8880_v25 }
 0x6b6   :  { %v16215_v23 = vpack.c.bf16 %v8479_v44, %v8471_v48  ;;  %11723 = vmatpush2.bf16.msra.mxu0 %v14411_v10  ;;  %v9000_v57 = vld [vmem:[#allocation15 + $0xfe0] sm:$0xff] }
 0x6b7   :  { %11778 = vmatprep.subr.bf16.mxu0 %v14150_v7  ;;  %v14596_v27 = vcombine.high %v8996_v61, %v9000_v57  ;;  %v8988_v58 = vld [vmem:[#allocation15 + $0xf80] sm:$0xff]  ;;  %v14595_v38 = vcombine.low %v8996_v61, %v9000_v57  ;;  %v8435_v57 = vrot.slane %v16173_v11, %v8434_v1 }
 0x6b8   :  { %11681 = vmatprep.mubr.bf16.mxu1 %v16215_v23  ;;  %v8992_v8 = vld [vmem:[#allocation15 + $0xfa0] sm:$0xff] }
 0x6b9   :  { %11682 = vmatmul.mubr.bf16.vlgmr.msra.gmra.mxu1 %v16213_v33  ;;  %v14588_v18 = vcombine.high %v8988_v58, %v8992_v8  ;;  %v8980_v10 = vld [vmem:[#allocation15 + $0xf40] sm:$0xff]  ;;  %v14587_v48 = vcombine.low %v8988_v58, %v8992_v8 }
 0x6ba   :  { %11736 = vmatpush1.bf16.msra.mxu1 %v14531_v49  ;;  %v8984_v7 = vld [vmem:[#allocation15 + $0xf60] sm:$0xff] }
 0x6bb   :  { %11737 = vmatprep.subr.bf16.mxu1 %v14524_v52  ;;  %v14580_v44 = vcombine.high %v8980_v10, %v8984_v7  ;;  %v8976_v2 = vld [vmem:[#allocation15 + $0xf20] sm:$0xff]  ;;  %v14579_v49 = vcombine.low %v8980_v10, %v8984_v7 }
 0x6bc   :  { %v14572_v52 = vcombine.high %v8972_v28, %v8976_v2  ;;  %v8964_v20 = vld [vmem:[#allocation15 + $0xec0] sm:$0xff] }
 0x6bd   :  { %v8968_v54 = vld [vmem:[#allocation15 + $0xee0] sm:$0xff] }
 0x6be   :  { %11738 = vmatpush1.bf16.msra.mxu1 %v14523_v32  ;;  %v8256_v32 = vpop.f32.mrf.mxu0  ;;  %v14564_v21 = vcombine.high %v8964_v20, %v8968_v54  ;;  %v8956_v31 = vld [vmem:[#allocation15 + $0xe80] sm:$0xff]  ;;  %v14563_v17 = vcombine.low %v8964_v20, %v8968_v54  ;;  %v14278_v54 = vcombine.high %v16219_v62, %v16221_v46 }
 0x6bf   :  { %11739 = vmatprep.subr.bf16.mxu1 %v14516_v13  ;;  %v14571_v13 = vcombine.low %v8972_v28, %v8976_v2  ;;  %v8944_v58 = vld [vmem:[#allocation15 + $0xe20] sm:$0xff] }
 0x6c2   :  { %11740 = vmatpush1.bf16.msra.mxu1 %v14515_v9  ;;  %v8960_v9 = vld [vmem:[#allocation15 + $0xea0] sm:$0xff] }
 0x6c3   :  { %11741 = vmatprep.subr.bf16.mxu1 %v14508_v26  ;;  %v8258_v26 = vpop.f32.mrf.mxu0  ;;  %v14555_v25 = vcombine.low %v8956_v31, %v8960_v9 }
 0x6c5   :  { %v8260_v63 = vpop.f32.mrf.mxu0 }
 0x6c6   :  { %11742 = vmatpush1.bf16.msra.mxu1 %v14507_v34 }
 0x6c7   :  { %11743 = vmatprep.subr.bf16.mxu1 %v14500_v45  ;;  %v14556_v45 = vcombine.high %v8956_v31, %v8960_v9  ;;  %v8545_v31 = vld [vmem:[#allocation15 + $0x1a8] sm:$0xff] }
 0x6ca   :  { %11744 = vmatpush1.bf16.msra.mxu1 %v14499_v19  ;;  %v8948_v19 = vld [vmem:[#allocation15 + $0xe40] sm:$0xff] }
 0x6cb   :  { %11745 = vmatprep.subr.bf16.mxu1 %v14492_v59  ;;  %v8952_v59 = vld [vmem:[#allocation15 + $0xe60] sm:$0xff] }
 0x6cc   :  { %v14547_v7 = vcombine.low %v8948_v19, %v8952_v59 }
 0x6ce   :  { %11746 = vmatpush1.bf16.msra.mxu1 %v14491_v53 }
 0x6cf   :  { %11747 = vmatprep.subr.bf16.mxu1 %v14484_v47  ;;  %v8431_v47 = vrot.slane %v16173_v11, %v8430_v12 }
 0x6d2   :  { %11748 = vmatpush1.bf16.msra.mxu1 %v14483_v51 }
 0x6d3   :  { %11749 = vmatprep.subr.bf16.mxu1 %v14476_v5  ;;  %v14548_v5 = vcombine.high %v8948_v19, %v8952_v59  ;;  %v8529_v19 = vld [vmem:[#allocation15 + $0x128] sm:$0xff] }
 0x6d6   :  { %11750 = vmatpush1.bf16.msra.mxu1 %v14475_v56 }
 0x6d7   :  { %11751 = vmatprep.subr.bf16.mxu1 %v14596_v27  ;;  %v8940_v27 = vld [vmem:[#allocation15 + $0xe00] sm:$0xff] }
 0x6d8   :  { %v14539_v20 = vcombine.low %v8940_v27, %v8944_v58 }
 0x6da   :  { %11752 = vmatpush2.bf16.msra.mxu1 %v14595_v38 }
 0x6db   :  { %11753 = vmatprep.subr.bf16.mxu1 %v14588_v18 }
 0x6de   :  { %11754 = vmatpush2.bf16.msra.mxu1 %v14587_v48  ;;  %v14540_v48 = vcombine.high %v8940_v27, %v8944_v58  ;;  %v8497_v27 = vld [vmem:[#allocation15 + $0x28] sm:$0xff] }
 0x6df   :  { %11755 = vmatprep.subr.bf16.mxu1 %v14580_v44 }
 0x6e2   :  { %11756 = vmatpush2.bf16.msra.mxu1 %v14579_v49 }
 0x6e3   :  { %11757 = vmatprep.subr.bf16.mxu1 %v14572_v52 }
 0x6e6   :  { %11758 = vmatpush2.bf16.msra.mxu1 %v14571_v13 }
 0x6e7   :  { %v8299_v34 = vpop.f32.mrf.mxu1  ;;  %11759 = vmatprep.subr.bf16.mxu1 %v14564_v21  ;;  %v8541_v21 = vld [vmem:[#allocation15 + $0x188] sm:$0xff] }
 0x6e8   :  { %v8300_v0 = vadd.f32 %v8299_v34, %v8256_v32  ;;  %v14141_v34 = vcombine.low %v8541_v21, %v8545_v31 }
 0x6e9   :  { %v8301_v4 = vpop.f32.mrf.mxu1 }
 0x6ea   :  { %v8398_v53 = vadd.f32 %v8300_v0, %v16115_v24  ;;  %v8302_v36 = vadd.f32 %v8301_v4, %v8258_v26  ;;  %11760 = vmatpush2.bf16.msra.mxu1 %v14563_v17  ;;  %v8262_v24 = vpop.f32.mrf.mxu0  ;;  %v14142_v26 = vcombine.high %v8541_v21, %v8545_v31  ;;  %v8537_v17 = vld [vmem:[#allocation15 + $0x168] sm:$0xff] }
 0x6eb   :  { %v8303_v51 = vpop.f32.mrf.mxu1  ;;  %11761 = vmatprep.subr.bf16.mxu1 %v14556_v45  ;;  %v8525_v0 = vld [vmem:[#allocation15 + $0x108] sm:$0xff] }
 0x6ec   :  { %v8399_v61 = vadd.f32 %v8302_v36, %v16123_v16  ;;  %v8304_v56 = vadd.f32 %v8303_v51, %v8260_v63  ;;  %v8456_v38 = vadd.f32 %v8431_v47, %v8398_v53  ;;  %v14126_v63 = vcombine.high %v8525_v0, %v8529_v19  ;;  %v8517_v4 = vld [vmem:[#allocation15 + $0xc8] sm:$0xff] }
 0x6ed   :  { %v8305_v8 = vpop.f32.mrf.mxu1  ;;  %v8521_v53 = vld [vmem:[#allocation15 + $0xe8] sm:$0xff] }
 0x6ee   :  { %v8406_v18 = vadd.f32 %v8304_v56, %v16130_v15  ;;  %v8306_v10 = vadd.f32 %v8305_v8, %v8262_v24  ;;  %11762 = vmatpush2.bf16.msra.mxu1 %v14555_v25  ;;  %v8457_v44 = vadd.f32 %v8435_v57, %v8399_v61  ;;  %v8472_v2 = vmax.f32 %v8456_v38, 0.0  ;;  %v8509_v25 = vld [vmem:[#allocation15 + $0x88] sm:$0xff] }
 0x6ef   :  { %11763 = vmatprep.subr.bf16.mxu1 %v14548_v5  ;;  %v14118_v36 = vcombine.high %v8517_v4, %v8521_v53  ;;  %v14117_v37 = vcombine.low %v8517_v4, %v8521_v53  ;;  %v8501_v51 = vld [vmem:[#allocation15 + $0x48] sm:$0xff]  ;;  %v14109_v61 = vcombine.low %v8509_v25, %v8513_v55 }
 0x6f0   :  { %v8464_v28 = vadd.f32 %v8431_v47, %v8406_v18  ;;  %v8407_v16 = vadd.f32 %v8306_v10, %v16136_v14  ;;  %v8473_v32 = vmax.f32 %v8457_v44, 0.0  ;;  %v8533_v14 = vld [vmem:[#allocation15 + $0x148] sm:$0xff]  ;;  %v14125_v47 = vcombine.low %v8525_v0, %v8529_v19 }
 0x6f1   :  { %v14134_v45 = vcombine.high %v8533_v14, %v8537_v17  ;;  %v14133_v59 = vcombine.low %v8533_v14, %v8537_v17  ;;  %v8505_v5 = vld [vmem:[#allocation15 + $0x68] sm:$0xff]  ;;  %v8438_v19 = vsub.s32 6, %v15676_v39 }
 0x6f2   :  { %v8480_v49 = vmax.f32 %v8464_v28, 0.0  ;;  %v8465_v52 = vadd.f32 %v8435_v57, %v8407_v16  ;;  %11764 = vmatpush2.bf16.msra.mxu1 %v14547_v7  ;;  %v14102_v57 = vcombine.high %v8501_v51, %v8505_v5  ;;  %v8493_v56 = vld [vmem:[#allocation15 + $0x8] sm:$0xff]  ;;  %v14101_v58 = vcombine.low %v8501_v51, %v8505_v5 }
 0x6f3   :  { %11765 = vmatprep.subr.bf16.mxu1 %v14540_v48  ;;  %v14094_v24 = vcombine.high %v8493_v56, %v8497_v27  ;;  %v8613_v8 = vld [vmem:[#allocation15 + $0x3c8] sm:$0xff]  ;;  %v14093_v18 = vcombine.low %v8493_v56, %v8497_v27  ;;  %v8439_v51 = vrot.slane %v16173_v11, %v8438_v19 }
 0x6f4   :  { %v16241_v15 = vpack.c.bf16 %v8480_v49, %v8472_v2  ;;  %v8481_v13 = vmax.f32 %v8465_v52, 0.0  ;;  %v8617_v38 = vld [vmem:[#allocation15 + $0x3e8] sm:$0xff] }
 0x6f5   :  { %v14214_v10 = vcombine.high %v8613_v8, %v8617_v38  ;;  %v8605_v7 = vld [vmem:[#allocation15 + $0x388] sm:$0xff]  ;;  %v14213_v44 = vcombine.low %v8613_v8, %v8617_v38 }
 0x6f6   :  { %v16243_v9 = vpack.c.bf16 %v8481_v13, %v8473_v32  ;;  %11766 = vmatpush2.bf16.msra.mxu1 %v14539_v20  ;;  %v8609_v48 = vld [vmem:[#allocation15 + $0x3a8] sm:$0xff] }
 0x6f7   :  { %11821 = vmatprep.subr.bf16.mxu1 %v14278_v54  ;;  %v14206_v28 = vcombine.high %v8605_v7, %v8609_v48  ;;  %v8597_v16 = vld [vmem:[#allocation15 + $0x348] sm:$0xff]  ;;  %v14205_v49 = vcombine.low %v8605_v7, %v8609_v48 }
 0x6f8   :  { %11724 = vmatprep.mubr.bf16.mxu0 %v16243_v9  ;;  %v8601_v2 = vld [vmem:[#allocation15 + $0x368] sm:$0xff] }
 0x6f9   :  { %11725 = vmatmul.mubr.bf16.vlgmr.msra.gmra.mxu0 %v16241_v15  ;;  %v14198_v52 = vcombine.high %v8597_v16, %v8601_v2  ;;  %v8589_v20 = vld [vmem:[#allocation15 + $0x308] sm:$0xff]  ;;  %v14197_v32 = vcombine.low %v8597_v16, %v8601_v2 }
 0x6fa   :  { %11779 = vmatpush1.bf16.msra.mxu0 %v14149_v29  ;;  %11810 = vmatprep.mubr.bf16.mxu0 %v16183_v50  ;;  %v14110_v29 = vcombine.high %v8509_v25, %v8513_v55  ;;  %v8593_v54 = vld [vmem:[#allocation15 + $0x328] sm:$0xff] }
 0x6fb   :  { %11780 = vmatprep.subr.bf16.mxu0 %v14142_v26  ;;  %v14190_v13 = vcombine.high %v8589_v20, %v8593_v54  ;;  %v8581_v21 = vld [vmem:[#allocation15 + $0x2c8] sm:$0xff]  ;;  %v8342_v26 = vpop.f32.mrf.mxu0  ;;  %v14189_v14 = vcombine.low %v8589_v20, %v8593_v54 }
 0x6fc   :  { %v8585_v31 = vld [vmem:[#allocation15 + $0x2e8] sm:$0xff] }
 0x6fd   :  { %v14182_v17 = vcombine.high %v8581_v21, %v8585_v31  ;;  %v8344_v0 = vpop.f32.mrf.mxu0  ;;  %v8569_v25 = vld [vmem:[#allocation15 + $0x268] sm:$0xff] }
 0x6fe   :  { %11781 = vmatpush1.bf16.msra.mxu0 %v14141_v34  ;;  %v8573_v34 = vld [vmem:[#allocation15 + $0x288] sm:$0xff] }
 0x6ff   :  { %11782 = vmatprep.subr.bf16.mxu0 %v14134_v45  ;;  %v8577_v45 = vld [vmem:[#allocation15 + $0x2a8] sm:$0xff]  ;;  %v8346_v55 = vpop.f32.mrf.mxu0 }
 0x700   :  { %v14174_v4 = vcombine.high %v8573_v34, %v8577_v45  ;;  %v8557_v8 = vld [vmem:[#allocation15 + $0x208] sm:$0xff] }
 0x701   :  { %v8561_v38 = vld [vmem:[#allocation15 + $0x228] sm:$0xff] }
 0x702   :  { %11783 = vmatpush1.bf16.msra.mxu0 %v14133_v59  ;;  %v14181_v59 = vcombine.low %v8581_v21, %v8585_v31 }
 0x703   :  { %11784 = vmatprep.subr.bf16.mxu0 %v14126_v63 }
 0x706   :  { %11785 = vmatpush1.bf16.msra.mxu0 %v14125_v47  ;;  %v8442_v47 = vsub.s32 7, %v15676_v39 }
 0x707   :  { %11786 = vmatprep.subr.bf16.mxu0 %v14118_v36  ;;  %v8565_v36 = vld [vmem:[#allocation15 + $0x248] sm:$0xff] }
 0x708   :  { %v14166_v56 = vcombine.high %v8565_v36, %v8569_v25 }
 0x70a   :  { %11787 = vmatpush1.bf16.msra.mxu0 %v14117_v37 }
 0x70b   :  { %11788 = vmatprep.subr.bf16.mxu0 %v14110_v29 }
 0x70e   :  { %11789 = vmatpush1.bf16.msra.mxu0 %v14109_v61  ;;  %v14173_v61 = vcombine.low %v8573_v34, %v8577_v45  ;;  %v8801_v34 = vld [vmem:[#allocation15 + $0x9a8] sm:$0xff] }
 0x70f   :  { %11790 = vmatprep.subr.bf16.mxu0 %v14102_v57 }
 0x712   :  { %11791 = vmatpush1.bf16.msra.mxu0 %v14101_v58  ;;  %v8443_v58 = vrot.slane %v16173_v11, %v8442_v47 }
 0x713   :  { %11792 = vmatprep.subr.bf16.mxu0 %v14094_v24 }
 0x716   :  { %11793 = vmatpush1.bf16.msra.mxu0 %v14093_v18 }
 0x717   :  { %11794 = vmatprep.subr.bf16.mxu0 %v14214_v10 }
 0x71a   :  { %11795 = vmatpush2.bf16.msra.mxu0 %v14213_v44  ;;  %v14165_v44 = vcombine.low %v8565_v36, %v8569_v25  ;;  %v8793_v36 = vld [vmem:[#allocation15 + $0x968] sm:$0xff] }
 0x71b   :  { %11796 = vmatprep.subr.bf16.mxu0 %v14206_v28  ;;  %v14158_v28 = vcombine.high %v8557_v8, %v8561_v38 }
 0x71e   :  { %11797 = vmatpush2.bf16.msra.mxu0 %v14205_v49  ;;  %v8805_v49 = vld [vmem:[#allocation15 + $0x9c8] sm:$0xff] }
 0x71f   :  { %11798 = vmatprep.subr.bf16.mxu0 %v14198_v52  ;;  %v8809_v52 = vld [vmem:[#allocation15 + $0x9e8] sm:$0xff] }
 0x722   :  { %11799 = vmatpush2.bf16.msra.mxu0 %v14197_v32  ;;  %v14157_v32 = vcombine.low %v8557_v8, %v8561_v38  ;;  %v8777_v8 = vld [vmem:[#allocation15 + $0x8e8] sm:$0xff] }
 0x723   :  { %11800 = vmatprep.subr.bf16.mxu0 %v14190_v13  ;;  %v14406_v13 = vcombine.high %v8805_v49, %v8809_v52 }
 0x726   :  { %11801 = vmatpush2.bf16.msra.mxu0 %v14189_v14  ;;  %v8673_v14 = vld [vmem:[#allocation15 + $0x5a8] sm:$0xff] }
 0x727   :  { %v8385_v63 = vpop.f32.mrf.mxu1  ;;  %11802 = vmatprep.subr.bf16.mxu0 %v14182_v17  ;;  %v8797_v17 = vld [vmem:[#allocation15 + $0x988] sm:$0xff] }
 0x728   :  { %v8386_v53 = vadd.f32 %v8385_v63, %v8342_v26  ;;  %v8669_v26 = vld [vmem:[#allocation15 + $0x588] sm:$0xff]  ;;  %v14398_v63 = vcombine.high %v8797_v17, %v8801_v34 }
 0x729   :  { %v8387_v37 = vpop.f32.mrf.mxu1  ;;  %v14269_v25 = vcombine.low %v8669_v26, %v8673_v14 }
 0x72a   :  { %v8400_v29 = vadd.f32 %v8386_v53, %v16143_v3  ;;  %v8388_v5 = vadd.f32 %v8387_v37, %v8344_v0  ;;  %11803 = vmatpush2.bf16.msra.mxu0 %v14181_v59  ;;  %v8348_v3 = vpop.f32.mrf.mxu0  ;;  %v8661_v0 = vld [vmem:[#allocation15 + $0x548] sm:$0xff]  ;;  %v14270_v59 = vcombine.high %v8669_v26, %v8673_v14 }
 0x72b   :  { %v8389_v57 = vpop.f32.mrf.mxu1  ;;  %11804 = vmatprep.subr.bf16.mxu0 %v14174_v4  ;;  %v8665_v4 = vld [vmem:[#allocation15 + $0x568] sm:$0xff] }
 0x72c   :  { %v8401_v27 = vadd.f32 %v8388_v5, %v16148_v30  ;;  %v8390_v24 = vadd.f32 %v8389_v57, %v8346_v55  ;;  %v8458_v10 = vadd.f32 %v8439_v51, %v8400_v29  ;;  %v8789_v53 = vld [vmem:[#allocation15 + $0x948] sm:$0xff]  ;;  %v14397_v55 = vcombine.low %v8797_v17, %v8801_v34 }
 0x72d   :  { %v8391_v18 = vpop.f32.mrf.mxu1  ;;  %v14262_v37 = vcombine.high %v8661_v0, %v8665_v4  ;;  %v14390_v29 = vcombine.high %v8789_v53, %v8793_v36  ;;  %v8657_v5 = vld [vmem:[#allocation15 + $0x528] sm:$0xff]  ;;  %v14389_v62 = vcombine.low %v8789_v53, %v8793_v36 }
 0x72e   :  { %v8408_v7 = vadd.f32 %v8390_v24, %v16151_v35  ;;  %v8392_v48 = vadd.f32 %v8391_v18, %v8348_v3  ;;  %11805 = vmatpush2.bf16.msra.mxu0 %v14173_v61  ;;  %v8459_v16 = vadd.f32 %v8443_v58, %v8401_v27  ;;  %v8474_v11 = vmax.f32 %v8458_v10, 0.0  ;;  %v8781_v61 = vld [vmem:[#allocation15 + $0x908] sm:$0xff] }
 0x72f   :  { %11806 = vmatprep.subr.bf16.mxu0 %v14166_v56  ;;  %v8785_v57 = vld [vmem:[#allocation15 + $0x928] sm:$0xff]  ;;  %v14261_v56 = vcombine.low %v8661_v0, %v8665_v4 }
 0x730   :  { %v8466_v2 = vadd.f32 %v8439_v51, %v8408_v7  ;;  %v8409_v30 = vadd.f32 %v8392_v48, %v16154_v60  ;;  %v8475_v21 = vmax.f32 %v8459_v16, 0.0  ;;  %v14405_v60 = vcombine.low %v8805_v49, %v8809_v52  ;;  %v8653_v51 = vld [vmem:[#allocation15 + $0x508] sm:$0xff] }
 0x731   :  { %v14254_v46 = vcombine.high %v8653_v51, %v8657_v5  ;;  %v8645_v27 = vld [vmem:[#allocation15 + $0x4c8] sm:$0xff]  ;;  %v14253_v38 = vcombine.low %v8653_v51, %v8657_v5  ;;  %v14381_v3 = vcombine.low %v8781_v61, %v8785_v57 }
 0x732   :  { %v8482_v20 = vmax.f32 %v8466_v2, 0.0  ;;  %v8467_v54 = vadd.f32 %v8443_v58, %v8409_v30  ;;  %11807 = vmatpush2.bf16.msra.mxu0 %v14165_v44  ;;  %v8649_v58 = vld [vmem:[#allocation15 + $0x4e8] sm:$0xff] }
 0x733   :  { %11808 = vmatprep.subr.bf16.mxu0 %v14158_v28  ;;  %v8773_v24 = vld [vmem:[#allocation15 + $0x8c8] sm:$0xff]  ;;  %v14246_v18 = vcombine.high %v8645_v27, %v8649_v58  ;;  %v14245_v16 = vcombine.low %v8645_v27, %v8649_v58 }
 0x734   :  { %v16263_v35 = vpack.c.bf16 %v8482_v20, %v8474_v11  ;;  %v8483_v31 = vmax.f32 %v8467_v54, 0.0  ;;  %v14374_v10 = vcombine.high %v8773_v24, %v8777_v8  ;;  %v8637_v7 = vld [vmem:[#allocation15 + $0x488] sm:$0xff]  ;;  %v14373_v2 = vcombine.low %v8773_v24, %v8777_v8 }
 0x735   :  { %v8641_v48 = vld [vmem:[#allocation15 + $0x4a8] sm:$0xff] }
 0x736   :  { %v16265_v45 = vpack.c.bf16 %v8483_v31, %v8475_v21  ;;  %11809 = vmatpush2.bf16.msra.mxu0 %v14157_v32  ;;  %v8765_v44 = vld [vmem:[#allocation15 + $0x888] sm:$0xff]  ;;  %v14238_v30 = vcombine.high %v8637_v7, %v8641_v48  ;;  %v14237_v32 = vcombine.low %v8637_v7, %v8641_v48 }
 0x737   :  { %11864 = vmatprep.subr.bf16.mxu0 %v14406_v13  ;;  %v8769_v28 = vld [vmem:[#allocation15 + $0x8a8] sm:$0xff] }
 0x738   :  { %11767 = vmatprep.mubr.bf16.mxu1 %v16265_v45  ;;  %v14366_v49 = vcombine.high %v8765_v44, %v8769_v28  ;;  %v8629_v52 = vld [vmem:[#allocation15 + $0x448] sm:$0xff]  ;;  %v14365_v13 = vcombine.low %v8765_v44, %v8769_v28 }
 0x739   :  { %11811 = vmatmul.mubr.bf16.vlgmr.msra.gmra.mxu0 %v16189_v22  ;;  %11768 = vmatmul.mubr.bf16.vlgmr.msra.gmra.mxu1 %v16263_v35  ;;  %v8633_v11 = vld [vmem:[#allocation15 + $0x468] sm:$0xff] }
 0x73a   :  { %11822 = vmatpush1.bf16.msra.mxu1 %v14277_v6  ;;  %11865 = vmatpush1.bf16.msra.mxu0 %v14405_v60  ;;  %v14382_v6 = vcombine.high %v8781_v61, %v8785_v57  ;;  %v8757_v20 = vld [vmem:[#allocation15 + $0x848] sm:$0xff]  ;;  %v14230_v21 = vcombine.high %v8629_v52, %v8633_v11  ;;  %v14229_v60 = vcombine.low %v8629_v52, %v8633_v11 }
 0x73b   :  { %11896 = vmatprep.mubr.bf16.mxu0 %v16243_v9  ;;  %11853 = vmatprep.mubr.bf16.mxu1 %v16215_v23  ;;  %v8761_v54 = vld [vmem:[#allocation15 + $0x868] sm:$0xff] }
 0x73c   :  { %11823 = vmatprep.subr.bf16.mxu1 %v14270_v59  ;;  %11866 = vmatprep.subr.bf16.mxu0 %v14398_v63  ;;  %v14358_v31 = vcombine.high %v8757_v20, %v8761_v54  ;;  %v8621_v26 = vld [vmem:[#allocation15 + $0x408] sm:$0xff]  ;;  %v14357_v0 = vcombine.low %v8757_v20, %v8761_v54 }
 0x73d   :  { %v8625_v14 = vld [vmem:[#allocation15 + $0x428] sm:$0xff] }
 0x73e   :  { %11824 = vmatpush1.bf16.msra.mxu1 %v14269_v25  ;;  %11867 = vmatpush1.bf16.msra.mxu0 %v14397_v55  ;;  %v8749_v17 = vld [vmem:[#allocation15 + $0x808] sm:$0xff]  ;;  %v14222_v59 = vcombine.high %v8621_v26, %v8625_v14  ;;  %v14221_v55 = vcombine.low %v8621_v26, %v8625_v14 }
 0x73f   :  { %11825 = vmatprep.subr.bf16.mxu1 %v14262_v37  ;;  %11868 = vmatprep.subr.bf16.mxu0 %v14390_v29  ;;  %v8753_v34 = vld [vmem:[#allocation15 + $0x828] sm:$0xff] }
 0x740   :  { %v14350_v63 = vcombine.high %v8749_v17, %v8753_v34  ;;  %v8741_v4 = vld [vmem:[#allocation15 + $0x7c8] sm:$0xff]  ;;  %v14349_v37 = vcombine.low %v8749_v17, %v8753_v34 }
 0x741   :  { %v8745_v53 = vld [vmem:[#allocation15 + $0x7e8] sm:$0xff] }
 0x742   :  { %11826 = vmatpush1.bf16.msra.mxu1 %v14261_v56  ;;  %11869 = vmatpush1.bf16.msra.mxu0 %v14389_v62  ;;  %v8869_v36 = vld [vmem:[#allocation15 + $0xbc8] sm:$0xff]  ;;  %v14342_v29 = vcombine.high %v8741_v4, %v8745_v53  ;;  %v14341_v62 = vcombine.low %v8741_v4, %v8745_v53 }
 0x743   :  { %11827 = vmatprep.subr.bf16.mxu1 %v14254_v46  ;;  %11870 = vmatprep.subr.bf16.mxu0 %v14382_v6  ;;  %v8873_v25 = vld [vmem:[#allocation15 + $0xbe8] sm:$0xff] }
 0x744   :  { %v14470_v51 = vcombine.high %v8869_v36, %v8873_v25  ;;  %v8733_v5 = vld [vmem:[#allocation15 + $0x788] sm:$0xff]  ;;  %v14469_v46 = vcombine.low %v8869_v36, %v8873_v25 }
 0x745   :  { %v8737_v61 = vld [vmem:[#allocation15 + $0x7a8] sm:$0xff] }
 0x746   :  { %11828 = vmatpush1.bf16.msra.mxu1 %v14253_v38  ;;  %11871 = vmatpush1.bf16.msra.mxu0 %v14381_v3  ;;  %v8861_v57 = vld [vmem:[#allocation15 + $0xb88] sm:$0xff]  ;;  %v14334_v6 = vcombine.high %v8733_v5, %v8737_v61  ;;  %v14333_v3 = vcombine.low %v8733_v5, %v8737_v61 }
 0x747   :  { %11829 = vmatprep.subr.bf16.mxu1 %v14246_v18  ;;  %11872 = vmatprep.subr.bf16.mxu0 %v14374_v10  ;;  %v8865_v56 = vld [vmem:[#allocation15 + $0xba8] sm:$0xff] }
 0x748   :  { %v14462_v27 = vcombine.high %v8861_v57, %v8865_v56  ;;  %v8725_v58 = vld [vmem:[#allocation15 + $0x748] sm:$0xff]  ;;  %v14461_v18 = vcombine.low %v8861_v57, %v8865_v56 }
 0x749   :  { %v8729_v24 = vld [vmem:[#allocation15 + $0x768] sm:$0xff] }
 0x74a   :  { %11830 = vmatpush1.bf16.msra.mxu1 %v14245_v16  ;;  %11873 = vmatpush1.bf16.msra.mxu0 %v14373_v2  ;;  %v8853_v8 = vld [vmem:[#allocation15 + $0xb48] sm:$0xff]  ;;  %v14326_v10 = vcombine.high %v8725_v58, %v8729_v24  ;;  %v14325_v2 = vcombine.low %v8725_v58, %v8729_v24 }
 0x74b   :  { %11831 = vmatprep.subr.bf16.mxu1 %v14238_v30  ;;  %11874 = vmatprep.subr.bf16.mxu0 %v14366_v49  ;;  %v8857_v38 = vld [vmem:[#allocation15 + $0xb68] sm:$0xff] }
 0x74c   :  { %v14454_v7 = vcombine.high %v8853_v8, %v8857_v38  ;;  %v8717_v48 = vld [vmem:[#allocation15 + $0x708] sm:$0xff]  ;;  %v14453_v30 = vcombine.low %v8853_v8, %v8857_v38  ;;  %v8550_v38 = vld [vmem:[#allocation15 + $0x1d0] sm:$0xff] }
 0x74d   :  { %v8721_v44 = vld [vmem:[#allocation15 + $0x728] sm:$0xff] }
 0x74e   :  { %11832 = vmatpush1.bf16.msra.mxu1 %v14237_v32  ;;  %11875 = vmatpush1.bf16.msra.mxu0 %v14365_v13  ;;  %v8845_v28 = vld [vmem:[#allocation15 + $0xb08] sm:$0xff]  ;;  %v14318_v49 = vcombine.high %v8717_v48, %v8721_v44  ;;  %v14317_v13 = vcombine.low %v8717_v48, %v8721_v44 }
 0x74f   :  { %11833 = vmatprep.subr.bf16.mxu1 %v14230_v21  ;;  %11876 = vmatprep.subr.bf16.mxu0 %v14358_v31  ;;  %v8849_v16 = vld [vmem:[#allocation15 + $0xb28] sm:$0xff] }
 0x750   :  { %v14446_v52 = vcombine.high %v8845_v28, %v8849_v16  ;;  %v8709_v11 = vld [vmem:[#allocation15 + $0x6c8] sm:$0xff]  ;;  %v14445_v21 = vcombine.low %v8845_v28, %v8849_v16  ;;  %v8542_v16 = vld [vmem:[#allocation15 + $0x190] sm:$0xff] }
 0x751   :  { %v8713_v20 = vld [vmem:[#allocation15 + $0x6e8] sm:$0xff] }
 0x752   :  { %11834 = vmatpush1.bf16.msra.mxu1 %v14229_v60  ;;  %11877 = vmatpush1.bf16.msra.mxu0 %v14357_v0  ;;  %v8837_v54 = vld [vmem:[#allocation15 + $0xac8] sm:$0xff]  ;;  %v14310_v31 = vcombine.high %v8709_v11, %v8713_v20  ;;  %v14309_v0 = vcombine.low %v8709_v11, %v8713_v20 }
 0x753   :  { %11835 = vmatprep.subr.bf16.mxu1 %v14222_v59  ;;  %11878 = vmatprep.subr.bf16.mxu0 %v14350_v63  ;;  %v8841_v32 = vld [vmem:[#allocation15 + $0xae8] sm:$0xff] }
 0x754   :  { %v14438_v26 = vcombine.high %v8837_v54, %v8841_v32  ;;  %v8701_v14 = vld [vmem:[#allocation15 + $0x688] sm:$0xff]  ;;  %v14437_v59 = vcombine.low %v8837_v54, %v8841_v32  ;;  %v8534_v32 = vld [vmem:[#allocation15 + $0x150] sm:$0xff] }
 0x755   :  { %v8705_v17 = vld [vmem:[#allocation15 + $0x6a8] sm:$0xff] }
 0x756   :  { %11836 = vmatpush1.bf16.msra.mxu1 %v14221_v55  ;;  %11879 = vmatpush1.bf16.msra.mxu0 %v14349_v37  ;;  %v8829_v34 = vld [vmem:[#allocation15 + $0xa88] sm:$0xff]  ;;  %v14302_v63 = vcombine.high %v8701_v14, %v8705_v17  ;;  %v14301_v37 = vcombine.low %v8701_v14, %v8705_v17 }
 0x757   :  { %11837 = vmatprep.subr.bf16.mxu1 %v14342_v29  ;;  %11880 = vmatprep.subr.bf16.mxu0 %v14470_v51  ;;  %v8833_v60 = vld [vmem:[#allocation15 + $0xaa8] sm:$0xff] }
 0x758   :  { %v14430_v4 = vcombine.high %v8829_v34, %v8833_v60  ;;  %v8693_v53 = vld [vmem:[#allocation15 + $0x648] sm:$0xff]  ;;  %v14429_v29 = vcombine.low %v8829_v34, %v8833_v60  ;;  %v8526_v60 = vld [vmem:[#allocation15 + $0x110] sm:$0xff] }
 0x759   :  { %v8697_v36 = vld [vmem:[#allocation15 + $0x668] sm:$0xff] }
 0x75a   :  { %11838 = vmatpush2.bf16.msra.mxu1 %v14341_v62  ;;  %11881 = vmatpush2.bf16.msra.mxu0 %v14469_v46  ;;  %v8821_v25 = vld [vmem:[#allocation15 + $0xa48] sm:$0xff]  ;;  %v14294_v51 = vcombine.high %v8693_v53, %v8697_v36  ;;  %v14293_v46 = vcombine.low %v8693_v53, %v8697_v36 }
 0x75b   :  { %11839 = vmatprep.subr.bf16.mxu1 %v14334_v6  ;;  %11882 = vmatprep.subr.bf16.mxu0 %v14462_v27  ;;  %v8825_v55 = vld [vmem:[#allocation15 + $0xa68] sm:$0xff] }
 0x75c   :  { %v14422_v5 = vcombine.high %v8821_v25, %v8825_v55  ;;  %v8685_v61 = vld [vmem:[#allocation15 + $0x608] sm:$0xff]  ;;  %v14421_v6 = vcombine.low %v8821_v25, %v8825_v55  ;;  %v8518_v55 = vld [vmem:[#allocation15 + $0xd0] sm:$0xff] }
 0x75d   :  { %v8689_v57 = vld [vmem:[#allocation15 + $0x628] sm:$0xff] }
 0x75e   :  { %11840 = vmatpush2.bf16.msra.mxu1 %v14333_v3  ;;  %11883 = vmatpush2.bf16.msra.mxu0 %v14461_v18  ;;  %v8813_v56 = vld [vmem:[#allocation15 + $0xa08] sm:$0xff]  ;;  %v14286_v27 = vcombine.high %v8685_v61, %v8689_v57  ;;  %v8554_v3 = vld [vmem:[#allocation15 + $0x1f0] sm:$0xff]  ;;  %v14285_v18 = vcombine.low %v8685_v61, %v8689_v57 }
 0x75f   :  { %11841 = vmatprep.subr.bf16.mxu1 %v14326_v10  ;;  %11884 = vmatprep.subr.bf16.mxu0 %v14454_v7  ;;  %v8817_v62 = vld [vmem:[#allocation15 + $0xa28] sm:$0xff]  ;;  %v14152_v48 = vcombine.high %v8550_v38, %v8554_v3 }
 0x760   :  { %v14414_v58 = vcombine.high %v8813_v56, %v8817_v62  ;;  %v8933_v24 = vld [vmem:[#allocation15 + $0xdc8] sm:$0xff]  ;;  %v14413_v10 = vcombine.low %v8813_v56, %v8817_v62  ;;  %v8510_v62 = vld [vmem:[#allocation15 + $0x90] sm:$0xff] }
 0x761   :  { %v8937_v8 = vld [vmem:[#allocation15 + $0xde8] sm:$0xff] }
 0x762   :  { %11842 = vmatpush2.bf16.msra.mxu1 %v14325_v2  ;;  %11885 = vmatpush2.bf16.msra.mxu0 %v14453_v30  ;;  %v14534_v7 = vcombine.high %v8933_v24, %v8937_v8  ;;  %v8925_v44 = vld [vmem:[#allocation15 + $0xd88] sm:$0xff]  ;;  %v8546_v2 = vld [vmem:[#allocation15 + $0x1b0] sm:$0xff]  ;;  %v14533_v30 = vcombine.low %v8933_v24, %v8937_v8 }
 0x763   :  { %11843 = vmatprep.subr.bf16.mxu1 %v14318_v49  ;;  %11886 = vmatprep.subr.bf16.mxu0 %v14446_v52  ;;  %v8929_v28 = vld [vmem:[#allocation15 + $0xda8] sm:$0xff]  ;;  %v14151_v49 = vcombine.low %v8550_v38, %v8554_v3  ;;  %v14144_v11 = vcombine.high %v8542_v16, %v8546_v2  ;;  %v8502_v3 = vld [vmem:[#allocation15 + $0x50] sm:$0xff] }
 0x764   :  { %v14526_v52 = vcombine.high %v8925_v44, %v8929_v28  ;;  %v8917_v20 = vld [vmem:[#allocation15 + $0xd48] sm:$0xff] }
 0x765   :  { %v8921_v54 = vld [vmem:[#allocation15 + $0xd68] sm:$0xff] }
 0x766   :  { %11844 = vmatpush2.bf16.msra.mxu1 %v14317_v13  ;;  %11887 = vmatpush2.bf16.msra.mxu0 %v14445_v21  ;;  %v8538_v13 = vld [vmem:[#allocation15 + $0x170] sm:$0xff]  ;;  %v14525_v21 = vcombine.low %v8925_v44, %v8929_v28  ;;  %v8909_v17 = vld [vmem:[#allocation15 + $0xd08] sm:$0xff] }
 0x767   :  { %11845 = vmatprep.subr.bf16.mxu1 %v14310_v31  ;;  %11888 = vmatprep.subr.bf16.mxu0 %v14438_v26  ;;  %v14143_v31 = vcombine.low %v8542_v16, %v8546_v2  ;;  %v14518_v26 = vcombine.high %v8917_v20, %v8921_v54  ;;  %v14136_v14 = vcombine.high %v8534_v32, %v8538_v13  ;;  %v8913_v34 = vld [vmem:[#allocation15 + $0xd28] sm:$0xff]  ;;  %v8494_v2 = vld [vmem:[#allocation15 + $0x10] sm:$0xff] }
 0x768   :  { %v8901_v36 = vld [vmem:[#allocation15 + $0xcc8] sm:$0xff] }
 0x769   :  { %v8905_v25 = vld [vmem:[#allocation15 + $0xce8] sm:$0xff] }
 0x76a   :  { %11846 = vmatpush2.bf16.msra.mxu1 %v14309_v0  ;;  %11889 = vmatpush2.bf16.msra.mxu0 %v14437_v59  ;;  %v8530_v0 = vld [vmem:[#allocation15 + $0x130] sm:$0xff]  ;;  %v14517_v59 = vcombine.low %v8917_v20, %v8921_v54  ;;  %v8893_v57 = vld [vmem:[#allocation15 + $0xc88] sm:$0xff] }
 0x76b   :  { %11847 = vmatprep.subr.bf16.mxu1 %v14302_v63  ;;  %11890 = vmatprep.subr.bf16.mxu0 %v14430_v4  ;;  %v14135_v63 = vcombine.low %v8534_v32, %v8538_v13  ;;  %v14510_v4 = vcombine.high %v8909_v17, %v8913_v34  ;;  %v14128_v53 = vcombine.high %v8526_v60, %v8530_v0  ;;  %v8897_v56 = vld [vmem:[#allocation15 + $0xca8] sm:$0xff]  ;;  %v8614_v13 = vld [vmem:[#allocation15 + $0x3d0] sm:$0xff] }
 0x76c   :  { %v8885_v8 = vld [vmem:[#allocation15 + $0xc48] sm:$0xff] }
 0x76d   :  { %v8889_v38 = vld [vmem:[#allocation15 + $0xc68] sm:$0xff] }
 0x76e   :  { %11848 = vmatpush2.bf16.msra.mxu1 %v14301_v37  ;;  %11891 = vmatpush2.bf16.msra.mxu0 %v14429_v29  ;;  %v8522_v37 = vld [vmem:[#allocation15 + $0xf0] sm:$0xff]  ;;  %v14509_v29 = vcombine.low %v8909_v17, %v8913_v34  ;;  %v8877_v28 = vld [vmem:[#allocation15 + $0xc08] sm:$0xff] }
 0x76f   :  { %11849 = vmatprep.subr.bf16.mxu1 %v14294_v51  ;;  %11892 = vmatprep.subr.bf16.mxu0 %v14422_v5  ;;  %v14127_v51 = vcombine.low %v8526_v60, %v8530_v0  ;;  %v14502_v5 = vcombine.high %v8901_v36, %v8905_v25  ;;  %v14120_v61 = vcombine.high %v8518_v55, %v8522_v37  ;;  %v8881_v16 = vld [vmem:[#allocation15 + $0xc28] sm:$0xff]  ;;  %v8606_v0 = vld [vmem:[#allocation15 + $0x390] sm:$0xff] }
 0x770   :  { %v8997_v54 = vld [vmem:[#allocation15 + $0xfc8] sm:$0xff] }
 0x771   :  { %v9001_v32 = vld [vmem:[#allocation15 + $0xfe8] sm:$0xff] }
 0x772   :  { %11850 = vmatpush2.bf16.msra.mxu1 %v14293_v46  ;;  %11893 = vmatpush2.bf16.msra.mxu0 %v14421_v6  ;;  %v8514_v46 = vld [vmem:[#allocation15 + $0xb0] sm:$0xff]  ;;  %v14501_v6 = vcombine.low %v8901_v36, %v8905_v25  ;;  %v8989_v34 = vld [vmem:[#allocation15 + $0xf88] sm:$0xff] }
 0x773   :  { %11851 = vmatprep.subr.bf16.mxu1 %v14286_v27  ;;  %11894 = vmatprep.subr.bf16.mxu0 %v14414_v58  ;;  %v14119_v27 = vcombine.low %v8518_v55, %v8522_v37  ;;  %v14494_v58 = vcombine.high %v8893_v57, %v8897_v56  ;;  %v14112_v24 = vcombine.high %v8510_v62, %v8514_v46  ;;  %v8993_v60 = vld [vmem:[#allocation15 + $0xfa8] sm:$0xff]  ;;  %v8598_v37 = vld [vmem:[#allocation15 + $0x350] sm:$0xff] }
 0x774   :  { %v8981_v25 = vld [vmem:[#allocation15 + $0xf48] sm:$0xff] }
 0x775   :  { %v8985_v55 = vld [vmem:[#allocation15 + $0xf68] sm:$0xff] }
 0x776   :  { %11852 = vmatpush2.bf16.msra.mxu1 %v14285_v18  ;;  %11895 = vmatpush2.bf16.msra.mxu0 %v14413_v10  ;;  %v8506_v18 = vld [vmem:[#allocation15 + $0x70] sm:$0xff]  ;;  %v14493_v10 = vcombine.low %v8893_v57, %v8897_v56  ;;  %v8973_v56 = vld [vmem:[#allocation15 + $0xf08] sm:$0xff] }
 0x777   :  { %11907 = vmatprep.subr.bf16.mxu1 %v14534_v7  ;;  %11950 = vmatprep.subr.bf16.mxu0 %v14152_v48  ;;  %v14111_v7 = vcombine.low %v8510_v62, %v8514_v46  ;;  %v14486_v48 = vcombine.high %v8885_v8, %v8889_v38  ;;  %v14104_v44 = vcombine.high %v8502_v3, %v8506_v18  ;;  %v8977_v62 = vld [vmem:[#allocation15 + $0xf28] sm:$0xff]  ;;  %v8590_v46 = vld [vmem:[#allocation15 + $0x310] sm:$0xff] }
 0x779   :  { %11854 = vmatmul.mubr.bf16.vlgmr.msra.gmra.mxu1 %v16213_v33  ;;  %11897 = vmatmul.mubr.bf16.vlgmr.msra.gmra.mxu0 %v16241_v15 }
 0x77a   :  { %11908 = vmatpush1.bf16.msra.mxu1 %v14533_v30  ;;  %11939 = vmatprep.mubr.bf16.mxu1 %v16265_v45  ;;  %v8498_v30 = vld [vmem:[#allocation15 + $0x30] sm:$0xff] }
 0x77b   :  { %11951 = vmatpush1.bf16.msra.mxu0 %v14151_v49  ;;  %11982 = vmatprep.mubr.bf16.mxu0 %v16183_v50  ;;  %v14485_v49 = vcombine.low %v8885_v8, %v8889_v38  ;;  %v14096_v20 = vcombine.high %v8494_v2, %v8498_v30  ;;  %v8965_v38 = vld [vmem:[#allocation15 + $0xec8] sm:$0xff] }
 0x77c   :  { %11909 = vmatprep.subr.bf16.mxu1 %v14526_v52  ;;  %11952 = vmatprep.subr.bf16.mxu0 %v14144_v11  ;;  %v14103_v52 = vcombine.low %v8502_v3, %v8506_v18  ;;  %v14478_v11 = vcombine.high %v8877_v28, %v8881_v16  ;;  %v8969_v3 = vld [vmem:[#allocation15 + $0xee8] sm:$0xff]  ;;  %v8582_v18 = vld [vmem:[#allocation15 + $0x2d0] sm:$0xff] }
 0x77e   :  { %11910 = vmatpush1.bf16.msra.mxu1 %v14525_v21  ;;  %v8618_v21 = vld [vmem:[#allocation15 + $0x3f0] sm:$0xff] }
 0x77f   :  { %11953 = vmatpush1.bf16.msra.mxu0 %v14143_v31  ;;  %11911 = vmatprep.subr.bf16.mxu1 %v14518_v26  ;;  %v14477_v31 = vcombine.low %v8877_v28, %v8881_v16  ;;  %v14095_v26 = vcombine.low %v8494_v2, %v8498_v30  ;;  %v14216_v17 = vcombine.high %v8614_v13, %v8618_v21  ;;  %v8957_v16 = vld [vmem:[#allocation15 + $0xe88] sm:$0xff]  ;;  %v8574_v30 = vld [vmem:[#allocation15 + $0x290] sm:$0xff] }
 0x780   :  { %11954 = vmatprep.subr.bf16.mxu0 %v14136_v14  ;;  %v14598_v14 = vcombine.high %v8997_v54, %v9001_v32  ;;  %v8961_v2 = vld [vmem:[#allocation15 + $0xea8] sm:$0xff] }
 0x782   :  { %11912 = vmatpush1.bf16.msra.mxu1 %v14517_v59  ;;  %v8610_v59 = vld [vmem:[#allocation15 + $0x3b0] sm:$0xff] }
 0x783   :  { %11955 = vmatpush1.bf16.msra.mxu0 %v14135_v63  ;;  %11913 = vmatprep.subr.bf16.mxu1 %v14510_v4  ;;  %v14597_v63 = vcombine.low %v8997_v54, %v9001_v32  ;;  %v14215_v4 = vcombine.low %v8614_v13, %v8618_v21  ;;  %v14208_v36 = vcombine.high %v8606_v0, %v8610_v59  ;;  %v8949_v32 = vld [vmem:[#allocation15 + $0xe48] sm:$0xff]  ;;  %v8566_v21 = vld [vmem:[#allocation15 + $0x250] sm:$0xff] }
 0x784   :  { %11956 = vmatprep.subr.bf16.mxu0 %v14128_v53  ;;  %v14590_v53 = vcombine.high %v8989_v34, %v8993_v60  ;;  %v8953_v13 = vld [vmem:[#allocation15 + $0xe68] sm:$0xff] }
 0x786   :  { %11914 = vmatpush1.bf16.msra.mxu1 %v14509_v29  ;;  %v8602_v29 = vld [vmem:[#allocation15 + $0x370] sm:$0xff] }
 0x787   :  { %11957 = vmatpush1.bf16.msra.mxu0 %v14127_v51  ;;  %11915 = vmatprep.subr.bf16.mxu1 %v14502_v5  ;;  %v14589_v51 = vcombine.low %v8989_v34, %v8993_v60  ;;  %v14207_v5 = vcombine.low %v8606_v0, %v8610_v59  ;;  %v14200_v57 = vcombine.high %v8598_v37, %v8602_v29  ;;  %v8941_v60 = vld [vmem:[#allocation15 + $0xe08] sm:$0xff]  ;;  %v8558_v59 = vld [vmem:[#allocation15 + $0x210] sm:$0xff] }
 0x788   :  { %11958 = vmatprep.subr.bf16.mxu0 %v14120_v61  ;;  %v14582_v61 = vcombine.high %v8981_v25, %v8985_v55  ;;  %v8945_v0 = vld [vmem:[#allocation15 + $0xe28] sm:$0xff] }
 0x78a   :  { %11916 = vmatpush1.bf16.msra.mxu1 %v14501_v6  ;;  %v8594_v6 = vld [vmem:[#allocation15 + $0x330] sm:$0xff] }
 0x78b   :  { %11959 = vmatpush1.bf16.msra.mxu0 %v14119_v27  ;;  %11917 = vmatprep.subr.bf16.mxu1 %v14494_v58  ;;  %v14581_v27 = vcombine.low %v8981_v25, %v8985_v55  ;;  %v14199_v58 = vcombine.low %v8598_v37, %v8602_v29  ;;  %v14192_v8 = vcombine.high %v8590_v46, %v8594_v6  ;;  %v8678_v55 = vld [vmem:[#allocation15 + $0x5d0] sm:$0xff] }
 0x78c   :  { %11960 = vmatprep.subr.bf16.mxu0 %v14112_v24  ;;  %v14574_v24 = vcombine.high %v8973_v56, %v8977_v62  ;;  %v8682_v37 = vld [vmem:[#allocation15 + $0x5f0] sm:$0xff] }
 0x78d   :  { %v8806_v29 = vld [vmem:[#allocation15 + $0x9d0] sm:$0xff] }
 0x78e   :  { %11918 = vmatpush1.bf16.msra.mxu1 %v14493_v10  ;;  %v8586_v10 = vld [vmem:[#allocation15 + $0x2f0] sm:$0xff] }
 0x78f   :  { %11961 = vmatpush1.bf16.msra.mxu0 %v14111_v7  ;;  %11919 = vmatprep.subr.bf16.mxu1 %v14486_v48  ;;  %v14573_v7 = vcombine.low %v8973_v56, %v8977_v62  ;;  %v14191_v48 = vcombine.low %v8590_v46, %v8594_v6  ;;  %v14184_v28 = vcombine.high %v8582_v18, %v8586_v10  ;;  %v8670_v62 = vld [vmem:[#allocation15 + $0x590] sm:$0xff] }
 0x790   :  { %11962 = vmatprep.subr.bf16.mxu0 %v14104_v44  ;;  %v14566_v44 = vcombine.high %v8965_v38, %v8969_v3  ;;  %v8674_v46 = vld [vmem:[#allocation15 + $0x5b0] sm:$0xff]  ;;  %v14279_v6 = vcombine.low %v8678_v55, %v8682_v37 }
 0x792   :  { %11920 = vmatpush1.bf16.msra.mxu1 %v14485_v49  ;;  %v8578_v49 = vld [vmem:[#allocation15 + $0x2b0] sm:$0xff] }
 0x793   :  { %11963 = vmatpush1.bf16.msra.mxu0 %v14103_v52  ;;  %11921 = vmatprep.subr.bf16.mxu1 %v14478_v11  ;;  %v14565_v52 = vcombine.low %v8965_v38, %v8969_v3  ;;  %v14183_v11 = vcombine.low %v8582_v18, %v8586_v10  ;;  %v14176_v54 = vcombine.high %v8574_v30, %v8578_v49  ;;  %v8662_v38 = vld [vmem:[#allocation15 + $0x550] sm:$0xff] }
 0x794   :  { %11964 = vmatprep.subr.bf16.mxu0 %v14096_v20  ;;  %v14558_v20 = vcombine.high %v8957_v16, %v8961_v2  ;;  %v8666_v3 = vld [vmem:[#allocation15 + $0x570] sm:$0xff] }
 0x795   :  { %v8790_v10 = vld [vmem:[#allocation15 + $0x950] sm:$0xff] }
 0x796   :  { %11922 = vmatpush1.bf16.msra.mxu1 %v14477_v31  ;;  %v8570_v31 = vld [vmem:[#allocation15 + $0x270] sm:$0xff] }
 0x797   :  { %11965 = vmatpush1.bf16.msra.mxu0 %v14095_v26  ;;  %11923 = vmatprep.subr.bf16.mxu1 %v14598_v14  ;;  %v14557_v26 = vcombine.low %v8957_v16, %v8961_v2  ;;  %v14175_v14 = vcombine.low %v8574_v30, %v8578_v49  ;;  %v14168_v34 = vcombine.high %v8566_v21, %v8570_v31  ;;  %v8654_v2 = vld [vmem:[#allocation15 + $0x510] sm:$0xff] }
 0x798   :  { %11966 = vmatprep.subr.bf16.mxu0 %v14216_v17  ;;  %v14550_v17 = vcombine.high %v8949_v32, %v8953_v13  ;;  %v8658_v30 = vld [vmem:[#allocation15 + $0x530] sm:$0xff] }
 0x799   :  { %v8782_v49 = vld [vmem:[#allocation15 + $0x910] sm:$0xff] }
 0x79a   :  { %11924 = vmatpush2.bf16.msra.mxu1 %v14597_v63  ;;  %v8562_v63 = vld [vmem:[#allocation15 + $0x230] sm:$0xff] }
 0x79b   :  { %11967 = vmatpush2.bf16.msra.mxu0 %v14215_v4  ;;  %11925 = vmatprep.subr.bf16.mxu1 %v14590_v53  ;;  %v14549_v4 = vcombine.low %v8949_v32, %v8953_v13  ;;  %v14167_v53 = vcombine.low %v8566_v21, %v8570_v31  ;;  %v14160_v25 = vcombine.high %v8558_v59, %v8562_v63  ;;  %v8646_v13 = vld [vmem:[#allocation15 + $0x4d0] sm:$0xff] }
 0x79c   :  { %11968 = vmatprep.subr.bf16.mxu0 %v14208_v36  ;;  %v14542_v36 = vcombine.high %v8941_v60, %v8945_v0  ;;  %v8650_v21 = vld [vmem:[#allocation15 + $0x4f0] sm:$0xff] }
 0x79d   :  { %v8774_v31 = vld [vmem:[#allocation15 + $0x8d0] sm:$0xff] }
 0x79e   :  { %11926 = vmatpush2.bf16.msra.mxu1 %v14589_v51  ;;  %v8810_v51 = vld [vmem:[#allocation15 + $0x9f0] sm:$0xff] }
 0x79f   :  { %11969 = vmatpush2.bf16.msra.mxu0 %v14207_v5  ;;  %11927 = vmatprep.subr.bf16.mxu1 %v14582_v61  ;;  %v14541_v5 = vcombine.low %v8941_v60, %v8945_v0  ;;  %v14159_v61 = vcombine.low %v8558_v59, %v8562_v63  ;;  %v14408_v56 = vcombine.high %v8806_v29, %v8810_v51  ;;  %v8638_v0 = vld [vmem:[#allocation15 + $0x490] sm:$0xff] }
 0x7a0   :  { %11970 = vmatprep.subr.bf16.mxu0 %v14200_v57  ;;  %v14280_v57 = vcombine.high %v8678_v55, %v8682_v37  ;;  %v8642_v59 = vld [vmem:[#allocation15 + $0x4b0] sm:$0xff] }
 0x7a1   :  { %v8766_v63 = vld [vmem:[#allocation15 + $0x890] sm:$0xff] }
 0x7a2   :  { %11928 = vmatpush2.bf16.msra.mxu1 %v14581_v27  ;;  %v8798_v27 = vld [vmem:[#allocation15 + $0x990] sm:$0xff] }
 0x7a3   :  { %11971 = vmatpush2.bf16.msra.mxu0 %v14199_v58  ;;  %11929 = vmatprep.subr.bf16.mxu1 %v14574_v24  ;;  %v8802_v58 = vld [vmem:[#allocation15 + $0x9b0] sm:$0xff]  ;;  %v14407_v24 = vcombine.low %v8806_v29, %v8810_v51 }
 0x7a4   :  { %11972 = vmatprep.subr.bf16.mxu0 %v14192_v8  ;;  %v14272_v8 = vcombine.high %v8670_v62, %v8674_v46  ;;  %v14400_v18 = vcombine.high %v8798_v27, %v8802_v58  ;;  %v8630_v37 = vld [vmem:[#allocation15 + $0x450] sm:$0xff] }
 0x7a5   :  { %v8634_v29 = vld [vmem:[#allocation15 + $0x470] sm:$0xff] }
 0x7a6   :  { %11930 = vmatpush2.bf16.msra.mxu1 %v14573_v7  ;;  %v8794_v7 = vld [vmem:[#allocation15 + $0x970] sm:$0xff] }
 0x7a7   :  { %11973 = vmatpush2.bf16.msra.mxu0 %v14191_v48  ;;  %11931 = vmatprep.subr.bf16.mxu1 %v14566_v44  ;;  %v14271_v48 = vcombine.low %v8670_v62, %v8674_v46  ;;  %v14399_v44 = vcombine.low %v8798_v27, %v8802_v58  ;;  %v14392_v16 = vcombine.high %v8790_v10, %v8794_v7  ;;  %v8758_v51 = vld [vmem:[#allocation15 + $0x850] sm:$0xff] }
 0x7a8   :  { %11974 = vmatprep.subr.bf16.mxu0 %v14184_v28  ;;  %v14264_v28 = vcombine.high %v8662_v38, %v8666_v3  ;;  %v8622_v46 = vld [vmem:[#allocation15 + $0x410] sm:$0xff] }
 0x7a9   :  { %v8750_v27 = vld [vmem:[#allocation15 + $0x810] sm:$0xff] }
 0x7aa   :  { %11932 = vmatpush2.bf16.msra.mxu1 %v14565_v52  ;;  %v8786_v52 = vld [vmem:[#allocation15 + $0x930] sm:$0xff] }
 0x7ab   :  { %11975 = vmatpush2.bf16.msra.mxu0 %v14183_v11  ;;  %11933 = vmatprep.subr.bf16.mxu1 %v14558_v20  ;;  %v14263_v11 = vcombine.low %v8662_v38, %v8666_v3  ;;  %v14391_v20 = vcombine.low %v8790_v10, %v8794_v7  ;;  %v14384_v32 = vcombine.high %v8782_v49, %v8786_v52  ;;  %v8754_v58 = vld [vmem:[#allocation15 + $0x830] sm:$0xff] }
 0x7ac   :  { %11976 = vmatprep.subr.bf16.mxu0 %v14176_v54  ;;  %v14256_v54 = vcombine.high %v8654_v2, %v8658_v30  ;;  %v14352_v3 = vcombine.high %v8750_v27, %v8754_v58  ;;  %v8746_v10 = vld [vmem:[#allocation15 + $0x7f0] sm:$0xff] }
 0x7ad   :  { %v8870_v7 = vld [vmem:[#allocation15 + $0xbd0] sm:$0xff] }
 0x7ae   :  { %11934 = vmatpush2.bf16.msra.mxu1 %v14557_v26  ;;  %v8778_v26 = vld [vmem:[#allocation15 + $0x8f0] sm:$0xff] }
 0x7af   :  { %11977 = vmatpush2.bf16.msra.mxu0 %v14175_v14  ;;  %11935 = vmatprep.subr.bf16.mxu1 %v14550_v17  ;;  %v14255_v14 = vcombine.low %v8654_v2, %v8658_v30  ;;  %v14383_v17 = vcombine.low %v8782_v49, %v8786_v52  ;;  %v14376_v60 = vcombine.high %v8774_v31, %v8778_v26  ;;  %v8734_v30 = vld [vmem:[#allocation15 + $0x790] sm:$0xff] }
 0x7b0   :  { %11978 = vmatprep.subr.bf16.mxu0 %v14168_v34  ;;  %v14248_v34 = vcombine.high %v8646_v13, %v8650_v21  ;;  %v8738_v49 = vld [vmem:[#allocation15 + $0x7b0] sm:$0xff] }
 0x7b1   :  { %v8862_v52 = vld [vmem:[#allocation15 + $0xb90] sm:$0xff] }
 0x7b2   :  { %11936 = vmatpush2.bf16.msra.mxu1 %v14549_v4  ;;  %v8770_v4 = vld [vmem:[#allocation15 + $0x8b0] sm:$0xff] }
 0x7b3   :  { %11979 = vmatpush2.bf16.msra.mxu0 %v14167_v53  ;;  %11937 = vmatprep.subr.bf16.mxu1 %v14542_v36  ;;  %v14247_v53 = vcombine.low %v8646_v13, %v8650_v21  ;;  %v14375_v36 = vcombine.low %v8774_v31, %v8778_v26  ;;  %v14368_v55 = vcombine.high %v8766_v63, %v8770_v4  ;;  %v8726_v21 = vld [vmem:[#allocation15 + $0x750] sm:$0xff] }
 0x7b4   :  { %11980 = vmatprep.subr.bf16.mxu0 %v14160_v25  ;;  %v14240_v25 = vcombine.high %v8638_v0, %v8642_v59  ;;  %v8730_v31 = vld [vmem:[#allocation15 + $0x770] sm:$0xff] }
 0x7b5   :  { %v8854_v26 = vld [vmem:[#allocation15 + $0xb50] sm:$0xff] }
 0x7b6   :  { %11938 = vmatpush2.bf16.msra.mxu1 %v14541_v5  ;;  %v8762_v5 = vld [vmem:[#allocation15 + $0x870] sm:$0xff] }
 0x7b7   :  { %11981 = vmatpush2.bf16.msra.mxu0 %v14159_v61  ;;  %11993 = vmatprep.subr.bf16.mxu1 %v14280_v57  ;;  %v14239_v61 = vcombine.low %v8638_v0, %v8642_v59  ;;  %v14367_v57 = vcombine.low %v8766_v63, %v8770_v4  ;;  %v14360_v62 = vcombine.high %v8758_v51, %v8762_v5  ;;  %v8718_v59 = vld [vmem:[#allocation15 + $0x710] sm:$0xff] }
 0x7b8   :  { %12036 = vmatprep.subr.bf16.mxu0 %v14408_v56  ;;  %v14232_v56 = vcombine.high %v8630_v37, %v8634_v29  ;;  %v8722_v63 = vld [vmem:[#allocation15 + $0x730] sm:$0xff] }
 0x7b9   :  { %11940 = vmatmul.mubr.bf16.vlgmr.msra.gmra.mxu1 %v16263_v35  ;;  %v8846_v4 = vld [vmem:[#allocation15 + $0xb10] sm:$0xff] }
 0x7ba   :  { %11983 = vmatmul.mubr.bf16.vlgmr.msra.gmra.mxu0 %v16189_v22  ;;  %11994 = vmatpush1.bf16.msra.mxu1 %v14279_v6  ;;  %v8626_v6 = vld [vmem:[#allocation15 + $0x430] sm:$0xff] }
 0x7bb   :  { %12025 = vmatprep.mubr.bf16.mxu1 %v16215_v23  ;;  %12037 = vmatpush1.bf16.msra.mxu0 %v14407_v24  ;;  %v14231_v24 = vcombine.low %v8630_v37, %v8634_v29  ;;  %v14224_v38 = vcombine.high %v8622_v46, %v8626_v6  ;;  %v8710_v29 = vld [vmem:[#allocation15 + $0x6d0] sm:$0xff] }
 0x7bc   :  { %12068 = vmatprep.mubr.bf16.mxu0 %v16243_v9  ;;  %11995 = vmatprep.subr.bf16.mxu1 %v14272_v8  ;;  %v14359_v8 = vcombine.low %v8758_v51, %v8762_v5  ;;  %v8714_v51 = vld [vmem:[#allocation15 + $0x6f0] sm:$0xff] }
 0x7bd   :  { %12038 = vmatprep.subr.bf16.mxu0 %v14400_v18  ;;  %v8742_v18 = vld [vmem:[#allocation15 + $0x7d0] sm:$0xff] }
 0x7be   :  { %11996 = vmatpush1.bf16.msra.mxu1 %v14271_v48  ;;  %v8874_v48 = vld [vmem:[#allocation15 + $0xbf0] sm:$0xff] }
 0x7bf   :  { %12039 = vmatpush1.bf16.msra.mxu0 %v14399_v44  ;;  %11997 = vmatprep.subr.bf16.mxu1 %v14264_v28  ;;  %v14223_v44 = vcombine.low %v8622_v46, %v8626_v6  ;;  %v14351_v28 = vcombine.low %v8750_v27, %v8754_v58  ;;  %v14472_v2 = vcombine.high %v8870_v7, %v8874_v48  ;;  %v8838_v5 = vld [vmem:[#allocation15 + $0xad0] sm:$0xff] }
 0x7c0   :  { %12040 = vmatprep.subr.bf16.mxu0 %v14392_v16  ;;  %v14344_v16 = vcombine.high %v8742_v18, %v8746_v10  ;;  %v8702_v6 = vld [vmem:[#allocation15 + $0x690] sm:$0xff] }
 0x7c1   :  { %v8706_v27 = vld [vmem:[#allocation15 + $0x6b0] sm:$0xff] }
 0x7c2   :  { %11998 = vmatpush1.bf16.msra.mxu1 %v14263_v11  ;;  %v8866_v11 = vld [vmem:[#allocation15 + $0xbb0] sm:$0xff] }
 0x7c3   :  { %12041 = vmatpush1.bf16.msra.mxu0 %v14391_v20  ;;  %11999 = vmatprep.subr.bf16.mxu1 %v14256_v54  ;;  %v14343_v20 = vcombine.low %v8742_v18, %v8746_v10  ;;  %v14471_v54 = vcombine.low %v8870_v7, %v8874_v48  ;;  %v14464_v13 = vcombine.high %v8862_v52, %v8866_v11  ;;  %v8830_v58 = vld [vmem:[#allocation15 + $0xa90] sm:$0xff] }
 0x7c4   :  { %12042 = vmatprep.subr.bf16.mxu0 %v14384_v32  ;;  %v14336_v32 = vcombine.high %v8734_v30, %v8738_v49  ;;  %v8694_v10 = vld [vmem:[#allocation15 + $0x650] sm:$0xff] }
 0x7c5   :  { %v8698_v7 = vld [vmem:[#allocation15 + $0x670] sm:$0xff] }
 0x7c6   :  { %12000 = vmatpush1.bf16.msra.mxu1 %v14255_v14  ;;  %v8858_v14 = vld [vmem:[#allocation15 + $0xb70] sm:$0xff] }
 0x7c7   :  { %12043 = vmatpush1.bf16.msra.mxu0 %v14383_v17  ;;  %12001 = vmatprep.subr.bf16.mxu1 %v14248_v34  ;;  %v14335_v17 = vcombine.low %v8734_v30, %v8738_v49  ;;  %v14463_v34 = vcombine.low %v8862_v52, %v8866_v11  ;;  %v14456_v0 = vcombine.high %v8854_v26, %v8858_v14  ;;  %v8822_v48 = vld [vmem:[#allocation15 + $0xa50] sm:$0xff] }
 0x7c8   :  { %12044 = vmatprep.subr.bf16.mxu0 %v14376_v60  ;;  %v14328_v60 = vcombine.high %v8726_v21, %v8730_v31  ;;  %v8686_v49 = vld [vmem:[#allocation15 + $0x610] sm:$0xff] }
 0x7c9   :  { %v8690_v52 = vld [vmem:[#allocation15 + $0x630] sm:$0xff] }
 0x7ca   :  { %12002 = vmatpush1.bf16.msra.mxu1 %v14247_v53  ;;  %v8850_v53 = vld [vmem:[#allocation15 + $0xb30] sm:$0xff] }
 0x7cb   :  { %12045 = vmatpush1.bf16.msra.mxu0 %v14375_v36  ;;  %12003 = vmatprep.subr.bf16.mxu1 %v14240_v25  ;;  %v14327_v36 = vcombine.low %v8726_v21, %v8730_v31  ;;  %v14455_v25 = vcombine.low %v8854_v26, %v8858_v14  ;;  %v14448_v37 = vcombine.high %v8846_v4, %v8850_v53  ;;  %v8814_v11 = vld [vmem:[#allocation15 + $0xa10] sm:$0xff]  ;;  %v8551_v14 = vld [vmem:[#allocation15 + $0x1d8] sm:$0xff] }
 0x7cc   :  { %12046 = vmatprep.subr.bf16.mxu0 %v14368_v55  ;;  %v14320_v55 = vcombine.high %v8718_v59, %v8722_v63  ;;  %v8934_v31 = vld [vmem:[#allocation15 + $0xdd0] sm:$0xff] }
 0x7cd   :  { %v8938_v26 = vld [vmem:[#allocation15 + $0xdf0] sm:$0xff] }
 0x7ce   :  { %12004 = vmatpush1.bf16.msra.mxu1 %v14239_v61  ;;  %v8842_v61 = vld [vmem:[#allocation15 + $0xaf0] sm:$0xff] }
 0x7cf   :  { %12047 = vmatpush1.bf16.msra.mxu0 %v14367_v57  ;;  %12005 = vmatprep.subr.bf16.mxu1 %v14232_v56  ;;  %v14319_v57 = vcombine.low %v8718_v59, %v8722_v63  ;;  %v14447_v56 = vcombine.low %v8846_v4, %v8850_v53  ;;  %v14440_v46 = vcombine.high %v8838_v5, %v8842_v61  ;;  %v8926_v63 = vld [vmem:[#allocation15 + $0xd90] sm:$0xff] }
 0x7d0   :  { %12048 = vmatprep.subr.bf16.mxu0 %v14360_v62  ;;  %v14312_v62 = vcombine.high %v8710_v29, %v8714_v51  ;;  %v8930_v4 = vld [vmem:[#allocation15 + $0xdb0] sm:$0xff]  ;;  %v14535_v53 = vcombine.low %v8934_v31, %v8938_v26 }
 0x7d2   :  { %12006 = vmatpush1.bf16.msra.mxu1 %v14231_v24  ;;  %v8834_v24 = vld [vmem:[#allocation15 + $0xab0] sm:$0xff] }
 0x7d3   :  { %12049 = vmatpush1.bf16.msra.mxu0 %v14359_v8  ;;  %12007 = vmatprep.subr.bf16.mxu1 %v14224_v38  ;;  %v14311_v8 = vcombine.low %v8710_v29, %v8714_v51  ;;  %v14439_v38 = vcombine.low %v8838_v5, %v8842_v61  ;;  %v14432_v18 = vcombine.high %v8830_v58, %v8834_v24  ;;  %v8918_v29 = vld [vmem:[#allocation15 + $0xd50] sm:$0xff]  ;;  %v8535_v61 = vld [vmem:[#allocation15 + $0x158] sm:$0xff] }
 0x7d4   :  { %12050 = vmatprep.subr.bf16.mxu0 %v14352_v3  ;;  %v14304_v3 = vcombine.high %v8702_v6, %v8706_v27  ;;  %v8922_v51 = vld [vmem:[#allocation15 + $0xd70] sm:$0xff] }
 0x7d6   :  { %12008 = vmatpush1.bf16.msra.mxu1 %v14223_v44  ;;  %v8826_v44 = vld [vmem:[#allocation15 + $0xa70] sm:$0xff] }
 0x7d7   :  { %12051 = vmatpush1.bf16.msra.mxu0 %v14351_v28  ;;  %12009 = vmatprep.subr.bf16.mxu1 %v14344_v16  ;;  %v14303_v28 = vcombine.low %v8702_v6, %v8706_v27  ;;  %v14431_v16 = vcombine.low %v8830_v58, %v8834_v24  ;;  %v14424_v30 = vcombine.high %v8822_v48, %v8826_v44  ;;  %v8910_v27 = vld [vmem:[#allocation15 + $0xd10] sm:$0xff]  ;;  %v8527_v24 = vld [vmem:[#allocation15 + $0x118] sm:$0xff] }
 0x7d8   :  { %12052 = vmatprep.subr.bf16.mxu0 %v14472_v2  ;;  %v14296_v2 = vcombine.high %v8694_v10, %v8698_v7  ;;  %v8914_v58 = vld [vmem:[#allocation15 + $0xd30] sm:$0xff] }
 0x7da   :  { %12010 = vmatpush2.bf16.msra.mxu1 %v14343_v20  ;;  %v8818_v20 = vld [vmem:[#allocation15 + $0xa30] sm:$0xff] }
 0x7db   :  { %12053 = vmatpush2.bf16.msra.mxu0 %v14471_v54  ;;  %12011 = vmatprep.subr.bf16.mxu1 %v14336_v32  ;;  %v14295_v54 = vcombine.low %v8694_v10, %v8698_v7  ;;  %v14423_v32 = vcombine.low %v8822_v48, %v8826_v44  ;;  %v14416_v21 = vcombine.high %v8814_v11, %v8818_v20  ;;  %v8902_v7 = vld [vmem:[#allocation15 + $0xcd0] sm:$0xff]  ;;  %v8519_v44 = vld [vmem:[#allocation15 + $0xd8] sm:$0xff] }
 0x7dc   :  { %12054 = vmatprep.subr.bf16.mxu0 %v14464_v13  ;;  %v14288_v13 = vcombine.high %v8686_v49, %v8690_v52  ;;  %v8906_v48 = vld [vmem:[#allocation15 + $0xcf0] sm:$0xff] }
 0x7de   :  { %12012 = vmatpush2.bf16.msra.mxu1 %v14335_v17  ;;  %v8555_v17 = vld [vmem:[#allocation15 + $0x1f8] sm:$0xff] }
 0x7df   :  { %12055 = vmatpush2.bf16.msra.mxu0 %v14463_v34  ;;  %12013 = vmatprep.subr.bf16.mxu1 %v14328_v60  ;;  %v14287_v34 = vcombine.low %v8686_v49, %v8690_v52  ;;  %v14415_v60 = vcombine.low %v8814_v11, %v8818_v20  ;;  %v14154_v59 = vcombine.high %v8551_v14, %v8555_v17  ;;  %v8894_v49 = vld [vmem:[#allocation15 + $0xc90] sm:$0xff]  ;;  %v8511_v11 = vld [vmem:[#allocation15 + $0x98] sm:$0xff] }
 0x7e0   :  { %12056 = vmatprep.subr.bf16.mxu0 %v14456_v0  ;;  %v14536_v0 = vcombine.high %v8934_v31, %v8938_v26  ;;  %v8898_v52 = vld [vmem:[#allocation15 + $0xcb0] sm:$0xff]  ;;  %v8515_v20 = vld [vmem:[#allocation15 + $0xb8] sm:$0xff] }
 0x7e1   :  { %v8886_v31 = vld [vmem:[#allocation15 + $0xc50] sm:$0xff] }
 0x7e2   :  { %12014 = vmatpush2.bf16.msra.mxu1 %v14327_v36  ;;  %v8543_v36 = vld [vmem:[#allocation15 + $0x198] sm:$0xff]  ;;  %v8890_v26 = vld [vmem:[#allocation15 + $0xc70] sm:$0xff] }
 0x7e3   :  { %12057 = vmatpush2.bf16.msra.mxu0 %v14455_v25  ;;  %12015 = vmatprep.subr.bf16.mxu1 %v14320_v55  ;;  %v8547_v25 = vld [vmem:[#allocation15 + $0x1b8] sm:$0xff]  ;;  %v14153_v55 = vcombine.low %v8551_v14, %v8555_v17 }
 0x7e4   :  { %12058 = vmatprep.subr.bf16.mxu0 %v14448_v37  ;;  %v14528_v37 = vcombine.high %v8926_v63, %v8930_v4  ;;  %v14146_v5 = vcombine.high %v8543_v36, %v8547_v25  ;;  %v8503_v14 = vld [vmem:[#allocation15 + $0x58] sm:$0xff] }
 0x7e5   :  { %v8507_v17 = vld [vmem:[#allocation15 + $0x78] sm:$0xff] }
 0x7e6   :  { %12016 = vmatpush2.bf16.msra.mxu1 %v14319_v57  ;;  %v8539_v57 = vld [vmem:[#allocation15 + $0x178] sm:$0xff] }
 0x7e7   :  { %12059 = vmatpush2.bf16.msra.mxu0 %v14447_v56  ;;  %12017 = vmatprep.subr.bf16.mxu1 %v14312_v62  ;;  %v14527_v56 = vcombine.low %v8926_v63, %v8930_v4  ;;  %v14145_v62 = vcombine.low %v8543_v36, %v8547_v25  ;;  %v14138_v6 = vcombine.high %v8535_v61, %v8539_v57  ;;  %v8878_v63 = vld [vmem:[#allocation15 + $0xc10] sm:$0xff]  ;;  %v8499_v36 = vld [vmem:[#allocation15 + $0x38] sm:$0xff] }
 0x7e8   :  { %12060 = vmatprep.subr.bf16.mxu0 %v14440_v46  ;;  %v14520_v46 = vcombine.high %v8918_v29, %v8922_v51  ;;  %v8882_v4 = vld [vmem:[#allocation15 + $0xc30] sm:$0xff]  ;;  %v14487_v25 = vcombine.low %v8886_v31, %v8890_v26 }
 0x7ea   :  { %12018 = vmatpush2.bf16.msra.mxu1 %v14311_v8  ;;  %v8531_v8 = vld [vmem:[#allocation15 + $0x138] sm:$0xff] }
 0x7eb   :  { %12061 = vmatpush2.bf16.msra.mxu0 %v14439_v38  ;;  %12019 = vmatprep.subr.bf16.mxu1 %v14304_v3  ;;  %v14519_v38 = vcombine.low %v8918_v29, %v8922_v51  ;;  %v14137_v3 = vcombine.low %v8535_v61, %v8539_v57  ;;  %v14130_v10 = vcombine.high %v8527_v24, %v8531_v8  ;;  %v8998_v51 = vld [vmem:[#allocation15 + $0xfd0] sm:$0xff]  ;;  %v8615_v61 = vld [vmem:[#allocation15 + $0x3d8] sm:$0xff] }
 0x7ec   :  { %12062 = vmatprep.subr.bf16.mxu0 %v14432_v18  ;;  %v14512_v18 = vcombine.high %v8910_v27, %v8914_v58  ;;  %v8619_v57 = vld [vmem:[#allocation15 + $0x3f8] sm:$0xff] }
 0x7ee   :  { %12020 = vmatpush2.bf16.msra.mxu1 %v14303_v28  ;;  %v8523_v28 = vld [vmem:[#allocation15 + $0xf8] sm:$0xff] }
 0x7ef   :  { %12063 = vmatpush2.bf16.msra.mxu0 %v14431_v16  ;;  %12021 = vmatprep.subr.bf16.mxu1 %v14296_v2  ;;  %v14129_v16 = vcombine.low %v8527_v24, %v8531_v8  ;;  %v14504_v2 = vcombine.high %v8902_v7, %v8906_v48  ;;  %v8607_v24 = vld [vmem:[#allocation15 + $0x398] sm:$0xff] }
 0x7f0   :  { %12064 = vmatprep.subr.bf16.mxu0 %v14424_v30  ;;  %v14122_v30 = vcombine.high %v8519_v44, %v8523_v28  ;;  %v8611_v8 = vld [vmem:[#allocation15 + $0x3b8] sm:$0xff] }
 0x7f2   :  { %12022 = vmatpush2.bf16.msra.mxu1 %v14295_v54  ;;  %v14503_v54 = vcombine.low %v8902_v7, %v8906_v48  ;;  %v8982_v7 = vld [vmem:[#allocation15 + $0xf50] sm:$0xff] }
 0x7f3   :  { %12065 = vmatpush2.bf16.msra.mxu0 %v14423_v32  ;;  %12023 = vmatprep.subr.bf16.mxu1 %v14288_v13  ;;  %v14121_v32 = vcombine.low %v8519_v44, %v8523_v28  ;;  %v14496_v13 = vcombine.high %v8894_v49, %v8898_v52  ;;  %v8986_v48 = vld [vmem:[#allocation15 + $0xf70] sm:$0xff]  ;;  %v8599_v44 = vld [vmem:[#allocation15 + $0x358] sm:$0xff] }
 0x7f4   :  { %12066 = vmatprep.subr.bf16.mxu0 %v14416_v21  ;;  %v14114_v21 = vcombine.high %v8511_v11, %v8515_v20  ;;  %v8603_v28 = vld [vmem:[#allocation15 + $0x378] sm:$0xff] }
 0x7f6   :  { %12024 = vmatpush2.bf16.msra.mxu1 %v14287_v34  ;;  %v14495_v34 = vcombine.low %v8894_v49, %v8898_v52  ;;  %v8974_v49 = vld [vmem:[#allocation15 + $0xf10] sm:$0xff] }
 0x7f7   :  { %12067 = vmatpush2.bf16.msra.mxu0 %v14415_v60  ;;  %12079 = vmatprep.subr.bf16.mxu1 %v14536_v0  ;;  %v14113_v60 = vcombine.low %v8511_v11, %v8515_v20  ;;  %v14488_v0 = vcombine.high %v8886_v31, %v8890_v26  ;;  %v8978_v52 = vld [vmem:[#allocation15 + $0xf30] sm:$0xff]  ;;  %v8591_v11 = vld [vmem:[#allocation15 + $0x318] sm:$0xff] }
 0x7f8   :  { %12122 = vmatprep.subr.bf16.mxu0 %v14154_v59  ;;  %v14106_v59 = vcombine.high %v8503_v14, %v8507_v17  ;;  %v8595_v20 = vld [vmem:[#allocation15 + $0x338] sm:$0xff]  ;;  %v8966_v31 = vld [vmem:[#allocation15 + $0xed0] sm:$0xff] }
 0x7f9   :  { %12026 = vmatmul.mubr.bf16.vlgmr.msra.gmra.mxu1 %v16213_v33  ;;  %v8970_v26 = vld [vmem:[#allocation15 + $0xef0] sm:$0xff] }
 0x7fa   :  { %12069 = vmatmul.mubr.bf16.vlgmr.msra.gmra.mxu0 %v16241_v15  ;;  %12080 = vmatpush1.bf16.msra.mxu1 %v14535_v53  ;;  %v8495_v53 = vld [vmem:[#allocation15 + $0x18] sm:$0xff] }
 0x7fb   :  { %12111 = vmatprep.mubr.bf16.mxu1 %v16265_v45  ;;  %12123 = vmatpush1.bf16.msra.mxu0 %v14153_v55  ;;  %v14105_v55 = vcombine.low %v8503_v14, %v8507_v17  ;;  %v14098_v29 = vcombine.high %v8495_v53, %v8499_v36  ;;  %v8583_v14 = vld [vmem:[#allocation15 + $0x2d8] sm:$0xff] }
 0x7fc   :  { %12154 = vmatprep.mubr.bf16.mxu0 %v16183_v50  ;;  %12081 = vmatprep.subr.bf16.mxu1 %v14528_v37  ;;  %v14511_v50 = vcombine.low %v8910_v27, %v8914_v58  ;;  %v14480_v37 = vcombine.high %v8878_v63, %v8882_v4  ;;  %v8990_v27 = vld [vmem:[#allocation15 + $0xf90] sm:$0xff]  ;;  %v8587_v17 = vld [vmem:[#allocation15 + $0x2f8] sm:$0xff] }
 0x7fd   :  { %12124 = vmatprep.subr.bf16.mxu0 %v14146_v5  ;;  %v9002_v5 = vld [vmem:[#allocation15 + $0xff0] sm:$0xff] }
 0x7fe   :  { %12082 = vmatpush1.bf16.msra.mxu1 %v14527_v56  ;;  %v14479_v56 = vcombine.low %v8878_v63, %v8882_v4  ;;  %v8994_v58 = vld [vmem:[#allocation15 + $0xfb0] sm:$0xff] }
 0x7ff   :  { %12125 = vmatpush1.bf16.msra.mxu0 %v14145_v62  ;;  %12083 = vmatprep.subr.bf16.mxu1 %v14520_v46  ;;  %v14097_v62 = vcombine.low %v8495_v53, %v8499_v36  ;;  %v14600_v46 = vcombine.high %v8998_v51, %v9002_v5  ;;  %v8958_v63 = vld [vmem:[#allocation15 + $0xe90] sm:$0xff]  ;;  %v8575_v53 = vld [vmem:[#allocation15 + $0x298] sm:$0xff] }
 0x800   :  { %12126 = vmatprep.subr.bf16.mxu0 %v14138_v6  ;;  %v14218_v6 = vcombine.high %v8615_v61, %v8619_v57  ;;  %v8962_v4 = vld [vmem:[#allocation15 + $0xeb0] sm:$0xff]  ;;  %v8579_v36 = vld [vmem:[#allocation15 + $0x2b8] sm:$0xff] }
 0x802   :  { %12084 = vmatpush1.bf16.msra.mxu1 %v14519_v38  ;;  %v14599_v38 = vcombine.low %v8998_v51, %v9002_v5  ;;  %v8950_v51 = vld [vmem:[#allocation15 + $0xe50] sm:$0xff] }
 0x803   :  { %12127 = vmatpush1.bf16.msra.mxu0 %v14137_v3  ;;  %12085 = vmatprep.subr.bf16.mxu1 %v14512_v18  ;;  %v14217_v3 = vcombine.low %v8615_v61, %v8619_v57  ;;  %v14592_v18 = vcombine.high %v8990_v27, %v8994_v58  ;;  %v8954_v5 = vld [vmem:[#allocation15 + $0xe70] sm:$0xff]  ;;  %v8567_v61 = vld [vmem:[#allocation15 + $0x258] sm:$0xff] }
 0x804   :  { %12128 = vmatprep.subr.bf16.mxu0 %v14130_v10  ;;  %v14210_v10 = vcombine.high %v8607_v24, %v8611_v8  ;;  %v8571_v57 = vld [vmem:[#allocation15 + $0x278] sm:$0xff] }
 0x806   :  { %12086 = vmatpush1.bf16.msra.mxu1 %v14511_v50  ;;  %v14591_v50 = vcombine.low %v8990_v27, %v8994_v58  ;;  %v8942_v27 = vld [vmem:[#allocation15 + $0xe10] sm:$0xff] }
 0x807   :  { %12129 = vmatpush1.bf16.msra.mxu0 %v14129_v16  ;;  %12087 = vmatprep.subr.bf16.mxu1 %v14504_v2  ;;  %v14209_v16 = vcombine.low %v8607_v24, %v8611_v8  ;;  %v14584_v2 = vcombine.high %v8982_v7, %v8986_v48  ;;  %v8946_v58 = vld [vmem:[#allocation15 + $0xe30] sm:$0xff]  ;;  %v8559_v24 = vld [vmem:[#allocation15 + $0x218] sm:$0xff] }
 0x808   :  { %12130 = vmatprep.subr.bf16.mxu0 %v14122_v30  ;;  %v14202_v30 = vcombine.high %v8599_v44, %v8603_v28  ;;  %v8563_v8 = vld [vmem:[#allocation15 + $0x238] sm:$0xff] }
 0x80a   :  { %12088 = vmatpush1.bf16.msra.mxu1 %v14503_v54  ;;  %v14583_v54 = vcombine.low %v8982_v7, %v8986_v48  ;;  %v8679_v7 = vld [vmem:[#allocation15 + $0x5d8] sm:$0xff] }
 0x80b   :  { %12131 = vmatpush1.bf16.msra.mxu0 %v14121_v32  ;;  %12089 = vmatprep.subr.bf16.mxu1 %v14496_v13  ;;  %v14201_v32 = vcombine.low %v8599_v44, %v8603_v28  ;;  %v14576_v13 = vcombine.high %v8974_v49, %v8978_v52  ;;  %v8683_v48 = vld [vmem:[#allocation15 + $0x5f8] sm:$0xff] }
 0x80c   :  { %12132 = vmatprep.subr.bf16.mxu0 %v14114_v21  ;;  %v14194_v21 = vcombine.high %v8591_v11, %v8595_v20  ;;  %v8807_v44 = vld [vmem:[#allocation15 + $0x9d8] sm:$0xff] }
 0x80d   :  { %v8811_v28 = vld [vmem:[#allocation15 + $0x9f8] sm:$0xff] }
 0x80e   :  { %12090 = vmatpush1.bf16.msra.mxu1 %v14495_v34  ;;  %v14575_v34 = vcombine.low %v8974_v49, %v8978_v52  ;;  %v8671_v49 = vld [vmem:[#allocation15 + $0x598] sm:$0xff] }
 0x80f   :  { %12133 = vmatpush1.bf16.msra.mxu0 %v14113_v60  ;;  %12091 = vmatprep.subr.bf16.mxu1 %v14488_v0  ;;  %v14193_v60 = vcombine.low %v8591_v11, %v8595_v20  ;;  %v14568_v0 = vcombine.high %v8966_v31, %v8970_v26  ;;  %v8675_v52 = vld [vmem:[#allocation15 + $0x5b8] sm:$0xff]  ;;  %v14281_v11 = vcombine.low %v8679_v7, %v8683_v48 }
 0x810   :  { %12134 = vmatprep.subr.bf16.mxu0 %v14106_v59  ;;  %v14186_v59 = vcombine.high %v8583_v14, %v8587_v17  ;;  %v8799_v20 = vld [vmem:[#allocation15 + $0x998] sm:$0xff] }
 0x812   :  { %12092 = vmatpush1.bf16.msra.mxu1 %v14487_v25  ;;  %v14567_v25 = vcombine.low %v8966_v31, %v8970_v26  ;;  %v8667_v31 = vld [vmem:[#allocation15 + $0x578] sm:$0xff] }
 0x813   :  { %12135 = vmatpush1.bf16.msra.mxu0 %v14105_v55  ;;  %12093 = vmatprep.subr.bf16.mxu1 %v14480_v37  ;;  %v14185_v55 = vcombine.low %v8583_v14, %v8587_v17  ;;  %v14560_v37 = vcombine.high %v8958_v63, %v8962_v4  ;;  %v8791_v14 = vld [vmem:[#allocation15 + $0x958] sm:$0xff] }
 0x814   :  { %12136 = vmatprep.subr.bf16.mxu0 %v14098_v29  ;;  %v14178_v29 = vcombine.high %v8575_v53, %v8579_v36  ;;  %v8795_v17 = vld [vmem:[#allocation15 + $0x978] sm:$0xff] }
 0x816   :  { %12094 = vmatpush1.bf16.msra.mxu1 %v14479_v56  ;;  %v14559_v56 = vcombine.low %v8958_v63, %v8962_v4  ;;  %v8655_v63 = vld [vmem:[#allocation15 + $0x518] sm:$0xff] }
 0x817   :  { %12137 = vmatpush1.bf16.msra.mxu0 %v14097_v62  ;;  %12095 = vmatprep.subr.bf16.mxu1 %v14600_v46  ;;  %v14177_v62 = vcombine.low %v8575_v53, %v8579_v36  ;;  %v14552_v46 = vcombine.high %v8950_v51, %v8954_v5  ;;  %v8659_v4 = vld [vmem:[#allocation15 + $0x538] sm:$0xff] }
 0x818   :  { %12138 = vmatprep.subr.bf16.mxu0 %v14218_v6  ;;  %v14170_v6 = vcombine.high %v8567_v61, %v8571_v57  ;;  %v8783_v53 = vld [vmem:[#allocation15 + $0x918] sm:$0xff] }
 0x819   :  { %v8787_v36 = vld [vmem:[#allocation15 + $0x938] sm:$0xff] }
 0x81a   :  { %12096 = vmatpush2.bf16.msra.mxu1 %v14599_v38  ;;  %v14551_v38 = vcombine.low %v8950_v51, %v8954_v5  ;;  %v8775_v51 = vld [vmem:[#allocation15 + $0x8d8] sm:$0xff] }
 0x81b   :  { %12139 = vmatpush2.bf16.msra.mxu0 %v14217_v3  ;;  %12097 = vmatprep.subr.bf16.mxu1 %v14592_v18  ;;  %v14169_v3 = vcombine.low %v8567_v61, %v8571_v57  ;;  %v14544_v18 = vcombine.high %v8942_v27, %v8946_v58  ;;  %v8779_v5 = vld [vmem:[#allocation15 + $0x8f8] sm:$0xff]  ;;  %v14385_v61 = vcombine.low %v8783_v53, %v8787_v36 }
 0x81c   :  { %12140 = vmatprep.subr.bf16.mxu0 %v14210_v10  ;;  %v14162_v10 = vcombine.high %v8559_v24, %v8563_v8 }
 0x81e   :  { %12098 = vmatpush2.bf16.msra.mxu1 %v14591_v50  ;;  %v14543_v50 = vcombine.low %v8942_v27, %v8946_v58  ;;  %v8771_v27 = vld [vmem:[#allocation15 + $0x8b8] sm:$0xff] }
 0x81f   :  { %12141 = vmatpush2.bf16.msra.mxu0 %v14209_v16  ;;  %12099 = vmatprep.subr.bf16.mxu1 %v14584_v2  ;;  %v14161_v16 = vcombine.low %v8559_v24, %v8563_v8  ;;  %v14282_v2 = vcombine.high %v8679_v7, %v8683_v48  ;;  %v14377_v24 = vcombine.low %v8775_v51, %v8779_v5  ;;  %v8763_v7 = vld [vmem:[#allocation15 + $0x878] sm:$0xff] }
 0x820   :  { %12142 = vmatprep.subr.bf16.mxu0 %v14202_v30  ;;  %v14410_v30 = vcombine.high %v8807_v44, %v8811_v28 }
 0x822   :  { %12100 = vmatpush2.bf16.msra.mxu1 %v14583_v54  ;;  %v8803_v54 = vld [vmem:[#allocation15 + $0x9b8] sm:$0xff] }
 0x823   :  { %12143 = vmatpush2.bf16.msra.mxu0 %v14201_v32  ;;  %12101 = vmatprep.subr.bf16.mxu1 %v14576_v13  ;;  %v14409_v32 = vcombine.low %v8807_v44, %v8811_v28  ;;  %v14274_v13 = vcombine.high %v8671_v49, %v8675_v52  ;;  %v14402_v26 = vcombine.high %v8799_v20, %v8803_v54 }
 0x824   :  { %12144 = vmatprep.subr.bf16.mxu0 %v14194_v21  ;;  %v8663_v21 = vld [vmem:[#allocation15 + $0x558] sm:$0xff] }
 0x826   :  { %12102 = vmatpush2.bf16.msra.mxu1 %v14575_v34  ;;  %v14273_v34 = vcombine.low %v8671_v49, %v8675_v52  ;;  %v8755_v49 = vld [vmem:[#allocation15 + $0x838] sm:$0xff] }
 0x827   :  { %12145 = vmatpush2.bf16.msra.mxu0 %v14193_v60  ;;  %12103 = vmatprep.subr.bf16.mxu1 %v14568_v0  ;;  %v14401_v60 = vcombine.low %v8799_v20, %v8803_v54  ;;  %v14266_v0 = vcombine.high %v8663_v21, %v8667_v31 }
 0x828   :  { %12146 = vmatprep.subr.bf16.mxu0 %v14186_v59  ;;  %v14394_v59 = vcombine.high %v8791_v14, %v8795_v17 }
 0x82a   :  { %12104 = vmatpush2.bf16.msra.mxu1 %v14567_v25  ;;  %v14265_v25 = vcombine.low %v8663_v21, %v8667_v31  ;;  %v8871_v21 = vld [vmem:[#allocation15 + $0xbd8] sm:$0xff] }
 0x82b   :  { %12147 = vmatpush2.bf16.msra.mxu0 %v14185_v55  ;;  %12105 = vmatprep.subr.bf16.mxu1 %v14560_v37  ;;  %v14258_v55 = vcombine.high %v8655_v63, %v8659_v4  ;;  %v8647_v37 = vld [vmem:[#allocation15 + $0x4d8] sm:$0xff] }
 0x82c   :  { %12148 = vmatprep.subr.bf16.mxu0 %v14178_v29  ;;  %v8651_v29 = vld [vmem:[#allocation15 + $0x4f8] sm:$0xff] }
 0x82d   :  { %v14250_v57 = vcombine.high %v8647_v37, %v8651_v29  ;;  %v14249_v58 = vcombine.low %v8647_v37, %v8651_v29  ;;  %v8875_v31 = vld [vmem:[#allocation15 + $0xbf8] sm:$0xff] }
 0x82e   :  { %12106 = vmatpush2.bf16.msra.mxu1 %v14559_v56  ;;  %v14378_v56 = vcombine.high %v8775_v51, %v8779_v5  ;;  %v8727_v37 = vld [vmem:[#allocation15 + $0x758] sm:$0xff] }
 0x82f   :  { %12149 = vmatpush2.bf16.msra.mxu0 %v14177_v62  ;;  %12107 = vmatprep.subr.bf16.mxu1 %v14552_v46  ;;  %v8639_v62 = vld [vmem:[#allocation15 + $0x498] sm:$0xff] }
 0x830   :  { %12150 = vmatprep.subr.bf16.mxu0 %v14170_v6  ;;  %v8643_v46 = vld [vmem:[#allocation15 + $0x4b8] sm:$0xff] }
 0x831   :  { %v8767_v6 = vld [vmem:[#allocation15 + $0x898] sm:$0xff]  ;;  %v14242_v8 = vcombine.high %v8639_v62, %v8643_v46  ;;  %v14241_v48 = vcombine.low %v8639_v62, %v8643_v46 }
 0x832   :  { %12108 = vmatpush2.bf16.msra.mxu1 %v14551_v38  ;;  %v14370_v38 = vcombine.high %v8767_v6, %v8771_v27  ;;  %v14369_v44 = vcombine.low %v8767_v6, %v8771_v27  ;;  %v8731_v29 = vld [vmem:[#allocation15 + $0x778] sm:$0xff] }
 0x833   :  { %12151 = vmatpush2.bf16.msra.mxu0 %v14169_v3  ;;  %12109 = vmatprep.subr.bf16.mxu1 %v14544_v18  ;;  %v8631_v3 = vld [vmem:[#allocation15 + $0x458] sm:$0xff]  ;;  %v14330_v62 = vcombine.high %v8727_v37, %v8731_v29 }
 0x834   :  { %12152 = vmatprep.subr.bf16.mxu0 %v14162_v10  ;;  %v8635_v18 = vld [vmem:[#allocation15 + $0x478] sm:$0xff] }
 0x835   :  { %v8759_v10 = vld [vmem:[#allocation15 + $0x858] sm:$0xff]  ;;  %v14234_v28 = vcombine.high %v8631_v3, %v8635_v18  ;;  %v14233_v52 = vcombine.low %v8631_v3, %v8635_v18 }
 0x836   :  { %12110 = vmatpush2.bf16.msra.mxu1 %v14543_v50  ;;  %v14362_v50 = vcombine.high %v8759_v10, %v8763_v7  ;;  %v8855_v5 = vld [vmem:[#allocation15 + $0xb58] sm:$0xff] }
 0x837   :  { %12153 = vmatpush2.bf16.msra.mxu0 %v14161_v16  ;;  %12165 = vmatprep.subr.bf16.mxu1 %v14282_v2  ;;  %v8623_v16 = vld [vmem:[#allocation15 + $0x418] sm:$0xff] }
 0x838   :  { %12208 = vmatprep.subr.bf16.mxu0 %v14410_v30  ;;  %v8627_v2 = vld [vmem:[#allocation15 + $0x438] sm:$0xff] }
 0x839   :  { %12112 = vmatmul.mubr.bf16.vlgmr.msra.gmra.mxu1 %v16263_v35  ;;  %v8751_v30 = vld [vmem:[#allocation15 + $0x818] sm:$0xff]  ;;  %v14226_v20 = vcombine.high %v8623_v16, %v8627_v2 }
 0x83a   :  { %12155 = vmatmul.mubr.bf16.vlgmr.msra.gmra.mxu0 %v16189_v22  ;;  %12166 = vmatpush1.bf16.msra.mxu1 %v14281_v11  ;;  %v14393_v22 = vcombine.low %v8791_v14, %v8795_v17  ;;  %v14361_v11 = vcombine.low %v8759_v10, %v8763_v7  ;;  %v14354_v54 = vcombine.high %v8751_v30, %v8755_v49  ;;  %v16291_v14 = vpop.f32.mrf.mxu0  ;;  %v8719_v6 = vld [vmem:[#allocation15 + $0x718] sm:$0xff] }
 0x83b   :  { %12197 = vmatprep.mubr.bf16.mxu1 %v16215_v23  ;;  %12209 = vmatpush1.bf16.msra.mxu0 %v14409_v32  ;;  %v14386_v23 = vcombine.high %v8783_v53, %v8787_v36  ;;  %v8743_v32 = vld [vmem:[#allocation15 + $0x7d8] sm:$0xff]  ;;  %v14353_v17 = vcombine.low %v8751_v30, %v8755_v49 }
 0x83c   :  { %12240 = vmatprep.mubr.bf16.mxu0 %v16243_v9  ;;  %12167 = vmatprep.subr.bf16.mxu1 %v14274_v13  ;;  %v14257_v9 = vcombine.low %v8655_v63, %v8659_v4  ;;  %v8747_v13 = vld [vmem:[#allocation15 + $0x7f8] sm:$0xff]  ;;  %v16293_v63 = vpop.f32.mrf.mxu1 }
 0x83d   :  { %12210 = vmatprep.subr.bf16.mxu0 %v14402_v26  ;;  %v14225_v26 = vcombine.low %v8623_v16, %v8627_v2  ;;  %v8863_v4 = vld [vmem:[#allocation15 + $0xb98] sm:$0xff]  ;;  %v14345_v36 = vcombine.low %v8743_v32, %v8747_v13 }
 0x83e   :  { %12168 = vmatpush1.bf16.msra.mxu1 %v14273_v34  ;;  %v14346_v34 = vcombine.high %v8743_v32, %v8747_v13  ;;  %v8867_v53 = vld [vmem:[#allocation15 + $0xbb8] sm:$0xff]  ;;  %v16297_v51 = vpop.f32.mrf.mxu1 }
 0x83f   :  { %12211 = vmatpush1.bf16.msra.mxu0 %v14401_v60  ;;  %12169 = vmatprep.subr.bf16.mxu1 %v14266_v0  ;;  %v14474_v60 = vcombine.high %v8871_v21, %v8875_v31  ;;  %v8735_v0 = vld [vmem:[#allocation15 + $0x798] sm:$0xff] }
 0x840   :  { %12212 = vmatprep.subr.bf16.mxu0 %v14394_v59  ;;  %v8739_v59 = vld [vmem:[#allocation15 + $0x7b8] sm:$0xff] }
 0x841   :  { %v8723_v27 = vld [vmem:[#allocation15 + $0x738] sm:$0xff] }
 0x842   :  { %12170 = vmatpush1.bf16.msra.mxu1 %v14265_v25  ;;  %v16295_v25 = vpop.f32.mrf.mxu0  ;;  %v14322_v10 = vcombine.high %v8719_v6, %v8723_v27  ;;  %v8839_v16 = vld [vmem:[#allocation15 + $0xad8] sm:$0xff]  ;;  %v14321_v30 = vcombine.low %v8719_v6, %v8723_v27 }
 0x843   :  { %12213 = vmatpush1.bf16.msra.mxu0 %v14393_v22  ;;  %12171 = vmatprep.subr.bf16.mxu1 %v14258_v55  ;;  %v14473_v22 = vcombine.low %v8871_v21, %v8875_v31  ;;  %v14338_v55 = vcombine.high %v8735_v0, %v8739_v59  ;;  %v8843_v2 = vld [vmem:[#allocation15 + $0xaf8] sm:$0xff] }
 0x844   :  { %12214 = vmatprep.subr.bf16.mxu0 %v14386_v23  ;;  %v14466_v23 = vcombine.high %v8863_v4, %v8867_v53  ;;  %v8707_v32 = vld [vmem:[#allocation15 + $0x6b8] sm:$0xff] }
 0x845   :  { %v8831_v21 = vld [vmem:[#allocation15 + $0xa98] sm:$0xff] }
 0x846   :  { %12172 = vmatpush1.bf16.msra.mxu1 %v14257_v9  ;;  %v8859_v9 = vld [vmem:[#allocation15 + $0xb78] sm:$0xff] }
 0x847   :  { %12215 = vmatpush1.bf16.msra.mxu0 %v14385_v61  ;;  %12173 = vmatprep.subr.bf16.mxu1 %v14250_v57  ;;  %v14337_v61 = vcombine.low %v8735_v0, %v8739_v59  ;;  %v16299_v57 = vpop.f32.mrf.mxu0  ;;  %v14458_v46 = vcombine.high %v8855_v5, %v8859_v9  ;;  %v14457_v18 = vcombine.low %v8855_v5, %v8859_v9  ;;  %v8835_v31 = vld [vmem:[#allocation15 + $0xab8] sm:$0xff] }
 0x848   :  { %12216 = vmatprep.subr.bf16.mxu0 %v14378_v56  ;;  %v14465_v56 = vcombine.low %v8863_v4, %v8867_v53  ;;  %v14434_v0 = vcombine.high %v8831_v21, %v8835_v31  ;;  %v8695_v59 = vld [vmem:[#allocation15 + $0x658] sm:$0xff]  ;;  %v16307_v53 = vld [vmem:[#allocation16] sm:$0xff]  ;;  %v14433_v5 = vcombine.low %v8831_v21, %v8835_v31 }
 0x849   :  { %v11646_v3 = vpop.f32.mrf.mxu0  ;;  %v8699_v4 = vld [vmem:[#allocation15 + $0x678] sm:$0xff] }
 0x84a   :  { %12174 = vmatpush1.bf16.msra.mxu1 %v14249_v58  ;;  %v16301_v58 = vpop.f32.mrf.mxu1  ;;  %v14298_v9 = vcombine.high %v8695_v59, %v8699_v4  ;;  %v8815_v27 = vld [vmem:[#allocation15 + $0xa18] sm:$0xff] }
 0x84b   :  { %12217 = vmatpush1.bf16.msra.mxu0 %v14377_v24  ;;  %12175 = vmatprep.subr.bf16.mxu1 %v14242_v8  ;;  %v8847_v24 = vld [vmem:[#allocation15 + $0xb18] sm:$0xff] }
 0x84c   :  { %12218 = vmatprep.subr.bf16.mxu0 %v14370_v38  ;;  %v8851_v8 = vld [vmem:[#allocation15 + $0xb38] sm:$0xff]  ;;  %v14329_v38 = vcombine.low %v8727_v37, %v8731_v29 }
 0x84d   :  { %v14450_v7 = vcombine.high %v8847_v24, %v8851_v8  ;;  %v8931_v21 = vld [vmem:[#allocation15 + $0xdb8] sm:$0xff] }
 0x84e   :  { %12176 = vmatpush1.bf16.msra.mxu1 %v14241_v48  ;;  %v8711_v48 = vld [vmem:[#allocation15 + $0x6d8] sm:$0xff] }
 0x84f   :  { %12219 = vmatpush1.bf16.msra.mxu0 %v14369_v44  ;;  %12177 = vmatprep.subr.bf16.mxu1 %v14234_v28  ;;  %v8715_v44 = vld [vmem:[#allocation15 + $0x6f8] sm:$0xff]  ;;  %v11689_v28 = vpop.f32.mrf.mxu1 }
 0x850   :  { %12220 = vmatprep.subr.bf16.mxu0 %v14362_v50  ;;  %v16303_v50 = vpop.f32.mrf.mxu0 }
 0x851   :  { %v16305_v49 = vpop.f32.mrf.mxu1 }
 0x852   :  { %12178 = vmatpush1.bf16.msra.mxu1 %v14233_v52  ;;  %v14449_v52 = vcombine.low %v8847_v24, %v8851_v8  ;;  %v11728_v13 = vpop.f32.mrf.mxu0  ;;  %v8819_v24 = vld [vmem:[#allocation15 + $0xa38] sm:$0xff] }
 0x853   :  { %12221 = vmatpush1.bf16.msra.mxu0 %v14361_v11  ;;  %12179 = vmatprep.subr.bf16.mxu1 %v14226_v20  ;;  %v14314_v11 = vcombine.high %v8711_v48, %v8715_v44  ;;  %v14442_v20 = vcombine.high %v8839_v16, %v8843_v2 }
 0x854   :  { %12222 = vmatprep.subr.bf16.mxu0 %v14354_v54  ;;  %v8703_v54 = vld [vmem:[#allocation15 + $0x698] sm:$0xff] }
 0x855   :  { %v14305_v37 = vcombine.low %v8703_v54, %v8707_v32 }
 0x856   :  { %12180 = vmatpush1.bf16.msra.mxu1 %v14225_v26  ;;  %v14313_v26 = vcombine.low %v8711_v48, %v8715_v44  ;;  %v14418_v44 = vcombine.high %v8815_v27, %v8819_v24 }
 0x857   :  { %12223 = vmatpush1.bf16.msra.mxu0 %v14353_v17  ;;  %12181 = vmatprep.subr.bf16.mxu1 %v14346_v34  ;;  %v11771_v17 = vpop.f32.mrf.mxu1  ;;  %v14441_v34 = vcombine.low %v8839_v16, %v8843_v2  ;;  %v8935_v16 = vld [vmem:[#allocation15 + $0xdd8] sm:$0xff] }
 0x858   :  { %12224 = vmatprep.subr.bf16.mxu0 %v14474_v60  ;;  %v14306_v60 = vcombine.high %v8703_v54, %v8707_v32  ;;  %v8939_v2 = vld [vmem:[#allocation15 + $0xdf8] sm:$0xff]  ;;  %v15210_v54 = vld [vmem:[#allocation18 + $0x78] sm:$0xff]  }
 0x859   :  { %v16313_v29 = vpop.f32.mrf.mxu1  ;;  %v8927_v32 = vld [vmem:[#allocation15 + $0xd98] sm:$0xff] }
 0x85a   :  { %12182 = vmatpush2.bf16.msra.mxu1 %v14345_v36  ;;  %v16309_v36 = vpop.f32.mrf.mxu0 }
 0x85b   :  { %12225 = vmatpush2.bf16.msra.mxu0 %v14473_v22  ;;  %12183 = vmatprep.subr.bf16.mxu1 %v14338_v55  ;;  %v8823_v22 = vld [vmem:[#allocation15 + $0xa58] sm:$0xff] }
 0x85c   :  { %12226 = vmatprep.subr.bf16.mxu0 %v14466_v23  ;;  %v8827_v55 = vld [vmem:[#allocation15 + $0xa78] sm:$0xff]  ;;  %v9013_v23 = vrot.slane %v16307_v53, %v15679_v40  ;;  %v11732_v6 = vpop.f32.mrf.mxu0  ;;  %v14297_v40 = vcombine.low %v8695_v59, %v8699_v4 }
 0x85d   :  { %v15212_v59 = vld [vmem:[#allocation18 + $0x70] sm:$0xff]  }
 0x85e   :  { %12184 = vmatpush2.bf16.msra.mxu1 %v14337_v61  ;;  %v11647_v61 = vadd.f32 %v11646_v3, %v9013_v23  ;;  %v11643_v8 = vadd.f32 %v16295_v25, %v9013_v23  ;;  %v14417_v25 = vcombine.low %v8815_v27, %v8819_v24  ;;  %v15214_v23 = vld [vmem:[#allocation18 + $0x68] sm:$0xff]   ;;  %v15218_v27 = vld [vmem:[#allocation18 + $0x58] sm:$0xff]   ;;  %v8895_v24 = vld [vmem:[#allocation15 + $0xc98] sm:$0xff] }
 0x85f   :  { %12227 = vmatpush2.bf16.msra.mxu0 %v14465_v56  ;;  %12185 = vmatprep.subr.bf16.mxu1 %v14330_v62  ;;  %v14426_v56 = vcombine.high %v8823_v22, %v8827_v55  ;;  %v8687_v62 = vld [vmem:[#allocation15 + $0x618] sm:$0xff] }
 0x860   :  { %12228 = vmatprep.subr.bf16.mxu0 %v14458_v46  ;;  %v8691_v46 = vld [vmem:[#allocation15 + $0x638] sm:$0xff]  ;;  %v11686_v48 = vadd.f32 %v16297_v51, %v11643_v8  ;;  %v14537_v51 = vcombine.low %v8935_v16, %v8939_v2 }
 0x861   :  { %v8899_v8 = vld [vmem:[#allocation15 + $0xcb8] sm:$0xff] }
 0x862   :  { %12186 = vmatpush2.bf16.msra.mxu1 %v14329_v38  ;;  %v11690_v38 = vadd.f32 %v11689_v28, %v11647_v61  ;;  %v14538_v28 = vcombine.high %v8935_v16, %v8939_v2  ;;  %v14497_v16 = vcombine.low %v8895_v24, %v8899_v8  ;;  %v15221_v2 = vld [vmem:[#allocation18 + $0x10] sm:$0xff]  }
 0x863   :  { %12229 = vmatpush2.bf16.msra.mxu0 %v14457_v18  ;;  %12187 = vmatprep.subr.bf16.mxu1 %v14322_v10  ;;  %v11775_v18 = vpop.f32.mrf.mxu1  ;;  %v14425_v10 = vcombine.low %v8823_v22, %v8827_v55  ;;  %v15213_v22 = vld [vmem:[#allocation18 + $0x30] sm:$0xff]  }
 0x864   :  { %12230 = vmatprep.subr.bf16.mxu0 %v14450_v7  ;;  %v14290_v7 = vcombine.high %v8687_v62, %v8691_v46  ;;  %v11733_v3 = vadd.f32 %v11732_v6, %v11690_v38 }
 0x866   :  { %12188 = vmatpush2.bf16.msra.mxu1 %v14321_v30  ;;  %v11729_v30 = vadd.f32 %v11728_v13, %v11686_v48  ;;  %v14530_v13 = vcombine.high %v8927_v32, %v8931_v21  ;;  %v8887_v48 = vld [vmem:[#allocation15 + $0xc58] sm:$0xff] }
 0x867   :  { %12231 = vmatpush2.bf16.msra.mxu0 %v14449_v52  ;;  %12189 = vmatprep.subr.bf16.mxu1 %v14314_v11  ;;  %v11776_v52 = vadd.f32 %v11775_v18, %v11733_v3  ;;  %v14289_v11 = vcombine.low %v8687_v62, %v8691_v46  ;;  %v8907_v62 = vld [vmem:[#allocation15 + $0xcf8] sm:$0xff]  ;;  %v15217_v46 = vld [vmem:[#allocation18 + $0x20] sm:$0xff]   ;;  %v14498_v18 = vcombine.high %v8895_v24, %v8899_v8  ;;  %v15246_v24 = vld [vmem:[#allocation18 + $0x168] sm:$0xff]  }
 0x868   :  { %12232 = vmatprep.subr.bf16.mxu0 %v14442_v20  ;;  %v11772_v20 = vadd.f32 %v11771_v17, %v11729_v30  ;;  %v14529_v17 = vcombine.low %v8927_v32, %v8931_v21  ;;  %v8891_v3 = vld [vmem:[#allocation15 + $0xc78] sm:$0xff]  ;;  %v15223_v32 = vld [vmem:[#allocation18 + $0x8] sm:$0xff]  }
 0x869   :  { %v12303_v31 = vmax.f32 %v11776_v52, 0.0  ;;  %v14490_v30 = vcombine.high %v8887_v48, %v8891_v3 }
 0x86a   :  { %12190 = vmatpush2.bf16.msra.mxu1 %v14313_v26  ;;  %v15211_v26 = vld [vmem:[#allocation18 + $0x38] sm:$0xff]  }
 0x86b   :  { %12233 = vmatpush2.bf16.msra.mxu0 %v14441_v34  ;;  %12191 = vmatprep.subr.bf16.mxu1 %v14306_v60  ;;  %v12295_v34 = vmax.f32 %v11772_v20, 0.0  ;;  %v8919_v60 = vld [vmem:[#allocation15 + $0xd58] sm:$0xff] }
 0x86c   :  { %12234 = vmatprep.subr.bf16.mxu0 %v14434_v0  ;;  %v8923_v0 = vld [vmem:[#allocation15 + $0xd78] sm:$0xff] }
 0x86d   :  { %v12311_v4 = vpack.c.bf16 %v12303_v31, %v12295_v34  ;;  %v14522_v55 = vcombine.high %v8919_v60, %v8923_v0 }
 0x86e   :  { %12192 = vmatpush2.bf16.msra.mxu1 %v14305_v37  ;;  %v8911_v37 = vld [vmem:[#allocation15 + $0xd18] sm:$0xff] }
 0x86f   :  { %12235 = vmatpush2.bf16.msra.mxu0 %v14433_v5  ;;  %12193 = vmatprep.subr.bf16.mxu1 %v14298_v9  ;;  %v8915_v5 = vld [vmem:[#allocation15 + $0xd38] sm:$0xff]  ;;  %v14521_v9 = vcombine.low %v8919_v60, %v8923_v0  ;;  %v15225_v60 = vld [vmem:[#allocation18] sm:$0xff]  }
 0x870   :  { %12236 = vmatprep.subr.bf16.mxu0 %v14426_v56  ;;  %v14514_v61 = vcombine.high %v8911_v37, %v8915_v5  ;;  %v8903_v56 = vld [vmem:[#allocation15 + $0xcd8] sm:$0xff] }
 0x871   :  { %v14506_v6 = vcombine.high %v8903_v56, %v8907_v62  ;;  %v14505_v38 = vcombine.low %v8903_v56, %v8907_v62 }
 0x872   :  { %12194 = vmatpush2.bf16.msra.mxu1 %v14297_v40  ;;  %v15219_v40 = vld [vmem:[#allocation18 + $0x18] sm:$0xff]  }
 0x873   :  { %12237 = vmatpush2.bf16.msra.mxu0 %v14425_v10  ;;  %12195 = vmatprep.subr.bf16.mxu1 %v14290_v7  ;;  %v9009_v10 = vrot.slane %v16307_v53, %v15685_v42  ;;  %v15220_v7 = vld [vmem:[#allocation18 + $0x50] sm:$0xff]  }
 0x874   :  { %12238 = vmatprep.subr.bf16.mxu0 %v14418_v44  ;;  %v8883_v42 = vld [vmem:[#allocation15 + $0xc38] sm:$0xff] }
 0x875   :  { %v11645_v44 = vadd.f32 %v16299_v57, %v9009_v10  ;;  %v11641_v52 = vadd.f32 %v16291_v14, %v9009_v10  ;;  %v14489_v57 = vcombine.low %v8887_v48, %v8891_v3  ;;  %v15247_v10 = vld [vmem:[#allocation18 + $0x128] sm:$0xff]   ;;  %v8971_v48 = vld [vmem:[#allocation15 + $0xef8] sm:$0xff]  ;;  %v15248_v3 = vld [vmem:[#allocation18 + $0x160] sm:$0xff]  }
 0x876   :  { %12196 = vmatpush2.bf16.msra.mxu1 %v14289_v11 }
 0x877   :  { %12239 = vmatpush2.bf16.msra.mxu0 %v14417_v25  ;;  %12251 = vmatprep.subr.bf16.mxu1 %v14538_v28  ;;  %v11688_v11 = vadd.f32 %v16301_v58, %v11645_v44  ;;  %v15222_v25 = vld [vmem:[#allocation18 + $0x48] sm:$0xff]   ;;  %v8879_v28 = vld [vmem:[#allocation15 + $0xc18] sm:$0xff]  ;;  %v11684_v20 = vadd.f32 %v16293_v63, %v11641_v52  ;;  %v15224_v58 = vld [vmem:[#allocation18 + $0x40] sm:$0xff]  }
 0x878   :  { %14668 = vmatprep.subr.bf16.mxu0 %v15210_v54  ;;  %v14482_v21 = vcombine.high %v8879_v28, %v8883_v42  ;;  %v14481_v63 = vcombine.low %v8879_v28, %v8883_v42  ;;  %v15249_v52 = vld [vmem:[#allocation18 + $0x120] sm:$0xff]   ;;  %v15250_v28 = vld [vmem:[#allocation18 + $0x158] sm:$0xff]  }
 0x879   :  { %12198 = vmatmul.mubr.bf16.vlgmr.msra.gmra.mxu1 %v16213_v33  ;;  %v15215_v33 = vld [vmem:[#allocation18 + $0x28] sm:$0xff]   ;;  %v11731_v54 = vadd.f32 %v16309_v36, %v11688_v11  ;;  %v11727_v31 = vadd.f32 %v16303_v50, %v11684_v20  ;;  %v16332_v36 = vpop.f32.mrf.mxu1  ;;  %v8991_v50 = vld [vmem:[#allocation15 + $0xf98] sm:$0xff] }
 0x87a   :  { %12241 = vmatmul.mubr.bf16.vlgmr.msra.gmra.mxu0 %v16241_v15  ;;  %12252 = vmatpush1.bf16.msra.mxu1 %v14537_v51  ;;  %v15216_v15 = vld [vmem:[#allocation18 + $0x60] sm:$0xff]   ;;  %v8999_v51 = vld [vmem:[#allocation15 + $0xfd8] sm:$0xff] }
 0x87b   :  { %12283 = vmatprep.mubr.bf16.mxu1 %v16265_v45  ;;  %14669 = vmatpush3.bf16.msra.mxu0 %v15211_v26  ;;  %v14513_v45 = vcombine.low %v8911_v37, %v8915_v5  ;;  %v11774_v14 = vadd.f32 %v16313_v29, %v11731_v54  ;;  %v9003_v26 = vld [vmem:[#allocation15 + $0xff8] sm:$0xff]  ;;  %v11770_v34 = vadd.f32 %v16305_v49, %v11727_v31  ;;  %v16336_v49 = vpop.f32.mrf.mxu1  ;;  %v15243_v37 = vld [vmem:[#allocation18 + $0x138] sm:$0xff]  }
 0x87c   :  { %12869 = vmatprep.mubr.bf16.mxu0 %v12311_v4  ;;  %12253 = vmatprep.subr.bf16.mxu1 %v14530_v13  ;;  %v16330_v13 = vpop.f32.mrf.mxu0  ;;  %v14602_v0 = vcombine.high %v8999_v51, %v9003_v26  ;;  %v8995_v29 = vld [vmem:[#allocation15 + $0xfb8] sm:$0xff]  ;;  %v15242_v4 = vld [vmem:[#allocation18 + $0x178] sm:$0xff]   ;;  %v9021_v54 = vrot.slane %v16307_v53, %v15682_v41 }
 0x87d   :  { %14670 = vmatprep.subr.bf16.mxu0 %v15212_v59  ;;  %v12302_v59 = vmax.f32 %v11774_v14, 0.0  ;;  %v16340_v62 = vpop.f32.mrf.mxu1  ;;  %v8959_v11 = vld [vmem:[#allocation15 + $0xe98] sm:$0xff] }
 0x87e   :  { %12254 = vmatpush1.bf16.msra.mxu1 %v14529_v17  ;;  %v12294_v17 = vmax.f32 %v11770_v34, 0.0  ;;  %v8951_v14 = vld [vmem:[#allocation15 + $0xe58] sm:$0xff] }
 0x87f   :  { %14671 = vmatpush3.bf16.msra.mxu0 %v15213_v22  ;;  %12255 = vmatprep.subr.bf16.mxu1 %v14522_v55  ;;  %v14601_v22 = vcombine.low %v8999_v51, %v9003_v26  ;;  %v16334_v55 = vpop.f32.mrf.mxu0  ;;  %v15252_v51 = vld [vmem:[#allocation18 + $0x150] sm:$0xff]  }
 0x880   :  { %14672 = vmatprep.subr.bf16.mxu0 %v15214_v23  ;;  %v14594_v23 = vcombine.high %v8991_v50, %v8995_v29  ;;  %v12310_v5 = vpack.c.bf16 %v12302_v59, %v12294_v17  ;;  %v15253_v59 = vld [vmem:[#allocation18 + $0x110] sm:$0xff]   ;;  %v15254_v17 = vld [vmem:[#allocation18 + $0x148] sm:$0xff]  }
 0x881   :  { %v16338_v56 = vpop.f32.mrf.mxu0 }
 0x882   :  { %12256 = vmatpush1.bf16.msra.mxu1 %v14521_v9  ;;  %v8983_v9 = vld [vmem:[#allocation15 + $0xf58] sm:$0xff] }
 0x883   :  { %14673 = vmatpush3.bf16.msra.mxu0 %v15215_v33  ;;  %12257 = vmatprep.subr.bf16.mxu1 %v14514_v61  ;;  %v8987_v33 = vld [vmem:[#allocation15 + $0xf78] sm:$0xff] }
 0x884   :  { %14674 = vmatprep.subr.bf16.mxu0 %v15216_v15  ;;  %v15244_v61 = vld [vmem:[#allocation18 + $0x170] sm:$0xff]   ;;  %v14593_v15 = vcombine.low %v8991_v50, %v8995_v29  ;;  %v14585_v8 = vcombine.low %v8983_v9, %v8987_v33 }
 0x885   :  { %v8943_v29 = vld [vmem:[#allocation15 + $0xe18] sm:$0xff] }
 0x886   :  { %12258 = vmatpush1.bf16.msra.mxu1 %v14513_v45  ;;  %v14586_v45 = vcombine.high %v8983_v9, %v8987_v33  ;;  %v15255_v9 = vld [vmem:[#allocation18 + $0x108] sm:$0xff]  }
 0x887   :  { %14675 = vmatpush3.bf16.msra.mxu0 %v15217_v46  ;;  %12259 = vmatprep.subr.bf16.mxu1 %v14506_v6  ;;  %v15245_v46 = vld [vmem:[#allocation18 + $0x130] sm:$0xff]  }
 0x888   :  { %14676 = vmatprep.subr.bf16.mxu0 %v15218_v27  ;;  %v8975_v6 = vld [vmem:[#allocation15 + $0xf18] sm:$0xff] }
 0x889   :  { %v8979_v27 = vld [vmem:[#allocation15 + $0xf38] sm:$0xff] }
 0x88a   :  { %12260 = vmatpush1.bf16.msra.mxu1 %v14505_v38  ;;  %v11818_v38 = vpop.f32.mrf.mxu0 }
 0x88b   :  { %14677 = vmatpush3.bf16.msra.mxu0 %v15219_v40  ;;  %12261 = vmatprep.subr.bf16.mxu1 %v14498_v18  ;;  %v11861_v40 = vpop.f32.mrf.mxu1  ;;  %v14578_v18 = vcombine.high %v8975_v6, %v8979_v27  ;;  %v11819_v31 = vadd.f32 %v11818_v38, %v9021_v54  ;;  %v15228_v38 = vld [vmem:[#allocation18 + $0xf0] sm:$0xff]  }
 0x88c   :  { %14678 = vmatprep.subr.bf16.mxu0 %v15220_v7  ;;  %v8967_v7 = vld [vmem:[#allocation15 + $0xed8] sm:$0xff]  ;;  %v16342_v44 = vpop.f32.mrf.mxu0 }
 0x88e   :  { %12262 = vmatpush1.bf16.msra.mxu1 %v14497_v16  ;;  %v16344_v16 = vpop.f32.mrf.mxu1  ;;  %v11900_v42 = vpop.f32.mrf.mxu0 }
 0x88f   :  { %14679 = vmatpush3.bf16.msra.mxu0 %v15221_v2  ;;  %12263 = vmatprep.subr.bf16.mxu1 %v14490_v30  ;;  %v14577_v2 = vcombine.low %v8975_v6, %v8979_v27  ;;  %v14570_v30 = vcombine.high %v8967_v7, %v8971_v48  ;;  %v15257_v6 = vld [vmem:[#allocation18 + $0x100] sm:$0xff]  }
 0x890   :  { %14680 = vmatprep.subr.bf16.mxu0 %v15222_v25  ;;  %v8963_v25 = vld [vmem:[#allocation15 + $0xeb8] sm:$0xff]  ;;  %v11943_v20 = vpop.f32.mrf.mxu1  ;;  %v16348_v26 = vpop.f32.mrf.mxu0 }
 0x891   :  { %v14561_v41 = vcombine.low %v8959_v11, %v8963_v25 }
 0x892   :  { %12264 = vmatpush1.bf16.msra.mxu1 %v14489_v57  ;;  %v14569_v57 = vcombine.low %v8967_v7, %v8971_v48  ;;  %v16350_v34 = vpop.f32.mrf.mxu1  ;;  %v15231_v7 = vld [vmem:[#allocation18 + $0xa8] sm:$0xff]   ;;  %v15232_v48 = vld [vmem:[#allocation18 + $0xe0] sm:$0xff]  }
 0x893   :  { %14681 = vmatpush3.bf16.msra.mxu0 %v15223_v32  ;;  %12265 = vmatprep.subr.bf16.mxu1 %v14482_v21  ;;  %v14562_v32 = vcombine.high %v8959_v11, %v8963_v25  ;;  %v15251_v21 = vld [vmem:[#allocation18 + $0x118] sm:$0xff]   ;;  %v15236_v11 = vld [vmem:[#allocation18 + $0xd0] sm:$0xff]  }
 0x894   :  { %14682 = vmatprep.subr.bf16.mxu0 %v15224_v58  ;;  %v8955_v58 = vld [vmem:[#allocation15 + $0xe78] sm:$0xff] }
 0x896   :  { %12266 = vmatpush1.bf16.msra.mxu1 %v14481_v63  ;;  %v11815_v63 = vadd.f32 %v16334_v55, %v9021_v54  ;;  %v15238_v54 = vld [vmem:[#allocation18 + $0xc8] sm:$0xff]  }
 0x897   :  { %14683 = vmatpush3.bf16.msra.mxu0 %v15225_v60  ;;  %12267 = vmatprep.subr.bf16.mxu1 %v14602_v0  ;;  %v11862_v60 = vadd.f32 %v11861_v40, %v11819_v31  ;;  %v14554_v0 = vcombine.high %v8951_v14, %v8955_v58 }
 0x898   :  { %14712 = vmatprep.subr.bf16.mxu0 %v15242_v4  ;;  %v11858_v50 = vadd.f32 %v16336_v49, %v11815_v63  ;;  %v8947_v4 = vld [vmem:[#allocation15 + $0xe38] sm:$0xff] }
 0x899   :  { %v14546_v55 = vcombine.high %v8943_v29, %v8947_v4  ;;  %v14545_v49 = vcombine.low %v8943_v29, %v8947_v4  ;;  %v15260_v63 = vld [vmem:[#allocation18 + $0x1f0] sm:$0xff]  }
 0x89a   :  { %12870 = vmatmul.mubr.bf16.vlgmr.msra.gmra.mxu0 %v12310_v5  ;;  %12268 = vmatpush2.bf16.msra.mxu1 %v14601_v22  ;;  %v11904_v22 = vpop.f32.mrf.mxu0  ;;  %v14553_v5 = vcombine.low %v8951_v14, %v8955_v58  ;;  %v11901_v33 = vadd.f32 %v11900_v42, %v11858_v50  ;;  %v15237_v42 = vld [vmem:[#allocation18 + $0x90] sm:$0xff]   ;;  %v15265_v50 = vld [vmem:[#allocation18 + $0x1a0] sm:$0xff]  }
 0x89b   :  { %12269 = vmatprep.subr.bf16.mxu1 %v14594_v23  ;;  %14713 = vmatpush3.bf16.msra.mxu0 %v15243_v37  ;;  %v11947_v23 = vpop.f32.mrf.mxu1  ;;  %v11905_v37 = vadd.f32 %v11904_v22, %v11862_v60  ;;  %v15262_v60 = vld [vmem:[#allocation18 + $0x1e8] sm:$0xff]  }
 0x89c   :  { %14714 = vmatprep.subr.bf16.mxu0 %v15244_v61  ;;  %v11984_v58 = vpop.f32.mrf.mxu0 }
 0x89d   :  { %v11948_v61 = vadd.f32 %v11947_v23, %v11905_v37  ;;  %v9029_v23 = vrot.slane %v16307_v53, %v8434_v1  ;;  %v15267_v37 = vld [vmem:[#allocation18 + $0x198] sm:$0xff]  }
 0x89e   :  { %12270 = vmatpush2.bf16.msra.mxu1 %v14593_v15  ;;  %v15256_v15 = vld [vmem:[#allocation18 + $0x140] sm:$0xff]  }
 0x89f   :  { %12271 = vmatprep.subr.bf16.mxu1 %v14586_v45  ;;  %14715 = vmatpush3.bf16.msra.mxu0 %v15245_v46  ;;  %v11944_v45 = vadd.f32 %v11943_v20, %v11901_v33  ;;  %v15226_v46 = vld [vmem:[#allocation18 + $0xf8] sm:$0xff]   ;;  %v12305_v27 = vmax.f32 %v11948_v61, 0.0 }
 0x8a0   :  { %14716 = vmatprep.subr.bf16.mxu0 %v15246_v24 }
 0x8a1   :  { %v12297_v24 = vmax.f32 %v11944_v45, 0.0 }
 0x8a2   :  { %12272 = vmatpush2.bf16.msra.mxu1 %v14585_v8  ;;  %v15227_v8 = vld [vmem:[#allocation18 + $0xb8] sm:$0xff]  }
 0x8a3   :  { %12273 = vmatprep.subr.bf16.mxu1 %v14578_v18  ;;  %14717 = vmatpush3.bf16.msra.mxu0 %v15247_v10  ;;  %v12313_v40 = vpack.c.bf16 %v12305_v27, %v12297_v24  ;;  %v15229_v18 = vld [vmem:[#allocation18 + $0xb0] sm:$0xff]   ;;  %v15230_v10 = vld [vmem:[#allocation18 + $0xe8] sm:$0xff]  }
 0x8a4   :  { %14718 = vmatprep.subr.bf16.mxu0 %v15248_v3  ;;  %v15233_v3 = vld [vmem:[#allocation18 + $0xa0] sm:$0xff]  }
 0x8a6   :  { %12274 = vmatpush2.bf16.msra.mxu1 %v14577_v2  ;;  %v15234_v2 = vld [vmem:[#allocation18 + $0xd8] sm:$0xff]  }
 0x8a7   :  { %12275 = vmatprep.subr.bf16.mxu1 %v14570_v30  ;;  %14719 = vmatpush3.bf16.msra.mxu0 %v15249_v52  ;;  %v9017_v30 = vrot.slane %v16307_v53, %v15688_v43  ;;  %v15235_v52 = vld [vmem:[#allocation18 + $0x98] sm:$0xff]   ;;  %v15239_v43 = vld [vmem:[#allocation18 + $0x88] sm:$0xff]  }
 0x8a8   :  { %14720 = vmatprep.subr.bf16.mxu0 %v15250_v28 }
 0x8a9   :  { %v11813_v25 = vadd.f32 %v16330_v13, %v9017_v30 }
 0x8aa   :  { %12276 = vmatpush2.bf16.msra.mxu1 %v14569_v57 }
 0x8ab   :  { %12277 = vmatprep.subr.bf16.mxu1 %v14562_v32  ;;  %14721 = vmatpush3.bf16.msra.mxu0 %v15251_v21  ;;  %v11856_v20 = vadd.f32 %v16332_v36, %v11813_v25  ;;  %v15240_v21 = vld [vmem:[#allocation18 + $0xc0] sm:$0xff]   ;;  %v15270_v25 = vld [vmem:[#allocation18 + $0x1c8] sm:$0xff]  }
 0x8ac   :  { %14722 = vmatprep.subr.bf16.mxu0 %v15252_v51  ;;  %v15258_v51 = vld [vmem:[#allocation18 + $0x1f8] sm:$0xff]  }
 0x8ad   :  { %v11899_v32 = vadd.f32 %v16342_v44, %v11856_v20  ;;  %v15261_v44 = vld [vmem:[#allocation18 + $0x1b0] sm:$0xff]  }
 0x8ae   :  { %12278 = vmatpush2.bf16.msra.mxu1 %v14561_v41 }
 0x8af   :  { %12279 = vmatprep.subr.bf16.mxu1 %v14554_v0  ;;  %14723 = vmatpush3.bf16.msra.mxu0 %v15253_v59  ;;  %v11942_v13 = vadd.f32 %v16344_v16, %v11899_v32  ;;  %v15263_v16 = vld [vmem:[#allocation18 + $0x1a8] sm:$0xff]   ;;  %v15264_v59 = vld [vmem:[#allocation18 + $0x1e0] sm:$0xff]  }
 0x8b0   :  { %14724 = vmatprep.subr.bf16.mxu0 %v15254_v17  ;;  %v15266_v17 = vld [vmem:[#allocation18 + $0x1d8] sm:$0xff]   ;;  %v15272_v32 = vld [vmem:[#allocation18 + $0x1c0] sm:$0xff]  }
 0x8b1   :  { %v12296_v14 = vmax.f32 %v11942_v13, 0.0 }
 0x8b2   :  { %12280 = vmatpush2.bf16.msra.mxu1 %v14553_v5  ;;  %v9025_v5 = vrot.slane %v16307_v53, %v8430_v12  ;;  %v15269_v12 = vld [vmem:[#allocation18 + $0x190] sm:$0xff]  }
 0x8b3   :  { %12281 = vmatprep.subr.bf16.mxu1 %v14546_v55  ;;  %14725 = vmatpush3.bf16.msra.mxu0 %v15255_v9 }
 0x8b4   :  { %14726 = vmatprep.subr.bf16.mxu0 %v15256_v15  ;;  %v11985_v15 = vadd.f32 %v11984_v58, %v9025_v5 }
 0x8b6   :  { %12282 = vmatpush2.bf16.msra.mxu1 %v14545_v49 }
 0x8b7   :  { %14690 = vmatprep.subr.bf16.mxu1 %v15226_v46  ;;  %14727 = vmatpush3.bf16.msra.mxu0 %v15257_v6 }
 0x8b9   :  { %12284 = vmatmul.mubr.bf16.vlgmr.msra.gmra.mxu1 %v16263_v35  ;;  %v11817_v35 = vadd.f32 %v16338_v56, %v9017_v30  ;;  %v12027_v0 = vpop.f32.mrf.mxu1 }
 0x8ba   :  { %14691 = vmatpush3.bf16.msra.mxu1 %v15227_v8  ;;  %12910 = vmatprep.mubr.bf16.mxu1 %v12313_v40  ;;  %v12028_v27 = vadd.f32 %v12027_v0, %v11985_v15  ;;  %v15268_v40 = vld [vmem:[#allocation18 + $0x1d0] sm:$0xff]  }
 0x8bb   :  { %14692 = vmatprep.subr.bf16.mxu1 %v15228_v38  ;;  %v11860_v28 = vadd.f32 %v16340_v62, %v11817_v35  ;;  %v15241_v62 = vld [vmem:[#allocation18 + $0x80] sm:$0xff]   ;;  %v12029_v4 = vpop.f32.mrf.mxu1 }
 0x8bd   :  { %v11903_v57 = vadd.f32 %v16348_v26, %v11860_v28  ;;  %v15259_v26 = vld [vmem:[#allocation18 + $0x1b8] sm:$0xff]   ;;  %v12031_v55 = vpop.f32.mrf.mxu1 }
 0x8be   :  { %14693 = vmatpush3.bf16.msra.mxu1 %v15229_v18 }
 0x8bf   :  { %14694 = vmatprep.subr.bf16.mxu1 %v15230_v10  ;;  %v11946_v56 = vadd.f32 %v16350_v34, %v11903_v57  ;;  %v11986_v34 = vpop.f32.mrf.mxu0  ;;  %v12033_v45 = vpop.f32.mrf.mxu1 }
 0x8c0   :  { %v11987_v33 = vadd.f32 %v11986_v34, %v9029_v23 }
 0x8c1   :  { %v12304_v31 = vmax.f32 %v11946_v56, 0.0  ;;  %v11988_v41 = vpop.f32.mrf.mxu0 }
 0x8c2   :  { %14695 = vmatpush3.bf16.msra.mxu1 %v15231_v7  ;;  %v11989_v61 = vadd.f32 %v11988_v41, %v9025_v5  ;;  %v12030_v46 = vadd.f32 %v12029_v4, %v11987_v33 }
 0x8c3   :  { %14696 = vmatprep.subr.bf16.mxu1 %v15232_v48  ;;  %v12312_v36 = vpack.c.bf16 %v12304_v31, %v12296_v14  ;;  %v11990_v29 = vpop.f32.mrf.mxu0 }
 0x8c4   :  { %v11991_v49 = vadd.f32 %v11990_v29, %v9029_v23  ;;  %v12032_v6 = vadd.f32 %v12031_v55, %v11989_v61 }
 0x8c5   :  { %v12070_v22 = vpop.f32.mrf.mxu0 }
 0x8c6   :  { %14697 = vmatpush3.bf16.msra.mxu1 %v15233_v3  ;;  %v12034_v8 = vadd.f32 %v12033_v45, %v11991_v49  ;;  %v12071_v7 = vadd.f32 %v12070_v22, %v12028_v27 }
 0x8c7   :  { %14698 = vmatprep.subr.bf16.mxu1 %v15234_v2  ;;  %v12072_v9 = vpop.f32.mrf.mxu0 }
 0x8c8   :  { %v12073_v18 = vadd.f32 %v12072_v9, %v12030_v46 }
 0x8c9   :  { %v12074_v24 = vpop.f32.mrf.mxu0 }
 0x8ca   :  { %14699 = vmatpush3.bf16.msra.mxu1 %v15235_v52  ;;  %v12075_v10 = vadd.f32 %v12074_v24, %v12032_v6 }
 0x8cb   :  { %14700 = vmatprep.subr.bf16.mxu1 %v15236_v11  ;;  %v12076_v48 = vpop.f32.mrf.mxu0 }
 0x8cc   :  { %v12077_v2 = vadd.f32 %v12076_v48, %v12034_v8 }
 0x8ce   :  { %14701 = vmatpush3.bf16.msra.mxu1 %v15237_v42  ;;  %v15271_v42 = vld [vmem:[#allocation18 + $0x188] sm:$0xff]  }
 0x8cf   :  { %14702 = vmatprep.subr.bf16.mxu1 %v15238_v54 }
 0x8d2   :  { %14703 = vmatpush3.bf16.msra.mxu1 %v15239_v43 }
 0x8d3   :  { %14704 = vmatprep.subr.bf16.mxu1 %v15240_v21  ;;  %v15273_v21 = vld [vmem:[#allocation18 + $0x180] sm:$0xff]  }
 0x8d6   :  { %14705 = vmatpush3.bf16.msra.mxu1 %v15241_v62 }
 0x8d7   :  { %14734 = vmatprep.subr.bf16.mxu1 %v15258_v51 }
 0x8d9   :  { %12911 = vmatmul.mubr.bf16.vlgmr.msra.gmra.mxu1 %v12312_v36 }
 0x8da   :  { %14735 = vmatpush3.bf16.msra.mxu1 %v15259_v26 }
 0x8db   :  { %14736 = vmatprep.subr.bf16.mxu1 %v15260_v63  ;;  %v9037_v63 = vrot.slane %v16307_v53, %v8442_v47 }
 0x8de   :  { %14737 = vmatpush3.bf16.msra.mxu1 %v15261_v44  ;;  %v9033_v44 = vrot.slane %v16307_v53, %v8438_v19 }
 0x8df   :  { %14738 = vmatprep.subr.bf16.mxu1 %v15262_v60 }
 0x8e2   :  { %14739 = vmatpush3.bf16.msra.mxu1 %v15263_v16 }
 0x8e3   :  { %14740 = vmatprep.subr.bf16.mxu1 %v15264_v59 }
 0x8e6   :  { %14741 = vmatpush3.bf16.msra.mxu1 %v15265_v50 }
 0x8e7   :  { %14742 = vmatprep.subr.bf16.mxu1 %v15266_v17 }
 0x8ea   :  { %14743 = vmatpush3.bf16.msra.mxu1 %v15267_v37 }
 0x8eb   :  { %14744 = vmatprep.subr.bf16.mxu1 %v15268_v40 }
 0x8ee   :  { %14745 = vmatpush3.bf16.msra.mxu1 %v15269_v12 }
 0x8ef   :  { %14746 = vmatprep.subr.bf16.mxu1 %v15270_v25 }
 0x8f2   :  { %14747 = vmatpush3.bf16.msra.mxu1 %v15271_v42 }
 0x8f3   :  { %14748 = vmatprep.subr.bf16.mxu1 %v15272_v32 }
 0x8f6   :  { %14749 = vmatpush3.bf16.msra.mxu1 %v15273_v21 }
 0x8f9   :  { %v12113_v1 = vpop.f32.mrf.mxu1 }
 0x8fa   :  { %v12114_v35 = vadd.f32 %v12113_v1, %v12071_v7  ;;  %v12156_v62 = vpop.f32.mrf.mxu0 }
 0x8fb   :  { %v12115_v38 = vpop.f32.mrf.mxu1  ;;  %v12157_v0 = vadd.f32 %v12156_v62, %v9033_v44 }
 0x8fc   :  { %v12116_v30 = vadd.f32 %v12115_v38, %v12073_v18  ;;  %v12298_v43 = vmax.f32 %v12114_v35, 0.0  ;;  %v12158_v31 = vpop.f32.mrf.mxu0 }
 0x8fd   :  { %v12117_v3 = vpop.f32.mrf.mxu1  ;;  %v12159_v16 = vadd.f32 %v12158_v31, %v9037_v63 }
 0x8fe   :  { %v12118_v52 = vadd.f32 %v12117_v3, %v12075_v10  ;;  %v12299_v54 = vmax.f32 %v12116_v30, 0.0  ;;  %v12160_v14 = vpop.f32.mrf.mxu0 }
 0x8ff   :  { %v12119_v11 = vpop.f32.mrf.mxu1  ;;  %v12161_v41 = vadd.f32 %v12160_v14, %v9033_v44 }
 0x900   :  { %v12120_v28 = vadd.f32 %v12119_v11, %v12077_v2  ;;  %v12306_v20 = vmax.f32 %v12118_v52, 0.0  ;;  %v12162_v58 = vpop.f32.mrf.mxu0  ;;  %v14603_v52 = vld [vmem:[#allocation19] ss:$0 sm:$0xff] }
 0x901   :  { %v12163_v50 = vadd.f32 %v12162_v58, %v9037_v63 }
 0x902   :  { %v12307_v57 = vmax.f32 %v12120_v28, 0.0  ;;  %v12314_v13 = vpack.c.bf16 %v12306_v20, %v12298_v43 }
 0x904   :  { %v12315_v56 = vpack.c.bf16 %v12307_v57, %v12299_v54 }
 0x906   :  { %12951 = vmatprep.mubr.bf16.mxu0 %v12315_v56 }
 0x907   :  { %12952 = vmatmul.mubr.bf16.vlgmr.msra.gmra.mxu0 %v12314_v13 }
 0x939   :  { %v12199_v36 = vpop.f32.mrf.mxu1 }
 0x93a   :  { %v12242_v26 = vpop.f32.mrf.mxu0  ;;  %v12200_v17 = vadd.f32 %v12199_v36, %v12157_v0 }
 0x93b   :  { %v12201_v51 = vpop.f32.mrf.mxu1 }
 0x93c   :  { %v12244_v60 = vpop.f32.mrf.mxu0  ;;  %v12202_v29 = vadd.f32 %v12201_v51, %v12159_v16  ;;  %v12243_v9 = vadd.f32 %v12242_v26, %v12200_v17 }
 0x93d   :  { %v12203_v34 = vpop.f32.mrf.mxu1 }
 0x93e   :  { %v12204_v4 = vadd.f32 %v12203_v34, %v12161_v41  ;;  %v12246_v22 = vpop.f32.mrf.mxu0  ;;  %v12245_v55 = vadd.f32 %v12244_v60, %v12202_v29 }
 0x93f   :  { %v12205_v59 = vpop.f32.mrf.mxu1 }
 0x940   :  { %v12206_v37 = vadd.f32 %v12205_v59, %v12163_v50  ;;  %v12247_v47 = vadd.f32 %v12246_v22, %v12204_v4  ;;  %v12248_v39 = vpop.f32.mrf.mxu0 }
 0x942   :  { %v12249_v19 = vadd.f32 %v12248_v39, %v12206_v37 }
 0x95a   :  { %v14684_v38 = vpop.f32.mrf.mxu0 }
 0x95c   :  { %v14685_v40 = vpop.f32.mrf.mxu0 }
 0x95d   :  { %v14686_v30 = vadd.f32 %v14685_v40, %v14684_v38 }
 0x95e   :  { %v14687_v18 = vpop.f32.mrf.mxu0 }
 0x95f   :  { %v12872_v28 = vadd.f32 %v14686_v30, %v14603_v52 }
 0x960   :  { %v14688_v10 = vpop.f32.mrf.mxu0 }
 0x961   :  { %v14689_v42 = vadd.f32 %v14688_v10, %v14687_v18 }
 0x963   :  { %v12875_v21 = vadd.f32 %v14689_v42, %v14603_v52 }
 0x979   :  { %v12285_v23 = vpop.f32.mrf.mxu1 }
 0x97a   :  { %v12286_v15 = vadd.f32 %v12285_v23, %v12243_v9 }
 0x97b   :  { %v12287_v5 = vpop.f32.mrf.mxu1 }
 0x97c   :  { %v12288_v53 = vadd.f32 %v12287_v5, %v12245_v55  ;;  %v12300_v24 = vmax.f32 %v12286_v15, 0.0 }
 0x97d   :  { %v12289_v33 = vpop.f32.mrf.mxu1 }
 0x97e   :  { %v12290_v61 = vadd.f32 %v12289_v33, %v12247_v47  ;;  %v12301_v6 = vmax.f32 %v12288_v53, 0.0 }
 0x97f   :  { %v12291_v45 = vpop.f32.mrf.mxu1 }
 0x980   :  { %v12292_v49 = vadd.f32 %v12291_v45, %v12249_v19  ;;  %v12308_v46 = vmax.f32 %v12290_v61, 0.0 }
 0x982   :  { %v12309_v27 = vmax.f32 %v12292_v49, 0.0  ;;  %v12316_v8 = vpack.c.bf16 %v12308_v46, %v12300_v24 }
 0x984   :  { %v12317_v1 = vpack.c.bf16 %v12309_v27, %v12301_v6 }
 0x986   :  { %12992 = vmatprep.mubr.bf16.mxu1 %v12317_v1 }
 0x987   :  { %12993 = vmatmul.mubr.bf16.vlgmr.msra.gmra.mxu1 %v12316_v8 }
 0x999   :  { %v14706_v12 = vpop.f32.mrf.mxu1 }
 0x99b   :  { %v14707_v48 = vpop.f32.mrf.mxu1 }
 0x99c   :  { %v14708_v11 = vadd.f32 %v14707_v48, %v14706_v12 }
 0x99d   :  { %v14709_v2 = vpop.f32.mrf.mxu1 }
 0x99e   :  { %v12913_v43 = vadd.f32 %v14708_v11, %v12872_v28 }
 0x99f   :  { %v14710_v25 = vpop.f32.mrf.mxu1 }
 0x9a0   :  { %v14711_v32 = vadd.f32 %v14710_v25, %v14709_v2 }
 0x9a2   :  { %v12916_v36 = vadd.f32 %v14711_v32, %v12875_v21 }
 0x9c7   :  { %v14728_v7 = vpop.f32.mrf.mxu0 }
 0x9c9   :  { %v14729_v3 = vpop.f32.mrf.mxu0 }
 0x9ca   :  { %v14730_v20 = vadd.f32 %v14729_v3, %v14728_v7 }
 0x9cb   :  { %v14731_v35 = vpop.f32.mrf.mxu0 }
 0x9cc   :  { %v12954_v13 = vadd.f32 %v14730_v20, %v12913_v43 }
 0x9cd   :  { %v14732_v54 = vpop.f32.mrf.mxu0 }
 0x9ce   :  { %v14733_v62 = vadd.f32 %v14732_v54, %v14731_v35 }
 0x9d0   :  { %v12957_v26 = vadd.f32 %v14733_v62, %v12916_v36 }
 0xa47   :  { %v14750_v57 = vpop.f32.mrf.mxu1 }
 0xa49   :  { %v14751_v56 = vpop.f32.mrf.mxu1 }
 0xa4a   :  { %v14752_v31 = vadd.f32 %v14751_v56, %v14750_v57 }
 0xa4b   :  { %v14753_v14 = vpop.f32.mrf.mxu1 }
 0xa4c   :  { %v12995_v58 = vadd.f32 %v14752_v31, %v12954_v13 }
 0xa4d   :  { %v14754_v51 = vpop.f32.mrf.mxu1 }
 0xa4e   :  { %v14755_v63 = vadd.f32 %v14754_v51, %v14753_v14  ;;  %13001 = vmax.xlane.f32.xlu0 %v12995_v58 }
 0xa50   :  { %v12998_v44 = vadd.f32 %v14755_v63, %v12957_v26 }
 0xa52   :  { %13003 = vmax.xlane.f32.xlu0 %v12998_v44 }
 0xad7   :  { %v13002_v34 = vpop.xlane.xlu0 %13001 }
 0xad8   :  { %v13005_v60 = vsub.f32 %v12995_v58, %v13002_v34 }
 0xada   :  { %v13007_v16 = vmul.f32 1.442695, %v13005_v60 }
 0xadb   :  { %v13004_v41 = vpop.xlane.xlu0 %13003 }
 0xadc   :  { %15274 = vpow2.f32 %v13007_v16  ;;  %v13006_v0 = vsub.f32 %v12998_v44, %v13004_v41 }
 0xade   :  { %v13009_v59 = vmul.f32 1.442695, %v13006_v0 }
 0xae0   :  { %15276 = vpow2.f32 %v13009_v59 }
 0xae9   :  { %v15275_v50 = vpop.eup %15274 }
 0xaea   :  { %13011 = vadd.xlane.f32.xlu1 %v15275_v50 }
 0xaed   :  { %v15277_v29 = vpop.eup %15276 }
 0xaee   :  { %13013 = vadd.xlane.f32.xlu1 %v15277_v29 }
 0xb73   :  { %v13012_v4 = vpop.xlane.xlu1 %13011 }
 0xb74   :  { %15278 = vrcp.f32 %v13012_v4 }
 0xb77   :  { %v13014_v17 = vpop.xlane.xlu1 %13013 }
 0xb78   :  { %15280 = vrcp.f32 %v13014_v17 }
 0xb81   :  { %v15279_v22 = vpop.eup %15278 }
 0xb82   :  { %v13016_v23 = vmul.f32 %v15279_v22, %v15275_v50 }
 0xb84   :  { %13019 = vst [vmem:[%s16396_s13] sm:$0xff] %v13016_v23 }
 0xb85   :  { %v15281_v37 = vpop.eup %15280 }
 0xb86   :  { %v13018_v5 = vmul.f32 %v15281_v37, %v15277_v29 }
 0xb88   :  { %13020 = vst [vmem:[%s16396_s13 + $0x8] sm:$0xff] %v13018_v5 }
 0xb89   :  { %13025 = vsyncpa [#allocation3], 1 }
 0xb8a   :  { %13026 = vsyncpa [#allocation5], 1 }
 0xb8b   :  { %13027 = vsyncpa [#allocation8], 1 }
 0xb8c   :  { %13028 = vsyncpa [#allocation11], 1 }
 0xb8d   :  { %13029 = vsyncpa [#allocation14], 1 }
 0xb8e   :  { %13030 = vsyncpa [#allocation17], 1 }
 0xb8f   :  { %13031 = vsyncpa [#allocation20], 1 }

</bundles_post_ra>
